<compile_context>
chip_gen: v7x
topology: tpu7x:2x2x1
jax: 0.10.0
libtpu: 0.0.40
codegen_flags: <defaults>
</compile_context>

<pallas_src>
import jax
import jax.numpy as jnp
from jax.experimental import pallas as pl
from jax.experimental.pallas import tpu as pltpu

GROUPS = 32          # normalization() == GroupNorm(32, C)
EPS = 1e-5           # PyTorch GroupNorm default eps


def _silu(v):
    # Exact SiLU: exp on the EUP, ordinary divide (no approx reciprocal).
    return v / (1.0 + jnp.exp(-v))


def _make_resblock_kernel(H, W, C, cpg_real, conv_dtype):
    """C is the (possibly lane-padded) channel count; cpg_real is the real
    channels-per-group count used for the GroupNorm statistics."""
    HW = H * W
    inv_cnt = 1.0 / float(HW * cpg_real)

    def kernel(x_ref, emb_ref, we_ref, be_ref,
               g1_ref, bt1_ref, w1_ref, b1_ref,
               g2_ref, bt2_ref, w2_ref, b2_ref,
               m_ref, mt_ref, out_ref, patch_ref):
        # x-boundary masks for the 3x3 halo (per grid step).
        pos = jax.lax.broadcasted_iota(jnp.int32, (HW, 1), 0)
        xcoord = pos % W
        xm_l = xcoord > 0          # dx = -1 tap valid
        xm_r = xcoord < W - 1      # dx = +1 tap valid

        # Zero the W-row top/bottom halo pads of the patch scratch; conv3x3 only
        # ever writes rows [W, W+HW), so the pads stay zero for both convs.
        zpad = jnp.zeros((W, 3 * C), conv_dtype)
        patch_ref[pl.ds(0, W), :] = zpad
        patch_ref[pl.ds(W + HW, W), :] = zpad

        Mcg = m_ref[...]    # (C, G) channel->group membership
        Mgc = mt_ref[...]   # (G, C)

        def group_norm(v2, gamma, beta):
            # One-pass stats: sum and sum-of-squares reduce independently, then
            # tiny (1,C)x(C,G) matmuls map channels <-> groups.
            ch_sum = jnp.sum(v2, axis=0, keepdims=True)                    # (1, C)
            ch_ss = jnp.sum(v2 * v2, axis=0, keepdims=True)                # (1, C)
            g_mean = jnp.dot(ch_sum, Mcg,
                             preferred_element_type=jnp.float32) * inv_cnt  # (1, G)
            g_ms = jnp.dot(ch_ss, Mcg,
                           preferred_element_type=jnp.float32) * inv_cnt    # (1, G)
            g_inv = jax.lax.rsqrt(g_ms - g_mean * g_mean + EPS)             # (1, G)
            mean_c = jnp.dot(g_mean, Mgc, preferred_element_type=jnp.float32)
            inv_c = jnp.dot(g_inv, Mgc, preferred_element_type=jnp.float32)
            scale = inv_c * gamma                                           # (1, C)
            shift = beta - mean_c * scale
            return v2 * scale + shift        # one fused mul-add over (HW, C)

        def conv3x3(v2, w3_ref, bias):
            # 3x3 / pad=1 conv as 3 chained MXU matmuls with K = 3*Cin.
            # dx taps: XLU rolls + x-boundary masks, concatenated on the lane
            # axis in conv_dtype.  dy taps: store the patch once into the
            # W-row zero-padded scratch and take static row-offset slices -- no
            # patch rolls, no output masks, pure MXU accumulation.
            vc = v2.astype(conv_dtype)
            left = jnp.where(xm_l, pltpu.roll(v2, shift=1, axis=0),
                             0.0).astype(conv_dtype)
            right = jnp.where(xm_r, pltpu.roll(v2, shift=HW - 1, axis=0),
                              0.0).astype(conv_dtype)
            patch_ref[pl.ds(W, HW), :] = jnp.concatenate([left, vc, right], axis=1)
            top = patch_ref[pl.ds(0, HW), :]        # pixel row y-1 (zeros at y==0)
            mid = patch_ref[pl.ds(W, HW), :]        # pixel row y
            bot = patch_ref[pl.ds(2 * W, HW), :]    # pixel row y+1 (zeros at y==H-1)
            acc = jnp.dot(top, w3_ref[0], preferred_element_type=jnp.float32)
            acc = acc + jnp.dot(mid, w3_ref[1], preferred_element_type=jnp.float32)
            acc = acc + jnp.dot(bot, w3_ref[2], preferred_element_type=jnp.float32)
            return acc + bias

        x2 = x_ref[0]                                                  # (HW, C) f32

        # emb_layers: SiLU -> Linear; folded into conv1's bias.
        eo = jnp.dot(_silu(emb_ref[0]), we_ref[...],
                     preferred_element_type=jnp.float32) + be_ref[...]  # (1, C)

        # in_layers: GroupNorm32 -> SiLU -> conv3x3 (+ emb via bias)
        h = conv3x3(_silu(group_norm(x2, g1_ref[...], bt1_ref[...])),
                    w1_ref, b1_ref[...] + eo)

        # out_layers: GroupNorm32 -> SiLU -> Dropout -> conv3x3
        # TODO(synk): nn.Dropout is identity in eval mode; training dropout not implemented.
        h = conv3x3(_silu(group_norm(h, g2_ref[...], bt2_ref[...])),
                    w2_ref, b2_ref[...])

        # skip_connection = Identity (out_channels == channels)
        out_ref[0] = x2 + h

    return kernel


# --------------------------------------------------------------------------
# Wrapper
# --------------------------------------------------------------------------
def resblock_forward(x_nchw, emb, params, conv_dtype=jnp.bfloat16):
    x = jnp.transpose(x_nchw, (0, 2, 3, 1)).astype(jnp.float32)      # NCHW -> NHWC
    N, H, W, C = x.shape
    Cout = params["w1"].shape[-1]
    assert C == Cout, "skip_connection is Identity only when out_channels == channels"
    assert C % GROUPS == 0, "GroupNorm32 requires channels % 32 == 0"
    assert W % 8 == 0, "keep the (H,W,C)->(H*W,C) reshape sublane-aligned"
    E = emb.shape[1]
    HW = H * W
    cpg = C // GROUPS

    # Lane padding: small channel counts waste VPU lanes / MXU width and force
    # masked partial stores; pad to the full 128-lane width and slice after.
    Cp = 128 if C < 128 else C
    pc = Cp - C

    def padc(a, axis):
        if pc == 0:
            return a
        widths = [(0, 0)] * a.ndim
        widths[axis] = (0, pc)
        return jnp.pad(a, widths)

    x2 = padc(x.reshape(N, HW, C), 2)              # channels stay on the lane axis
    emb3 = emb.astype(jnp.float32).reshape(N, 1, E)

    # Conv weights: flat HWIO (9, Cin, Cout) -> pad channels -> (3, 3*Cp, Cp).
    def prep_w(w):
        w = padc(padc(w.astype(jnp.float32), 1), 2)
        return w.reshape(3, 3 * Cp, Cp).astype(conv_dtype)

    w1 = prep_w(params["w1"])
    w2 = prep_w(params["w2"])
    we = padc(params["we"].astype(jnp.float32), 1)
    be = padc(params["be"].astype(jnp.float32), 1)
    g1 = padc(params["g1"].astype(jnp.float32), 1)
    bt1 = padc(params["beta1"].astype(jnp.float32), 1)
    b1 = padc(params["b1"].astype(jnp.float32), 1)
    g2 = padc(params["g2"].astype(jnp.float32), 1)
    bt2 = padc(params["beta2"].astype(jnp.float32), 1)
    b2 = padc(params["b2"].astype(jnp.float32), 1)

    # GroupNorm channel<->group membership matrices (padded channels -> no group).
    ch = jnp.arange(Cp, dtype=jnp.int32)
    grp = ch // cpg
    M = ((grp[:, None] == jnp.arange(GROUPS, dtype=jnp.int32)[None, :])
         & (ch[:, None] < C)).astype(jnp.float32)
    Mt = M.T

    def rep(arr):
        s = tuple(arr.shape)
        return pl.BlockSpec(s, lambda n, _r=len(s): (0,) * _r)

    kernel = _make_resblock_kernel(H, W, Cp, cpg, conv_dtype)

    # Explicit VMEM budget: double-buffered x/out blocks + halo patch scratch +
    # f32 temporaries + weights, clamped to [32 MiB, ~90% of physical VMEM].
    conv_bytes = int(jnp.dtype(conv_dtype).itemsize)
    blk = HW * Cp * 4
    needed = (4 * blk                                  # x + out, double-buffered
              + (HW + 2 * W) * 3 * Cp * conv_bytes     # halo patch scratch
              + 8 * blk                                # live f32 temporaries
              + 2 * 2 * 3 * Cp * Cp * conv_bytes       # conv weights (dbl-buffered)
              + 8 * 1024 * 1024)                       # headroom
    try:
        vmem_cap = int(pltpu.get_tpu_info().vmem_capacity_bytes)
    except Exception:
        vmem_cap = 64 * 1024 * 1024                    # conservative (v7x)
    vmem_limit = int(min(max(needed, 32 * 1024 * 1024), int(vmem_cap * 0.9)))

    out2 = pl.pallas_call(
        kernel,
        out_shape=jax.ShapeDtypeStruct((N, HW, Cp), jnp.float32),
        grid=(N,),
        in_specs=[
            pl.BlockSpec((1, HW, Cp), lambda n: (n, 0, 0)),           # x
            pl.BlockSpec((1, 1, E), lambda n: (n, 0, 0)),             # emb
            rep(we), rep(be),                                         # emb Linear
            rep(g1), rep(bt1),                                        # GN1 gamma/beta
            rep(w1), rep(b1),                                         # conv1 w/b
            rep(g2), rep(bt2),                                        # GN2 gamma/beta
            rep(w2), rep(b2),                                         # conv2 w/b
            rep(M), rep(Mt),                                          # group membership
        ],
        out_specs=pl.BlockSpec((1, HW, Cp), lambda n: (n, 0, 0)),
        scratch_shapes=[pltpu.VMEM((HW + 2 * W, 3 * Cp), conv_dtype)],
        compiler_params=pltpu.CompilerParams(
            dimension_semantics=("parallel",),        # feeds both v7x TCs when N>=2
            vmem_limit_bytes=vmem_limit),
    )(x2, emb3, we, be, g1, bt1, w1, b1, g2, bt2, w2, b2, M, Mt)

    out = out2[:, :, :C].reshape(N, H, W, C)
    return jnp.transpose(out, (0, 3, 1, 2))                           # NHWC -> NCHW


# --------------------------------------------------------------------------
# Pure-JAX reference (f32, correctness check only)
# --------------------------------------------------------------------------
def ref_forward(x_nchw, emb, params):
    x = jnp.transpose(x_nchw, (0, 2, 3, 1))

    def gn(v, gamma, beta):
        n, h, w, c = v.shape
        vg = v.reshape(n, h, w, GROUPS, c // GROUPS)
        mean = jnp.mean(vg, axis=(1, 2, 4), keepdims=True)
        var = jnp.var(vg, axis=(1, 2, 4), keepdims=True)
        vg = (vg - mean) / jnp.sqrt(var + EPS)
        return vg.reshape(n, h, w, c) * gamma.reshape(1, 1, 1, c) + beta.reshape(1, 1, 1, c)

    def silu(v):
        return v * jax.nn.sigmoid(v)

    def conv(v, w9, b):
        w = w9.reshape(3, 3, v.shape[-1], -1)
        o = jax.lax.conv_general_dilated(v, w, (1, 1), "SAME",
                                         dimension_numbers=("NHWC", "HWIO", "NHWC"))
        return o + b.reshape(1, 1, 1, -1)

    h = conv(silu(gn(x, params["g1"], params["beta1"])), params["w1"], params["b1"])
    eo = silu(emb) @ params["we"] + params["be"].reshape(-1)
    h = h + eo[:, None, None, :]
    h = conv(silu(gn(h, params["g2"], params["beta2"])), params["w2"], params["b2"])
    return jnp.transpose(x + h, (0, 3, 1, 2))


if __name__ == "__main__":
    key = jax.random.PRNGKey(0)

    def make_params(k, C, E):
        ks = jax.random.split(k, 8)
        return dict(
            g1=jnp.ones((1, C), jnp.float32),                             # GN1 weight
            beta1=jnp.zeros((1, C), jnp.float32),                         # GN1 bias
            w1=0.1 * jax.random.normal(ks[0], (9, C, C), jnp.float32),    # conv1 (HWIO flat)
            b1=0.05 * jax.random.normal(ks[1], (1, C), jnp.float32),
            we=0.1 * jax.random.normal(ks[2], (E, C), jnp.float32),       # emb Linear (in,out)
            be=0.05 * jax.random.normal(ks[3], (1, C), jnp.float32),
            g2=1.0 + 0.1 * jax.random.normal(ks[4], (1, C), jnp.float32),
            beta2=0.05 * jax.random.normal(ks[5], (1, C), jnp.float32),
            # NOTE: the module zero-inits the final conv (zero_module); small
            # random weights are used here so the second conv path is exercised.
            w2=0.1 * jax.random.normal(ks[6], (9, C, C), jnp.float32),
            b2=0.05 * jax.random.normal(ks[7], (1, C), jnp.float32),
        )

    # Case 1: bf16 conv operands (default fast path), small shapes.
    N, C, H, W, E = 2, 32, 16, 16, 64
    k0, k1, k2 = jax.random.split(key, 3)
    x = jax.random.normal(k0, (N, C, H, W), jnp.float32)
    emb = jax.random.normal(k1, (N, E), jnp.float32)
    params = make_params(k2, C, E)

    out = resblock_forward(x, emb, params)
    jax.block_until_ready(out)
    ref = ref_forward(x, emb, params)
    assert out.shape == (N, C, H, W)
    max_abs = float(jnp.max(jnp.abs(out - ref)))
    rel_fro = float(jnp.sqrt(jnp.sum((out - ref) ** 2)) / jnp.sqrt(jnp.sum(ref ** 2)))
    # Tolerance covers bf16 MXU conv operands (reference is f32 end-to-end).
    assert max_abs < 1e-1 and rel_fro < 1.5e-2, (max_abs, rel_fro)

    # Case 2: f32 conv operands, non-power-of-two H and larger C — pins the
    # halo/mask logic at a tight tolerance.
    N2, C2, H2, W2, E2 = 1, 64, 24, 16, 48
    k3, k4, k5 = jax.random.split(k2, 3)
    x_b = jax.random.normal(k3, (N2, C2, H2, W2), jnp.float32)
    emb_b = jax.random.normal(k4, (N2, E2), jnp.float32)
    params_b = make_params(k5, C2, E2)

    out_b = resblock_forward(x_b, emb_b, params_b, conv_dtype=jnp.float32)
    jax.block_until_ready(out_b)
    ref_b = ref_forward(x_b, emb_b, params_b)
    max_abs_b = float(jnp.max(jnp.abs(out_b - ref_b)))
    assert max_abs_b < 1e-3, max_abs_b

    print("KERNEL_OK")
</pallas_src>

<mosaic_0001>
module attributes {stable_mosaic.version = 11 : i64} {
  func.func @kernel(%arg0: i32, %arg1: memref<1x256x128xf32, #tpu.memory_space<vmem>>, %arg2: memref<1x1x64xf32, #tpu.memory_space<vmem>>, %arg3: memref<64x128xf32, #tpu.memory_space<vmem>>, %arg4: memref<1x128xf32, #tpu.memory_space<vmem>>, %arg5: memref<1x128xf32, #tpu.memory_space<vmem>>, %arg6: memref<1x128xf32, #tpu.memory_space<vmem>>, %arg7: memref<3x384x128xbf16, #tpu.memory_space<vmem>>, %arg8: memref<1x128xf32, #tpu.memory_space<vmem>>, %arg9: memref<1x128xf32, #tpu.memory_space<vmem>>, %arg10: memref<1x128xf32, #tpu.memory_space<vmem>>, %arg11: memref<3x384x128xbf16, #tpu.memory_space<vmem>>, %arg12: memref<1x128xf32, #tpu.memory_space<vmem>>, %arg13: memref<128x32xf32, #tpu.memory_space<vmem>>, %arg14: memref<32x128xf32, #tpu.memory_space<vmem>>, %arg15: memref<1x256x128xf32, #tpu.memory_space<vmem>>, %arg16: memref<288x384xbf16, #tpu.memory_space<vmem>>) attributes {dimension_semantics = [#tpu.dimension_semantics<parallel>], iteration_bounds = array<i64: 2>, scalar_prefetch = 0 : i64, scratch_operands = 1 : i64, tpu.core_type = #tpu.core_type<tc>, window_params = [{transform_indices = @transform_0, window_bounds = array<i64: 1, 256, 128>}, {transform_indices = @transform_1, window_bounds = array<i64: 1, 1, 64>}, {pipeline_mode = #tpu.pipeline_mode<synchronous>, transform_indices = @transform_2, window_bounds = array<i64: 64, 128>}, {pipeline_mode = #tpu.pipeline_mode<synchronous>, transform_indices = @transform_3, window_bounds = array<i64: 1, 128>}, {pipeline_mode = #tpu.pipeline_mode<synchronous>, transform_indices = @transform_4, window_bounds = array<i64: 1, 128>}, {pipeline_mode = #tpu.pipeline_mode<synchronous>, transform_indices = @transform_5, window_bounds = array<i64: 1, 128>}, {pipeline_mode = #tpu.pipeline_mode<synchronous>, transform_indices = @transform_6, window_bounds = array<i64: 3, 384, 128>}, {pipeline_mode = #tpu.pipeline_mode<synchronous>, transform_indices = @transform_7, window_bounds = array<i64: 1, 128>}, {pipeline_mode = #tpu.pipeline_mode<synchronous>, transform_indices = @transform_8, window_bounds = array<i64: 1, 128>}, {pipeline_mode = #tpu.pipeline_mode<synchronous>, transform_indices = @transform_9, window_bounds = array<i64: 1, 128>}, {pipeline_mode = #tpu.pipeline_mode<synchronous>, transform_indices = @transform_10, window_bounds = array<i64: 3, 384, 128>}, {pipeline_mode = #tpu.pipeline_mode<synchronous>, transform_indices = @transform_11, window_bounds = array<i64: 1, 128>}, {pipeline_mode = #tpu.pipeline_mode<synchronous>, transform_indices = @transform_12, window_bounds = array<i64: 128, 32>}, {pipeline_mode = #tpu.pipeline_mode<synchronous>, transform_indices = @transform_13, window_bounds = array<i64: 32, 128>}, {transform_indices = @transform_14, window_bounds = array<i64: 1, 256, 128>}]} {
    %0 = tpu.iota {dimensions = array<i32: 0>} : vector<256x1xi32>
    %c16_i32 = arith.constant 16 : i32
    %c0_i32 = arith.constant 0 : i32
    %1 = arith.cmpi eq, %c16_i32, %c0_i32 : i32
    %c1_i32 = arith.constant 1 : i32
    %2 = arith.select %1, %c1_i32, %c16_i32 : i32
    %3 = vector.broadcast %2 : i32 to vector<256x1xi32>
    %4 = arith.remsi %0, %3 : vector<256x1xi32>
    %c0_i32_0 = arith.constant 0 : i32
    %5 = vector.broadcast %c0_i32_0 : i32 to vector<256x1xi32>
    %6 = arith.cmpi ne, %4, %5 : vector<256x1xi32>
    %c0_i32_1 = arith.constant 0 : i32
    %7 = vector.broadcast %c0_i32_1 : i32 to vector<256x1xi32>
    %8 = arith.cmpi slt, %4, %7 : vector<256x1xi32>
    %c0_i32_2 = arith.constant 0 : i32
    %9 = arith.cmpi slt, %2, %c0_i32_2 : i32
    %10 = vector.broadcast %9 : i1 to vector<256x1xi1>
    %11 = vector.broadcast %10 : vector<256x1xi1> to vector<256x1xi1>
    %12 = arith.xori %8, %11 : vector<256x1xi1>
    %13 = arith.andi %12, %6 : vector<256x1xi1>
    %14 = vector.broadcast %2 : i32 to vector<256x1xi32>
    %15 = arith.addi %4, %14 : vector<256x1xi32>
    %16 = arith.select %13, %15, %4 : vector<256x1xi1>, vector<256x1xi32>
    %c0_i32_3 = arith.constant 0 : i32
    %17 = vector.broadcast %c0_i32_3 : i32 to vector<256x1xi32>
    %18 = arith.cmpi sgt, %16, %17 : vector<256x1xi32>
    %c15_i32 = arith.constant 15 : i32
    %19 = vector.broadcast %c15_i32 : i32 to vector<256x1xi32>
    %20 = arith.cmpi slt, %16, %19 : vector<256x1xi32>
    %cst = arith.constant 0.000000e+00 : bf16
    %21 = vector.broadcast %cst : bf16 to vector<16x384xbf16>
    %c0 = arith.constant 0 : index
    %c0_4 = arith.constant 0 : index
    %22 = vector.load %arg16[%c0, %c0_4] : memref<288x384xbf16, #tpu.memory_space<vmem>>, vector<16x384xbf16>
    tpu.vector_store %arg16[%c0, %c0_4], %21 {strides = array<i32>} : memref<288x384xbf16, #tpu.memory_space<vmem>>, vector<16x384xbf16>,
    %c272 = arith.constant 272 : index
    %c0_5 = arith.constant 0 : index
    %23 = vector.load %arg16[%c272, %c0_5] : memref<288x384xbf16, #tpu.memory_space<vmem>>, vector<16x384xbf16>
    tpu.vector_store %arg16[%c272, %c0_5], %21 {strides = array<i32>} : memref<288x384xbf16, #tpu.memory_space<vmem>>, vector<16x384xbf16>,
    %c0_6 = arith.constant 0 : index
    %c0_7 = arith.constant 0 : index
    %24 = vector.load %arg13[%c0_6, %c0_7] : memref<128x32xf32, #tpu.memory_space<vmem>>, vector<128x32xf32>
    %c0_8 = arith.constant 0 : index
    %c0_9 = arith.constant 0 : index
    %25 = vector.load %arg14[%c0_8, %c0_9] : memref<32x128xf32, #tpu.memory_space<vmem>>, vector<32x128xf32>
    %c0_10 = arith.constant 0 : index
    %c0_11 = arith.constant 0 : index
    %c0_12 = arith.constant 0 : index
    %26 = vector.load %arg1[%c0_10, %c0_11, %c0_12] : memref<1x256x128xf32, #tpu.memory_space<vmem>>, vector<1x256x128xf32>
    %27 = vector.shape_cast %26 : vector<1x256x128xf32> to vector<256x128xf32>
    %c0_13 = arith.constant 0 : index
    %c0_14 = arith.constant 0 : index
    %c0_15 = arith.constant 0 : index
    %28 = vector.load %arg2[%c0_13, %c0_14, %c0_15] : memref<1x1x64xf32, #tpu.memory_space<vmem>>, vector<1x1x64xf32>
    %29 = vector.shape_cast %28 : vector<1x1x64xf32> to vector<1x64xf32>
    %cst_16 = arith.constant 0.000000e+00 : f32
    %30 = vector.broadcast %cst_16 : f32 to vector<1x64xf32>
    %31 = arith.subf %30, %29 : vector<1x64xf32>
    %32 = math.exp %31 : vector<1x64xf32>
    %cst_17 = arith.constant 1.000000e+00 : f32
    %33 = vector.broadcast %cst_17 : f32 to vector<1x64xf32>
    %34 = arith.addf %33, %32 : vector<1x64xf32>
    %35 = arith.divf %29, %34 : vector<1x64xf32>
    %c0_18 = arith.constant 0 : index
    %c0_19 = arith.constant 0 : index
    %36 = vector.load %arg3[%c0_18, %c0_19] : memref<64x128xf32, #tpu.memory_space<vmem>>, vector<64x128xf32>
    %cst_20 = arith.constant dense<0.000000e+00> : vector<1x128xf32>
    %37 = tpu.matmul %35, %36, %cst_20 {dimension_numbers = #tpu.dot_dimension_numbers<[1], [0], [0], [1], [0, 0, 1, 1], [], []>} : vector<1x64xf32>, vector<64x128xf32>, vector<1x128xf32> -> vector<1x128xf32>
    %c0_21 = arith.constant 0 : index
    %c0_22 = arith.constant 0 : index
    %38 = vector.load %arg4[%c0_21, %c0_22] : memref<1x128xf32, #tpu.memory_space<vmem>>, vector<1x128xf32>
    %39 = arith.addf %37, %38 : vector<1x128xf32>
    %c0_23 = arith.constant 0 : index
    %c0_24 = arith.constant 0 : index
    %40 = vector.load %arg5[%c0_23, %c0_24] : memref<1x128xf32, #tpu.memory_space<vmem>>, vector<1x128xf32>
    %c0_25 = arith.constant 0 : index
    %c0_26 = arith.constant 0 : index
    %41 = vector.load %arg6[%c0_25, %c0_26] : memref<1x128xf32, #tpu.memory_space<vmem>>, vector<1x128xf32>
    %cst_27 = arith.constant dense<0.000000e+00> : vector<128xf32>
    %42 = vector.multi_reduction <add>, %27, %cst_27 [0] : vector<256x128xf32> to vector<128xf32>
    %43 = vector.shape_cast %42 : vector<128xf32> to vector<1x128xf32>
    %44 = arith.mulf %27, %27 : vector<256x128xf32>
    %cst_28 = arith.constant dense<0.000000e+00> : vector<128xf32>
    %45 = vector.multi_reduction <add>, %44, %cst_28 [0] : vector<256x128xf32> to vector<128xf32>
    %46 = vector.shape_cast %45 : vector<128xf32> to vector<1x128xf32>
    %cst_29 = arith.constant dense<0.000000e+00> : vector<1x32xf32>
    %47 = tpu.matmul %43, %24, %cst_29 {dimension_numbers = #tpu.dot_dimension_numbers<[1], [0], [0], [1], [0, 0, 1, 1], [], []>} : vector<1x128xf32>, vector<128x32xf32>, vector<1x32xf32> -> vector<1x32xf32>
    %cst_30 = arith.constant 3.906250e-03 : f32
    %48 = vector.broadcast %cst_30 : f32 to vector<1x32xf32>
    %49 = arith.mulf %47, %48 : vector<1x32xf32>
    %cst_31 = arith.constant dense<0.000000e+00> : vector<1x32xf32>
    %50 = tpu.matmul %46, %24, %cst_31 {dimension_numbers = #tpu.dot_dimension_numbers<[1], [0], [0], [1], [0, 0, 1, 1], [], []>} : vector<1x128xf32>, vector<128x32xf32>, vector<1x32xf32> -> vector<1x32xf32>
    %cst_32 = arith.constant 3.906250e-03 : f32
    %51 = vector.broadcast %cst_32 : f32 to vector<1x32xf32>
    %52 = arith.mulf %50, %51 : vector<1x32xf32>
    %53 = arith.mulf %49, %49 : vector<1x32xf32>
    %54 = arith.subf %52, %53 : vector<1x32xf32>
    %cst_33 = arith.constant 9.99999974E-6 : f32
    %55 = vector.broadcast %cst_33 : f32 to vector<1x32xf32>
    %56 = arith.addf %54, %55 : vector<1x32xf32>
    %57 = math.rsqrt %56 : vector<1x32xf32>
    %cst_34 = arith.constant dense<0.000000e+00> : vector<1x128xf32>
    %58 = tpu.matmul %49, %25, %cst_34 {dimension_numbers = #tpu.dot_dimension_numbers<[1], [0], [0], [1], [0, 0, 1, 1], [], []>} : vector<1x32xf32>, vector<32x128xf32>, vector<1x128xf32> -> vector<1x128xf32>
    %cst_35 = arith.constant dense<0.000000e+00> : vector<1x128xf32>
    %59 = tpu.matmul %57, %25, %cst_35 {dimension_numbers = #tpu.dot_dimension_numbers<[1], [0], [0], [1], [0, 0, 1, 1], [], []>} : vector<1x32xf32>, vector<32x128xf32>, vector<1x128xf32> -> vector<1x128xf32>
    %60 = arith.mulf %59, %40 : vector<1x128xf32>
    %61 = arith.mulf %58, %60 : vector<1x128xf32>
    %62 = arith.subf %41, %61 : vector<1x128xf32>
    %63 = vector.broadcast %60 : vector<1x128xf32> to vector<256x128xf32>
    %64 = arith.mulf %27, %63 : vector<256x128xf32>
    %65 = vector.broadcast %62 : vector<1x128xf32> to vector<256x128xf32>
    %66 = arith.addf %64, %65 : vector<256x128xf32>
    %cst_36 = arith.constant 0.000000e+00 : f32
    %67 = vector.broadcast %cst_36 : f32 to vector<256x128xf32>
    %68 = arith.subf %67, %66 : vector<256x128xf32>
    %69 = math.exp %68 : vector<256x128xf32>
    %cst_37 = arith.constant 1.000000e+00 : f32
    %70 = vector.broadcast %cst_37 : f32 to vector<256x128xf32>
    %71 = arith.addf %70, %69 : vector<256x128xf32>
    %72 = arith.divf %66, %71 : vector<256x128xf32>
    %c0_38 = arith.constant 0 : index
    %c0_39 = arith.constant 0 : index
    %73 = vector.load %arg8[%c0_38, %c0_39] : memref<1x128xf32, #tpu.memory_space<vmem>>, vector<1x128xf32>
    %74 = arith.addf %73, %39 : vector<1x128xf32>
    %75 = arith.truncf %72 : vector<256x128xf32> to vector<256x128xbf16>
    %c1_i32_40 = arith.constant 1 : i32
    %76 = tpu.dynamic_rotate %72 by %c1_i32_40 dim 0 : vector<256x128xf32>, i32 -> vector<256x128xf32>
    %cst_41 = arith.constant 0.000000e+00 : f32
    %77 = vector.shape_cast %18 : vector<256x1xi1> to vector<256x1xi1>
    %78 = vector.broadcast %77 : vector<256x1xi1> to vector<256x128xi1>
    %79 = vector.broadcast %cst_41 : f32 to vector<256x128xf32>
    %80 = arith.select %78, %76, %79 : vector<256x128xi1>, vector<256x128xf32>
    %81 = arith.truncf %80 : vector<256x128xf32> to vector<256x128xbf16>
    %c255_i32 = arith.constant 255 : i32
    %82 = tpu.dynamic_rotate %72 by %c255_i32 dim 0 : vector<256x128xf32>, i32 -> vector<256x128xf32>
    %cst_42 = arith.constant 0.000000e+00 : f32
    %83 = vector.shape_cast %20 : vector<256x1xi1> to vector<256x1xi1>
    %84 = vector.broadcast %83 : vector<256x1xi1> to vector<256x128xi1>
    %85 = vector.broadcast %cst_42 : f32 to vector<256x128xf32>
    %86 = arith.select %84, %82, %85 : vector<256x128xi1>, vector<256x128xf32>
    %87 = arith.truncf %86 : vector<256x128xf32> to vector<256x128xbf16>
    %88 = tpu.concatenate %81, %75, %87 in 1 : vector<256x128xbf16>, vector<256x128xbf16>, vector<256x128xbf16> -> vector<256x384xbf16>
    %c16 = arith.constant 16 : index
    %c0_43 = arith.constant 0 : index
    %89 = vector.load %arg16[%c16, %c0_43] : memref<288x384xbf16, #tpu.memory_space<vmem>>, vector<256x384xbf16>
    tpu.vector_store %arg16[%c16, %c0_43], %88 {strides = array<i32>} : memref<288x384xbf16, #tpu.memory_space<vmem>>, vector<256x384xbf16>,
    %c0_44 = arith.constant 0 : index
    %c0_45 = arith.constant 0 : index
    %90 = vector.load %arg16[%c0_44, %c0_45] : memref<288x384xbf16, #tpu.memory_space<vmem>>, vector<256x384xbf16>
    %c16_46 = arith.constant 16 : index
    %c0_47 = arith.constant 0 : index
    %91 = vector.load %arg16[%c16_46, %c0_47] : memref<288x384xbf16, #tpu.memory_space<vmem>>, vector<256x384xbf16>
    %c32 = arith.constant 32 : index
    %c0_48 = arith.constant 0 : index
    %92 = vector.load %arg16[%c32, %c0_48] : memref<288x384xbf16, #tpu.memory_space<vmem>>, vector<256x384xbf16>
    %c0_49 = arith.constant 0 : index
    %c0_50 = arith.constant 0 : index
    %c0_51 = arith.constant 0 : index
    %93 = vector.load %arg7[%c0_49, %c0_50, %c0_51] : memref<3x384x128xbf16, #tpu.memory_space<vmem>>, vector<1x384x128xbf16>
    %94 = vector.shape_cast %93 : vector<1x384x128xbf16> to vector<384x128xbf16>
    %cst_52 = arith.constant dense<0.000000e+00> : vector<256x128xf32>
    %95 = tpu.matmul %90, %94, %cst_52 {dimension_numbers = #tpu.dot_dimension_numbers<[1], [0], [0], [1], [0, 0, 1, 1], [], []>} : vector<256x384xbf16>, vector<384x128xbf16>, vector<256x128xf32> -> vector<256x128xf32>
    %c1 = arith.constant 1 : index
    %c0_53 = arith.constant 0 : index
    %c0_54 = arith.constant 0 : index
    %96 = vector.load %arg7[%c1, %c0_53, %c0_54] : memref<3x384x128xbf16, #tpu.memory_space<vmem>>, vector<1x384x128xbf16>
    %97 = vector.shape_cast %96 : vector<1x384x128xbf16> to vector<384x128xbf16>
    %cst_55 = arith.constant dense<0.000000e+00> : vector<256x128xf32>
    %98 = tpu.matmul %91, %97, %cst_55 {dimension_numbers = #tpu.dot_dimension_numbers<[1], [0], [0], [1], [0, 0, 1, 1], [], []>} : vector<256x384xbf16>, vector<384x128xbf16>, vector<256x128xf32> -> vector<256x128xf32>
    %99 = arith.addf %95, %98 : vector<256x128xf32>
    %c2 = arith.constant 2 : index
    %c0_56 = arith.constant 0 : index
    %c0_57 = arith.constant 0 : index
    %100 = vector.load %arg7[%c2, %c0_56, %c0_57] : memref<3x384x128xbf16, #tpu.memory_space<vmem>>, vector<1x384x128xbf16>
    %101 = vector.shape_cast %100 : vector<1x384x128xbf16> to vector<384x128xbf16>
    %cst_58 = arith.constant dense<0.000000e+00> : vector<256x128xf32>
    %102 = tpu.matmul %92, %101, %cst_58 {dimension_numbers = #tpu.dot_dimension_numbers<[1], [0], [0], [1], [0, 0, 1, 1], [], []>} : vector<256x384xbf16>, vector<384x128xbf16>, vector<256x128xf32> -> vector<256x128xf32>
    %103 = arith.addf %99, %102 : vector<256x128xf32>
    %104 = vector.broadcast %74 : vector<1x128xf32> to vector<256x128xf32>
    %105 = arith.addf %103, %104 : vector<256x128xf32>
    %c0_59 = arith.constant 0 : index
    %c0_60 = arith.constant 0 : index
    %106 = vector.load %arg9[%c0_59, %c0_60] : memref<1x128xf32, #tpu.memory_space<vmem>>, vector<1x128xf32>
    %c0_61 = arith.constant 0 : index
    %c0_62 = arith.constant 0 : index
    %107 = vector.load %arg10[%c0_61, %c0_62] : memref<1x128xf32, #tpu.memory_space<vmem>>, vector<1x128xf32>
    %cst_63 = arith.constant dense<0.000000e+00> : vector<128xf32>
    %108 = vector.multi_reduction <add>, %105, %cst_63 [0] : vector<256x128xf32> to vector<128xf32>
    %109 = vector.shape_cast %108 : vector<128xf32> to vector<1x128xf32>
    %110 = arith.mulf %105, %105 : vector<256x128xf32>
    %cst_64 = arith.constant dense<0.000000e+00> : vector<128xf32>
    %111 = vector.multi_reduction <add>, %110, %cst_64 [0] : vector<256x128xf32> to vector<128xf32>
    %112 = vector.shape_cast %111 : vector<128xf32> to vector<1x128xf32>
    %cst_65 = arith.constant dense<0.000000e+00> : vector<1x32xf32>
    %113 = tpu.matmul %109, %24, %cst_65 {dimension_numbers = #tpu.dot_dimension_numbers<[1], [0], [0], [1], [0, 0, 1, 1], [], []>} : vector<1x128xf32>, vector<128x32xf32>, vector<1x32xf32> -> vector<1x32xf32>
    %cst_66 = arith.constant 3.906250e-03 : f32
    %114 = vector.broadcast %cst_66 : f32 to vector<1x32xf32>
    %115 = arith.mulf %113, %114 : vector<1x32xf32>
    %cst_67 = arith.constant dense<0.000000e+00> : vector<1x32xf32>
    %116 = tpu.matmul %112, %24, %cst_67 {dimension_numbers = #tpu.dot_dimension_numbers<[1], [0], [0], [1], [0, 0, 1, 1], [], []>} : vector<1x128xf32>, vector<128x32xf32>, vector<1x32xf32> -> vector<1x32xf32>
    %cst_68 = arith.constant 3.906250e-03 : f32
    %117 = vector.broadcast %cst_68 : f32 to vector<1x32xf32>
    %118 = arith.mulf %116, %117 : vector<1x32xf32>
    %119 = arith.mulf %115, %115 : vector<1x32xf32>
    %120 = arith.subf %118, %119 : vector<1x32xf32>
    %cst_69 = arith.constant 9.99999974E-6 : f32
    %121 = vector.broadcast %cst_69 : f32 to vector<1x32xf32>
    %122 = arith.addf %120, %121 : vector<1x32xf32>
    %123 = math.rsqrt %122 : vector<1x32xf32>
    %cst_70 = arith.constant dense<0.000000e+00> : vector<1x128xf32>
    %124 = tpu.matmul %115, %25, %cst_70 {dimension_numbers = #tpu.dot_dimension_numbers<[1], [0], [0], [1], [0, 0, 1, 1], [], []>} : vector<1x32xf32>, vector<32x128xf32>, vector<1x128xf32> -> vector<1x128xf32>
    %cst_71 = arith.constant dense<0.000000e+00> : vector<1x128xf32>
    %125 = tpu.matmul %123, %25, %cst_71 {dimension_numbers = #tpu.dot_dimension_numbers<[1], [0], [0], [1], [0, 0, 1, 1], [], []>} : vector<1x32xf32>, vector<32x128xf32>, vector<1x128xf32> -> vector<1x128xf32>
    %126 = arith.mulf %125, %106 : vector<1x128xf32>
    %127 = arith.mulf %124, %126 : vector<1x128xf32>
    %128 = arith.subf %107, %127 : vector<1x128xf32>
    %129 = vector.broadcast %126 : vector<1x128xf32> to vector<256x128xf32>
    %130 = arith.mulf %105, %129 : vector<256x128xf32>
    %131 = vector.broadcast %128 : vector<1x128xf32> to vector<256x128xf32>
    %132 = arith.addf %130, %131 : vector<256x128xf32>
    %cst_72 = arith.constant 0.000000e+00 : f32
    %133 = vector.broadcast %cst_72 : f32 to vector<256x128xf32>
    %134 = arith.subf %133, %132 : vector<256x128xf32>
    %135 = math.exp %134 : vector<256x128xf32>
    %cst_73 = arith.constant 1.000000e+00 : f32
    %136 = vector.broadcast %cst_73 : f32 to vector<256x128xf32>
    %137 = arith.addf %136, %135 : vector<256x128xf32>
    %138 = arith.divf %132, %137 : vector<256x128xf32>
    %c0_74 = arith.constant 0 : index
    %c0_75 = arith.constant 0 : index
    %139 = vector.load %arg12[%c0_74, %c0_75] : memref<1x128xf32, #tpu.memory_space<vmem>>, vector<1x128xf32>
    %140 = arith.truncf %138 : vector<256x128xf32> to vector<256x128xbf16>
    %c1_i32_76 = arith.constant 1 : i32
    %141 = tpu.dynamic_rotate %138 by %c1_i32_76 dim 0 : vector<256x128xf32>, i32 -> vector<256x128xf32>
    %cst_77 = arith.constant 0.000000e+00 : f32
    %142 = vector.shape_cast %18 : vector<256x1xi1> to vector<256x1xi1>
    %143 = vector.broadcast %142 : vector<256x1xi1> to vector<256x128xi1>
    %144 = vector.broadcast %cst_77 : f32 to vector<256x128xf32>
    %145 = arith.select %143, %141, %144 : vector<256x128xi1>, vector<256x128xf32>
    %146 = arith.truncf %145 : vector<256x128xf32> to vector<256x128xbf16>
    %c255_i32_78 = arith.constant 255 : i32
    %147 = tpu.dynamic_rotate %138 by %c255_i32_78 dim 0 : vector<256x128xf32>, i32 -> vector<256x128xf32>
    %cst_79 = arith.constant 0.000000e+00 : f32
    %148 = vector.shape_cast %20 : vector<256x1xi1> to vector<256x1xi1>
    %149 = vector.broadcast %148 : vector<256x1xi1> to vector<256x128xi1>
    %150 = vector.broadcast %cst_79 : f32 to vector<256x128xf32>
    %151 = arith.select %149, %147, %150 : vector<256x128xi1>, vector<256x128xf32>
    %152 = arith.truncf %151 : vector<256x128xf32> to vector<256x128xbf16>
    %153 = tpu.concatenate %146, %140, %152 in 1 : vector<256x128xbf16>, vector<256x128xbf16>, vector<256x128xbf16> -> vector<256x384xbf16>
    %c16_80 = arith.constant 16 : index
    %c0_81 = arith.constant 0 : index
    %154 = vector.load %arg16[%c16_80, %c0_81] : memref<288x384xbf16, #tpu.memory_space<vmem>>, vector<256x384xbf16>
    tpu.vector_store %arg16[%c16_80, %c0_81], %153 {strides = array<i32>} : memref<288x384xbf16, #tpu.memory_space<vmem>>, vector<256x384xbf16>,
    %c0_82 = arith.constant 0 : index
    %c0_83 = arith.constant 0 : index
    %155 = vector.load %arg16[%c0_82, %c0_83] : memref<288x384xbf16, #tpu.memory_space<vmem>>, vector<256x384xbf16>
    %c16_84 = arith.constant 16 : index
    %c0_85 = arith.constant 0 : index
    %156 = vector.load %arg16[%c16_84, %c0_85] : memref<288x384xbf16, #tpu.memory_space<vmem>>, vector<256x384xbf16>
    %c32_86 = arith.constant 32 : index
    %c0_87 = arith.constant 0 : index
    %157 = vector.load %arg16[%c32_86, %c0_87] : memref<288x384xbf16, #tpu.memory_space<vmem>>, vector<256x384xbf16>
    %c0_88 = arith.constant 0 : index
    %c0_89 = arith.constant 0 : index
    %c0_90 = arith.constant 0 : index
    %158 = vector.load %arg11[%c0_88, %c0_89, %c0_90] : memref<3x384x128xbf16, #tpu.memory_space<vmem>>, vector<1x384x128xbf16>
    %159 = vector.shape_cast %158 : vector<1x384x128xbf16> to vector<384x128xbf16>
    %cst_91 = arith.constant dense<0.000000e+00> : vector<256x128xf32>
    %160 = tpu.matmul %155, %159, %cst_91 {dimension_numbers = #tpu.dot_dimension_numbers<[1], [0], [0], [1], [0, 0, 1, 1], [], []>} : vector<256x384xbf16>, vector<384x128xbf16>, vector<256x128xf32> -> vector<256x128xf32>
    %c1_92 = arith.constant 1 : index
    %c0_93 = arith.constant 0 : index
    %c0_94 = arith.constant 0 : index
    %161 = vector.load %arg11[%c1_92, %c0_93, %c0_94] : memref<3x384x128xbf16, #tpu.memory_space<vmem>>, vector<1x384x128xbf16>
    %162 = vector.shape_cast %161 : vector<1x384x128xbf16> to vector<384x128xbf16>
    %cst_95 = arith.constant dense<0.000000e+00> : vector<256x128xf32>
    %163 = tpu.matmul %156, %162, %cst_95 {dimension_numbers = #tpu.dot_dimension_numbers<[1], [0], [0], [1], [0, 0, 1, 1], [], []>} : vector<256x384xbf16>, vector<384x128xbf16>, vector<256x128xf32> -> vector<256x128xf32>
    %164 = arith.addf %160, %163 : vector<256x128xf32>
    %c2_96 = arith.constant 2 : index
    %c0_97 = arith.constant 0 : index
    %c0_98 = arith.constant 0 : index
    %165 = vector.load %arg11[%c2_96, %c0_97, %c0_98] : memref<3x384x128xbf16, #tpu.memory_space<vmem>>, vector<1x384x128xbf16>
    %166 = vector.shape_cast %165 : vector<1x384x128xbf16> to vector<384x128xbf16>
    %cst_99 = arith.constant dense<0.000000e+00> : vector<256x128xf32>
    %167 = tpu.matmul %157, %166, %cst_99 {dimension_numbers = #tpu.dot_dimension_numbers<[1], [0], [0], [1], [0, 0, 1, 1], [], []>} : vector<256x384xbf16>, vector<384x128xbf16>, vector<256x128xf32> -> vector<256x128xf32>
    %168 = arith.addf %164, %167 : vector<256x128xf32>
    %169 = vector.broadcast %139 : vector<1x128xf32> to vector<256x128xf32>
    %170 = arith.addf %168, %169 : vector<256x128xf32>
    %171 = arith.addf %27, %170 : vector<256x128xf32>
    %c0_100 = arith.constant 0 : index
    %c0_101 = arith.constant 0 : index
    %c0_102 = arith.constant 0 : index
    %172 = vector.load %arg15[%c0_100, %c0_101, %c0_102] : memref<1x256x128xf32, #tpu.memory_space<vmem>>, vector<1x256x128xf32>
    %173 = vector.shape_cast %172 : vector<1x256x128xf32> to vector<256x128xf32>
    %174 = vector.shape_cast %171 : vector<256x128xf32> to vector<1x256x128xf32>
    tpu.vector_store %arg15[%c0_100, %c0_101, %c0_102], %174 {strides = array<i32>} : memref<1x256x128xf32, #tpu.memory_space<vmem>>, vector<1x256x128xf32>,
    return
  }
  func.func @transform_0(%arg0: i32) -> (i32, i32, i32) {
    %c0_i32 = arith.constant 0 : i32
    %c0_i32_0 = arith.constant 0 : i32
    %c0_i32_1 = arith.constant 0 : i32
    return %arg0, %c0_i32, %c0_i32_0 : i32, i32, i32
  }
  func.func @transform_1(%arg0: i32) -> (i32, i32, i32) {
    %c0_i32 = arith.constant 0 : i32
    %c0_i32_0 = arith.constant 0 : i32
    %c0_i32_1 = arith.constant 0 : i32
    return %arg0, %c0_i32, %c0_i32_0 : i32, i32, i32
  }
  func.func @transform_2(%arg0: i32) -> (i32, i32) {
    %c0_i32 = arith.constant 0 : i32
    %c0_i32_0 = arith.constant 0 : i32
    %c0_i32_1 = arith.constant 0 : i32
    return %c0_i32, %c0_i32_0 : i32, i32
  }
  func.func @transform_3(%arg0: i32) -> (i32, i32) {
    %c0_i32 = arith.constant 0 : i32
    %c0_i32_0 = arith.constant 0 : i32
    %c0_i32_1 = arith.constant 0 : i32
    return %c0_i32, %c0_i32_0 : i32, i32
  }
  func.func @transform_4(%arg0: i32) -> (i32, i32) {
    %c0_i32 = arith.constant 0 : i32
    %c0_i32_0 = arith.constant 0 : i32
    %c0_i32_1 = arith.constant 0 : i32
    return %c0_i32, %c0_i32_0 : i32, i32
  }
  func.func @transform_5(%arg0: i32) -> (i32, i32) {
    %c0_i32 = arith.constant 0 : i32
    %c0_i32_0 = arith.constant 0 : i32
    %c0_i32_1 = arith.constant 0 : i32
    return %c0_i32, %c0_i32_0 : i32, i32
  }
  func.func @transform_6(%arg0: i32) -> (i32, i32, i32) {
    %c0_i32 = arith.constant 0 : i32
    %c0_i32_0 = arith.constant 0 : i32
    %c0_i32_1 = arith.constant 0 : i32
    %c0_i32_2 = arith.constant 0 : i32
    return %c0_i32, %c0_i32_0, %c0_i32_1 : i32, i32, i32
  }
  func.func @transform_7(%arg0: i32) -> (i32, i32) {
    %c0_i32 = arith.constant 0 : i32
    %c0_i32_0 = arith.constant 0 : i32
    %c0_i32_1 = arith.constant 0 : i32
    return %c0_i32, %c0_i32_0 : i32, i32
  }
  func.func @transform_8(%arg0: i32) -> (i32, i32) {
    %c0_i32 = arith.constant 0 : i32
    %c0_i32_0 = arith.constant 0 : i32
    %c0_i32_1 = arith.constant 0 : i32
    return %c0_i32, %c0_i32_0 : i32, i32
  }
  func.func @transform_9(%arg0: i32) -> (i32, i32) {
    %c0_i32 = arith.constant 0 : i32
    %c0_i32_0 = arith.constant 0 : i32
    %c0_i32_1 = arith.constant 0 : i32
    return %c0_i32, %c0_i32_0 : i32, i32
  }
  func.func @transform_10(%arg0: i32) -> (i32, i32, i32) {
    %c0_i32 = arith.constant 0 : i32
    %c0_i32_0 = arith.constant 0 : i32
    %c0_i32_1 = arith.constant 0 : i32
    %c0_i32_2 = arith.constant 0 : i32
    return %c0_i32, %c0_i32_0, %c0_i32_1 : i32, i32, i32
  }
  func.func @transform_11(%arg0: i32) -> (i32, i32) {
    %c0_i32 = arith.constant 0 : i32
    %c0_i32_0 = arith.constant 0 : i32
    %c0_i32_1 = arith.constant 0 : i32
    return %c0_i32, %c0_i32_0 : i32, i32
  }
  func.func @transform_12(%arg0: i32) -> (i32, i32) {
    %c0_i32 = arith.constant 0 : i32
    %c0_i32_0 = arith.constant 0 : i32
    %c0_i32_1 = arith.constant 0 : i32
    return %c0_i32, %c0_i32_0 : i32, i32
  }
  func.func @transform_13(%arg0: i32) -> (i32, i32) {
    %c0_i32 = arith.constant 0 : i32
    %c0_i32_0 = arith.constant 0 : i32
    %c0_i32_1 = arith.constant 0 : i32
    return %c0_i32, %c0_i32_0 : i32, i32
  }
  func.func @transform_14(%arg0: i32) -> (i32, i32, i32) {
    %c0_i32 = arith.constant 0 : i32
    %c0_i32_0 = arith.constant 0 : i32
    %c0_i32_1 = arith.constant 0 : i32
    return %arg0, %c0_i32, %c0_i32_0 : i32, i32, i32
  }
}

</mosaic_0001>

<bundles_post_ra>
// kernel: tpu_custom_call.1
= control target key start
LH: loop header
LB: loop body
LE: loop exit
PB: predicated region body
PF: predicated region fallthrough
CT: control target
= control target key end

     0   :  { %s13959_s0 = inlined_call_operand.hbm [shape: f32[2,256,128], index: 0, kind: input, shape index: {}]   ;;  %s13960_s1 = inlined_call_operand.vmem [shape: f32[2,1,64], index: 1, kind: input, shape index: {}]   ;;  %s13961_s2 = inlined_call_operand.vmem [shape: f32[64,128], index: 2, kind: input, shape index: {}]   ;;  %s13962_s3 = inlined_call_operand.vmem [shape: f32[1,128], index: 3, kind: input, shape index: {}]   ;;  %s13963_s4 = inlined_call_operand.vmem [shape: f32[1,128], index: 4, kind: input, shape index: {}]   ;;  %s13964_s5 = inlined_call_operand.vmem [shape: f32[1,128], index: 5, kind: input, shape index: {}]   ;;  %s13965_s6 = inlined_call_operand.hbm [shape: bf16[3,384,128], index: 6, kind: input, shape index: {}]   ;;  %s13966_s7 = inlined_call_operand.vmem [shape: f32[1,128], index: 7, kind: input, shape index: {}]   ;;  %s13967_s8 = inlined_call_operand.vmem [shape: f32[1,128], index: 8, kind: input, shape index: {}]   ;;  %s13968_s9 = inlined_call_operand.vmem [shape: f32[1,128], index: 9, kind: input, shape index: {}]   ;;  %s13969_s10 = inlined_call_operand.hbm [shape: bf16[3,384,128], index: 10, kind: input, shape index: {}]   ;;  %s13970_s11 = inlined_call_operand.vmem [shape: f32[1,128], index: 11, kind: input, shape index: {}]   ;;  %s13971_s12 = inlined_call_operand.vmem [shape: f32[128,32], index: 12, kind: input, shape index: {}]   ;;  %s13972_s13 = inlined_call_operand.vmem [shape: f32[32,128], index: 13, kind: input, shape index: {}]   ;;  %s13973_s14 = inlined_call_operand.hbm [shape: f32[2,256,128], index: 14, kind: output, shape index: {}]  }
   0x1   :  { %14243 = sst [smem:[#allocation76_spill]] %s13959_s0 }
   0x2   :  { %14244 = sst [smem:[#allocation77_spill]] %s13965_s6 }
   0x3   :  { %14245 = sst [smem:[#allocation78_spill]] %s13967_s8 }
   0x4   :  { %14246 = sst [smem:[#allocation79_spill]] %s13968_s9 }
   0x5   :  { %14247 = sst [smem:[#allocation80_spill]] %s13970_s11 }
   0x6   :  { %14248 = sst [smem:[#allocation81_spill]] %s13973_s14 }
   0x7   :  { %19 = vsyncpa [#allocation4], 0 }
   0x8   :  { %21 = vsyncpa [#allocation4 + $0x1], 0 }
   0x9   :  { %22 = vsyncpa [#allocation7], 0 }
   0xa   :  { %23 = vsyncpa [#allocation5], 0 }
   0xb   :  { %25 = vsyncpa [#allocation5 + $0x1], 0  ;;  %s10193_s29 = smov 0   ;;  %s10195_s30 = smov 0  }
   0xc   :  { %s10197_s15 = smov 0   ;;  %s10199_s16 = smov 0  }
   0xd LB: > { %14249 = sst [smem:[#allocation13_spill]] %s10089_s29  ;;  %s10214_s17 = sadd.s32 4294967295, %s10101_s16   ;;  %s10101_s16 = sphi %s10199_s16, %s14806_s16   ;;  %s10097_s15 = sphi %s10197_s15, %s14805_s15   ;;  %s10093_s30 = sphi %s10195_s30, %s14804_s30   ;;  %s10089_s29 = sphi %s10193_s29, %s14803_s29  }
   0xe   : > { %s6812_s18 = sadd.s32 4294967294, %s10101_s16   ;;  %p51_p0 = scmp.ne.s32.totalorder %s10093_s30, %s10089_s29 }
   0xf   : > { %p13977_p1 = scmp.eq.s32.totalorder %s10214_s17, 0  ;;  %p359_p3 = scmp.eq.s32.totalorder %s6812_s18, 1 }
  0x10   : > { %p6813_p5 = scmp.ge.s32.totalorder %s10101_s16, 1  ;;  %p366_p7 = scmp.lt.s32.totalorder %s10101_s16, 3 }
  0x11   : > { %p10223_p4 = por %p13977_p1, %p51_p0  ;;  %p10228_p6 = por %p359_p3, %p51_p0 }
  0x12   : > { %p10233_p8 = pnand %p6813_p5, %p366_p7  ;;  %s10103_s22 = smov [#allocation6]  }
  0x13   : > { %s14250_s19 = scalar_select %p10223_p4, 1, 0 }
  0x14   : > { %s14251_s20 = scalar_select %p10228_p6, 1, 0 }
  0x15   : > { %s390_s23 = sshll.u32 %s10103_s22, 4  ;;  %p9418_p9 = pneg %p10233_p8  ;;  %s10237_s23 = int_to_ptr.vmem [resolvable:$true] %s390_s23 }
  0x16   : > { %14252 = sst [smem:[#allocation14_spill]] %s14251_s20  ;;  %s10104_s25 = smov [#allocation8]  }
  0x17   : > { %p10244_p11 = pnand %p9418_p9, %p13977_p1  ;;  %s412_s26 = sshll.u32 %s10104_s25, 4  ;;  %s10248_s26 = int_to_ptr.vmem [resolvable:$true] %s412_s26 }
  0x18   : > { %s14255_s6 = sld [smem:[#allocation77_spill]] }
  0x19   : > { %p9947_p13 = pneg %p10244_p11 }
  0x1e   : > { %s9945_s18 = scalar_lea.hbm %s14255_s6, 9216 }
  0x1f   : > { %p9946_p12 = scmp.ne.s32.totalorder %s14255_s6, %s9945_s18  ;;  %p9952_p5 = scmp.lt.u32.totalorder %s9945_s18, %s14255_s6 }
  0x21   : > { %p9948_p0 = pnand %p9947_p13, %p9946_p12 }
  0x23   : > { %p9949_p3 = pneg %p9948_p0 }
  0x25   : > { %p9954_p7 = pnand %p9952_p5, %p9949_p3 }
  0x27   : > { %9957 = shalt.err (!%p9954_p7)
}
  0x28   : > { %s9958_s25 = scalar_lea.vmem %s10237_s23, 9216  ;;  %p9966_p2 = scmp.lt.s32.totalorder %s10237_s23, %s10237_s23 }
  0x29   : > { %p9959_p9 = scmp.ne.s32.totalorder %s10237_s23, %s9958_s25  ;;  %p9967_p12 = scmp.lt.s32.totalorder %s9958_s25, %s9958_s25 }
  0x2b   : > { %p9961_p10 = pnand %p9959_p9, %p9947_p13  ;;  %p9968_p0 = por %p9967_p12, %p9966_p2 }
  0x2d   : > { %p9962_p1 = pneg %p9961_p10 }
  0x2f   : > { %p9969_p6 = pnand %p9968_p0, %p9962_p1 }
  0x31   : > { %9972 = shalt.err (!%p9969_p6)
}
  0x32   : > { %s10105_s14 = smov 64   ;;  %s10106_s29 = smov 4  }
  0x33   : > { %9421 = dma.hbm_to_vmem [thread:$0]  (!%p10244_p11), %s14255_s6, 9216, %s10237_s23, [#allocation7], %s10105_s14, %s10105_s14, %s10106_s29  }
  0x34   : > { %s9973_s22 = scalar_lea.hbm %s13969_s10, 9216 }
  0x35   : > { %p9974_p2 = scmp.ne.s32.totalorder %s13969_s10, %s9973_s22  ;;  %p9980_p10 = scmp.lt.u32.totalorder %s9973_s22, %s13969_s10 }
  0x37   : > { %p9976_p1 = pnand %p9974_p2, %p9947_p13 }
  0x39   : > { %p9977_p6 = pneg %p9976_p1 }
  0x3b   : > { %p9982_p3 = pnand %p9980_p10, %p9977_p6 }
  0x3d   : > { %9985 = shalt.err (!%p9982_p3)
}
  0x3e   : > { %s9986_s23 = scalar_lea.vmem %s10248_s26, 9216  ;;  %p9994_p12 = scmp.lt.s32.totalorder %s10248_s26, %s10248_s26 }
  0x3f   : > { %p9987_p5 = scmp.ne.s32.totalorder %s10248_s26, %s9986_s23  ;;  %p9995_p0 = scmp.lt.s32.totalorder %s9986_s23, %s9986_s23 }
  0x41   : > { %p9989_p7 = pnand %p9987_p5, %p9947_p13  ;;  %p9996_p2 = por %p9995_p0, %p9994_p12 }
  0x43   : > { %p9990_p9 = pneg %p9989_p7 }
  0x45   : > { %p9997_p1 = pnand %p9996_p2, %p9990_p9 }
  0x47   : > { %10000 = shalt.err (!%p9997_p1)
}
  0x48   : > { %9424 = dma.hbm_to_vmem [thread:$0]  (!%p10244_p11), %s13969_s10, 9216, %s10248_s26, [#allocation7], %s10105_s14, %s10105_s14, %s10106_s29  }
  0x49   : > { %s10303_s11 = sadd.s32 1, %s10101_s16   ;;  %s38_s24 = sadd.s32 1, %s10097_s15 }
  0x4a   : > { %s35_s20 = ssub.s32 %s10101_s16, %s10303_s11  ;;  %p45_p13 = scmp.ne.s32.totalorder %s10097_s15, %s10093_s30 }
  0x4b   : > { %p36_p6 = scmp.eq.s32.totalorder %s35_s20, 0  ;;  %p46_p10 = scmp.eq.s32.totalorder %s10101_s16, 0 }
  0x4c   : > { %p14256_p3 = scmp.eq.s32.totalorder %s10214_s17, 1  ;;  %p9435_p7 = scmp.lt.s32.totalorder %s10101_s16, 2 }
  0x4d   : > { %s10319_s28 = scalar_select %p36_p6, %s10097_s15, %s38_s24  }
  0x4e   : > { %p10313_p5 = por %p14256_p3, %p45_p13  ;;  %p47_p9 = por %p46_p10, %p45_p13 }
  0x4f   : > { %s435_s18 = sand.u32 1, %s10097_s15   ;;  %s6980_s26 = sshll.u32 %s10101_s16, 12 }
  0x50   : > { %s14257_s27 = scalar_select %p10313_p5, 1, 0 }
  0x51   : > { %s6817_s22 = sshll.u32 %s435_s18, 8  ;;  %s14258_s0 = sld [smem:[#allocation76_spill]] }
  0x52   : > { %s439_s23 = scalar_lea.vmem [#allocation3], %s6817_s22  ;;  %p10330_p11 = pnand %p9435_p7, %p47_p9 }
  0x53   : > { %s446_s8 = sshll.u32 %s439_s23, 4  ;;  %s10334_s24 = scalar_lea.sflag [#allocation4], %s435_s18  ;;  %s10328_s8 = int_to_ptr.vmem [resolvable:$true] %s446_s8 }
  0x54   : > { %p10003_p0 = pneg %p10330_p11 }
  0x57   : > { %s10326_s25 = scalar_lea.hbm %s14258_s0, %s6980_s26  ;;  %s10006_s14 = scalar_lea.hbm %s14258_s0, 8192 }
  0x58   : > { %s10001_s20 = scalar_lea.hbm %s10326_s25, 4096  ;;  %p10007_p13 = scmp.lt.u32.totalorder %s10326_s25, %s14258_s0 }
  0x59   : > { %p10002_p12 = scmp.ne.s32.totalorder %s10326_s25, %s10001_s20  ;;  %p10008_p6 = scmp.lt.u32.totalorder %s10006_s14, %s10001_s20 }
  0x5a   : > { %p10010_p3 = scmp.lt.u32.totalorder %s10001_s20, %s10326_s25 }
  0x5b   : > { %p10004_p2 = pnand %p10003_p0, %p10002_p12  ;;  %p10009_p10 = por %p10008_p6, %p10007_p13 }
  0x5d   : > { %p10005_p1 = pneg %p10004_p2  ;;  %p10011_p7 = por %p10010_p3, %p10009_p10 }
  0x5f   : > { %p10012_p9 = pnand %p10011_p7, %p10005_p1 }
  0x61   : > { %10015 = shalt.err (!%p10012_p9)
}
  0x62   : > { %s10016_s18 = scalar_lea.vmem %s10328_s8, 4096  ;;  %s10107_s22 = smov [#allocation3]  }
  0x63   : > { %p10017_p12 = scmp.ne.s32.totalorder %s10328_s8, %s10016_s18  ;;  %s10021_s26 = sshll.u32 %s10107_s22, 4  ;;  %s10022_s26 = int_to_ptr.vmem [resolvable:$false] %s10021_s26 }
  0x64   : > { %s10023_s29 = scalar_lea.vmem %s10022_s26, 8192  ;;  %p10024_p4 = scmp.lt.s32.totalorder %s10328_s8, %s10022_s26 }
  0x65   : > { %p10019_p2 = pnand %p10017_p12, %p10003_p0  ;;  %p10025_p13 = scmp.lt.s32.totalorder %s10023_s29, %s10016_s18 }
  0x67   : > { %p10020_p5 = pneg %p10019_p2  ;;  %p10026_p6 = por %p10025_p13, %p10024_p4 }
  0x69   : > { %p10027_p10 = pnand %p10026_p6, %p10020_p5 }
  0x6b   : > { %10030 = shalt.err (!%p10027_p10)
}
  0x6c   : > { %s10108_s20 = smov 128   ;;  %s10109_s14 = smov 8  }
  0x6d   : > { %9428 = dma.hbm_to_vmem [thread:$0]  (!%p10330_p11), %s10326_s25, 4096, %s10328_s8, %s10334_s24, %s10108_s20, %s10108_s20, %s10109_s14  }
  0x6e   : > { %464 = sbr.rel (%p10233_p8) target bundleno = 2422 (0x976), region = 76 }
  0x75   : > { %s10365_s23 = sand.u32 1, %s10093_s30   ;;  %p14260_p4 = scmp.ne.s32.totalorder %s14250_s19, 0 }
  0x76   : > { %s13980_s18 = sshll.u32 %s10365_s23, 8  ;;  %s467_s22 = scalar_lea.sflag [#allocation4], %s10365_s23 }
  0x77   : > { %s10371_s26 = scalar_lea.vmem [#allocation3], %s13980_s18 }
  0x78   : > { %10076 = dma.done.wait (%p14260_p4), %s467_s22, 4096  }
  0x79   : > { %10078 = vsyncadd (%p14260_p4), %s467_s22, 4294963200  ;;  %p14261_p5 = scmp.eq.s32.totalorder %s10214_s17, 0 }
  0x7b   : > { %10080 = dma.done.wait (%p14261_p5), [#allocation7], 18432   ;;  %p14262_p8 = pmov %p14261_p5 }
  0x7c   : > { %p526_p11 = scmp.lt.s32.totalorder %s10214_s17, 1  ;;  %v13983_v0 = vmov 0.0|0.0   ;;  %vm14055_vm0 = vmmov 0   ;;  %v13981_v1 = vmov 0.0   ;;  %v1076_v2 = vld [vmem:[%s13961_s2] sm:$0xff]  ;;  %v1077_v3 = vld [vmem:[%s13961_s2 + $0x8] sm:$0xff] }
  0x7d   : > { %10082 = vsyncadd (%p14262_p8), [#allocation7], 4294948864  ;;  %8938 = vmatprep.subr.bf16.mxu0 %v13983_v0  ;;  %8950 = vmatprep.subr.bf16.mxu1 %v13983_v0  ;;  %v1078_v4 = vld [vmem:[%s13961_s2 + $0x10] sm:$0xff]  ;;  %v8939_v5 = vpack.c.bf16 %v1077_v3, %v1076_v2  ;;  %v1079_v6 = vld [vmem:[%s13961_s2 + $0x18] sm:$0xff]  ;;  %vm1085_vm1 = vcmask 523264   ;;  %vm14054_vm2 = vcmask 261120  }
  0x7e   : > { %8463 = vmatprep.mubr.msk.f32.mxu0 %vm14055_vm0, %v13981_v1  ;;  %8498 = vmatprep.mubr.msk.f32.mxu1 %vm14055_vm0, %v13981_v1  ;;  %s527_s19 = scalar_select %p526_p11, %s10214_s17, 1  ;;  %v1017_v7 = vld [vmem:[%s13971_s12] sm:$0xff]  ;;  %v8942_v8 = vpack.c.bf16 %v1079_v6, %v1078_v4  ;;  %v1018_v9 = vld [vmem:[%s13971_s12 + $0x8] sm:$0xff]  ;;  %v1019_v11 = vld [vmem:[%s13971_s12 + $0x10] sm:$0xff]  ;;  %vm14057_vm7 = vmmov 1  }
  0x7f   : > { %8940 = vmatpush3.bf16.msra.mxu0 %v8939_v5  ;;  %v1080_v12 = vld [vmem:[%s13961_s2 + $0x20] sm:$0xff]  ;;  %v1081_v13 = vld [vmem:[%s13961_s2 + $0x28] sm:$0xff]  ;;  %v10422_v14 = vpack.c.bf16 %v1018_v9, %v1017_v7  ;;  %v1020_v16 = vld [vmem:[%s13971_s12 + $0x18] sm:$0xff]  ;;  %s14627_s0 = sld [smem:[#allocation78_spill]]  ;;  %s14795_s14 = sld [smem:[#allocation80_spill]] }
  0x80   : > { %s528_s22 = scalar_lea.vmem %s13960_s1, %s527_s19  ;;  %8941 = vmatprep.subr.bf16.mxu0 %v13983_v0  ;;  %v10429_v18 = vpack.c.bf16 %v1020_v16, %v1019_v11  ;;  %v8945_v19 = vpack.c.bf16 %v1081_v13, %v1080_v12  ;;  %v1082_v20 = vld [vmem:[%s13961_s2 + $0x30] sm:$0xff]  ;;  %v1021_v21 = vld [vmem:[%s13971_s12 + $0x20] sm:$0xff]  ;;  %v1022_v22 = vld [vmem:[%s13971_s12 + $0x28] sm:$0xff]  ;;  %s14628_s19 = sld [smem:[#allocation79_spill]] }
  0x81   : > { %v10410_v10 = vld [vmem:[%s528_s22] sm:$0x1]  ;;  %14263 = vst [vmem:[#allocation15_spill] sm:$0xff] %v10422_v14  ;;  %8952 = vmatpush3.bf16.msra.mxu1 %v10422_v14  ;;  %v1083_v23 = vld [vmem:[%s13961_s2 + $0x38] sm:$0xff]  ;;  %v1038_v25 = vld [vmem:[%s10371_s26 + $0x8] sm:$0xff]  ;;  %v10449_v28 = vpack.c.bf16 %v1022_v22, %v1021_v21  ;;  %s14796_s22 = sshll.u32 %s10365_s23, 8 }
  0x82   : > { %v1070_v15 = vsub.f32 0.0, %v10410_v10  ;;  %14264 = vst [vmem:[#allocation16_spill] sm:$0xff] %v10429_v18  ;;  %8953 = vmatprep.subr.bf16.mxu1 %v13983_v0  ;;  %v1037_v24 = vld [vmem:[%s10371_s26] sm:$0xff]  ;;  %v1039_v26 = vld [vmem:[%s10371_s26 + $0x10] sm:$0xff]  ;;  %v1040_v29 = vld [vmem:[%s10371_s26 + $0x18] sm:$0xff]  ;;  %v1199_v31 = vmul.f32 %v1038_v25, %v1038_v25  ;;  %v8948_v32 = vpack.c.bf16 %v1083_v23, %v1082_v20  ;;  %s13773_s21 = scalar_lea.vmem [#allocation9], %s14796_s22 }
  0x83   : > { %8943 = vmatpush3.bf16.msra.mxu0 %v8942_v8  ;;  %v1161_v27 = vadd.f32 %v1038_v25, %v1037_v24  ;;  %14265 = vst [vmem:[#allocation17_spill] sm:$0xff] %v10449_v28  ;;  %v1198_v30 = vmul.f32 %v1037_v24, %v1037_v24  ;;  %v1023_v33 = vld [vmem:[%s13971_s12 + $0x30] sm:$0xff]  ;;  %v1024_v34 = vld [vmem:[%s13971_s12 + $0x38] sm:$0xff]  ;;  %v1041_v36 = vld [vmem:[%s10371_s26 + $0x20] sm:$0xff]  ;;  %v1200_v40 = vmul.f32 %v1039_v26, %v1039_v26  ;;  %s6981_s25 = sshll.u32 %s10214_s17, 12  ;;  %s6711_s8 = sshll.u32 %s13773_s21, 4  ;;  %s13911_s8 = int_to_ptr.vmem [resolvable:$true] %s6711_s8 }
  0x84   : > { %v1071_v17 = vmul.f32 1.442695, %v1070_v15  ;;  %8944 = vmatprep.subr.bf16.mxu0 %v13983_v0  ;;  %v10462_v38 = vpack.c.bf16 %v1024_v34, %v1023_v33  ;;  %v1042_v39 = vld [vmem:[%s10371_s26 + $0x28] sm:$0xff]  ;;  %v1025_v42 = vld [vmem:[%s13971_s12 + $0x40] sm:$0xff]  ;;  %v1043_v45 = vld [vmem:[%s10371_s26 + $0x30] sm:$0xff]  ;;  %v1201_v46 = vmul.f32 %v1040_v29, %v1040_v29  ;;  %v1202_v52 = vmul.f32 %v1041_v36, %v1041_v36  ;;  %s6698_s18 = scalar_lea.sflag [#allocation5], %s10365_s23 }
  0x85   : > { %8955 = vmatpush3.bf16.msra.mxu1 %v10429_v18  ;;  %v1162_v35 = vadd.f32 %v1161_v27, %v1039_v26  ;;  %v1230_v41 = vadd.f32 %v1199_v31, %v1198_v30  ;;  %v1026_v43 = vld [vmem:[%s13971_s12 + $0x48] sm:$0xff]  ;;  %v1027_v50 = vld [vmem:[%s13971_s12 + $0x50] sm:$0xff]  ;;  %v1044_v51 = vld [vmem:[%s10371_s26 + $0x38] sm:$0xff]  ;;  %v1203_v59 = vmul.f32 %v1042_v39, %v1042_v39  ;;  %v1204_v4 = vmul.f32 %v1043_v45, %v1043_v45  ;;  %s10031_s6 = scalar_lea.vmem %s13911_s8, 4096  ;;  %p14798_p1 = scmp.ne.s32.totalorder %s14257_s27, 0 }
  0x86   : > { %9628 = vpow2.f32 %v1071_v17  ;;  %8956 = vmatprep.subr.bf16.mxu1 %v13983_v0  ;;  %14266 = vst [vmem:[#allocation18_spill] sm:$0xff] %v10462_v38  ;;  %v10475_v49 = vpack.c.bf16 %v1026_v43, %v1025_v42  ;;  %v1028_v55 = vld [vmem:[%s13971_s12 + $0x58] sm:$0xff]  ;;  %v1045_v56 = vld [vmem:[%s10371_s26 + $0x40] sm:$0xff]  ;;  %v1046_v58 = vld [vmem:[%s10371_s26 + $0x48] sm:$0xff]  ;;  %v1205_v8 = vmul.f32 %v1044_v51, %v1044_v51  ;;  %p10032_p0 = scmp.ne.s32.totalorder %s13911_s8, %s10031_s6 }
  0x87   : > { %8946 = vmatpush3.bf16.msra.mxu0 %v8945_v19  ;;  %v1163_v37 = vadd.f32 %v1162_v35, %v1040_v29  ;;  %v1231_v53 = vadd.f32 %v1230_v41, %v1200_v40  ;;  %v1029_v61 = vld [vmem:[%s13971_s12 + $0x60] sm:$0xff]  ;;  %v1030_v62 = vld [vmem:[%s13971_s12 + $0x68] sm:$0xff]  ;;  %v10494_v2 = vpack.c.bf16 %v1028_v55, %v1027_v50  ;;  %v1047_v3 = vld [vmem:[%s10371_s26 + $0x50] sm:$0xff]  ;;  %v1206_v17 = vmul.f32 %v1045_v56, %v1045_v56 }
  0x88   : > { %8947 = vmatprep.subr.bf16.mxu0 %v13983_v0  ;;  %14267 = vst [vmem:[#allocation19_spill] sm:$0xff] %v10475_v49  ;;  %v1048_v7 = vld [vmem:[%s10371_s26 + $0x58] sm:$0xff]  ;;  %v1031_v11 = vld [vmem:[%s13971_s12 + $0x70] sm:$0xff]  ;;  %v10506_v15 = vpack.c.bf16 %v1030_v62, %v1029_v61  ;;  %v1049_v16 = vld [vmem:[%s10371_s26 + $0x60] sm:$0xff]  ;;  %v1207_v22 = vmul.f32 %v1046_v58, %v1046_v58  ;;  %v1208_v27 = vmul.f32 %v1047_v3, %v1047_v3  ;;  %p10033_p3 = pnand %p10032_p0, %p14798_p1 }
  0x89   : > { %8958 = vmatpush3.bf16.msra.mxu1 %v10449_v28  ;;  %v1164_v44 = vadd.f32 %v1163_v37, %v1041_v36  ;;  %v1232_v60 = vadd.f32 %v1231_v53, %v1201_v46  ;;  %14268 = vst [vmem:[#allocation20_spill] sm:$0xff] %v10494_v2  ;;  %v1032_v12 = vld [vmem:[%s13971_s12 + $0x78] sm:$0xff]  ;;  %v1050_v21 = vld [vmem:[%s10371_s26 + $0x68] sm:$0xff]  ;;  %v1051_v26 = vld [vmem:[%s10371_s26 + $0x70] sm:$0xff]  ;;  %v1209_v34 = vmul.f32 %v1048_v7, %v1048_v7 }
  0x8a   : > { %8959 = vmatprep.subr.bf16.mxu1 %v13983_v0  ;;  %14269 = vst [vmem:[#allocation21_spill] sm:$0xff] %v10506_v15  ;;  %v10512_v25 = vpack.c.bf16 %v1032_v12, %v1031_v11  ;;  %v1052_v33 = vld [vmem:[%s10371_s26 + $0x78] sm:$0xff]  ;;  %v1053_v37 = vld [vmem:[%s10371_s26 + $0x80] sm:$0xff]  ;;  %v1211_v42 = vmul.f32 %v1050_v21, %v1050_v21  ;;  %v1212_v46 = vmul.f32 %v1051_v26, %v1051_v26  ;;  %v10538_v62 = vld [vmem:[%s10371_s26 + $0xb0] sm:$0xff]  ;;  %p10034_p7 = pneg %p10033_p3 }
  0x8b   : > { %8949 = vmatpush3.bf16.msra.mxu0 %v8948_v32  ;;  %v1165_v47 = vadd.f32 %v1164_v44, %v1042_v39  ;;  %v1233_v5 = vadd.f32 %v1232_v60, %v1202_v52  ;;  %v1210_v39 = vmul.f32 %v1049_v16, %v1049_v16  ;;  %v1056_v50 = vld [vmem:[%s10371_s26 + $0x98] sm:$0xff]  ;;  %v1214_v55 = vmul.f32 %v1053_v37, %v1053_v37 }
  0x8c   : > { %8974 = vmatprep.subr.bf16.mxu0 %v13983_v0  ;;  %14270 = vst [vmem:[#allocation22_spill] sm:$0xff] %v10512_v25 }
  0x8d   : > { %8961 = vmatpush3.bf16.msra.mxu1 %v10462_v38  ;;  %v1166_v57 = vadd.f32 %v1165_v47, %v1043_v45  ;;  %v1234_v9 = vadd.f32 %v1233_v5, %v1203_v59  ;;  %v1055_v45 = vld [vmem:[%s10371_s26 + $0x90] sm:$0xff]  ;;  %v10543_v5 = vld [vmem:[%s10371_s26 + $0xb8] sm:$0xff] }
  0x8e   : > { %8962 = vmatprep.subr.bf16.mxu1 %v13983_v0 }
  0x8f   : > { %v1167_v63 = vadd.f32 %v1166_v57, %v1044_v51  ;;  %v1235_v19 = vadd.f32 %v1234_v9, %v1204_v4  ;;  %v1213_v51 = vmul.f32 %v1052_v33, %v1052_v33  ;;  %v10547_v9 = vld [vmem:[%s10371_s26 + $0xc0] sm:$0xff] }
  0x90   : > { %v9629_v48 = vpop.eup %9628 }
  0x91   : > { %v1073_v54 = vadd.f32 1.0, %v9629_v48  ;;  %8964 = vmatpush3.bf16.msra.mxu1 %v10475_v49  ;;  %v1168_v6 = vadd.f32 %v1167_v63, %v1045_v56  ;;  %v1236_v23 = vadd.f32 %v1235_v19, %v1205_v8  ;;  %v1216_v63 = vmul.f32 %v1055_v45, %v1055_v45 }
  0x92   : > { %8965 = vmatprep.subr.bf16.mxu1 %v13983_v0 }
  0x93   : > { %9630 = vrcp.f32 %v1073_v54  ;;  %v1169_v13 = vadd.f32 %v1168_v6, %v1046_v58  ;;  %v1237_v29 = vadd.f32 %v1236_v23, %v1206_v17  ;;  %v1057_v54 = vld [vmem:[%s10371_s26 + $0xa0] sm:$0xff]  ;;  %v10535_v58 = vld [vmem:[%s10371_s26 + $0xa8] sm:$0xff]  ;;  %v1217_v6 = vmul.f32 %v1056_v50, %v1056_v50 }
  0x94   : > { %v1218_v11 = vmul.f32 %v1057_v54, %v1057_v54  ;;  %v1219_v17 = vmul.f32 %v10535_v58, %v10535_v58 }
  0x95   : > { %8967 = vmatpush3.bf16.msra.mxu1 %v10494_v2  ;;  %v1170_v20 = vadd.f32 %v1169_v13, %v1047_v3  ;;  %v1238_v35 = vadd.f32 %v1237_v29, %v1207_v22  ;;  %v1220_v22 = vmul.f32 %v10538_v62, %v10538_v62 }
  0x96   : > { %8968 = vmatprep.subr.bf16.mxu1 %v13983_v0 }
  0x97   : > { %v1171_v24 = vadd.f32 %v1170_v20, %v1048_v7  ;;  %v1239_v40 = vadd.f32 %v1238_v35, %v1208_v27  ;;  %v1221_v27 = vmul.f32 %v10543_v5, %v10543_v5  ;;  %v10581_v35 = vld [vmem:[%s10371_s26 + $0xe8] sm:$0xff] }
  0x99   : > { %8970 = vmatpush3.bf16.msra.mxu1 %v10506_v15  ;;  %v1172_v31 = vadd.f32 %v1171_v24, %v1049_v16  ;;  %v1240_v43 = vadd.f32 %v1239_v40, %v1209_v34  ;;  %v10553_v16 = vld [vmem:[%s10371_s26 + $0xc8] sm:$0xff]  ;;  %v10587_v40 = vld [vmem:[%s10371_s26 + $0xf0] sm:$0xff] }
  0x9a   : > { %8971 = vmatprep.subr.bf16.mxu1 %v13983_v0 }
  0x9b   : > { %v1173_v36 = vadd.f32 %v1172_v31, %v1050_v21  ;;  %v1241_v47 = vadd.f32 %v1240_v43, %v1210_v39  ;;  %v10559_v21 = vld [vmem:[%s10371_s26 + $0xd0] sm:$0xff]  ;;  %v10573_v31 = vld [vmem:[%s10371_s26 + $0xe0] sm:$0xff]  ;;  %v10594_v43 = vld [vmem:[%s10371_s26 + $0xf8] sm:$0xff] }
  0x9d   : > { %v9631_v30 = vpop.eup %9630  ;;  %8973 = vmatpush3.bf16.msra.mxu1 %v10512_v25  ;;  %v1174_v41 = vadd.f32 %v1173_v36, %v1051_v26  ;;  %v1242_v52 = vadd.f32 %v1241_v47, %v1211_v42  ;;  %v10567_v26 = vld [vmem:[%s10371_s26 + $0xd8] sm:$0xff]  ;;  %v1223_v36 = vmul.f32 %v10553_v16, %v10553_v16  ;;  %v1226_v47 = vmul.f32 %v10573_v31, %v10573_v31 }
  0x9e   : > { %v1075_v32 = vmul.f32 %v9631_v30, %v10410_v10  ;;  %v1054_v10 = vld [vmem:[%s10371_s26 + $0x88] sm:$0xff]  ;;  %8998 = vmatprep.subr.bf16.mxu1 %v13983_v0 }
  0x9f   : > { %v1175_v44 = vadd.f32 %v1174_v41, %v1052_v33  ;;  %v1243_v56 = vadd.f32 %v1242_v52, %v1212_v46  ;;  %v1215_v59 = vmul.f32 %v1054_v10, %v1054_v10  ;;  %v1224_v41 = vmul.f32 %v10559_v21, %v10559_v21 }
  0xa0   : > { %8464 = vmatmul.mubr.msk.f32.vlgmr.msra.gmra.mrb[0].mxu0 %vm1085_vm1, %v1075_v32  ;;  %v1222_v32 = vmul.f32 %v10547_v9, %v10547_v9 }
  0xa1   : > { %8976 = vmatpush3.bf16.msra.mxu0 %v10422_v14  ;;  %8533 = vmatprep.mubr.msk.f32.mxu0 %vm14055_vm0, %v13981_v1  ;;  %v1176_v48 = vadd.f32 %v1175_v44, %v1053_v37  ;;  %v1244_v60 = vadd.f32 %v1243_v56, %v1213_v51  ;;  %v1225_v44 = vmul.f32 %v10567_v26, %v10567_v26 }
  0xa2   : > { %8977 = vmatprep.subr.bf16.mxu0 %v13983_v0  ;;  %v1227_v51 = vmul.f32 %v10581_v35, %v10581_v35 }
  0xa3   : > { %v1177_v53 = vadd.f32 %v1176_v48, %v1054_v10  ;;  %v1245_v3 = vadd.f32 %v1244_v60, %v1214_v55 }
  0xa5   : > { %8979 = vmatpush3.bf16.msra.mxu0 %v10429_v18  ;;  %v1178_v57 = vadd.f32 %v1177_v53, %v1055_v45  ;;  %v1246_v7 = vadd.f32 %v1245_v3, %v1215_v59 }
  0xa6   : > { %8980 = vmatprep.subr.bf16.mxu0 %v13983_v0 }
  0xa7   : > { %v1179_v61 = vadd.f32 %v1178_v57, %v1056_v50  ;;  %v1247_v12 = vadd.f32 %v1246_v7, %v1216_v63  ;;  %v1229_v57 = vmul.f32 %v10594_v43, %v10594_v43 }
  0xa9   : > { %8982 = vmatpush3.bf16.msra.mxu0 %v10449_v28  ;;  %v1180_v4 = vadd.f32 %v1179_v61, %v1057_v54  ;;  %v1248_v19 = vadd.f32 %v1247_v12, %v1217_v6  ;;  %v1228_v54 = vmul.f32 %v10587_v40, %v10587_v40 }
  0xaa   : > { %8983 = vmatprep.subr.bf16.mxu0 %v13983_v0 }
  0xab   : > { %v1181_v8 = vadd.f32 %v1180_v4, %v10535_v58  ;;  %v1249_v23 = vadd.f32 %v1248_v19, %v1218_v11 }
  0xad   : > { %8985 = vmatpush3.bf16.msra.mxu0 %v10462_v38  ;;  %v1182_v13 = vadd.f32 %v1181_v8, %v10538_v62  ;;  %v1250_v29 = vadd.f32 %v1249_v23, %v1219_v17 }
  0xae   : > { %8986 = vmatprep.subr.bf16.mxu0 %v13983_v0 }
  0xaf   : > { %v1183_v20 = vadd.f32 %v1182_v13, %v10543_v5  ;;  %v1251_v33 = vadd.f32 %v1250_v29, %v1220_v22  ;;  %v1034_v22 = vld [vmem:[%s13972_s13 + $0x8] sm:$0xff] }
  0xb1   : > { %8988 = vmatpush3.bf16.msra.mxu0 %v10475_v49  ;;  %v1184_v24 = vadd.f32 %v1183_v20, %v10547_v9  ;;  %v1252_v37 = vadd.f32 %v1251_v33, %v1221_v27  ;;  %v1033_v20 = vld [vmem:[%s13972_s13] sm:$0xff]  ;;  %v1036_v27 = vld [vmem:[%s13972_s13 + $0x18] sm:$0xff] }
  0xb2   : > { %8989 = vmatprep.subr.bf16.mxu0 %v13983_v0  ;;  %v10617_v23 = vpack.c.bf16 %v1034_v22, %v1033_v20 }
  0xb3   : > { %v1185_v30 = vadd.f32 %v1184_v24, %v10553_v16  ;;  %v1253_v10 = vadd.f32 %v1252_v37, %v1222_v32  ;;  %v1035_v24 = vld [vmem:[%s13972_s13 + $0x10] sm:$0xff] }
  0xb4   : > { %14271 = vst [vmem:[#allocation23_spill] sm:$0xff] %v10617_v23  ;;  %v10627_v29 = vpack.c.bf16 %v1036_v27, %v1035_v24 }
  0xb5   : > { %8991 = vmatpush3.bf16.msra.mxu0 %v10494_v2  ;;  %v1186_v34 = vadd.f32 %v1185_v30, %v10559_v21  ;;  %v1254_v45 = vadd.f32 %v1253_v10, %v1223_v36 }
  0xb6   : > { %8992 = vmatprep.subr.bf16.mxu0 %v13983_v0  ;;  %14272 = vst [vmem:[#allocation24_spill] sm:$0xff] %v10627_v29 }
  0xb7   : > { %v1187_v39 = vadd.f32 %v1186_v34, %v10567_v26  ;;  %v1255_v48 = vadd.f32 %v1254_v45, %v1224_v41 }
  0xb9   : > { %8994 = vmatpush3.bf16.msra.mxu0 %v10506_v15  ;;  %v1188_v42 = vadd.f32 %v1187_v39, %v10573_v31  ;;  %v1256_v52 = vadd.f32 %v1255_v48, %v1225_v44  ;;  %v9486_v48 = vld [vmem:[#allocation6 + $0x108] sm:$0xff]  }
  0xba   : > { %8995 = vmatprep.subr.bf16.mxu0 %v13983_v0 }
  0xbb   : > { %v1189_v46 = vadd.f32 %v1188_v42, %v10581_v35  ;;  %v1257_v55 = vadd.f32 %v1256_v52, %v1226_v47  ;;  %v9485_v47 = vld [vmem:[#allocation6 + $0xc0] sm:$0xff]   ;;  %v9489_v52 = vld [vmem:[#allocation6 + $0xd0] sm:$0xff]  }
  0xbd   : > { %8997 = vmatpush3.bf16.msra.mxu0 %v10512_v25  ;;  %v1190_v50 = vadd.f32 %v1189_v46, %v10587_v40  ;;  %v1258_v59 = vadd.f32 %v1257_v55, %v1227_v51  ;;  %v9484_v46 = vld [vmem:[#allocation6 + $0x100] sm:$0xff]   ;;  %v9488_v51 = vld [vmem:[#allocation6 + $0x110] sm:$0xff]  }
  0xbe   : > { %7587 = vmatprep.subr.bf16.mxu0 %v9484_v46  ;;  %v9492_v55 = vld [vmem:[#allocation6 + $0x120] sm:$0xff]  }
  0xbf   : > { %v1191_v53 = vadd.f32 %v1190_v50, %v10594_v43  ;;  %v1259_v61 = vadd.f32 %v1258_v59, %v1228_v54  ;;  %v9487_v50 = vld [vmem:[#allocation6 + $0xc8] sm:$0xff]   ;;  %v9491_v54 = vld [vmem:[#allocation6 + $0xd8] sm:$0xff]  }
  0xc0   : > { %v9495_v59 = vld [vmem:[#allocation6 + $0xe8] sm:$0xff]  }
  0xc1   : > { %v1192_v56 = vrot.slane %v1191_v53, 4  ;;  %v1260_v3 = vadd.f32 %v1259_v61, %v1229_v57  ;;  %v9494_v57 = vld [vmem:[#allocation6 + $0x128] sm:$0xff]   ;;  %v9497_v61 = vld [vmem:[#allocation6 + $0xf0] sm:$0xff]  }
  0xc3   : > { %v1193_v60 = vadd.f32 %v1192_v56, %v1191_v53  ;;  %v1261_v6 = vrot.slane %v1260_v3, 4  ;;  %v9490_v53 = vld [vmem:[#allocation6 + $0x118] sm:$0xff]   ;;  %v9493_v56 = vld [vmem:[#allocation6 + $0xe0] sm:$0xff]  }
  0xc5   : > { %v1194_v63 = vrot.slane %v1193_v60, 2  ;;  %v1262_v8 = vadd.f32 %v1261_v6, %v1260_v3  ;;  %v9499_v3 = vld [vmem:[#allocation6 + $0xf8] sm:$0xff]  }
  0xc7   : > { %v1195_v4 = vadd.f32 %v1194_v63, %v1193_v60  ;;  %v1263_v12 = vrot.slane %v1262_v8, 2  ;;  %v9496_v60 = vld [vmem:[#allocation6 + $0x130] sm:$0xff]   ;;  %v9498_v63 = vld [vmem:[#allocation6 + $0x138] sm:$0xff]  }
  0xc9   : > { %v1196_v7 = vrot.slane %v1195_v4, 1  ;;  %v1264_v13 = vadd.f32 %v1263_v12, %v1262_v8  ;;  %v9514_v8 = vld [vmem:[#allocation6 + $0x1c0] sm:$0xff]  }
  0xcb   : > { %v1197_v11 = vadd.f32 %v1196_v7, %v1195_v4  ;;  %v1265_v17 = vrot.slane %v1264_v13, 1  ;;  %v10640_v4 = vld [vmem:[#allocation6 + $0x140] sm:$0xff]  }
  0xcd   : > { %8499 = vmatmul.mubr.f32.vlgmr.msra.gmra.mrb[0].mxu1 %v1197_v11  ;;  %v1266_v19 = vadd.f32 %v1265_v17, %v1264_v13  ;;  %v530_v11 = vlaneseq  ;;  %v1159_v13 = vld [vmem:[%s13963_s4] sm:$0x1] }
  0xce   : > { %8544 = vmatprep.mubr.msk.f32.mxu1 %vm14055_vm0, %v13981_v1  ;;  %9000 = vmatpush3.bf16.msra.mxu1 %v10617_v23 }
  0xcf   : > { %8534 = vmatmul.mubr.f32.vlgmr.msra.gmra.mrb[2].mxu0 %v1266_v19  ;;  %9001 = vmatprep.subr.bf16.mxu1 %v13983_v0  ;;  %v10643_v12 = vshrl.u32 %v530_v11, 7 }
  0xd0   : > { %7588 = vmatpush3.bf16.msra.mxu0 %v9485_v47 }
  0xd1   : > { %7589 = vmatprep.subr.bf16.mxu0 %v9486_v48  ;;  %14274 = vst [vmem:[#allocation26_spill] sm:$0xff] %v10643_v12  ;;  %v10649_v17 = vadd.s32 176, %v10643_v12  ;;  %v10652_v19 = vadd.s32 16, %v10643_v12  ;;  %v10655_v20 = vadd.s32 192, %v10643_v12  ;;  %v10658_v22 = vadd.s32 32, %v10643_v12 }
  0xd2   : > { %9003 = vmatpush3.bf16.msra.mxu1 %v10627_v29  ;;  %v10661_v24 = vadd.s32 208, %v10643_v12  ;;  %vm14079_vm3 = vcmp.lt.s32.totalorder %v10643_v12, 1  ;;  %v14279_v2 = vand.u32 15, %v10643_v12 }
  0xd3   : > { %9004 = vmatprep.subr.bf16.mxu1 %v13983_v0 }
  0xd4   : > { %7590 = vmatpush3.bf16.msra.mxu0 %v9487_v50  ;;  %vm10851_vm4 = vcmp.gt.s32.totalorder %v14279_v2, 0 }
  0xd5   : > { %7591 = vmatprep.subr.bf16.mxu0 %v9488_v51  ;;  %vm10933_vm8 = vmpackc.low %vm14057_vm7, %vm10851_vm4 }
  0xd8   : > { %7592 = vmatpush3.bf16.msra.mxu0 %v9489_v52 }
  0xd9   : > { %7593 = vmatprep.subr.bf16.mxu0 %v9490_v53 }
  0xdc   : > { %7594 = vmatpush3.bf16.msra.mxu0 %v9491_v54 }
  0xdd   : > { %7595 = vmatprep.subr.bf16.mxu0 %v9492_v55 }
  0xe0   : > { %7596 = vmatpush3.bf16.msra.mxu0 %v9493_v56 }
  0xe1   : > { %7597 = vmatprep.subr.bf16.mxu0 %v9494_v57 }
  0xe4   : > { %7598 = vmatpush3.bf16.msra.mxu0 %v9495_v59 }
  0xe5   : > { %7599 = vmatprep.subr.bf16.mxu0 %v9496_v60 }
  0xe8   : > { %7600 = vmatpush3.bf16.msra.mxu0 %v9497_v61 }
  0xe9   : > { %7601 = vmatprep.subr.bf16.mxu0 %v9498_v63 }
  0xec   : > { %7602 = vmatpush3.bf16.msra.mxu0 %v9499_v3 }
  0xed   : > { %7859 = vmatprep.subr.bf16.mxu0 %v9514_v8 }
 0x173   : > { %v10631_v30 = vpop.f32.mrb[0].mxu0 }
 0x174   : > { %14273 = vst [vmem:[#allocation25_spill] sm:$0xff] %v10631_v30  ;;  %v8465_v32 = vpop.f32.mrb[1].mxu0 }
 0x175   : > { %v10664_v32 = vadd.s32 48, %v10643_v12 }
 0x1a0   : > { %v1333_v33 = vpop.f32.mrb[0].mxu1 }
 0x1a1   : > { %v1337_v34 = vmul.f32 0.00390625, %v1333_v33  ;;  %v8500_v36 = vpop.f32.mrb[1].mxu1  ;;  %v10667_v33 = vadd.s32 224, %v10643_v12 }
 0x1a2   : > { %v1404_v39 = vpop.f32.mrb[2].mxu0  ;;  %v10673_v36 = vadd.s32 240, %v10643_v12 }
 0x1a3   : > { %8545 = vmatmul.mubr.msk.f32.vlgmr.msra.gmra.mrb[2].mxu1 %vm14054_vm2, %v1337_v34  ;;  %v1409_v37 = vmul.f32 %v1337_v34, %v1337_v34  ;;  %v1408_v41 = vmul.f32 0.00390625, %v1404_v39  ;;  %v8535_v10 = vpop.f32.mrb[3].mxu0  ;;  %v10670_v34 = vadd.s32 64, %v10643_v12 }
 0x1a4   : > { %9006 = vmatpush3.bf16.msra.mxu1 %v10617_v23  ;;  %8555 = vmatprep.mubr.msk.f32.mxu1 %vm14055_vm0, %v13981_v1  ;;  %v1160_v10 = vld [vmem:[%s13964_s5] sm:$0x1] }
 0x1a5   : > { %9007 = vmatprep.subr.bf16.mxu1 %v13983_v0  ;;  %v1410_v42 = vsub.f32 %v1408_v41, %v1409_v37  ;;  %v10676_v37 = vsub.s32 0, %v10643_v12  ;;  %v9897_v0 = vld [vmem:[%s10371_s26 + $0x28] sm:$0xff] }
 0x1a7   : > { %v1411_v44 = vadd.f32 1e-05, %v1410_v42  ;;  %14275 = vst [vmem:[#allocation27_spill] sm:$0xff] %v10676_v37  ;;  %v9899_v42 = vld [vmem:[%s10371_s26 + $0x38] sm:$0xff] }
 0x1a8   : > { %9009 = vmatpush3.bf16.msra.mxu1 %v10627_v29 }
 0x1a9   : > { %9632 = vrsqrt.f32 %v1411_v44  ;;  %9070 = vmatprep.subr.bf16.mxu1 %v9484_v46 }
 0x1b3   : > { %v9633_v45 = vpop.eup %9632 }
 0x1b4   : > { %8556 = vmatmul.mubr.msk.f32.vlgmr.msra.gmra.mrb[4].mxu1 %vm14054_vm2, %v9633_v45 }
 0x1b5   : > { %9078 = vmatpush3.bf16.msra.mxu1 %v9485_v47 }
 0x1b6   : > { %9071 = vmatprep.subr.bf16.mxu1 %v9486_v48 }
 0x1b9   : > { %9079 = vmatpush3.bf16.msra.mxu1 %v9487_v50 }
 0x1ba   : > { %9072 = vmatprep.subr.bf16.mxu1 %v9488_v51 }
 0x1bd   : > { %9080 = vmatpush3.bf16.msra.mxu1 %v9489_v52 }
 0x1be   : > { %9073 = vmatprep.subr.bf16.mxu1 %v9490_v53 }
 0x1c1   : > { %9081 = vmatpush3.bf16.msra.mxu1 %v9491_v54 }
 0x1c2   : > { %9074 = vmatprep.subr.bf16.mxu1 %v9492_v55 }
 0x1c5   : > { %9082 = vmatpush3.bf16.msra.mxu1 %v9493_v56 }
 0x1c6   : > { %9075 = vmatprep.subr.bf16.mxu1 %v9494_v57  ;;  %v10695_v57 = vadd.s32 8, %v10643_v12 }
 0x1c9   : > { %9083 = vmatpush3.bf16.msra.mxu1 %v9495_v59  ;;  %v10698_v59 = vadd.s32 80, %v10643_v12 }
 0x1ca   : > { %9076 = vmatprep.subr.bf16.mxu1 %v9496_v60  ;;  %v10701_v60 = vadd.s32 24, %v10643_v12 }
 0x1cc   : > { %14276 = vst [vmem:[#allocation28_spill] sm:$0xff] %v10701_v60 }
 0x1cd   : > { %9084 = vmatpush3.bf16.msra.mxu1 %v9497_v61 }
 0x1ce   : > { %9077 = vmatprep.subr.bf16.mxu1 %v9498_v63  ;;  %v9892_v63 = vld [vmem:[%s10371_s26] sm:$0xff] }
 0x1d1   : > { %9085 = vmatpush3.bf16.msra.mxu1 %v9499_v3 }
 0x1d2   : > { %8558 = vmatprep.subr.bf16.mxu1 %v10640_v4 }
 0x276   : > { %v1483_v6 = vpop.f32.mrb[2].mxu1 }
 0x277   : > { %v8546_v7 = vpop.f32.mrb[3].mxu1 }
 0x287   : > { %v1556_v27 = vpop.f32.mrb[4].mxu1 }
 0x288   : > { %v1560_v39 = vmul.f32 %v1556_v27, %v1159_v13  ;;  %v8557_v41 = vpop.f32.mrb[5].mxu1 }
 0x289   : > { %v9895_v41 = vld [vmem:[%s10371_s26 + $0x18] sm:$0xff] }
 0x28a   : > { %v1561_v47 = vmul.f32 %v1560_v39, %v1483_v6  ;;  %v10686_v48 = vrot.slane %v1560_v39, %v10676_v37  ;;  %v9893_v6 = vld [vmem:[%s10371_s26 + $0x8] sm:$0xff]  ;;  %v9894_v39 = vld [vmem:[%s10371_s26 + $0x10] sm:$0xff] }
 0x28c   : > { %v1562_v56 = vsub.f32 %v1160_v10, %v1561_v47  ;;  %v1598_v61 = vmul.f32 %v10686_v48, %v10594_v43  ;;  %v1567_v3 = vmul.f32 %v9892_v63, %v10686_v48  ;;  %v1568_v7 = vmul.f32 %v9893_v6, %v10686_v48 }
 0x28d   : > { %v1589_v8 = vmul.f32 %v10686_v48, %v10538_v62  ;;  %v1590_v13 = vmul.f32 %v10686_v48, %v10543_v5  ;;  %v1588_v27 = vmul.f32 %v10686_v48, %v10535_v58  ;;  %v1569_v43 = vmul.f32 %v9894_v39, %v10686_v48 }
 0x28e   : > { %v10712_v11 = vrot.slane %v1562_v56, %v10676_v37  ;;  %v1570_v10 = vmul.f32 %v9895_v41, %v10686_v48  ;;  %v1591_v47 = vmul.f32 %v10686_v48, %v10547_v9  ;;  %v1592_v62 = vmul.f32 %v10686_v48, %v10553_v16  ;;  %v9896_v56 = vld [vmem:[%s10371_s26 + $0x20] sm:$0xff]  ;;  %v9901_v37 = vld [vmem:[%s10371_s26 + $0x48] sm:$0xff] }
 0x28f   : > { %v1571_v63 = vmul.f32 %v9896_v56, %v10686_v48  ;;  %v1593_v46 = vmul.f32 %v10686_v48, %v10559_v21  ;;  %v10782_v21 = vadd.s32 40, %v10643_v12 }
 0x290   : > { %v10729_v5 = vadd.f32 %v10712_v11, %v1598_v61  ;;  %v10732_v58 = vadd.f32 %v10712_v11, %v1567_v3  ;;  %v10735_v6 = vadd.f32 %v10712_v11, %v1568_v7  ;;  %v10738_v39 = vadd.f32 %v10712_v11, %v1589_v8 }
 0x291   : > { %v10741_v9 = vadd.f32 %v10712_v11, %v1590_v13  ;;  %v10744_v16 = vadd.f32 %v10712_v11, %v1588_v27  ;;  %v10747_v41 = vadd.f32 %v10712_v11, %v1569_v43  ;;  %v10750_v61 = vadd.f32 %v10712_v11, %v1570_v10  ;;  %14277 = vst [vmem:[#allocation29_spill] sm:$0xff] %v10782_v21 }
 0x292   : > { %v1668_v3 = vsub.f32 0.0, %v10729_v5  ;;  %v1637_v7 = vsub.f32 0.0, %v10732_v58  ;;  %v1638_v56 = vsub.f32 0.0, %v10735_v6  ;;  %v1659_v8 = vsub.f32 0.0, %v10738_v39 }
 0x293   : > { %v1660_v13 = vsub.f32 0.0, %v10741_v9  ;;  %v1658_v1 = vsub.f32 0.0, %v10744_v16  ;;  %v1639_v27 = vsub.f32 0.0, %v10747_v41  ;;  %v1572_v43 = vmul.f32 %v9897_v0, %v10686_v48 }
 0x294   : > { %v1731_v55 = vmul.f32 1.442695, %v1668_v3  ;;  %v1669_v10 = vmul.f32 1.442695, %v1637_v7  ;;  %v1671_v54 = vmul.f32 1.442695, %v1638_v56  ;;  %v10762_v53 = vadd.f32 %v10712_v11, %v1591_v47 }
 0x295   : > { %v1713_v52 = vmul.f32 1.442695, %v1659_v8  ;;  %v1640_v51 = vsub.f32 0.0, %v10750_v61  ;;  %v10766_v50 = vadd.f32 %v10712_v11, %v1592_v62  ;;  %v1715_v45 = vmul.f32 1.442695, %v1660_v13 }
 0x296   : > { %9634 = vpow2.f32 %v1731_v55  ;;  %v1711_v44 = vmul.f32 1.442695, %v1658_v1  ;;  %v1661_v0 = vsub.f32 0.0, %v10762_v53  ;;  %v10773_v47 = vadd.f32 %v10712_v11, %v1571_v63 }
 0x297   : > { %9636 = vpow2.f32 %v1669_v10  ;;  %v1662_v3 = vsub.f32 0.0, %v10766_v50  ;;  %v10776_v7 = vadd.f32 %v10712_v11, %v1572_v43  ;;  %v1673_v62 = vmul.f32 1.442695, %v1639_v27 }
 0x298   : > { %9638 = vpow2.f32 %v1671_v54  ;;  %v10779_v56 = vadd.f32 %v10712_v11, %v1593_v46  ;;  %v1675_v1 = vmul.f32 1.442695, %v1640_v51  ;;  %v1641_v55 = vsub.f32 0.0, %v10773_v47  ;;  %v9898_v54 = vld [vmem:[%s10371_s26 + $0x30] sm:$0xff] }
 0x299   : > { %9640 = vpow2.f32 %v1713_v52  ;;  %v1642_v8 = vsub.f32 0.0, %v10776_v7  ;;  %v1717_v63 = vmul.f32 1.442695, %v1661_v0  ;;  %v1719_v46 = vmul.f32 1.442695, %v1662_v3 }
 0x29a   : > { %9642 = vpow2.f32 %v1715_v45  ;;  %v1663_v13 = vsub.f32 0.0, %v10779_v56  ;;  %v1594_v27 = vmul.f32 %v10686_v48, %v10567_v26  ;;  %v10791_v52 = vadd.s32 96, %v10643_v12 }
 0x29b   : > { %9644 = vpow2.f32 %v1711_v44  ;;  %v1677_v51 = vmul.f32 1.442695, %v1641_v55  ;;  %v1679_v10 = vmul.f32 1.442695, %v1642_v8  ;;  %v1573_v26 = vmul.f32 %v9898_v54, %v10686_v48 }
 0x29c   : > { %14278 = vst [vmem:[#allocation30_spill] sm:$0xff] %v10791_v52  ;;  %9646 = vpow2.f32 %v1673_v62  ;;  %v10796_v0 = vadd.f32 %v10712_v11, %v1594_v27  ;;  %v1721_v3 = vmul.f32 1.442695, %v1663_v13  ;;  %v1574_v62 = vmul.f32 %v9899_v42, %v10686_v48 }
 0x29d   : > { %9648 = vpow2.f32 %v1675_v1  ;;  %v10805_v45 = vadd.s32 56, %v10643_v12  ;;  %v10808_v1 = vadd.s32 72, %v10643_v12  ;;  %v10817_v42 = vadd.s32 112, %v10643_v12 }
 0x29e   : > { %9650 = vpow2.f32 %v1717_v63  ;;  %v10811_v63 = vadd.f32 %v10712_v11, %v1573_v26  ;;  %v10814_v13 = vadd.f32 %v10712_v11, %v1574_v62  ;;  %v1595_v27 = vmul.f32 %v10686_v48, %v10573_v31  ;;  %v9900_v62 = vld [vmem:[%s10371_s26 + $0x40] sm:$0xff] }
 0x29f   : > { %9652 = vpow2.f32 %v1719_v46  ;;  %v1596_v55 = vmul.f32 %v10686_v48, %v10581_v35  ;;  %v1664_v26 = vsub.f32 0.0, %v10796_v0  ;;  %v1575_v43 = vmul.f32 %v9900_v62, %v10686_v48 }
 0x2a0   : > { %v9635_v8 = vpop.eup %9634  ;;  %9654 = vpow2.f32 %v1677_v51 }
 0x2a1   : > { %v9637_v54 = vpop.eup %9636  ;;  %v1764_v46 = vadd.f32 1.0, %v9635_v8  ;;  %9656 = vpow2.f32 %v1679_v10  ;;  %v10827_v10 = vadd.f32 %v10712_v11, %v1595_v27  ;;  %v10830_v31 = vadd.f32 %v10712_v11, %v1596_v55 }
 0x2a2   : > { %v9639_v51 = vpop.eup %9638  ;;  %v1733_v44 = vadd.f32 1.0, %v9637_v54  ;;  %9658 = vpow2.f32 %v1721_v3  ;;  %v1576_v54 = vmul.f32 %v9901_v37, %v10686_v48  ;;  %v10835_v3 = vadd.f32 %v10712_v11, %v1575_v43 }
 0x2a3   : > { %v9641_v29 = vpop.eup %9640  ;;  %9660 = vrcp.f32 %v1764_v46  ;;  %v1734_v23 = vadd.f32 1.0, %v9639_v51  ;;  %v1643_v46 = vsub.f32 0.0, %v10811_v63  ;;  %v1644_v27 = vsub.f32 0.0, %v10814_v13 }
 0x2a4   : > { %v9643_v8 = vpop.eup %9642  ;;  %9662 = vrcp.f32 %v1733_v44  ;;  %v1755_v35 = vadd.f32 1.0, %v9641_v29  ;;  %v10840_v25 = vadd.f32 %v10712_v11, %v1576_v54  ;;  %v10843_v29 = vadd.s32 88, %v10643_v12 }
 0x2a5   : > { %v9645_v30 = vpop.eup %9644  ;;  %9664 = vrcp.f32 %v1734_v23  ;;  %v1756_v62 = vadd.f32 1.0, %v9643_v8  ;;  %v1665_v44 = vsub.f32 0.0, %v10827_v10  ;;  %v1666_v23 = vsub.f32 0.0, %v10830_v31 }
 0x2a6   : > { %v9647_v51 = vpop.eup %9646  ;;  %9666 = vrcp.f32 %v1755_v35  ;;  %v1754_v55 = vadd.f32 1.0, %v9645_v30  ;;  %v1723_v35 = vmul.f32 1.442695, %v1664_v26  ;;  %v1645_v30 = vsub.f32 0.0, %v10835_v3 }
 0x2a7   : > { %v9649_v37 = vpop.eup %9648  ;;  %9668 = vrcp.f32 %v1756_v62  ;;  %v1735_v43 = vadd.f32 1.0, %v9647_v51  ;;  %v1681_v51 = vmul.f32 1.442695, %v1643_v46  ;;  %v1683_v38 = vmul.f32 1.442695, %v1644_v27 }
 0x2a8   : > { %v9651_v8 = vpop.eup %9650  ;;  %9670 = vrcp.f32 %v1754_v55  ;;  %v1736_v15 = vadd.f32 1.0, %v9649_v37  ;;  %v1646_v55 = vsub.f32 0.0, %v10840_v25  ;;  %v1597_v26 = vmul.f32 %v10686_v48, %v10587_v40 }
 0x2a9   : > { %v9653_v54 = vpop.eup %9652  ;;  %9672 = vrcp.f32 %v1735_v43  ;;  %v1757_v62 = vadd.f32 1.0, %v9651_v8  ;;  %v1725_v14 = vmul.f32 1.442695, %v1665_v44  ;;  %v1727_v52 = vmul.f32 1.442695, %v1666_v23  ;;  %v9903_v23 = vld [vmem:[%s10371_s26 + $0x58] sm:$0xff] }
 0x2aa   : > { %v9655_v28 = vpop.eup %9654  ;;  %9674 = vrcp.f32 %v1736_v15  ;;  %v1758_v18 = vadd.f32 1.0, %v9653_v54  ;;  %v14282_v43 = vand.u32 15, %v10649_v17  ;;  %v1685_v27 = vmul.f32 1.442695, %v1645_v30  ;;  %v9904_v30 = vld [vmem:[%s10371_s26 + $0x60] sm:$0xff] }
 0x2ab   : > { %v9657_v37 = vpop.eup %9656  ;;  %9676 = vrcp.f32 %v1757_v62  ;;  %v1737_v2 = vadd.f32 1.0, %v9655_v28  ;;  %v10865_v8 = vadd.f32 %v10712_v11, %v1597_v26  ;;  %v9902_v28 = vld [vmem:[%s10371_s26 + $0x50] sm:$0xff]  ;;  %v1578_v17 = vmul.f32 %v9903_v23, %v10686_v48 }
 0x2ac   : > { %v9659_v21 = vpop.eup %9658  ;;  %vm10860_vm5 = vcmp.gt.s32.totalorder %v14282_v43, 0  ;;  %9678 = vrcp.f32 %v1758_v18  ;;  %v1738_v15 = vadd.f32 1.0, %v9657_v37  ;;  %v1577_v44 = vmul.f32 %v9902_v28, %v10686_v48 }
 0x2ad   : > { %v9661_v40 = vpop.eup %9660  ;;  %9680 = vrcp.f32 %v1737_v2  ;;  %v1759_v54 = vadd.f32 1.0, %v9659_v21  ;;  %v10874_v18 = vmul.f32 1.442695, %v1646_v55  ;;  %v1579_v26 = vmul.f32 %v9904_v30, %v10686_v48  ;;  %vm10969_vm10 = vmpackc.low %vm14057_vm7, %vm10860_vm5 }
 0x2ae   : > { %v9663_v62 = vpop.eup %9662  ;;  %v10872_v43 = vmul.f32 %v9661_v40, %v10729_v5  ;;  %9682 = vrcp.f32 %v1738_v15  ;;  %v10882_v2 = vadd.f32 %v10712_v11, %v1577_v44  ;;  %v10885_v28 = vadd.f32 %v10712_v11, %v1578_v17  ;;  %v9515_v40 = vld [vmem:[#allocation6 + $0x180] sm:$0xff]  }
 0x2af   : > { %v9665_v37 = vpop.eup %9664  ;;  %v10879_v21 = vmul.f32 %v9663_v62, %v10732_v58  ;;  %9684 = vpow2.f32 %v1723_v35  ;;  %v14286_v44 = vand.u32 15, %v10652_v19 }
 0x2b0   : > { %v9667_v5 = vpop.eup %9666  ;;  %v10888_v15 = vmul.f32 %v9665_v37, %v10735_v6  ;;  %v14009_v55 = vrot.slane %v10872_v43, 7  ;;  %9686 = vrcp.f32 %v1759_v54  ;;  %v9905_v6 = vld [vmem:[%s10371_s26 + $0x68] sm:$0xff] }
 0x2b1   : > { %v9669_v23 = vpop.eup %9668  ;;  %v1847_v58 = vrot.slane %v10879_v21, 7  ;;  %v10894_v35 = vmul.f32 %v9667_v5, %v10738_v39  ;;  %vm10898_vm6 = vcmp.gt.s32.totalorder %v14286_v44, 0  ;;  %9688 = vpow2.f32 %v1681_v51 }
 0x2b2   : > { %v10904_v62 = vmul.f32 %v9905_v6, %v10686_v48  ;;  %v9671_v54 = vpop.eup %9670  ;;  %v10908_v30 = vpack.c.bf16 %v10888_v15, %v10879_v21  ;;  %v1848_v37 = vrot.slane %v10888_v15, 7  ;;  %v10912_v39 = vmul.f32 %v9669_v23, %v10741_v9  ;;  %vm11029_vm12 = vmpackc.low %vm14057_vm7, %vm10898_vm6 }
 0x2b3   : > { %14285 = vst [vmem:[#allocation31_spill] sm:$0xff] %v10894_v35  ;;  %9690 = vpow2.f32 %v1683_v38  ;;  %v9673_v19 = vpop.eup %9672  ;;  %v1869_v5 = vrot.slane %v10894_v35, 7  ;;  %v1911_v51 = vsel %vm14079_vm3, %v14009_v55, %v1847_v58  ;;  %v10920_v44 = vmul.f32 %v9671_v54, %v10744_v16 }
 0x2b4   : > { %14289 = vst [vmem:[#allocation32_spill] sm:$0xff] %v10908_v30  ;;  %14290 = vst [vmem:[#allocation33_spill] sm:$0xff] %v10912_v39  ;;  %9692 = vpow2.f32 %v1725_v14  ;;  %v9675_v6 = vpop.eup %9674  ;;  %2621 = vmatprep.mubr.bf16.mxu0 %v10908_v30  ;;  %v10925_v9 = vpack.c.bf16 %v10912_v39, %v10894_v35  ;;  %v1870_v38 = vrot.slane %v10912_v39, 7  ;;  %v1910_v23 = vsel %vm14079_vm3, %v1847_v58, %v1848_v37  ;;  %v9516_v35 = vld [vmem:[#allocation6 + $0x1c8] sm:$0xff]  }
 0x2b5   : > { %14291 = vst [vmem:[#allocation34_spill] sm:$0xff] %v10920_v44  ;;  %v14293_v16 = vmov 0  ;;  %v10938_v14 = vmul.f32 %v9673_v19, %v10747_v41  ;;  %v14296_v54 = vand.u32 15, %v10655_v20  ;;  %v9677_v30 = vpop.eup %9676  ;;  %v10946_v58 = vpack.c.bf16 %v1910_v23, %v1911_v51 }
 0x2b6   : > { %14292 = vst [vmem:[#allocation35_spill] sm:$0xff] %v10925_v9  ;;  %v14294_v16 = vsel %vm10933_vm8, 4294967295, %v14293_v16  ;;  %v14015_v49 = vrot.slane %v10920_v44, 7  ;;  %v10950_v39 = vmul.f32 %v9675_v6, %v10750_v61  ;;  %9694 = vpow2.f32 %v1727_v52  ;;  %v9679_v60 = vpop.eup %9678  ;;  %2709 = vmatprep.mubr.bf16.mxu1 %v10925_v9  ;;  %v9517_v9 = vld [vmem:[#allocation6 + $0x188] sm:$0xff]  }
 0x2b7   : > { %14295 = vst [vmem:[#allocation36_spill] sm:$0xff] %v14294_v16  ;;  %vm10942_vm9 = vcmp.gt.s32.totalorder %v14296_v54, 0  ;;  %14299 = vst [vmem:[#allocation37_spill] sm:$0xff] %v10946_v58  ;;  %v1888_v20 = vsel %vm14079_vm3, %v1869_v5, %v1870_v38  ;;  %v10956_v41 = vmul.f32 %v9677_v30, %v10762_v53  ;;  %v1849_v19 = vrot.slane %v10938_v14, 7  ;;  %v9681_v51 = vpop.eup %9680  ;;  %6984 = vmatmul.mubr.msk.bf16.vlgmr.msra.gmra.mrb[4].mxu0 %vm10933_vm8, %v10946_v58 }
 0x2b8   : > { %9696 = vpow2.f32 %v1685_v27  ;;  %v1889_v61 = vsel %vm14079_vm3, %v14015_v49, %v1869_v5  ;;  %v14301_v52 = vmov 0  ;;  %v10975_v53 = vpack.c.bf16 %v10950_v39, %v10938_v14  ;;  %v9683_v6 = vpop.eup %9682  ;;  %v9501_v5 = vld [vmem:[#allocation6 + $0x148] sm:$0xff]   ;;  %7860 = vmatpush3.bf16.msra.mxu0 %v9515_v40  ;;  %vm11055_vm13 = vmpackc.low %vm14057_vm7, %vm10942_vm9 }
 0x2b9   : > { %14300 = vst [vmem:[#allocation38_spill] sm:$0xff] %v10956_v41  ;;  %v14302_v52 = vsel %vm10969_vm10, 4294967295, %v14301_v52  ;;  %v10978_v27 = vmul.f32 %v9679_v60, %v10766_v50  ;;  %v10981_v30 = vadd.f32 %v10712_v11, %v1579_v26  ;;  %v10983_v23 = vpack.c.bf16 %v1888_v20, %v1889_v61  ;;  %v9685_v16 = vpop.eup %9684  ;;  %7861 = vmatprep.subr.bf16.mxu0 %v9516_v35  ;;  %v9520_v61 = vld [vmem:[#allocation6 + $0x1d0] sm:$0xff]  }
 0x2ba   : > { %14303 = vst [vmem:[#allocation39_spill] sm:$0xff] %v14302_v52  ;;  %14304 = vst [vmem:[#allocation40_spill] sm:$0xff] %v10975_v53  ;;  %v1909_v54 = vsel %vm14079_vm3, %v1848_v37, %v1849_v19  ;;  %v1871_v49 = vrot.slane %v10956_v41, 7  ;;  %2629 = vmatprep.mubr.bf16.mxu0 %v10975_v53  ;;  %v10996_v26 = vmul.f32 %v9681_v51, %v10773_v47  ;;  %v14307_v37 = vand.u32 15, %v10658_v22  ;;  %v9687_v46 = vpop.eup %9686 }
 0x2bb   : > { %14305 = vst [vmem:[#allocation41_spill] sm:$0xff] %v10983_v23  ;;  %v10992_v50 = vpack.c.bf16 %v10978_v27, %v10956_v41  ;;  %v10999_v20 = vmul.f32 %v9683_v6, %v10776_v7  ;;  %7017 = vmatmul.mubr.msk.bf16.vlgmr.msra.gmra.mrb[8].mxu1 %vm10969_vm10, %v10983_v23  ;;  %v14310_v60 = vrot.slane %v10950_v39, 7  ;;  %v1760_v7 = vadd.f32 1.0, %v9685_v16  ;;  %v9689_v6 = vpop.eup %9688 }
 0x2bc   : > { %vm11003_vm11 = vcmp.gt.s32.totalorder %v14307_v37, 0  ;;  %9698 = vpow2.f32 %v10874_v18  ;;  %v14311_v22 = vsub.f32 0.0, %v10865_v8  ;;  %8559 = vmatpush3.bf16.msra.mxu1 %v10640_v4  ;;  %v1647_v35 = vsub.f32 0.0, %v10882_v2  ;;  %7862 = vmatpush3.bf16.msra.mxu0 %v9517_v9  ;;  %v9522_v9 = vld [vmem:[#allocation6 + $0x1d8] sm:$0xff]  }
 0x2bd   : > { %14306 = vst [vmem:[#allocation42_spill] sm:$0xff] %v10992_v50  ;;  %v1908_v47 = vsel %vm14079_vm3, %v1849_v19, %v14310_v60  ;;  %2717 = vmatprep.mubr.bf16.mxu1 %v10992_v50  ;;  %v1648_v37 = vsub.f32 0.0, %v10885_v28  ;;  %v11023_v52 = vadd.f32 %v10712_v11, %v10904_v62  ;;  %v1649_v16 = vsub.f32 0.0, %v10981_v30  ;;  %v9691_v18 = vpop.eup %9690  ;;  %8560 = vmatprep.subr.bf16.mxu1 %v9501_v5  ;;  %v9906_v62 = vld [vmem:[%s10371_s26 + $0x70] sm:$0xff]  ;;  %vm11096_vm15 = vmpackc.low %vm14057_vm7, %vm11003_vm11 }
 0x2be   : > { %v1729_v51 = vmul.f32 1.442695, %v14311_v22  ;;  %v14312_v19 = vmov 0  ;;  %v11033_v4 = vpack.c.bf16 %v1908_v47, %v1909_v54  ;;  %v1887_v60 = vsel %vm14079_vm3, %v1870_v38, %v1871_v49  ;;  %v9502_v22 = vld [vmem:[#allocation6 + $0x150] sm:$0xff]   ;;  %v9693_v23 = vpop.eup %9692  ;;  %7863 = vmatprep.subr.bf16.mxu0 %v9520_v61 }
 0x2bf   : > { %v14313_v19 = vsel %vm11029_vm12, 4294967295, %v14312_v19  ;;  %9700 = vrcp.f32 %v1760_v7  ;;  %v1581_v50 = vmul.f32 %v9906_v62, %v10686_v48  ;;  %v14315_v58 = vrot.slane %v10978_v27, 7  ;;  %v9521_v38 = vld [vmem:[#allocation6 + $0x190] sm:$0xff]  }
 0x2c0   : > { %14314 = vst [vmem:[#allocation43_spill] sm:$0xff] %v14313_v19  ;;  %v11045_v53 = vpack.c.bf16 %v10999_v20, %v10996_v26  ;;  %v1739_v54 = vadd.f32 1.0, %v9689_v6  ;;  %v1740_v47 = vadd.f32 1.0, %v9691_v18  ;;  %v1851_v7 = vrot.slane %v10996_v26, 7  ;;  %v9695_v41 = vpop.eup %9694  ;;  %8561 = vmatpush3.bf16.msra.mxu1 %v9501_v5  ;;  %6987 = vmatmul.mubr.msk.bf16.gmra.mrb[8].mxu0 %vm11029_vm12, %v11033_v4  ;;  %v9503_v6 = vld [vmem:[#allocation6 + $0x158] sm:$0xff]  }
 0x2c1   : > { %v1886_v17 = vsel %vm14079_vm3, %v1871_v49, %v14315_v58  ;;  %v1761_v62 = vadd.f32 1.0, %v9693_v23  ;;  %9702 = vpow2.f32 %v1729_v51  ;;  %v14317_v58 = vmov 0  ;;  %8562 = vmatprep.subr.bf16.mxu1 %v9502_v22  ;;  %7864 = vmatpush3.bf16.msra.mxu0 %v9521_v38 }
 0x2c2   : > { %14316 = vst [vmem:[#allocation44_spill] sm:$0xff] %v11045_v53  ;;  %v14318_v58 = vsel %vm11055_vm13, 4294967295, %v14317_v58  ;;  %9704 = vrcp.f32 %v1739_v54  ;;  %v1689_v49 = vmul.f32 1.442695, %v1647_v35  ;;  %v1650_v23 = vsub.f32 0.0, %v11023_v52  ;;  %v9697_v5 = vpop.eup %9696  ;;  %2637 = vmatprep.mubr.bf16.mxu0 %v11045_v53  ;;  %v9523_v53 = vld [vmem:[#allocation6 + $0x198] sm:$0xff]   ;;  %7865 = vmatprep.subr.bf16.mxu0 %v9522_v9 }
 0x2c3   : > { %14319 = vst [vmem:[#allocation45_spill] sm:$0xff] %v14318_v58  ;;  %v11061_v61 = vadd.f32 %v10712_v11, %v1581_v50  ;;  %v11063_v51 = vpack.c.bf16 %v1886_v17, %v1887_v60  ;;  %v11067_v55 = vmul.f32 %v9687_v46, %v10779_v56  ;;  %v14321_v18 = vand.u32 15, %v10661_v24  ;;  %v9907_v60 = vld [vmem:[%s10371_s26 + $0x78] sm:$0xff]  ;;  %v9532_v58 = vld [vmem:[#allocation6 + $0x1f0] sm:$0xff]  }
 0x2c4   : > { %9706 = vrcp.f32 %v1740_v47  ;;  %v1762_v35 = vadd.f32 1.0, %v9695_v41  ;;  %v1741_v50 = vadd.f32 1.0, %v9697_v5  ;;  %v1691_v44 = vmul.f32 1.442695, %v1648_v37  ;;  %v9526_v47 = vld [vmem:[#allocation6 + $0x1e0] sm:$0xff]   ;;  %8563 = vmatpush3.bf16.msra.mxu1 %v9502_v22 }
 0x2c5   : > { %14320 = vst [vmem:[#allocation46_spill] sm:$0xff] %v11063_v51  ;;  %vm11071_vm14 = vcmp.gt.s32.totalorder %v14321_v18, 0  ;;  %9708 = vrcp.f32 %v1761_v62  ;;  %v1582_v17 = vmul.f32 %v9907_v60, %v10686_v48  ;;  %7020 = vmatmul.mubr.msk.bf16.gmra.mrb[12].mxu1 %vm11055_vm13, %v11063_v51  ;;  %v14324_v24 = vrot.slane %v10999_v20, 7  ;;  %8564 = vmatprep.subr.bf16.mxu1 %v9503_v6  ;;  %v9504_v22 = vld [vmem:[#allocation6 + $0x160] sm:$0xff]  }
 0x2c6   : > { %v14325_v46 = vrot.slane %v10950_v39, 7  ;;  %9710 = vrcp.f32 %v1762_v35  ;;  %v1693_v37 = vmul.f32 1.442695, %v1649_v16  ;;  %v9699_v18 = vpop.eup %9698  ;;  %v1873_v16 = vrot.slane %v11067_v55, 7  ;;  %7866 = vmatpush3.bf16.msra.mxu0 %v9523_v53  ;;  %vm11154_vm5 = vmpackc.low %vm14057_vm7, %vm11071_vm14 }
 0x2c7   : > { %v1906_v56 = vsel %vm14079_vm3, %v1851_v7, %v14324_v24  ;;  %9712 = vrcp.f32 %v1741_v50  ;;  %v11090_v62 = vadd.f32 %v10712_v11, %v1582_v17  ;;  %v14329_v9 = vand.u32 15, %v10664_v32  ;;  %7867 = vmatprep.subr.bf16.mxu0 %v9526_v47  ;;  %v9505_v47 = vld [vmem:[#allocation6 + $0x168] sm:$0xff]  }
 0x2c8   : > { %v1907_v41 = vsel %vm14079_vm3, %v14325_v46, %v1851_v7  ;;  %v14326_v7 = vmov 0  ;;  %9714 = vpow2.f32 %v1689_v49  ;;  %v1695_v50 = vmul.f32 1.442695, %v1650_v23  ;;  %v9527_v46 = vld [vmem:[#allocation6 + $0x1a0] sm:$0xff]   ;;  %v9528_v49 = vld [vmem:[#allocation6 + $0x1e8] sm:$0xff]   ;;  %8565 = vmatpush3.bf16.msra.mxu1 %v9503_v6 }
 0x2c9   : > { %v14327_v7 = vsel %vm11096_vm15, 4294967295, %v14326_v7  ;;  %vm11103_vm1 = vcmp.gt.s32.totalorder %v14329_v9, 0  ;;  %v1651_v60 = vsub.f32 0.0, %v11061_v61  ;;  %v11108_v17 = vpack.c.bf16 %v1906_v56, %v1907_v41  ;;  %v9701_v5 = vpop.eup %9700  ;;  %8566 = vmatprep.subr.bf16.mxu1 %v9504_v22 }
 0x2ca   : > { %14328 = vst [vmem:[#allocation47_spill] sm:$0xff] %v14327_v7  ;;  %v1742_v40 = vadd.f32 1.0, %v9699_v18  ;;  %9716 = vpow2.f32 %v1691_v44  ;;  %v1652_v24 = vsub.f32 0.0, %v11090_v62  ;;  %v11114_v23 = vmul.f32 %v9701_v5, %v10796_v0  ;;  %v9908_v18 = vld [vmem:[%s10371_s26 + $0x80] sm:$0xff]  ;;  %7868 = vmatpush3.bf16.msra.mxu0 %v9527_v46  ;;  %vm11210_vm11 = vmpackc.low %vm14057_vm7, %vm11103_vm1 }
 0x2cb   : > { %14332 = vst [vmem:[#allocation48_spill] sm:$0xff] %v11108_v17  ;;  %9718 = vpow2.f32 %v1693_v37  ;;  %v1697_v38 = vmul.f32 1.442695, %v1651_v60  ;;  %6990 = vmatmul.mubr.msk.bf16.gmra.mrb[12].mxu0 %vm11096_vm15, %v11108_v17  ;;  %v11120_v53 = vadd.s32 104, %v10643_v12  ;;  %v9703_v56 = vpop.eup %9702  ;;  %v14333_v41 = vrot.slane %v10978_v27, 7  ;;  %7869 = vmatprep.subr.bf16.mxu0 %v9528_v49 }
 0x2cc   : > { %9720 = vrcp.f32 %v1742_v40  ;;  %v1699_v44 = vmul.f32 1.442695, %v1652_v24  ;;  %v14334_v0 = vand.u32 15, %v10667_v33  ;;  %v1583_v60 = vmul.f32 %v9908_v18, %v10686_v48  ;;  %v9705_v40 = vpop.eup %9704  ;;  %8567 = vmatpush3.bf16.msra.mxu1 %v9504_v22 }
 0x2cd   : > { %v1885_v37 = vsel %vm14079_vm3, %v14333_v41, %v1873_v16  ;;  %9722 = vpow2.f32 %v1695_v50  ;;  %v11137_v24 = vpack.c.bf16 %v11114_v23, %v11067_v55  ;;  %v1874_v41 = vrot.slane %v11114_v23, 7  ;;  %v9909_v50 = vld [vmem:[%s10371_s26 + $0x88] sm:$0xff]  ;;  %8568 = vmatprep.subr.bf16.mxu1 %v9505_v47 }
 0x2ce   : > { %vm11128_vm4 = vcmp.gt.s32.totalorder %v14334_v0, 0  ;;  %v1763_v33 = vadd.f32 1.0, %v9703_v56  ;;  %9724 = vpow2.f32 %v1697_v38  ;;  %v9529_v0 = vld [vmem:[#allocation6 + $0x1a8] sm:$0xff]   ;;  %v9707_v9 = vpop.eup %9706  ;;  %v11141_v32 = vmul.f32 %v9705_v40, %v10811_v63 }
 0x2cf   : > { %14337 = vst [vmem:[#allocation49_spill] sm:$0xff] %v11137_v24  ;;  %9726 = vpow2.f32 %v1699_v44  ;;  %v1584_v5 = vmul.f32 %v9909_v50, %v10686_v48  ;;  %v11146_v18 = vadd.f32 %v10712_v11, %v1583_v60  ;;  %v9709_v51 = vpop.eup %9708  ;;  %2725 = vmatprep.mubr.bf16.mxu1 %v11137_v24  ;;  %v1884_v38 = vsel %vm14079_vm3, %v1873_v16, %v1874_v41  ;;  %v9506_v60 = vld [vmem:[#allocation6 + $0x170] sm:$0xff]   ;;  %vm11249_vm2 = vmpackc.low %vm14057_vm7, %vm11128_vm4 }
 0x2d0   : > { %v14338_v63 = vmov 0  ;;  %v11159_v46 = vmul.f32 %v9707_v9, %v10814_v13  ;;  %9728 = vrcp.f32 %v1763_v33  ;;  %v9711_v44 = vpop.eup %9710  ;;  %v11162_v56 = vpack.c.bf16 %v1884_v38, %v1885_v37  ;;  %v9910_v33 = vld [vmem:[%s10371_s26 + $0x90] sm:$0xff]  ;;  %7870 = vmatpush3.bf16.msra.mxu0 %v9529_v0  ;;  %8569 = vmatpush3.bf16.msra.mxu1 %v9505_v47  ;;  %v14370_v13 = vld [vmem:[#allocation28_spill] sm:$0xff] }
 0x2d1   : > { %v14339_v63 = vsel %vm11154_vm5, 4294967295, %v14338_v63  ;;  %v11165_v16 = vmul.f32 %v9709_v51, %v10827_v10  ;;  %v1853_v54 = vrot.slane %v11141_v32, 7  ;;  %v14342_v40 = vand.u32 15, %v10670_v34  ;;  %v9713_v9 = vpop.eup %9712  ;;  %v9533_v50 = vld [vmem:[#allocation6 + $0x1b0] sm:$0xff]   ;;  %7871 = vmatprep.subr.bf16.mxu0 %v9532_v58  ;;  %8570 = vmatprep.subr.bf16.mxu1 %v9506_v60  ;;  %v9507_v58 = vld [vmem:[#allocation6 + $0x178] sm:$0xff]  }
 0x2d2   : > { %14340 = vst [vmem:[#allocation50_spill] sm:$0xff] %v14339_v63  ;;  %14341 = vst [vmem:[#allocation51_spill] sm:$0xff] %v11162_v56  ;;  %v11175_v22 = vadd.f32 %v10712_v11, %v1584_v5  ;;  %v11179_v37 = vpack.c.bf16 %v11159_v46, %v11141_v32  ;;  %v11182_v10 = vmul.f32 %v9711_v44, %v10830_v31  ;;  %v1854_v51 = vrot.slane %v11159_v46, 7  ;;  %v9715_v38 = vpop.eup %9714 }
 0x2d3   : > { %vm11170_vm6 = vcmp.gt.s32.totalorder %v14342_v40, 0  ;;  %v1585_v34 = vmul.f32 %v9910_v33, %v10686_v48  ;;  %vm14074_vm9 = vcmp.lt.s32.totalorder %v10643_v12, 7  ;;  %7023 = vmatmul.mubr.msk.bf16.gmra.mrb[16].mxu1 %vm11154_vm5, %v11162_v56  ;;  %v14346_v5 = vrot.slane %v10999_v20, 7  ;;  %v9534_v33 = vld [vmem:[#allocation6 + $0x1f8] sm:$0xff]  }
 0x2d4   : > { %14345 = vst [vmem:[#allocation52_spill] sm:$0xff] %v11179_v37  ;;  %v1875_v44 = vrot.slane %v11165_v16, 7  ;;  %v11197_v40 = vmul.f32 %v9713_v9, %v10835_v3  ;;  %v1653_v0 = vsub.f32 0.0, %v11146_v18  ;;  %v9717_v49 = vpop.eup %9716  ;;  %2645 = vmatprep.mubr.bf16.mxu0 %v11179_v37  ;;  %v11203_v63 = vpack.c.bf16 %v11182_v10, %v11165_v16  ;;  %7872 = vmatpush3.bf16.msra.mxu0 %v9533_v50  ;;  %vm11290_vm0 = vmpackc.low %vm14057_vm7, %vm11170_vm6 }
 0x2d5   : > { %v1905_v31 = vsel %vm14079_vm3, %v14346_v5, %v1853_v54  ;;  %v1904_v56 = vsel %vm14079_vm3, %v1853_v54, %v1854_v51  ;;  %v14348_v3 = vmov 0  ;;  %v1743_v9 = vadd.f32 1.0, %v9715_v38  ;;  %v9719_v5 = vpop.eup %9718  ;;  %7873 = vmatprep.subr.bf16.mxu0 %v9534_v33  ;;  %8571 = vmatpush3.bf16.msra.mxu1 %v9506_v60 }
 0x2d6   : > { %14347 = vst [vmem:[#allocation53_spill] sm:$0xff] %v11203_v63  ;;  %v14349_v3 = vsel %vm11210_vm11, 4294967295, %v14348_v3  ;;  %v11215_v24 = vpack.c.bf16 %v1904_v56, %v1905_v31  ;;  %v1883_v37 = vsel %vm14079_vm3, %v1874_v41, %v1875_v44  ;;  %v1855_v54 = vrot.slane %v11197_v40, 7  ;;  %v9721_v47 = vpop.eup %9720  ;;  %2733 = vmatprep.mubr.bf16.mxu1 %v11203_v63  ;;  %8572 = vmatprep.subr.bf16.mxu1 %v9507_v58 }
 0x2d7   : > { %14350 = vst [vmem:[#allocation54_spill] sm:$0xff] %v14349_v3  ;;  %v14351_v35 = vand.u32 15, %v10673_v36  ;;  %v1744_v17 = vadd.f32 1.0, %v9717_v49  ;;  %v14354_v56 = vrot.slane %v11182_v10, 7  ;;  %9730 = vrcp.f32 %v1743_v9  ;;  %v9723_v19 = vpop.eup %9722 }
 0x2d8   : > { %v14355_v38 = vand.u32 15, %v10695_v57  ;;  %v1745_v31 = vadd.f32 1.0, %v9719_v5  ;;  %v1654_v49 = vsub.f32 0.0, %v11175_v22  ;;  %6993 = vmatmul.mubr.msk.bf16.gmra.mrb[16].mxu0 %vm11210_vm11, %v11215_v24  ;;  %v11242_v63 = vmul.f32 %v9721_v47, %v10840_v25  ;;  %v9911_v57 = vld [vmem:[%s10371_s26 + $0x98] sm:$0xff]  ;;  %v9508_v47 = vld [vmem:[#allocation6 + $0x40] sm:$0xff]  }
 0x2d9   : > { %vm11222_vm14 = vcmp.gt.s32.totalorder %v14351_v35, 0  ;;  %v1882_v41 = vsel %vm14079_vm3, %v1875_v44, %v14354_v56  ;;  %v9535_v35 = vld [vmem:[#allocation6 + $0x1b8] sm:$0xff]   ;;  %9732 = vrcp.f32 %v1744_v17  ;;  %v1701_v44 = vmul.f32 1.442695, %v1653_v0  ;;  %v9725_v56 = vpop.eup %9724  ;;  %8573 = vmatpush3.bf16.msra.mxu1 %v9507_v58 }
 0x2da   : > { %vm11233_vm1 = vcmp.lt.s32.totalorder %v14355_v38, 15  ;;  %v1586_v9 = vmul.f32 %v9911_v57, %v10686_v48  ;;  %v14358_v50 = vmov 0  ;;  %v11253_v5 = vpack.c.bf16 %v1882_v41, %v1883_v37  ;;  %v9727_v17 = vpop.eup %9726  ;;  %7874 = vmatpush3.bf16.msra.mxu0 %v9535_v35  ;;  %7723 = vmatprep.subr.bf16.mxu1 %v9508_v47 }
 0x2db   : > { %v14359_v50 = vsel %vm11249_vm2, 4294967295, %v14358_v50  ;;  %v1746_v38 = vadd.f32 1.0, %v9723_v19  ;;  %9734 = vrcp.f32 %v1745_v31  ;;  %v11256_v25 = vadd.f32 %v10712_v11, %v1585_v34  ;;  %v9729_v41 = vpop.eup %9728 }
 0x2dc   : > { %14360 = vst [vmem:[#allocation55_spill] sm:$0xff] %v14359_v50  ;;  %14361 = vst [vmem:[#allocation56_spill] sm:$0xff] %v11253_v5  ;;  %v11260_v0 = vpack.c.bf16 %v11242_v63, %v11197_v40  ;;  %v14063_v6 = vrot.slane %v11242_v63, 7  ;;  %v1903_v33 = vsel %vm14079_vm3, %v1854_v51, %v1855_v54  ;;  %v1747_v37 = vadd.f32 1.0, %v9725_v56  ;;  %7026 = vmatmul.mubr.msk.bf16.gmra.mrb[20].mxu1 %vm11249_vm2, %v11253_v5 }
 0x2dd   : > { %9736 = vrcp.f32 %v1746_v38  ;;  %v1748_v19 = vadd.f32 1.0, %v9727_v17  ;;  %v1703_v60 = vmul.f32 1.442695, %v1654_v49  ;;  %v11266_v34 = vadd.f32 %v10712_v11, %v1586_v9 }
 0x2de   : > { %2653 = vmatprep.mubr.bf16.mxu0 %v11260_v0  ;;  %v11273_v31 = vmul.f32 %v9729_v41, %v10865_v8  ;;  %v1902_v51 = vsel %vm14079_vm3, %v1855_v54, %v14063_v6  ;;  %v14064_v49 = vrot.slane %v10879_v21, 1  ;;  %v14362_v57 = vand.u32 15, %v10698_v59 }
 0x2df   : > { %9738 = vrcp.f32 %v1747_v37  ;;  %v2027_v9 = vrot.slane %v10950_v39, 1  ;;  %v14365_v8 = vmov 0  ;;  %v11294_v56 = vpack.c.bf16 %v1902_v51, %v1903_v33 }
 0x2e0   : > { %vm11282_vm4 = vcmp.gt.s32.totalorder %v14362_v57, 0  ;;  %v14366_v8 = vsel %vm11290_vm0, 4294967295, %v14365_v8  ;;  %9740 = vrcp.f32 %v1748_v19  ;;  %v1655_v59 = vsub.f32 0.0, %v11256_v25  ;;  %v14376_v57 = vld [vmem:[#allocation29_spill] sm:$0xff] }
 0x2e1   : > { %14367 = vst [vmem:[#allocation57_spill] sm:$0xff] %v14366_v8  ;;  %v14368_v54 = vmov 0.0|0.0   ;;  %v11300_v38 = vpack.c.bf16 %v10872_v43, %v11273_v31  ;;  %v1877_v39 = vrot.slane %v11273_v31, 7  ;;  %v14371_v17 = vand.u32 15, %v14370_v13  ;;  %6996 = vmatmul.mubr.msk.bf16.gmra.mrb[20].mxu0 %vm11290_vm0, %v11294_v56 }
 0x2e2   : > { %9010 = vmatprep.subr.bf16.mxu0 %v14368_v54  ;;  %9742 = vpow2.f32 %v1701_v44  ;;  %v1656_v58 = vsub.f32 0.0, %v11266_v34  ;;  %v2028_v33 = vrot.slane %v10996_v26, 1  ;;  %v14374_v41 = vrot.slane %v10938_v14, 1 }
 0x2e3   : > { %14369 = vst [vmem:[#allocation58_spill] sm:$0xff] %v11300_v38  ;;  %vm11305_vm6 = vcmp.lt.s32.totalorder %v14371_v17, 15  ;;  %v14375_v19 = vrot.slane %v10888_v15, 1  ;;  %v14377_v47 = vand.u32 15, %v14376_v57  ;;  %9744 = vpow2.f32 %v1703_v60  ;;  %2741 = vmatprep.mubr.bf16.mxu1 %v11300_v38 }
 0x2e4   : > { %v1705_v17 = vmul.f32 1.442695, %v1655_v59  ;;  %v14380_v26 = vrot.slane %v10872_v43, 7  ;;  %v14382_v57 = vrot.slane %v10888_v15, 1  ;;  %v1707_v59 = vmul.f32 1.442695, %v1656_v58 }
 0x2e5   : > { %v2086_v51 = vsel %vm14074_vm9, %v14375_v19, %v14374_v41  ;;  %vm11319_vm7 = vcmp.lt.s32.totalorder %v14377_v47, 15  ;;  %v14381_v41 = vrot.slane %v11182_v10, 7  ;;  %v9731_v47 = vpop.eup %9730  ;;  %vm14383_vm2 = vmmov 1  }
 0x2e6   : > { %v1880_v44 = vsel %vm14079_vm3, %v1877_v39, %v14380_v26  ;;  %v2087_v60 = vsel %vm14074_vm9, %v14064_v49, %v14382_v57  ;;  %vm11344_vm5 = vmpackc.low %vm14383_vm2, %vm11222_vm14  ;;  %v14384_v26 = vmov 0  ;;  %v2029_v6 = vrot.slane %v10999_v20, 1 }
 0x2e7   : > { %v1881_v19 = vsel %vm14079_vm3, %v14381_v41, %v1877_v39  ;;  %v14385_v26 = vsel %vm11344_vm5, 4294967295, %v14384_v26  ;;  %v11351_v15 = vadd.s32 128, %v10643_v12  ;;  %9746 = vpow2.f32 %v1705_v17  ;;  %v9733_v41 = vpop.eup %9732  ;;  %vm11361_vm14 = vmpackc.low %vm11233_vm1, %vm14383_vm2 }
 0x2e8   : > { %14386 = vst [vmem:[#allocation28_spill] sm:$0xff] %v14385_v26  ;;  %v11353_v57 = vpack.c.bf16 %v1880_v44, %v1881_v19  ;;  %v11356_v58 = vmul.f32 %v9731_v47, %v10882_v2  ;;  %v14388_v7 = vmov 0  ;;  %v2030_v20 = vrot.slane %v11141_v32, 1  ;;  %v9735_v49 = vpop.eup %9734  ;;  %v9912_v2 = vld [vmem:[%s10371_s26 + $0xa0] sm:$0xff] }
 0x2e9   : > { %v14389_v7 = vsel %vm11361_vm14, 4294967295, %v14388_v7  ;;  %9748 = vpow2.f32 %v1707_v59  ;;  %v11367_v39 = vmul.f32 %v9733_v41, %v10885_v28  ;;  %v11369_v17 = vpack.c.bf16 %v2086_v51, %v2087_v60  ;;  %v14393_v59 = vld [vmem:[#allocation30_spill] sm:$0xff]  ;;  %v9737_v41 = vpop.eup %9736 }
 0x2ea   : > { %14387 = vst [vmem:[#allocation29_spill] sm:$0xff] %v11353_v57  ;;  %14390 = vst [vmem:[#allocation59_spill] sm:$0xff] %v14389_v7  ;;  %v11372_v44 = vadd.s32 120, %v10643_v12  ;;  %v1587_v19 = vmul.f32 %v9912_v2, %v10686_v48  ;;  %v2084_v36 = vsel %vm14074_vm9, %v2027_v9, %v2028_v33  ;;  %7029 = vmatmul.mubr.msk.bf16.gmra.mrb[24].mxu1 %vm11344_vm5, %v11353_v57  ;;  %v14392_v32 = vrot.slane %v10938_v14, 1 }
 0x2eb   : > { %14391 = vst [vmem:[#allocation60_spill] sm:$0xff] %v11369_v17  ;;  %v1857_v51 = vrot.slane %v11356_v58, 7  ;;  %v11387_v60 = vmul.f32 %v9735_v49, %v10981_v30  ;;  %v14394_v47 = vand.u32 15, %v14393_v59  ;;  %v11397_v2 = vpack.c.bf16 %v11367_v39, %v11356_v58  ;;  %8574 = vmatprep.mubr.msk.bf16.mxu1 %vm11361_vm14, %v11369_v17  ;;  %vm11430_vm5 = vmpackc.low %vm14383_vm2, %vm11282_vm4 }
 0x2ec   : > { %v2085_v28 = vsel %vm14074_vm9, %v14392_v32, %v2027_v9  ;;  %v1858_v14 = vrot.slane %v11367_v39, 7  ;;  %v2083_v30 = vsel %vm14074_vm9, %v2028_v33, %v2029_v6  ;;  %v11406_v49 = vadd.f32 %v10712_v11, %v1587_v19  ;;  %v9739_v9 = vpop.eup %9738  ;;  %vm11451_vm4 = vmpackc.low %vm11305_vm6, %vm14383_vm2 }
 0x2ed   : > { %vm11391_vm1 = vcmp.gt.s32.totalorder %v14394_v47, 0  ;;  %v14397_v32 = vrot.slane %v11242_v63, 7  ;;  %v11413_v47 = vmul.f32 %v9737_v41, %v11023_v52  ;;  %v2082_v7 = vsel %vm14074_vm9, %v2029_v6, %v2030_v20  ;;  %v9741_v33 = vpop.eup %9740  ;;  %2661 = vmatprep.mubr.bf16.mxu0 %v11397_v2  ;;  %vm11469_vm6 = vmpackc.low %vm11319_vm7, %vm14383_vm2 }
 0x2ee   : > { %v14398_v17 = vand.u32 15, %v10805_v45  ;;  %v2031_v11 = vrot.slane %v11159_v46, 1  ;;  %v1900_v19 = vsel %vm14079_vm3, %v1857_v51, %v1858_v14  ;;  %v14401_v52 = vmov 0 }
 0x2ef   : > { %v1901_v59 = vsel %vm14079_vm3, %v14397_v32, %v1857_v51  ;;  %v14402_v52 = vsel %vm11430_vm5, 4294967295, %v14401_v52  ;;  %v2032_v45 = vrot.slane %v11197_v40, 1  ;;  %v14404_v6 = vand.u32 15, %v10808_v1  ;;  %v9743_v51 = vpop.eup %9742 }
 0x2f0   : > { %vm11419_vm14 = vcmp.lt.s32.totalorder %v14398_v17, 15  ;;  %14403 = vst [vmem:[#allocation30_spill] sm:$0xff] %v14402_v52  ;;  %v2033_v46 = vrot.slane %v11242_v63, 1  ;;  %v11443_v32 = vpack.c.bf16 %v1900_v19, %v1901_v59  ;;  %v1859_v35 = vrot.slane %v11387_v60, 7  ;;  %v9745_v40 = vpop.eup %9744 }
 0x2f1   : > { %vm11437_vm9 = vcmp.lt.s32.totalorder %v14404_v6, 15  ;;  %v14407_v1 = vmov 0  ;;  %v11455_v63 = vpack.c.bf16 %v2084_v36, %v2085_v28  ;;  %v9509_v6 = vld [vmem:[#allocation6] sm:$0xff]   ;;  %v11459_v59 = vpack.c.bf16 %v11413_v47, %v11387_v60  ;;  %v9510_v28 = vld [vmem:[#allocation6 + $0x48] sm:$0xff]   ;;  %v9747_v50 = vpop.eup %9746 }
 0x2f2   : > { %v14408_v1 = vsel %vm11451_vm4, 4294967295, %v14407_v1  ;;  %v1657_v57 = vsub.f32 0.0, %v11406_v49  ;;  %6999 = vmatmul.mubr.msk.bf16.gmra.mrb[24].mxu0 %vm11430_vm5, %v11443_v32  ;;  %v14410_v37 = vmov 0  ;;  %v11473_v36 = vpack.c.bf16 %v2082_v7, %v2083_v30 }
 0x2f3   : > { %14409 = vst [vmem:[#allocation61_spill] sm:$0xff] %v14408_v1  ;;  %v14411_v37 = vsel %vm11469_vm6, 4294967295, %v14410_v37  ;;  %v11476_v38 = vmul.f32 %v9739_v9, %v11061_v61  ;;  %v1749_v19 = vadd.f32 1.0, %v9743_v51  ;;  %v1750_v41 = vadd.f32 1.0, %v9745_v40  ;;  %2669 = vmatprep.mubr.bf16.mxu0 %v11459_v59  ;;  %v9749_v30 = vpop.eup %9748  ;;  %8575 = vmatmul.mubr.msk.bf16.vlgmr.msra.gmra.mrb[28].mxu1 %vm11451_vm4, %v11455_v63 }
 0x2f4   : > { %14412 = vst [vmem:[#allocation62_spill] sm:$0xff] %v14411_v37  ;;  %vm14413_vm3 = vcmp.lt.s32.totalorder %v10643_v12, 7  ;;  %v14415_v52 = vrot.slane %v11356_v58, 1  ;;  %v14418_v9 = vrot.slane %v11413_v47, 7  ;;  %7724 = vmatpush3.bf16.msra.mxu1 %v9509_v6  ;;  %8578 = vmatprep.mubr.msk.bf16.mxu1 %vm11469_vm6, %v11473_v36  ;;  %v1751_v40 = vadd.f32 1.0, %v9747_v50 }
 0x2f5   : > { %v2080_v5 = vsel %vm14413_vm3, %v2031_v11, %v2032_v45  ;;  %vm14414_vm13 = vmmov %vm14413_vm3  ;;  %9750 = vrcp.f32 %v1749_v19  ;;  %7725 = vmatprep.subr.bf16.mxu1 %v9510_v28  ;;  %v11520_v6 = vadd.s32 136, %v10643_v12  ;;  %v14428_v50 = vmov 0 }
 0x2f6   : > { %v2081_v13 = vsel %vm14414_vm13, %v2030_v20, %v2031_v11  ;;  %vm14416_vm7 = vmmov %vm14413_vm3  ;;  %v11499_v11 = vmul.f32 %v9741_v33, %v11090_v62  ;;  %9752 = vrcp.f32 %v1750_v41  ;;  %v9512_v33 = vld [vmem:[#allocation6 + $0x50] sm:$0xff]   ;;  %v14431_v28 = vand.u32 15, %v11120_v53  ;;  %v14435_v41 = vld [vmem:[#allocation38_spill] sm:$0xff] }
 0x2f7   : > { %v2078_v7 = vsel %vm14416_vm7, %v2033_v46, %v14415_v52  ;;  %vm14417_vm10 = vmmov %vm14413_vm3  ;;  %vm14419_vm3 = vcmp.lt.s32.totalorder %v10643_v12, 1  ;;  %v14421_v52 = vand.u32 15, %v10817_v42  ;;  %v11510_v62 = vpack.c.bf16 %v2080_v5, %v2081_v13 }
 0x2f8   : > { %v2079_v61 = vsel %vm14417_vm10, %v2032_v45, %v2033_v46  ;;  %v1898_v51 = vsel %vm14419_vm3, %v1859_v35, %v14418_v9  ;;  %vm14420_vm13 = vmmov %vm14419_vm3  ;;  %v9511_v46 = vld [vmem:[#allocation6 + $0x8] sm:$0xff]   ;;  %v1752_v9 = vadd.f32 1.0, %v9749_v30  ;;  %v1861_v42 = vrot.slane %v11476_v38, 7  ;;  %v14434_v30 = vld [vmem:[#allocation33_spill] sm:$0xff] }
 0x2f9   : > { %v1899_v20 = vsel %vm14420_vm13, %v1858_v14, %v1859_v35  ;;  %vm11503_vm7 = vcmp.gt.s32.totalorder %v14421_v52, 0  ;;  %v1709_v14 = vmul.f32 1.442695, %v1657_v57  ;;  %v14424_v35 = vand.u32 15, %v10843_v29  ;;  %v14427_v52 = vld [vmem:[#allocation31_spill] sm:$0xff]  ;;  %vm11526_vm3 = vmpackc.low %vm14383_vm2, %vm11391_vm1  ;;  %7726 = vmatpush3.bf16.msra.mxu1 %v9511_v46  ;;  %v9518_v46 = vld [vmem:[#allocation6 + $0x58] sm:$0xff]  }
 0x2fa   : > { %v14429_v50 = vsel %vm11526_vm3, 4294967295, %v14428_v50  ;;  %v11530_v5 = vpack.c.bf16 %v1898_v51, %v1899_v20  ;;  %v11532_v57 = vpack.c.bf16 %v2078_v7, %v2079_v61  ;;  %v2035_v29 = vrot.slane %v11367_v39, 1  ;;  %vm11547_vm1 = vmpackc.low %vm11419_vm14, %vm14383_vm2  ;;  %v9513_v61 = vld [vmem:[#allocation6 + $0x10] sm:$0xff]   ;;  %7727 = vmatprep.subr.bf16.mxu1 %v9512_v33 }
 0x2fb   : > { %vm11515_vm10 = vcmp.lt.s32.totalorder %v14424_v35, 15  ;;  %14430 = vst [vmem:[#allocation31_spill] sm:$0xff] %v14429_v50  ;;  %vm11537_vm13 = vcmp.lt.s32.totalorder %v14431_v28, 15  ;;  %9754 = vrcp.f32 %v1751_v40  ;;  %v14096_v48 = vrot.slane %v11499_v11, 7  ;;  %vm11563_vm14 = vmpackc.low %vm11437_vm9, %vm14383_vm2  ;;  %8579 = vmatmul.mubr.msk.bf16.gmra.mrb[32].mxu1 %vm11547_vm1, %v11510_v62 }
 0x2fc   : > { %9756 = vrcp.f32 %v1752_v9  ;;  %v2047_v35 = vrot.slane %v14434_v30, 1  ;;  %v2048_v37 = vrot.slane %v14435_v41, 1  ;;  %v14436_v7 = vmov 0  ;;  %7002 = vmatmul.mubr.msk.bf16.gmra.mrb[28].mxu0 %vm11526_vm3, %v11530_v5  ;;  %8582 = vmatprep.mubr.msk.bf16.mxu1 %vm11563_vm14, %v11532_v57 }
 0x2fd   : > { %v14437_v7 = vsel %vm11547_vm1, 4294967295, %v14436_v7  ;;  %v11553_v53 = vpack.c.bf16 %v11499_v11, %v11476_v38  ;;  %v2036_v39 = vrot.slane %v11387_v60, 1  ;;  %9758 = vpow2.f32 %v1709_v14  ;;  %7728 = vmatpush3.bf16.msra.mxu1 %v9513_v61 }
 0x2fe   : > { %14438 = vst [vmem:[#allocation33_spill] sm:$0xff] %v14437_v7  ;;  %v2049_v51 = vrot.slane %v10978_v27, 1  ;;  %v14439_v26 = vmov 0  ;;  %v14442_v20 = vrot.slane %v11413_v47, 7  ;;  %vm14443_vm6 = vcmp.lt.s32.totalorder %v10643_v12, 1  ;;  %7729 = vmatprep.subr.bf16.mxu1 %v9518_v46 }
 0x2ff   : > { %v14440_v26 = vsel %vm11563_vm14, 4294967295, %v14439_v26  ;;  %vm14444_vm4 = vcmp.lt.s32.totalorder %v10643_v12, 7  ;;  %v14445_v40 = vrot.slane %v14427_v52, 1  ;;  %v2050_v17 = vrot.slane %v11067_v55, 1  ;;  %2677 = vmatprep.mubr.bf16.mxu0 %v11553_v53  ;;  %vm11644_vm14 = vmpackc.low %vm11515_vm10, %vm14383_vm2 }
 0x300   : > { %14441 = vst [vmem:[#allocation38_spill] sm:$0xff] %v14440_v26  ;;  %v1897_v60 = vsel %vm14443_vm6, %v14442_v20, %v1861_v42  ;;  %v2064_v27 = vsel %vm14444_vm4, %v2047_v35, %v2048_v37  ;;  %vm14446_vm3 = vmmov %vm14444_vm4  ;;  %v2037_v14 = vrot.slane %v11413_v47, 1  ;;  %v2051_v28 = vrot.slane %v11114_v23, 1  ;;  %v9519_v23 = vld [vmem:[#allocation6 + $0x18] sm:$0xff]  }
 0x301   : > { %v2065_v9 = vsel %vm14446_vm3, %v14445_v40, %v2047_v35  ;;  %vm14447_vm9 = vmmov %vm14446_vm3  ;;  %v2038_v30 = vrot.slane %v11476_v38, 1  ;;  %v2052_v35 = vrot.slane %v11165_v16, 1  ;;  %v9751_v40 = vpop.eup %9750  ;;  %7730 = vmatpush3.bf16.msra.mxu1 %v9519_v23 }
 0x302   : > { %v11580_v33 = vpack.c.bf16 %v2064_v27, %v2065_v9  ;;  %v2063_v41 = vsel %vm14447_vm9, %v2048_v37, %v2049_v51  ;;  %vm14448_vm4 = vmmov %vm14443_vm6  ;;  %v11600_v37 = vadd.s32 144, %v10643_v12  ;;  %v2053_v27 = vrot.slane %v11182_v10, 1  ;;  %v9524_v9 = vld [vmem:[#allocation6 + $0x60] sm:$0xff]  }
 0x303   : > { %v1896_v55 = vsel %vm14448_vm4, %v1861_v42, %v14096_v48  ;;  %vm14449_vm6 = vmmov %vm14446_vm3  ;;  %v2061_v42 = vsel %vm14446_vm3, %v2050_v17, %v2051_v28  ;;  %v9753_v48 = vpop.eup %9752  ;;  %v14454_v10 = vmov 0  ;;  %7731 = vmatprep.subr.bf16.mxu1 %v9524_v9 }
 0x304   : > { %v2062_v47 = vsel %vm14449_vm6, %v2049_v51, %v2050_v17  ;;  %vm14450_vm9 = vmmov %vm14446_vm3  ;;  %v14451_v51 = vrot.slane %v11356_v58, 1  ;;  %v11623_v17 = vpack.c.bf16 %v1896_v55, %v1897_v60  ;;  %v1798_v58 = vmul.f32 %v9751_v40, %v11146_v18 }
 0x305   : > { %v11602_v20 = vpack.c.bf16 %v2062_v47, %v2063_v41  ;;  %v2076_v16 = vsel %vm14450_vm9, %v2035_v29, %v2036_v39  ;;  %vm14452_vm4 = vmmov %vm14446_vm3  ;;  %v2054_v47 = vrot.slane %v11273_v31, 1  ;;  %v9755_v18 = vpop.eup %9754  ;;  %v14460_v55 = vmov 0 }
 0x306   : > { %v2077_v61 = vsel %vm14452_vm4, %v14451_v51, %v2035_v29  ;;  %vm14453_vm6 = vmmov %vm14446_vm3  ;;  %v2074_v31 = vsel %vm14452_vm4, %v2037_v14, %v2038_v30  ;;  %v14461_v55 = vsel %vm11644_vm14, 4294967295, %v14460_v55  ;;  %v11668_v23 = vmul.f32 %v9755_v18, %v11256_v25  ;;  %v9531_v18 = vld [vmem:[#allocation6 + $0x28] sm:$0xff]  }
 0x307   : > { %v2060_v41 = vsel %vm14453_vm6, %v2051_v28, %v2052_v35  ;;  %vm11619_vm3 = vmpackc.low %vm14383_vm2, %vm11503_vm7  ;;  %v11631_v28 = vmul.f32 %v9753_v48, %v11175_v22  ;;  %14462 = vst [vmem:[#allocation64_spill] sm:$0xff] %v14461_v55  ;;  %v11648_v22 = vpack.c.bf16 %v2076_v16, %v2077_v61  ;;  %v1863_v48 = vrot.slane %v1798_v58, 7 }
 0x308   : > { %v14455_v10 = vsel %vm11619_vm3, 4294967295, %v14454_v10  ;;  %v11626_v29 = vpack.c.bf16 %v2060_v41, %v2061_v42  ;;  %vm14457_vm9 = vmmov %vm14452_vm4  ;;  %v9525_v42 = vld [vmem:[#allocation6 + $0x20] sm:$0xff]   ;;  %7005 = vmatmul.mubr.msk.bf16.gmra.mrb[32].mxu0 %vm11619_vm3, %v11623_v17  ;;  %v2055_v16 = vrot.slane %v10872_v43, 1  ;;  %v2039_v41 = vrot.slane %v11499_v11, 1 }
 0x309   : > { %14456 = vst [vmem:[#allocation63_spill] sm:$0xff] %v14455_v10  ;;  %v2059_v46 = vsel %vm14457_vm9, %v2052_v35, %v2053_v27  ;;  %vm14458_vm7 = vmmov %vm14452_vm4  ;;  %v686_v35 = vand.u32 15, %v11520_v6  ;;  %v11657_v19 = vpack.c.bf16 %v11631_v28, %v1798_v58  ;;  %v1864_v6 = vrot.slane %v11631_v28, 7  ;;  %8583 = vmatmul.mubr.msk.bf16.gmra.mrb[36].mxu1 %vm11644_vm14, %v11648_v22 }
 0x30a   : > { %v2075_v45 = vsel %vm14458_vm7, %v2036_v39, %v2037_v14  ;;  %vm14459_vm6 = vmmov %vm14452_vm4  ;;  %v9757_v39 = vpop.eup %9756  ;;  %v14464_v14 = vmov 0  ;;  %v2041_v13 = vrot.slane %v11631_v28, 1  ;;  %v14467_v25 = vand.u32 15, %v11351_v15  ;;  %7732 = vmatpush3.bf16.msra.mxu1 %v9525_v42 }
 0x30b   : > { %v2058_v60 = vsel %vm14459_vm6, %v2053_v27, %v2054_v47  ;;  %vm11662_vm10 = vmpackc.low %vm11537_vm13, %vm14383_vm2  ;;  %v9530_v27 = vld [vmem:[#allocation6 + $0x68] sm:$0xff]   ;;  %v9759_v51 = vpop.eup %9758  ;;  %v11671_v61 = vpack.c.bf16 %v2074_v31, %v2075_v45  ;;  %2685 = vmatprep.mubr.bf16.mxu0 %v11657_v19  ;;  %vm14470_vm9 = vcmp.lt.s32.totalorder %v10643_v12, 1  ;;  %v14471_v28 = vrot.slane %v11499_v11, 7 }
 0x30c   : > { %v11651_v40 = vpack.c.bf16 %v2058_v60, %v2059_v46  ;;  %v14465_v14 = vsel %vm11662_vm10, 4294967295, %v14464_v14  ;;  %v2040_v46 = vrot.slane %v1798_v58, 1  ;;  %vm11681_vm13 = vcmp.gt.s32.totalorder %v14467_v25, 0  ;;  %vm14472_vm4 = vmmov %vm14470_vm9  ;;  %7733 = vmatprep.subr.bf16.mxu1 %v9530_v27 }
 0x30d   : > { %14466 = vst [vmem:[#allocation66_spill] sm:$0xff] %v14465_v14  ;;  %8586 = vmatprep.mubr.msk.bf16.mxu1 %vm11662_vm10, %v11671_v61  ;;  %v1894_v58 = vsel %vm14470_vm9, %v1863_v48, %v1864_v6  ;;  %v1895_v31 = vsel %vm14472_vm4, %v14471_v28, %v1863_v48  ;;  %v14473_v15 = vand.u32 15, %v11372_v44  ;;  %v11702_v60 = vmul.f32 %v9757_v39, %v11266_v34  ;;  %v9536_v48 = vld [vmem:[#allocation6 + $0x70] sm:$0xff]   ;;  %vm11714_vm4 = vmpackc.low %vm14383_vm2, %vm11681_vm13 }
 0x30e   : > { %14463 = vst [vmem:[#allocation65_spill] sm:$0xff] %v11651_v40  ;;  %vm11704_vm6 = vcmp.lt.s32.totalorder %v686_v35, 15  ;;  %v693_v11 = vand.u32 15, %v11600_v37  ;;  %v1753_v43 = vadd.f32 1.0, %v9759_v51  ;;  %vm14478_vm9 = vcmp.lt.s32.totalorder %v10643_v12, 7  ;;  %7734 = vmatpush3.bf16.msra.mxu1 %v9531_v18 }
 0x30f   : > { %vm11697_vm7 = vcmp.lt.s32.totalorder %v14473_v15, 15  ;;  %v2057_v44 = vsel %vm14478_vm9, %v2054_v47, %v2055_v16  ;;  %v14479_v34 = vmov 0  ;;  %vm14482_vm10 = vmmov %vm14478_vm9  ;;  %v14485_v47 = vrot.slane %v10879_v21, 1  ;;  %7735 = vmatprep.subr.bf16.mxu1 %v9536_v48  ;;  %v9539_v48 = vld [vmem:[#allocation6 + $0x38] sm:$0xff]  }
 0x310   : > { %v14480_v34 = vsel %vm11714_vm4, 4294967295, %v14479_v34  ;;  %v2072_v35 = vsel %vm14482_vm10, %v2039_v41, %v2040_v46  ;;  %vm14483_vm14 = vmmov %vm14478_vm9  ;;  %v11730_v27 = vpack.c.bf16 %v1894_v58, %v1895_v31  ;;  %v14487_v51 = vrot.slane %v11668_v23, 1  ;;  %v9538_v58 = vld [vmem:[#allocation6 + $0x78] sm:$0xff]  }
 0x311   : > { %14481 = vst [vmem:[#allocation67_spill] sm:$0xff] %v14480_v34  ;;  %v2073_v37 = vsel %vm14483_vm14, %v2038_v30, %v2039_v41  ;;  %vm14484_vm1 = vmmov %vm14478_vm9  ;;  %9760 = vrcp.f32 %v1753_v43  ;;  %v14490_v30 = vmov 0  ;;  %v11747_v21 = vpack.c.bf16 %v11702_v60, %v11668_v23 }
 0x312   : > { %v2071_v42 = vsel %vm14484_vm1, %v2040_v46, %v2041_v13  ;;  %vm14486_vm9 = vmmov %vm14484_vm1  ;;  %v1866_v41 = vrot.slane %v11702_v60, 7  ;;  %v9537_v46 = vld [vmem:[#allocation6 + $0x30] sm:$0xff]   ;;  %7008 = vmatmul.mubr.msk.bf16.gmra.mrb[36].mxu0 %vm11714_vm4, %v11730_v27  ;;  %v14493_v43 = vmov 0  ;;  %v550_v31 = vadd.s32 152, %v10643_v12 }
 0x313   : > { %v2088_v39 = vsel %vm14486_vm9, %v2055_v16, %v14485_v47  ;;  %vm14488_vm13 = vmmov %vm14484_vm1  ;;  %v1865_v16 = vrot.slane %v11668_v23, 7  ;;  %2693 = vmatprep.mubr.bf16.mxu0 %v11747_v21  ;;  %vm965_vm10 = vcmp.gt.s32.totalorder %v693_v11, 0  ;;  %v552_v15 = vadd.s32 168, %v10643_v12  ;;  %7736 = vmatpush3.bf16.msra.mxu1 %v9537_v46  ;;  %v14521_v46 = vld [vmem:[#allocation40_spill] sm:$0xff] }
 0x314   : > { %v2070_v9 = vsel %vm14488_vm13, %v2041_v13, %v14487_v51  ;;  %v11736_v38 = vpack.c.bf16 %v2088_v39, %v2057_v44  ;;  %vm11741_vm14 = vmpackc.low %vm11697_vm7, %vm14383_vm2  ;;  %v11754_v13 = vpack.c.bf16 %v2072_v35, %v2073_v37  ;;  %v551_v45 = vadd.s32 160, %v10643_v12  ;;  %7737 = vmatprep.subr.bf16.mxu1 %v9538_v58  ;;  %v11779_v44 = vld [vmem:[#allocation6 + $0x80] sm:$0xff]  }
 0x315   : > { %v14491_v30 = vsel %vm11741_vm14, 4294967295, %v14490_v30  ;;  %vm11759_vm1 = vmpackc.low %vm11704_vm6, %vm14383_vm2  ;;  %v11764_v28 = vpack.c.bf16 %v2070_v9, %v2071_v42  ;;  %vm14496_vm7 = vcmp.lt.s32.totalorder %v10643_v12, 1  ;;  %v14498_v11 = vmov 0 }
 0x316   : > { %14489 = vst [vmem:[#allocation68_spill] sm:$0xff] %v11736_v38  ;;  %14492 = vst [vmem:[#allocation69_spill] sm:$0xff] %v14491_v30  ;;  %v14494_v43 = vsel %vm11759_vm1, 4294967295, %v14493_v43  ;;  %8587 = vmatmul.mubr.msk.bf16.gmra.mrb[40].mxu1 %vm11741_vm14, %v11754_v13  ;;  %v1892_v18 = vsel %vm14496_vm7, %v1865_v16, %v1866_v41  ;;  %v700_v35 = vand.u32 15, %v550_v31  ;;  %v714_v42 = vand.u32 15, %v552_v15 }
 0x317   : > { %14495 = vst [vmem:[#allocation70_spill] sm:$0xff] %v14494_v43  ;;  %8590 = vmatprep.mubr.msk.bf16.mxu1 %vm11759_vm1, %v11764_v28  ;;  %vm14497_vm6 = vmmov %vm14496_vm7  ;;  %v707_v47 = vand.u32 15, %v551_v45  ;;  %v2043_v39 = vrot.slane %v11702_v60, 1  ;;  %7738 = vmatpush3.bf16.msra.mxu1 %v9539_v48  ;;  %v554_v60 = vadd.s32 184, %v10643_v12  ;;  %v556_v58 = vadd.s32 200, %v10643_v12 }
 0x318   : > { %v1893_v25 = vsel %vm14497_vm6, %v1864_v6, %v1865_v16  ;;  %vm11782_vm9 = vmpackc.low %vm14383_vm2, %vm965_vm10  ;;  %v14501_v6 = vld [vmem:[#allocation34_spill] sm:$0xff]  ;;  %8606 = vmatprep.subr.bf16.mxu1 %v11779_v44  ;;  %vm998_vm13 = vcmp.lt.s32.totalorder %v700_v35, 15  ;;  %vm11795_vm10 = vcmp.lt.s32.totalorder %v714_v42, 15  ;;  %v14504_v15 = vrot.slane %v11668_v23, 1 }
 0x319   : > { %v14499_v11 = vsel %vm11782_vm9, 4294967295, %v14498_v11  ;;  %v11786_v37 = vpack.c.bf16 %v1892_v18, %v1893_v25  ;;  %v2045_v9 = vrot.slane %v14501_v6, 1  ;;  %vm967_vm7 = vcmp.gt.s32.totalorder %v707_v47, 0  ;;  %vm11809_vm1 = vmpackc.low %vm998_vm13, %vm14383_vm2 }
 0x31a   : > { %14500 = vst [vmem:[#allocation71_spill] sm:$0xff] %v14499_v11  ;;  %vm14505_vm6 = vcmp.lt.s32.totalorder %v10643_v12, 7  ;;  %v14509_v48 = vrot.slane %v14427_v52, 1  ;;  %v14512_v47 = vrot.slane %v14501_v6, 7  ;;  %vm14513_vm13 = vcmp.lt.s32.totalorder %v10643_v12, 1  ;;  %vm11829_vm3 = vmpackc.low %vm14383_vm2, %vm967_vm7 }
 0x31b   : > { %v9761_v51 = vpop.eup %9760  ;;  %7011 = vmatmul.mubr.msk.bf16.gmra.mrb[40].mxu0 %vm11782_vm9, %v11786_v37  ;;  %v2069_v45 = vsel %vm14505_vm6, %v14504_v15, %v2043_v39  ;;  %vm14510_vm14 = vmmov %vm14505_vm6  ;;  %v14515_v52 = vmov 0 }
 0x31c   : > { %v1806_v16 = vmul.f32 %v9761_v51, %v11406_v49  ;;  %v14506_v49 = vmov 0  ;;  %v2066_v35 = vsel %vm14510_vm14, %v2045_v9, %v14509_v48  ;;  %vm14511_vm9 = vmmov %vm14505_vm6  ;;  %v14516_v52 = vsel %vm11829_vm3, 4294967295, %v14515_v52 }
 0x31d   : > { %v14507_v49 = vsel %vm11809_vm1, 4294967295, %v14506_v49  ;;  %vm14514_vm4 = vmmov %vm14513_vm13  ;;  %14517 = vst [vmem:[#allocation72_spill] sm:$0xff] %v14516_v52 }
 0x31e   : > { %v2044_v31 = vrot.slane %v1806_v16, 1  ;;  %v11806_v18 = vpack.c.bf16 %v14501_v6, %v1806_v16  ;;  %v1867_v25 = vrot.slane %v1806_v16, 7  ;;  %14508 = vst [vmem:[#allocation34_spill] sm:$0xff] %v14507_v49  ;;  %vm11838_vm14 = vmpackc.low %vm11795_vm10, %vm14383_vm2 }
 0x320   : > { %v2068_v23 = vsel %vm14511_vm9, %v2043_v39, %v2044_v31  ;;  %2701 = vmatprep.mubr.bf16.mxu0 %v11806_v18  ;;  %v2067_v42 = vsel %vm14505_vm6, %v2044_v31, %v2045_v9  ;;  %v1890_v51 = vsel %vm14513_vm13, %v1867_v25, %v14512_v47  ;;  %v1891_v16 = vsel %vm14514_vm4, %v1866_v41, %v1867_v25 }
 0x321   : > { %v11833_v15 = vpack.c.bf16 %v2068_v23, %v2069_v45  ;;  %v14518_v39 = vmov 0  ;;  %v11842_v6 = vpack.c.bf16 %v1890_v51, %v1891_v16  ;;  %v728_v9 = vand.u32 15, %v554_v60  ;;  %v14530_v51 = vld [vmem:[#allocation15_spill] sm:$0xff]  ;;  %v9553_v23 = vld [vmem:[#allocation6 + $0x228] sm:$0xff]  }
 0x322   : > { %v14519_v39 = vsel %vm11838_vm14, 4294967295, %v14518_v39  ;;  %v11844_v31 = vpack.c.bf16 %v2066_v35, %v2067_v42  ;;  %v742_v41 = vand.u32 15, %v556_v58  ;;  %v558_v60 = vadd.s32 216, %v10643_v12  ;;  %v14529_v42 = vld [vmem:[#allocation44_spill] sm:$0xff] }
 0x323   : > { %14520 = vst [vmem:[#allocation73_spill] sm:$0xff] %v14519_v39  ;;  %8591 = vmatmul.mubr.msk.bf16.gmra.mrb[44].mxu1 %vm11809_vm1, %v11833_v15  ;;  %7014 = vmatmul.mubr.msk.bf16.gmra.mrb[44].mxu0 %vm11829_vm3, %v11842_v6  ;;  %vm1002_vm4 = vcmp.lt.s32.totalorder %v728_v9, 15  ;;  %v560_v58 = vadd.s32 232, %v10643_v12  ;;  %v14522_v45 = vmov 0  ;;  %v14525_v25 = vmov 0 }
 0x324   : > { %8594 = vmatprep.mubr.msk.bf16.mxu1 %vm11838_vm14, %v11844_v31  ;;  %3602 = vmatprep.mubr.bf16.mxu0 %v14521_v46  ;;  %vm1004_vm9 = vcmp.lt.s32.totalorder %v742_v41, 15  ;;  %vm11859_vm10 = vmpackc.low %vm1002_vm4, %vm14383_vm2  ;;  %v756_v48 = vand.u32 15, %v558_v60  ;;  %v562_v47 = vadd.s32 248, %v10643_v12  ;;  %v14531_v16 = vmov 0  ;;  %v14537_v60 = vld [vmem:[#allocation16_spill] sm:$0xff] }
 0x325   : > { %v14523_v45 = vsel %vm11859_vm10, 4294967295, %v14522_v45  ;;  %vm11864_vm7 = vmpackc.low %vm1004_vm9, %vm14383_vm2  ;;  %v770_v35 = vand.u32 15, %v560_v58  ;;  %v14534_v9 = vmov 0  ;;  %v14538_v58 = vld [vmem:[#allocation48_spill] sm:$0xff]  ;;  %v14542_v12 = vmov 0 }
 0x326   : > { %14524 = vst [vmem:[#allocation40_spill] sm:$0xff] %v14523_v45  ;;  %v14526_v25 = vsel %vm11864_vm7, 4294967295, %v14525_v25  ;;  %vm1006_vm6 = vcmp.lt.s32.totalorder %v756_v48, 15  ;;  %v784_v41 = vand.u32 15, %v562_v47  ;;  %v14541_v47 = vld [vmem:[#allocation17_spill] sm:$0xff] }
 0x327   : > { %14527 = vst [vmem:[#allocation74_spill] sm:$0xff] %v14526_v25  ;;  %vm1008_vm13 = vcmp.lt.s32.totalorder %v770_v35, 15  ;;  %vm11882_vm4 = vmpackc.low %vm1006_vm6, %vm14383_vm2  ;;  %v14540_v35 = vld [vmem:[#allocation52_spill] sm:$0xff] }
 0x328   : > { %v14532_v16 = vsel %vm11882_vm4, 4294967295, %v14531_v16  ;;  %vm11887_vm9 = vmpackc.low %vm1008_vm13, %vm14383_vm2  ;;  %vm1010_vm6 = vcmp.lt.s32.totalorder %v784_v41, 15  ;;  %v14120_v41 = vmov 0  }
 0x329   : > { %14533 = vst [vmem:[#allocation44_spill] sm:$0xff] %v14532_v16  ;;  %v14535_v9 = vsel %vm11887_vm9, 4294967295, %v14534_v9  ;;  %vm11906_vm13 = vmpackc.low %vm1010_vm6, %vm14383_vm2  ;;  %vm14554_vm2 = vnez %v14429_v50  ;;  %vm14555_vm6 = vnez %v14455_v10  ;;  %v14586_v50 = vld [vmem:[#allocation59_spill] sm:$0xff] }
 0x32a   : > { %14536 = vst [vmem:[#allocation75_spill] sm:$0xff] %v14535_v9  ;;  %v14543_v12 = vsel %vm11906_vm13, 4294967295, %v14542_v12  ;;  %v14551_v9 = vld [vmem:[#allocation37_spill] sm:$0xff] }
 0x32b   : > { %8595 = vmatmul.mubr.msk.bf16.gmra.mrb[48].mxu1 %vm11859_vm10, %v11580_v33  ;;  %7170 = vmatmul.mubr.msk.bf16.vlgmr.msra.gmra.mrb[48].mxu0 %vm11029_vm12, %v11033_v4  ;;  %14544 = vst [vmem:[#allocation48_spill] sm:$0xff] %v14543_v12  ;;  %v14548_v12 = vld [vmem:[#allocation32_spill] sm:$0xff] }
 0x32c   : > { %8598 = vmatprep.mubr.msk.bf16.mxu1 %vm11864_vm7, %v11602_v20  ;;  %3610 = vmatprep.mubr.bf16.mxu0 %v14529_v42 }
 0x32d   : > { %9012 = vmatpush3.bf16.msra.mxu0 %v14530_v51  ;;  %v14547_v51 = vld [vmem:[#allocation20_spill] sm:$0xff] }
 0x32e   : > { %9013 = vmatprep.subr.bf16.mxu0 %v14368_v54 }
 0x331   : > { %9015 = vmatpush3.bf16.msra.mxu0 %v14537_v60  ;;  %v14545_v60 = vld [vmem:[#allocation18_spill] sm:$0xff] }
 0x332   : > { %9016 = vmatprep.subr.bf16.mxu0 %v14368_v54 }
 0x333   : > { %8599 = vmatmul.mubr.msk.bf16.gmra.mrb[52].mxu1 %vm11882_vm4, %v11626_v29  ;;  %7173 = vmatmul.mubr.msk.bf16.gmra.mrb[52].mxu0 %vm11096_vm15, %v14538_v58 }
 0x334   : > { %8602 = vmatprep.mubr.msk.bf16.mxu1 %vm11887_vm9, %v11651_v40  ;;  %3618 = vmatprep.mubr.bf16.mxu0 %v14540_v35 }
 0x335   : > { %9018 = vmatpush3.bf16.msra.mxu0 %v14541_v47  ;;  %v14546_v47 = vld [vmem:[#allocation19_spill] sm:$0xff] }
 0x336   : > { %9019 = vmatprep.subr.bf16.mxu0 %v14368_v54 }
 0x339   : > { %9021 = vmatpush3.bf16.msra.mxu0 %v14545_v60  ;;  %v9541_v60 = vld [vmem:[#allocation6 + $0x88] sm:$0xff]  }
 0x33a   : > { %9022 = vmatprep.subr.bf16.mxu0 %v14368_v54 }
 0x33b   : > { %8603 = vmatmul.mubr.msk.bf16.gmra.mrb[56].mxu1 %vm11906_vm13, %v11736_v38  ;;  %7176 = vmatmul.mubr.msk.bf16.gmra.mrb[56].mxu0 %vm11210_vm11, %v11215_v24  ;;  %v14549_v38 = vld [vmem:[#allocation21_spill] sm:$0xff] }
 0x33c   : > { %3087 = vmatprep.mubr.bf16.mxu1 %v14120_v41  ;;  %3626 = vmatprep.mubr.bf16.mxu0 %v11260_v0 }
 0x33d   : > { %9024 = vmatpush3.bf16.msra.mxu0 %v14546_v47  ;;  %v9542_v47 = vld [vmem:[#allocation6 + $0x90] sm:$0xff]  }
 0x33e   : > { %9025 = vmatprep.subr.bf16.mxu0 %v14368_v54 }
 0x341   : > { %9027 = vmatpush3.bf16.msra.mxu0 %v14547_v51  ;;  %v9543_v51 = vld [vmem:[#allocation6 + $0x98] sm:$0xff]  }
 0x342   : > { %9028 = vmatprep.subr.bf16.mxu0 %v14368_v54 }
 0x343   : > { %3088 = vmatmul.mubr.bf16.vlgmr.msra.gmra.mrb[60].mxu1 %v14120_v41  ;;  %7179 = vmatmul.mubr.msk.bf16.gmra.mrb[60].mxu0 %vm11290_vm0, %v11294_v56  ;;  %v14550_v41 = vld [vmem:[#allocation22_spill] sm:$0xff] }
 0x344   : > { %8607 = vmatpush3.bf16.msra.mxu1 %v11779_v44  ;;  %3095 = vmatprep.mubr.bf16.mxu1 %v14548_v12  ;;  %v9544_v12 = vld [vmem:[#allocation6 + $0xa0] sm:$0xff]  }
 0x345   : > { %3634 = vmatprep.mubr.bf16.mxu0 %v11397_v2  ;;  %8608 = vmatprep.subr.bf16.mxu1 %v9541_v60 }
 0x346   : > { %9030 = vmatpush3.bf16.msra.mxu0 %v14549_v38 }
 0x347   : > { %9031 = vmatprep.subr.bf16.mxu0 %v14368_v54 }
 0x348   : > { %8609 = vmatpush3.bf16.msra.mxu1 %v9541_v60  ;;  %v9545_v60 = vld [vmem:[#allocation6 + $0xa8] sm:$0xff]  }
 0x349   : > { %8610 = vmatprep.subr.bf16.mxu1 %v9542_v47 }
 0x34a   : > { %9033 = vmatpush3.bf16.msra.mxu0 %v14550_v41 }
 0x34b   : > { %7080 = vmatmul.mubr.msk.bf16.gmra.mrb[64].mxu1 %vm10933_vm8, %v14551_v9  ;;  %7182 = vmatmul.mubr.msk.bf16.gmra.mrb[64].mxu0 %vm11430_vm5, %v11443_v32  ;;  %v14570_v9 = vld [vmem:[#allocation53_spill] sm:$0xff]  ;;  %vm14598_vm8 = vnez %v14491_v30 }
 0x34c   : > { %3103 = vmatprep.mubr.bf16.mxu1 %v14521_v46  ;;  %3642 = vmatprep.mubr.bf16.mxu0 %v11459_v59  ;;  %v9546_v46 = vld [vmem:[#allocation6 + $0xb0] sm:$0xff]  }
 0x34d   : > { %8611 = vmatpush3.bf16.msra.mxu1 %v9542_v47  ;;  %9034 = vmatprep.subr.bf16.mxu0 %v14368_v54 }
 0x34e   : > { %8612 = vmatprep.subr.bf16.mxu1 %v9543_v51 }
 0x351   : > { %8613 = vmatpush3.bf16.msra.mxu1 %v9543_v51  ;;  %v9547_v51 = vld [vmem:[#allocation6 + $0xb8] sm:$0xff]  }
 0x352   : > { %8614 = vmatprep.subr.bf16.mxu1 %v9544_v12 }
 0x353   : > { %7083 = vmatmul.mubr.msk.bf16.gmra.mrb[68].mxu1 %vm11029_vm12, %v11033_v4  ;;  %7185 = vmatmul.mubr.msk.bf16.gmra.mrb[68].mxu0 %vm14554_vm2, %v11530_v5  ;;  %v11959_v4 = vld [vmem:[#allocation6 + $0x200] sm:$0xff]   ;;  %vm14557_vm12 = vnez %v14499_v11 }
 0x354   : > { %3111 = vmatprep.mubr.bf16.mxu1 %v14529_v42  ;;  %3650 = vmatprep.mubr.bf16.mxu0 %v11553_v53  ;;  %v14566_v42 = vld [vmem:[#allocation49_spill] sm:$0xff] }
 0x355   : > { %8615 = vmatpush3.bf16.msra.mxu1 %v9544_v12 }
 0x356   : > { %8616 = vmatprep.subr.bf16.mxu1 %v9545_v60 }
 0x359   : > { %8617 = vmatpush3.bf16.msra.mxu1 %v9545_v60 }
 0x35a   : > { %8618 = vmatprep.subr.bf16.mxu1 %v9546_v46 }
 0x35b   : > { %7086 = vmatmul.mubr.msk.bf16.gmra.mrb[72].mxu1 %vm11096_vm15, %v14538_v58  ;;  %7188 = vmatmul.mubr.msk.bf16.gmra.mrb[72].mxu0 %vm14555_vm6, %v11623_v17  ;;  %vm14556_vm15 = vnez %v14480_v34  ;;  %v14574_v58 = vld [vmem:[#allocation58_spill] sm:$0xff] }
 0x35c   : > { %3119 = vmatprep.mubr.bf16.mxu1 %v14540_v35  ;;  %3658 = vmatprep.mubr.bf16.mxu0 %v11657_v19  ;;  %v14578_v35 = vmov 0  }
 0x35d   : > { %8619 = vmatpush3.bf16.msra.mxu1 %v9546_v46  ;;  %v14579_v46 = vmov 0.0  }
 0x35e   : > { %8620 = vmatprep.subr.bf16.mxu1 %v9547_v51 }
 0x361   : > { %8621 = vmatpush3.bf16.msra.mxu1 %v9547_v51 }
 0x362   : > { %8654 = vmatprep.subr.bf16.mxu1 %v11959_v4 }
 0x363   : > { %7089 = vmatmul.mubr.msk.bf16.gmra.mrb[76].mxu1 %vm11210_vm11, %v11215_v24  ;;  %7191 = vmatmul.mubr.msk.bf16.gmra.mrb[76].mxu0 %vm14556_vm15, %v11730_v27  ;;  %v14558_v24 = vld [vmem:[#allocation35_spill] sm:$0xff]  ;;  %vm14597_vm11 = vnez %v14465_v14 }
 0x364   : > { %3127 = vmatprep.mubr.bf16.mxu1 %v11260_v0  ;;  %3666 = vmatprep.mubr.bf16.mxu0 %v11747_v21  ;;  %v14559_v0 = vld [vmem:[#allocation41_spill] sm:$0xff] }
 0x36b   : > { %7092 = vmatmul.mubr.msk.bf16.gmra.mrb[80].mxu1 %vm11290_vm0, %v11294_v56  ;;  %7194 = vmatmul.mubr.msk.bf16.gmra.mrb[80].mxu0 %vm14557_vm12, %v11786_v37  ;;  %v14560_v56 = vld [vmem:[#allocation39_spill] sm:$0xff] }
 0x36c   : > { %3135 = vmatprep.mubr.bf16.mxu1 %v11397_v2  ;;  %3674 = vmatprep.mubr.bf16.mxu0 %v11806_v18  ;;  %vm14561_vm0 = vnez %v14560_v56  ;;  %v14562_v2 = vld [vmem:[#allocation42_spill] sm:$0xff] }
 0x373   : > { %7095 = vmatmul.mubr.msk.bf16.gmra.mrb[84].mxu1 %vm11430_vm5, %v11443_v32  ;;  %7197 = vmatmul.mubr.msk.bf16.gmra.mrb[84].mxu0 %vm11829_vm3, %v11842_v6  ;;  %v14563_v32 = vld [vmem:[#allocation46_spill] sm:$0xff] }
 0x374   : > { %3143 = vmatprep.mubr.bf16.mxu1 %v11459_v59  ;;  %3682 = vmatprep.mubr.bf16.mxu0 %v14558_v24  ;;  %v14564_v59 = vld [vmem:[#allocation45_spill] sm:$0xff] }
 0x375   : > { %vm14565_vm5 = vnez %v14564_v59 }
 0x37b   : > { %7098 = vmatmul.mubr.msk.bf16.gmra.mrb[88].mxu1 %vm14554_vm2, %v11530_v5  ;;  %7200 = vmatmul.mubr.msk.bf16.gmra.mrb[88].mxu0 %vm14561_vm0, %v14559_v0  ;;  %v14567_v5 = vld [vmem:[#allocation51_spill] sm:$0xff] }
 0x37c   : > { %3151 = vmatprep.mubr.bf16.mxu1 %v11553_v53  ;;  %3690 = vmatprep.mubr.bf16.mxu0 %v14562_v2  ;;  %v14568_v53 = vld [vmem:[#allocation50_spill] sm:$0xff] }
 0x37d   : > { %vm14569_vm2 = vnez %v14568_v53 }
 0x383   : > { %7101 = vmatmul.mubr.msk.bf16.gmra.mrb[92].mxu1 %vm14555_vm6, %v11623_v17  ;;  %7203 = vmatmul.mubr.msk.bf16.gmra.mrb[92].mxu0 %vm14565_vm5, %v14563_v32  ;;  %v14571_v17 = vld [vmem:[#allocation56_spill] sm:$0xff] }
 0x384   : > { %3159 = vmatprep.mubr.bf16.mxu1 %v11657_v19  ;;  %3698 = vmatprep.mubr.bf16.mxu0 %v14566_v42  ;;  %v14572_v19 = vld [vmem:[#allocation55_spill] sm:$0xff] }
 0x385   : > { %vm14573_vm6 = vnez %v14572_v19 }
 0x38b   : > { %7104 = vmatmul.mubr.msk.bf16.gmra.mrb[96].mxu1 %vm14556_vm15, %v11730_v27  ;;  %7206 = vmatmul.mubr.msk.bf16.gmra.mrb[96].mxu0 %vm14569_vm2, %v14567_v5  ;;  %v14575_v27 = vld [vmem:[#allocation29_spill] sm:$0xff] }
 0x38c   : > { %3167 = vmatprep.mubr.bf16.mxu1 %v11747_v21  ;;  %3706 = vmatprep.mubr.bf16.mxu0 %v14570_v9  ;;  %v14576_v21 = vld [vmem:[#allocation28_spill] sm:$0xff] }
 0x38d   : > { %vm14577_vm15 = vnez %v14576_v21 }
 0x393   : > { %7107 = vmatmul.mubr.msk.bf16.gmra.mrb[100].mxu1 %vm14557_vm12, %v11786_v37  ;;  %7209 = vmatmul.mubr.msk.bf16.gmra.mrb[100].mxu0 %vm14573_vm6, %v14571_v17  ;;  %v7603_v37 = vpop.f32.mrb[4].mxu0  ;;  %vm14596_vm12 = vnez %v14461_v55 }
 0x394   : > { %3175 = vmatprep.mubr.bf16.mxu1 %v11806_v18  ;;  %3714 = vmatprep.mubr.bf16.mxu0 %v14574_v58  ;;  %v7604_v47 = vpop.f32.mrb[5].mxu0 }
 0x395   : > { %v12029_v18 = vadd.f32 %v7604_v47, %v7603_v37  ;;  %v7606_v12 = vpop.f32.mrb[6].mxu0 }
 0x396   : > { %v7607_v60 = vpop.f32.mrb[7].mxu0 }
 0x397   : > { %v7609_v37 = vpop.f32.mrb[8].mxu0 }
 0x398   : > { %v7610_v47 = vpop.f32.mrb[9].mxu0 }
 0x399   : > { %v7612_v56 = vpop.f32.mrb[10].mxu0 }
 0x39b   : > { %7110 = vmatmul.mubr.msk.bf16.gmra.mrb[104].mxu1 %vm11829_vm3, %v11842_v6  ;;  %7212 = vmatmul.mubr.msk.bf16.gmra.mrb[104].mxu0 %vm14577_vm15, %v14575_v27  ;;  %v7669_v6 = vpop.f32.mrb[8].mxu1  ;;  %vm14580_vm15 = vmmov 0   ;;  %vm14595_vm3 = vnez %v14440_v26 }
 0x39c   : > { %3183 = vmatprep.mubr.bf16.mxu1 %v14558_v24  ;;  %3722 = vmatprep.mubr.bf16.mxu0 %v14578_v35  ;;  %v7670_v51 = vpop.f32.mrb[9].mxu1  ;;  %v12035_v24 = vadd.f32 %v7607_v60, %v7606_v12  ;;  %v7613_v12 = vpop.f32.mrb[11].mxu0 }
 0x39d   : > { %v12037_v58 = vadd.f32 %v7670_v51, %v7669_v6  ;;  %v7672_v27 = vpop.f32.mrb[10].mxu1  ;;  %v12047_v6 = vadd.f32 %v7613_v12, %v7612_v56 }
 0x39e   : > { %v7673_v21 = vpop.f32.mrb[11].mxu1  ;;  %v7615_v34 = vpop.f32.mrb[12].mxu0 }
 0x39f   : > { %v7675_v52 = vpop.f32.mrb[12].mxu1  ;;  %v7616_v10 = vpop.f32.mrb[13].mxu0 }
 0x3a0   : > { %v7676_v60 = vpop.f32.mrb[13].mxu1 }
 0x3a1   : > { %v12049_v51 = vadd.f32 %v7676_v60, %v7675_v52 }
 0x3a3   : > { %7113 = vmatmul.mubr.msk.bf16.gmra.mrb[108].mxu1 %vm14561_vm0, %v14559_v0  ;;  %3723 = vmatmul.mubr.bf16.gmra.mrb[108].mxu0 %v14578_v35  ;;  %v12039_v0 = vadd.f32 %v7673_v21, %v7672_v27  ;;  %v7678_v21 = vpop.f32.mrb[14].mxu1  ;;  %vm14593_vm0 = vnez %v14437_v7 }
 0x3a4   : > { %3191 = vmatprep.mubr.bf16.mxu1 %v14562_v2  ;;  %8734 = vmatprep.mubr.msk.f32.mxu0 %vm14580_vm15, %v14579_v46  ;;  %v12044_v2 = vadd.f32 %v7610_v47, %v7609_v37  ;;  %v7679_v27 = vpop.f32.mrb[15].mxu1 }
 0x3a5   : > { %v12051_v11 = vadd.f32 %v7679_v27, %v7678_v21 }
 0x3a6   : > { %v7681_v52 = vpop.f32.mrb[16].mxu1 }
 0x3a7   : > { %14581 = vst [vmem:[#allocation52_spill] sm:$0xff] %v12051_v11  ;;  %v7682_v47 = vpop.f32.mrb[17].mxu1 }
 0x3a8   : > { %v12061_v12 = vadd.f32 %v7682_v47, %v7681_v52  ;;  %v7684_v60 = vpop.f32.mrb[18].mxu1  ;;  %v9549_v47 = vld [vmem:[#allocation6 + $0x208] sm:$0xff]  }
 0x3a9   : > { %v7685_v21 = vpop.f32.mrb[19].mxu1 }
 0x3aa   : > { %14582 = vst [vmem:[#allocation32_spill] sm:$0xff] %v12061_v12  ;;  %v12066_v27 = vadd.f32 %v7685_v21, %v7684_v60 }
 0x3ab   : > { %7116 = vmatmul.mubr.msk.bf16.gmra.mrb[112].mxu1 %vm14565_vm5, %v14563_v32  ;;  %v12056_v32 = vadd.f32 %v7616_v10, %v7615_v34 }
 0x3ac   : > { %3199 = vmatprep.mubr.bf16.mxu1 %v14566_v42  ;;  %v7618_v42 = vpop.f32.mrb[14].mxu0  ;;  %14583 = vst [vmem:[#allocation37_spill] sm:$0xff] %v12066_v27 }
 0x3ad   : > { %v7619_v37 = vpop.f32.mrb[15].mxu0 }
 0x3ae   : > { %v12059_v56 = vadd.f32 %v7619_v37, %v7618_v42  ;;  %v7621_v10 = vpop.f32.mrb[16].mxu0 }
 0x3af   : > { %v7622_v34 = vpop.f32.mrb[17].mxu0  ;;  %v7687_v37 = vpop.f32.mrb[20].mxu1 }
 0x3b0   : > { %v7688_v52 = vpop.f32.mrb[21].mxu1 }
 0x3b1   : > { %v12073_v59 = vadd.f32 %v7688_v52, %v7687_v37  ;;  %v7690_v19 = vpop.f32.mrb[22].mxu1 }
 0x3b2   : > { %v7691_v60 = vpop.f32.mrb[23].mxu1 }
 0x3b3   : > { %7119 = vmatmul.mubr.msk.bf16.gmra.mrb[116].mxu1 %vm14569_vm2, %v14567_v5  ;;  %v12069_v5 = vadd.f32 %v7622_v34, %v7621_v10  ;;  %14584 = vst [vmem:[#allocation35_spill] sm:$0xff] %v12073_v59  ;;  %vm14588_vm2 = vnez %v14408_v1  ;;  %v12082_v21 = vadd.f32 %v7691_v60, %v7690_v19  ;;  %v14591_v19 = vld [vmem:[#allocation62_spill] sm:$0xff] }
 0x3b4   : > { %3207 = vmatprep.mubr.bf16.mxu1 %v14570_v9  ;;  %v7624_v9 = vpop.f32.mrb[18].mxu0  ;;  %vm14592_vm5 = vnez %v14591_v19 }
 0x3b5   : > { %v7625_v42 = vpop.f32.mrb[19].mxu0  ;;  %14589 = vst [vmem:[#allocation41_spill] sm:$0xff] %v12082_v21 }
 0x3b6   : > { %v12071_v53 = vadd.f32 %v7625_v42, %v7624_v9  ;;  %v7627_v10 = vpop.f32.mrb[20].mxu0  ;;  %v9550_v9 = vld [vmem:[#allocation6 + $0x210] sm:$0xff]  }
 0x3b7   : > { %v7628_v34 = vpop.f32.mrb[21].mxu0 }
 0x3b8   : > { %v12084_v42 = vadd.f32 %v7628_v34, %v7627_v10  ;;  %v7630_v37 = vpop.f32.mrb[22].mxu0 }
 0x3b9   : > { %v7631_v52 = vpop.f32.mrb[23].mxu0 }
 0x3bb   : > { %7122 = vmatmul.mubr.msk.bf16.gmra.mrb[120].mxu1 %vm14573_vm6, %v14571_v17  ;;  %v14585_v17 = vld [vmem:[#allocation60_spill] sm:$0xff]  ;;  %vm14587_vm6 = vnez %v14586_v50 }
 0x3bc   : > { %8622 = vmatprep.mubr.bf16.mxu1 %v14578_v35 }
 0x3bd   : > { %v7693_v44 = vpop.f32.mrb[24].mxu1 }
 0x3be   : > { %v7694_v8 = vpop.f32.mrb[25].mxu1 }
 0x3bf   : > { %v12088_v3 = vadd.f32 %v7694_v8, %v7693_v44  ;;  %v7696_v48 = vpop.f32.mrb[26].mxu1 }
 0x3c0   : > { %v7697_v60 = vpop.f32.mrb[27].mxu1 }
 0x3c1   : > { %14590 = vst [vmem:[#allocation42_spill] sm:$0xff] %v12088_v3  ;;  %v12096_v10 = vadd.f32 %v7697_v60, %v7696_v48  ;;  %v9554_v48 = vld [vmem:[#allocation6 + $0x230] sm:$0xff]  }
 0x3c3   : > { %8623 = vmatmul.mubr.msk.bf16.vlgmr.msra.gmra.mrb[28].mxu1 %vm14587_vm6, %v14585_v17  ;;  %v12086_v17 = vadd.f32 %v7631_v52, %v7630_v37  ;;  %14594 = vst [vmem:[#allocation46_spill] sm:$0xff] %v12096_v10  ;;  %vm14599_vm6 = vnez %v14494_v43 }
 0x3c4   : > { %8655 = vmatpush3.bf16.msra.mxu1 %v11959_v4  ;;  %8626 = vmatprep.mubr.msk.bf16.mxu1 %vm14588_vm2, %v11455_v63  ;;  %v9551_v4 = vld [vmem:[#allocation6 + $0x218] sm:$0xff]  }
 0x3c5   : > { %8656 = vmatprep.subr.bf16.mxu1 %v9549_v47  ;;  %v7633_v34 = vpop.f32.mrb[24].mxu0 }
 0x3c6   : > { %v7634_v37 = vpop.f32.mrb[25].mxu0 }
 0x3c7   : > { %v12098_v52 = vadd.f32 %v7634_v37, %v7633_v34  ;;  %v7636_v8 = vpop.f32.mrb[26].mxu0 }
 0x3c8   : > { %8657 = vmatpush3.bf16.msra.mxu1 %v9549_v47  ;;  %v9552_v47 = vld [vmem:[#allocation6 + $0x220] sm:$0xff]   ;;  %v7637_v44 = vpop.f32.mrb[27].mxu0 }
 0x3c9   : > { %8658 = vmatprep.subr.bf16.mxu1 %v9550_v9  ;;  %v12100_v40 = vadd.f32 %v7637_v44, %v7636_v8  ;;  %v9555_v8 = vld [vmem:[#allocation6 + $0x238] sm:$0xff]  }
 0x3cb   : > { %8627 = vmatmul.mubr.msk.bf16.gmra.mrb[32].mxu1 %vm14592_vm5, %v11473_v36 }
 0x3cc   : > { %8630 = vmatprep.mubr.msk.bf16.mxu1 %vm14593_vm0, %v11510_v62  ;;  %8659 = vmatpush3.bf16.msra.mxu1 %v9550_v9 }
 0x3cd   : > { %8660 = vmatprep.subr.bf16.mxu1 %v9551_v4 }
 0x3cf   : > { %v7639_v9 = vpop.f32.mrb[28].mxu0 }
 0x3d0   : > { %8661 = vmatpush3.bf16.msra.mxu1 %v9551_v4  ;;  %v7640_v60 = vpop.f32.mrb[29].mxu0 }
 0x3d1   : > { %8662 = vmatprep.subr.bf16.mxu1 %v9552_v47  ;;  %v12108_v34 = vadd.f32 %v7640_v60, %v7639_v9  ;;  %v7642_v4 = vpop.f32.mrb[30].mxu0 }
 0x3d2   : > { %v7643_v37 = vpop.f32.mrb[31].mxu0 }
 0x3d3   : > { %8631 = vmatmul.mubr.msk.bf16.gmra.mrb[36].mxu1 %vm14595_vm3, %v11532_v57  ;;  %v12110_v44 = vadd.f32 %v7643_v37, %v7642_v4 }
 0x3d4   : > { %8634 = vmatprep.mubr.msk.bf16.mxu1 %vm14596_vm12, %v11648_v22  ;;  %8663 = vmatpush3.bf16.msra.mxu1 %v9552_v47 }
 0x3d5   : > { %8664 = vmatprep.subr.bf16.mxu1 %v9553_v23 }
 0x3d8   : > { %8665 = vmatpush3.bf16.msra.mxu1 %v9553_v23 }
 0x3d9   : > { %8666 = vmatprep.subr.bf16.mxu1 %v9554_v48 }
 0x3db   : > { %8635 = vmatmul.mubr.msk.bf16.gmra.mrb[40].mxu1 %vm14597_vm11, %v11671_v61  ;;  %v7645_v47 = vpop.f32.mrb[32].mxu0 }
 0x3dc   : > { %8638 = vmatprep.mubr.msk.bf16.mxu1 %vm14598_vm8, %v11754_v13  ;;  %8667 = vmatpush3.bf16.msra.mxu1 %v9554_v48  ;;  %v7646_v9 = vpop.f32.mrb[33].mxu0 }
 0x3dd   : > { %8668 = vmatprep.subr.bf16.mxu1 %v9555_v8  ;;  %v12118_v60 = vadd.f32 %v7646_v9, %v7645_v47  ;;  %v7648_v23 = vpop.f32.mrb[34].mxu0 }
 0x3de   : > { %v7649_v50 = vpop.f32.mrb[35].mxu0 }
 0x3df   : > { %v12120_v41 = vadd.f32 %v7649_v50, %v7648_v23 }
 0x3e0   : > { %8669 = vmatpush3.bf16.msra.mxu1 %v9555_v8 }
 0x3e3   : > { %8639 = vmatmul.mubr.msk.bf16.gmra.mrb[44].mxu1 %vm14599_vm6, %v11764_v28 }
 0x3e4   : > { %8642 = vmatprep.mubr.msk.bf16.mxu1 %vm11809_vm1, %v11833_v15 }
 0x3e5   : > { %v7651_v4 = vpop.f32.mrb[36].mxu0 }
 0x3e6   : > { %v7652_v48 = vpop.f32.mrb[37].mxu0 }
 0x3e7   : > { %v12128_v37 = vadd.f32 %v7652_v48, %v7651_v4  ;;  %v7654_v38 = vpop.f32.mrb[38].mxu0 }
 0x3e8   : > { %v7655_v47 = vpop.f32.mrb[39].mxu0 }
 0x3e9   : > { %v12130_v9 = vadd.f32 %v7655_v47, %v7654_v38 }
 0x3eb   : > { %8643 = vmatmul.mubr.msk.bf16.gmra.mrb[48].mxu1 %vm11838_vm14, %v11844_v31 }
 0x3ec   : > { %8646 = vmatprep.mubr.msk.bf16.mxu1 %vm11859_vm10, %v11580_v33 }
 0x3ee   : > { %v7657_v50 = vpop.f32.mrb[40].mxu0 }
 0x3ef   : > { %v7658_v8 = vpop.f32.mrb[41].mxu0 }
 0x3f0   : > { %v12138_v23 = vadd.f32 %v7658_v8, %v7657_v50  ;;  %v7660_v54 = vpop.f32.mrb[42].mxu0  ;;  %v14600_v8 = vld [vmem:[#allocation65_spill] sm:$0xff] }
 0x3f1   : > { %v7661_v46 = vpop.f32.mrb[43].mxu0 }
 0x3f2   : > { %v12140_v4 = vadd.f32 %v7661_v46, %v7660_v54 }
 0x3f3   : > { %8647 = vmatmul.mubr.msk.bf16.gmra.mrb[52].mxu1 %vm11864_vm7, %v11602_v20 }
 0x3f4   : > { %8650 = vmatprep.mubr.msk.bf16.mxu1 %vm11882_vm4, %v11626_v29 }
 0x3f6   : > { %v7663_v38 = vpop.f32.mrb[44].mxu0 }
 0x3f7   : > { %v7664_v48 = vpop.f32.mrb[45].mxu0 }
 0x3f8   : > { %v12148_v47 = vadd.f32 %v7664_v48, %v7663_v38  ;;  %v7666_v10 = vpop.f32.mrb[46].mxu0 }
 0x3f9   : > { %v7667_v3 = vpop.f32.mrb[47].mxu0 }
 0x3fa   : > { %v12150_v50 = vadd.f32 %v7667_v3, %v7666_v10 }
 0x3fb   : > { %8651 = vmatmul.mubr.msk.bf16.gmra.mrb[56].mxu1 %vm11887_vm9, %v14600_v8 }
 0x3fc   : > { %8670 = vmatprep.mubr.msk.bf16.mxu1 %vm14588_vm2, %v11455_v63 }
 0x3fe   : > { %v7875_v54 = vpop.f32.mrb[48].mxu0 }
 0x3ff   : > { %v7876_v46 = vpop.f32.mrb[49].mxu0 }
 0x400   : > { %v7877_v59 = vadd.f32 %v7876_v46, %v7875_v54  ;;  %v7878_v27 = vpop.f32.mrb[50].mxu0 }
 0x401   : > { %v7879_v12 = vpop.f32.mrb[51].mxu0 }
 0x402   : > { %v7880_v11 = vadd.f32 %v7879_v12, %v7878_v27 }
 0x403   : > { %8671 = vmatmul.mubr.msk.bf16.vlgmr.msra.gmra.mrb[28].mxu1 %vm14592_vm5, %v11473_v36 }
 0x404   : > { %8674 = vmatprep.mubr.msk.bf16.mxu1 %vm14593_vm0, %v11510_v62 }
 0x406   : > { %v7881_v3 = vpop.f32.mrb[52].mxu0 }
 0x407   : > { %v7882_v10 = vpop.f32.mrb[53].mxu0 }
 0x408   : > { %v7883_v38 = vadd.f32 %v7882_v10, %v7881_v3  ;;  %v7884_v48 = vpop.f32.mrb[54].mxu0 }
 0x409   : > { %v7885_v1 = vpop.f32.mrb[55].mxu0 }
 0x40a   : > { %v7886_v63 = vadd.f32 %v7885_v1, %v7884_v48 }
 0x40b   : > { %8675 = vmatmul.mubr.msk.bf16.gmra.mrb[32].mxu1 %vm14595_vm3, %v11532_v57 }
 0x40c   : > { %8678 = vmatprep.mubr.msk.bf16.mxu1 %vm14596_vm12, %v11648_v22 }
 0x40e   : > { %v7887_v12 = vpop.f32.mrb[56].mxu0 }
 0x40f   : > { %v7888_v36 = vpop.f32.mrb[57].mxu0 }
 0x410   : > { %v7889_v27 = vadd.f32 %v7888_v36, %v7887_v12  ;;  %v7890_v54 = vpop.f32.mrb[58].mxu0 }
 0x411   : > { %v7891_v46 = vpop.f32.mrb[59].mxu0 }
 0x412   : > { %v7892_v62 = vadd.f32 %v7891_v46, %v7890_v54 }
 0x413   : > { %8679 = vmatmul.mubr.msk.bf16.gmra.mrb[36].mxu1 %vm14597_vm11, %v11671_v61 }
 0x414   : > { %8682 = vmatprep.mubr.msk.bf16.mxu1 %vm14598_vm8, %v11754_v13 }
 0x416   : > { %v7739_v1 = vpop.f32.mrb[60].mxu1  ;;  %v7893_v57 = vpop.f32.mrb[60].mxu0 }
 0x417   : > { %v7740_v3 = vpop.f32.mrb[61].mxu1  ;;  %v7894_v10 = vpop.f32.mrb[61].mxu0 }
 0x418   : > { %v7741_v48 = vadd.f32 %v7740_v3, %v7739_v1  ;;  %v7742_v22 = vpop.f32.mrb[62].mxu1  ;;  %v12176_v55 = vadd.f32 %v7894_v10, %v7893_v57  ;;  %v7896_v12 = vpop.f32.mrb[62].mxu0 }
 0x419   : > { %v7743_v36 = vpop.f32.mrb[63].mxu1  ;;  %v7897_v26 = vpop.f32.mrb[63].mxu0 }
 0x41a   : > { %v9089_v54 = vadd.f32 %v7741_v48, %v12029_v18  ;;  %v7744_v46 = vadd.f32 %v7743_v36, %v7742_v22  ;;  %v7898_v14 = vadd.f32 %v7897_v26, %v7896_v12 }
 0x41b   : > { %8683 = vmatmul.mubr.msk.bf16.gmra.mrb[40].mxu1 %vm14599_vm6, %v11764_v28 }
 0x41c   : > { %v9095_v61 = vadd.f32 %v7744_v46, %v12035_v24  ;;  %8686 = vmatprep.mubr.msk.bf16.mxu1 %vm11809_vm1, %v11833_v15  ;;  %v12186_v13 = vadd.f32 %v9089_v54, %v7877_v59 }
 0x41e   : > { %v7745_v1 = vpop.f32.mrb[64].mxu1  ;;  %v7899_v57 = vpop.f32.mrb[64].mxu0  ;;  %v12188_v3 = vadd.f32 %v9095_v61, %v7880_v11 }
 0x41f   : > { %v7746_v10 = vpop.f32.mrb[65].mxu1  ;;  %v7900_v18 = vpop.f32.mrb[65].mxu0 }
 0x420   : > { %v7747_v48 = vadd.f32 %v7746_v10, %v7745_v1  ;;  %v7748_v26 = vpop.f32.mrb[66].mxu1  ;;  %v12190_v22 = vadd.f32 %v7900_v18, %v7899_v57  ;;  %v7902_v12 = vpop.f32.mrb[66].mxu0 }
 0x421   : > { %v7749_v28 = vpop.f32.mrb[67].mxu1  ;;  %v7903_v36 = vpop.f32.mrb[67].mxu0 }
 0x422   : > { %v9086_v24 = vadd.f32 %v7747_v48, %v12044_v2  ;;  %v7750_v46 = vadd.f32 %v7749_v28, %v7748_v26  ;;  %v7904_v49 = vadd.f32 %v7903_v36, %v7902_v12 }
 0x423   : > { %8687 = vmatmul.mubr.msk.bf16.gmra.mrb[44].mxu1 %vm11838_vm14, %v11844_v31 }
 0x424   : > { %v9092_v11 = vadd.f32 %v7750_v46, %v12047_v6  ;;  %8690 = vmatprep.mubr.msk.bf16.mxu1 %vm11859_vm10, %v11580_v33  ;;  %v12200_v15 = vadd.f32 %v9086_v24, %v7883_v38 }
 0x426   : > { %v7751_v59 = vpop.f32.mrb[68].mxu1  ;;  %v7905_v54 = vpop.f32.mrb[68].mxu0  ;;  %v12202_v61 = vadd.f32 %v9092_v11, %v7886_v63 }
 0x427   : > { %v7752_v1 = vpop.f32.mrb[69].mxu1  ;;  %v7906_v2 = vpop.f32.mrb[69].mxu0 }
 0x428   : > { %v7753_v57 = vadd.f32 %v7752_v1, %v7751_v59  ;;  %v7754_v10 = vpop.f32.mrb[70].mxu1  ;;  %v7907_v18 = vadd.f32 %v7906_v2, %v7905_v54  ;;  %v7908_v48 = vpop.f32.mrb[70].mxu0 }
 0x429   : > { %v7755_v26 = vpop.f32.mrb[71].mxu1  ;;  %v7909_v31 = vpop.f32.mrb[71].mxu0 }
 0x42a   : > { %v9101_v6 = vadd.f32 %v7753_v57, %v12056_v32  ;;  %v7756_v12 = vadd.f32 %v7755_v26, %v7754_v10  ;;  %v7910_v28 = vadd.f32 %v7909_v31, %v7908_v48 }
 0x42b   : > { %8691 = vmatmul.mubr.msk.bf16.gmra.mrb[48].mxu1 %vm11864_vm7, %v11602_v20 }
 0x42c   : > { %v9107_v33 = vadd.f32 %v7756_v12, %v12059_v56  ;;  %8694 = vmatprep.mubr.msk.bf16.mxu1 %vm11882_vm4, %v11626_v29  ;;  %v12212_v38 = vadd.f32 %v9101_v6, %v7889_v27  ;;  %v14602_v27 = vld [vmem:[#allocation68_spill] sm:$0xff] }
 0x42e   : > { %v7757_v63 = vpop.f32.mrb[72].mxu1  ;;  %v7911_v36 = vpop.f32.mrb[72].mxu0  ;;  %v12214_v24 = vadd.f32 %v9107_v33, %v7892_v62 }
 0x42f   : > { %v7758_v46 = vpop.f32.mrb[73].mxu1  ;;  %v7912_v32 = vpop.f32.mrb[73].mxu0 }
 0x430   : > { %v7759_v11 = vadd.f32 %v7758_v46, %v7757_v63  ;;  %v7760_v59 = vpop.f32.mrb[74].mxu1  ;;  %v7913_v54 = vadd.f32 %v7912_v32, %v7911_v36  ;;  %v7914_v1 = vpop.f32.mrb[74].mxu0 }
 0x431   : > { %v7761_v2 = vpop.f32.mrb[75].mxu1  ;;  %v7915_v20 = vpop.f32.mrb[75].mxu0 }
 0x432   : > { %v9098_v56 = vadd.f32 %v7759_v11, %v12069_v5  ;;  %v7762_v57 = vadd.f32 %v7761_v2, %v7760_v59  ;;  %v7916_v10 = vadd.f32 %v7915_v20, %v7914_v1 }
 0x433   : > { %8695 = vmatmul.mubr.msk.bf16.gmra.mrb[52].mxu1 %vm11887_vm9, %v14600_v8 }
 0x434   : > { %v9104_v29 = vadd.f32 %v7762_v57, %v12071_v53  ;;  %8698 = vmatprep.mubr.msk.bf16.mxu1 %vm11906_vm13, %v14602_v27  ;;  %v12225_v48 = vadd.f32 %v9098_v56, %v12176_v55  ;;  %vm14625_vm13 = vcmask 261120  }
 0x435   : > { %vm14626_vm9 = vmmov %vm14625_vm13 }
 0x436   : > { %v7763_v26 = vpop.f32.mrb[76].mxu1  ;;  %v7917_v31 = vpop.f32.mrb[76].mxu0  ;;  %v12227_v6 = vadd.f32 %v9104_v29, %v7898_v14 }
 0x437   : > { %v7764_v5 = vpop.f32.mrb[77].mxu1  ;;  %v7918_v12 = vpop.f32.mrb[77].mxu0 }
 0x438   : > { %v7765_v33 = vadd.f32 %v7764_v5, %v7763_v26  ;;  %v7766_v63 = vpop.f32.mrb[78].mxu1  ;;  %v7919_v36 = vadd.f32 %v7918_v12, %v7917_v31  ;;  %v7920_v46 = vpop.f32.mrb[78].mxu0 }
 0x439   : > { %v7767_v8 = vpop.f32.mrb[79].mxu1  ;;  %v7921_v32 = vpop.f32.mrb[79].mxu0 }
 0x43a   : > { %v9113_v53 = vadd.f32 %v7765_v33, %v12084_v42  ;;  %v7768_v11 = vadd.f32 %v7767_v8, %v7766_v63  ;;  %v7922_v59 = vadd.f32 %v7921_v32, %v7920_v46 }
 0x43b   : > { %8699 = vmatmul.mubr.bf16.gmra.mrb[56].mxu1 %v14578_v35 }
 0x43c   : > { %v9119_v55 = vadd.f32 %v7768_v11, %v12086_v17  ;;  %v12233_v1 = vadd.f32 %v9113_v53, %v12190_v22 }
 0x43e   : > { %v7769_v14 = vpop.f32.mrb[80].mxu1  ;;  %v7923_v2 = vpop.f32.mrb[80].mxu0  ;;  %v12235_v20 = vadd.f32 %v9119_v55, %v7904_v49 }
 0x43f   : > { %v7770_v56 = vpop.f32.mrb[81].mxu1  ;;  %v7924_v57 = vpop.f32.mrb[81].mxu0 }
 0x440   : > { %v7771_v29 = vadd.f32 %v7770_v56, %v7769_v14  ;;  %v7772_v27 = vpop.f32.mrb[82].mxu1  ;;  %v7925_v26 = vadd.f32 %v7924_v57, %v7923_v2  ;;  %v7926_v31 = vpop.f32.mrb[82].mxu0 }
 0x441   : > { %v7773_v42 = vpop.f32.mrb[83].mxu1  ;;  %v7927_v5 = vpop.f32.mrb[83].mxu0 }
 0x442   : > { %v9110_v12 = vadd.f32 %v7771_v29, %v12098_v52  ;;  %v7774_v33 = vadd.f32 %v7773_v42, %v7772_v27  ;;  %v7928_v63 = vadd.f32 %v7927_v5, %v7926_v31 }
 0x444   : > { %v9116_v17 = vadd.f32 %v7774_v33, %v12100_v40  ;;  %v12239_v22 = vadd.f32 %v9110_v12, %v7907_v18 }
 0x446   : > { %v7775_v46 = vpop.f32.mrb[84].mxu1  ;;  %v7929_v8 = vpop.f32.mrb[84].mxu0  ;;  %v12241_v49 = vadd.f32 %v9116_v17, %v7910_v28 }
 0x447   : > { %v7776_v32 = vpop.f32.mrb[85].mxu1  ;;  %v7930_v53 = vpop.f32.mrb[85].mxu0 }
 0x448   : > { %v7777_v11 = vadd.f32 %v7776_v32, %v7775_v46  ;;  %v7778_v55 = vpop.f32.mrb[86].mxu1  ;;  %v7931_v14 = vadd.f32 %v7930_v53, %v7929_v8  ;;  %v7932_v2 = vpop.f32.mrb[86].mxu0 }
 0x449   : > { %v7779_v56 = vpop.f32.mrb[87].mxu1  ;;  %v7933_v57 = vpop.f32.mrb[87].mxu0 }
 0x44a   : > { %v9125_v52 = vadd.f32 %v7777_v11, %v12108_v34  ;;  %v7780_v29 = vadd.f32 %v7779_v56, %v7778_v55  ;;  %v7934_v27 = vadd.f32 %v7933_v57, %v7932_v2 }
 0x44c   : > { %v9131_v40 = vadd.f32 %v7780_v29, %v12110_v44  ;;  %v12245_v18 = vadd.f32 %v9125_v52, %v7913_v54 }
 0x44e   : > { %v7781_v31 = vpop.f32.mrb[88].mxu1  ;;  %v7935_v42 = vpop.f32.mrb[88].mxu0  ;;  %v12247_v28 = vadd.f32 %v9131_v40, %v7916_v10 }
 0x44f   : > { %v7782_v5 = vpop.f32.mrb[89].mxu1  ;;  %v7936_v12 = vpop.f32.mrb[89].mxu0 }
 0x450   : > { %v7783_v33 = vadd.f32 %v7782_v5, %v7781_v31  ;;  %v7784_v17 = vpop.f32.mrb[90].mxu1  ;;  %v7937_v46 = vadd.f32 %v7936_v12, %v7935_v42  ;;  %v7938_v8 = vpop.f32.mrb[90].mxu0 }
 0x451   : > { %v7785_v32 = vpop.f32.mrb[91].mxu1  ;;  %v7939_v53 = vpop.f32.mrb[91].mxu0 }
 0x452   : > { %v9122_v34 = vadd.f32 %v7783_v33, %v12118_v60  ;;  %v7786_v11 = vadd.f32 %v7785_v32, %v7784_v17  ;;  %v7940_v55 = vadd.f32 %v7939_v53, %v7938_v8 }
 0x454   : > { %v9128_v44 = vadd.f32 %v7786_v11, %v12120_v41  ;;  %v12251_v54 = vadd.f32 %v9122_v34, %v7919_v36 }
 0x456   : > { %v7787_v2 = vpop.f32.mrb[92].mxu1  ;;  %v7941_v56 = vpop.f32.mrb[92].mxu0  ;;  %v12253_v10 = vadd.f32 %v9128_v44, %v7922_v59 }
 0x457   : > { %v7788_v57 = vpop.f32.mrb[93].mxu1  ;;  %v7942_v52 = vpop.f32.mrb[93].mxu0 }
 0x458   : > { %v7789_v29 = vadd.f32 %v7788_v57, %v7787_v2  ;;  %v7790_v40 = vpop.f32.mrb[94].mxu1  ;;  %v7943_v31 = vadd.f32 %v7942_v52, %v7941_v56  ;;  %v7944_v42 = vpop.f32.mrb[94].mxu0 }
 0x459   : > { %v7791_v5 = vpop.f32.mrb[95].mxu1  ;;  %v7945_v12 = vpop.f32.mrb[95].mxu0 }
 0x45a   : > { %v9137_v60 = vadd.f32 %v7789_v29, %v12128_v37  ;;  %v7792_v33 = vadd.f32 %v7791_v5, %v7790_v40  ;;  %v7946_v17 = vadd.f32 %v7945_v12, %v7944_v42 }
 0x45c   : > { %v9143_v41 = vadd.f32 %v7792_v33, %v12130_v9  ;;  %v12257_v36 = vadd.f32 %v9137_v60, %v7925_v26 }
 0x45e   : > { %v7793_v8 = vpop.f32.mrb[96].mxu1  ;;  %v7947_v32 = vpop.f32.mrb[96].mxu0  ;;  %v12259_v59 = vadd.f32 %v9143_v41, %v7928_v63 }
 0x45f   : > { %v7794_v53 = vpop.f32.mrb[97].mxu1  ;;  %v7948_v34 = vpop.f32.mrb[97].mxu0 }
 0x460   : > { %v7795_v11 = vadd.f32 %v7794_v53, %v7793_v8  ;;  %v7796_v44 = vpop.f32.mrb[98].mxu1  ;;  %v7949_v2 = vadd.f32 %v7948_v34, %v7947_v32  ;;  %v7950_v56 = vpop.f32.mrb[98].mxu0 }
 0x461   : > { %v7797_v57 = vpop.f32.mrb[99].mxu1  ;;  %v7951_v52 = vpop.f32.mrb[99].mxu0 }
 0x462   : > { %v9134_v37 = vadd.f32 %v7795_v11, %v12138_v23  ;;  %v7798_v29 = vadd.f32 %v7797_v57, %v7796_v44  ;;  %v7952_v40 = vadd.f32 %v7951_v52, %v7950_v56 }
 0x464   : > { %v9140_v9 = vadd.f32 %v7798_v29, %v12140_v4  ;;  %v12263_v26 = vadd.f32 %v9134_v37, %v7931_v14 }
 0x466   : > { %v7799_v42 = vpop.f32.mrb[100].mxu1  ;;  %v7953_v5 = vpop.f32.mrb[100].mxu0  ;;  %v12265_v63 = vadd.f32 %v9140_v9, %v7934_v27 }
 0x467   : > { %v7800_v12 = vpop.f32.mrb[101].mxu1  ;;  %v7954_v60 = vpop.f32.mrb[101].mxu0 }
 0x468   : > { %v7801_v33 = vadd.f32 %v7800_v12, %v7799_v42  ;;  %v7802_v41 = vpop.f32.mrb[102].mxu1  ;;  %v7955_v8 = vadd.f32 %v7954_v60, %v7953_v5  ;;  %v7956_v32 = vpop.f32.mrb[102].mxu0 }
 0x469   : > { %v7803_v53 = vpop.f32.mrb[103].mxu1  ;;  %v7957_v34 = vpop.f32.mrb[103].mxu0 }
 0x46a   : > { %v9149_v23 = vadd.f32 %v7801_v33, %v12148_v47  ;;  %v7804_v11 = vadd.f32 %v7803_v53, %v7802_v41  ;;  %v7958_v44 = vadd.f32 %v7957_v34, %v7956_v32 }
 0x46c   : > { %v9155_v4 = vadd.f32 %v7804_v11, %v12150_v50  ;;  %v12269_v14 = vadd.f32 %v9149_v23, %v7937_v46 }
 0x46e   : > { %v7805_v56 = vpop.f32.mrb[104].mxu1  ;;  %v7959_v57 = vpop.f32.mrb[104].mxu0  ;;  %v12271_v27 = vadd.f32 %v9155_v4, %v7940_v55 }
 0x46f   : > { %v7806_v52 = vpop.f32.mrb[105].mxu1  ;;  %v7960_v37 = vpop.f32.mrb[105].mxu0 }
 0x470   : > { %v7807_v29 = vadd.f32 %v7806_v52, %v7805_v56  ;;  %v7808_v9 = vpop.f32.mrb[106].mxu1  ;;  %v7961_v42 = vadd.f32 %v7960_v37, %v7959_v57  ;;  %v7962_v5 = vpop.f32.mrb[106].mxu0 }
 0x471   : > { %v7809_v12 = vpop.f32.mrb[107].mxu1  ;;  %v7963_v60 = vpop.f32.mrb[107].mxu0 }
 0x472   : > { %v9146_v47 = vadd.f32 %v7807_v29, %v12037_v58  ;;  %v7810_v33 = vadd.f32 %v7809_v12, %v7808_v9  ;;  %v7964_v41 = vadd.f32 %v7963_v60, %v7962_v5  ;;  %v14604_v5 = vld [vmem:[#allocation52_spill] sm:$0xff] }
 0x474   : > { %v9152_v50 = vadd.f32 %v7810_v33, %v12039_v0  ;;  %v12275_v46 = vadd.f32 %v9146_v47, %v7943_v31 }
 0x476   : > { %v7811_v32 = vpop.f32.mrb[108].mxu1  ;;  %v7965_v53 = vpop.f32.mrb[108].mxu0  ;;  %v12277_v55 = vadd.f32 %v9152_v50, %v7946_v17 }
 0x477   : > { %v7812_v34 = vpop.f32.mrb[109].mxu1  ;;  %v7966_v23 = vpop.f32.mrb[109].mxu0 }
 0x478   : > { %v7813_v11 = vadd.f32 %v7812_v34, %v7811_v32  ;;  %v7814_v4 = vpop.f32.mrb[110].mxu1  ;;  %v7967_v56 = vadd.f32 %v7966_v23, %v7965_v53  ;;  %v7968_v57 = vpop.f32.mrb[110].mxu0  ;;  %v14605_v32 = vld [vmem:[#allocation32_spill] sm:$0xff]  ;;  %v14606_v23 = vld [vmem:[#allocation37_spill] sm:$0xff] }
 0x479   : > { %v7815_v52 = vpop.f32.mrb[111].mxu1  ;;  %v7969_v37 = vpop.f32.mrb[111].mxu0 }
 0x47a   : > { %v9161_v58 = vadd.f32 %v7813_v11, %v12049_v51  ;;  %v7816_v29 = vadd.f32 %v7815_v52, %v7814_v4  ;;  %v7970_v9 = vadd.f32 %v7969_v37, %v7968_v57 }
 0x47c   : > { %v9167_v0 = vadd.f32 %v7816_v29, %v14604_v5  ;;  %v12281_v31 = vadd.f32 %v9161_v58, %v7949_v2  ;;  %v14608_v29 = vld [vmem:[#allocation41_spill] sm:$0xff] }
 0x47e   : > { %v7817_v12 = vpop.f32.mrb[112].mxu1  ;;  %v12283_v60 = vadd.f32 %v9167_v0, %v7952_v40  ;;  %v14607_v40 = vld [vmem:[#allocation35_spill] sm:$0xff] }
 0x47f   : > { %v7818_v17 = vpop.f32.mrb[113].mxu1 }
 0x480   : > { %v7819_v47 = vadd.f32 %v7818_v17, %v7817_v12  ;;  %v7820_v33 = vpop.f32.mrb[114].mxu1 }
 0x481   : > { %v7821_v50 = vpop.f32.mrb[115].mxu1 }
 0x482   : > { %v9158_v53 = vadd.f32 %v7819_v47, %v14605_v32  ;;  %v7822_v34 = vadd.f32 %v7821_v50, %v7820_v33 }
 0x484   : > { %v9164_v35 = vadd.f32 %v7822_v34, %v14606_v23  ;;  %v12287_v62 = vadd.f32 %v9158_v53, %v7955_v8  ;;  %v14610_v53 = vld [vmem:[#allocation46_spill] sm:$0xff] }
 0x486   : > { %v7823_v51 = vpop.f32.mrb[116].mxu1  ;;  %v12289_v11 = vadd.f32 %v9164_v35, %v7958_v44  ;;  %v14609_v35 = vld [vmem:[#allocation42_spill] sm:$0xff] }
 0x487   : > { %v7824_v4 = vpop.f32.mrb[117].mxu1 }
 0x488   : > { %v7825_v2 = vadd.f32 %v7824_v4, %v7823_v51  ;;  %v7826_v57 = vpop.f32.mrb[118].mxu1  ;;  %v14611_v4 = vld [vmem:[#allocation25_spill] sm:$0xff] }
 0x489   : > { %v7827_v52 = vpop.f32.mrb[119].mxu1 }
 0x48a   : > { %v9173_v37 = vadd.f32 %v7825_v2, %v14607_v40  ;;  %v7828_v58 = vadd.f32 %v7827_v52, %v7826_v57  ;;  %v1829_v2 = vld [vmem:[%s13966_s7] sm:$0x1] }
 0x48b   : > { %v14612_v40 = vld [vmem:[#allocation27_spill] sm:$0xff] }
 0x48c   : > { %v9179_v5 = vadd.f32 %v7828_v58, %v14608_v29  ;;  %v12293_v0 = vadd.f32 %v9173_v37, %v7961_v42  ;;  %v1084_v42 = vld [vmem:[%s13962_s3] sm:$0x1] }
 0x48e   : > { %v7829_v12 = vpop.f32.mrb[120].mxu1  ;;  %v12295_v17 = vadd.f32 %v9179_v5, %v7964_v41  ;;  %v1156_v41 = vadd.f32 %v14611_v4, %v1084_v42 }
 0x48f   : > { %v7830_v47 = vpop.f32.mrb[121].mxu1 }
 0x490   : > { %v7831_v8 = vadd.f32 %v7830_v47, %v7829_v12  ;;  %v7832_v33 = vpop.f32.mrb[122].mxu1  ;;  %v1830_v57 = vadd.f32 %v1829_v2, %v1156_v41 }
 0x491   : > { %v7833_v50 = vpop.f32.mrb[123].mxu1 }
 0x492   : > { %v9170_v44 = vadd.f32 %v7831_v8, %v14609_v35  ;;  %v7834_v32 = vadd.f32 %v7833_v50, %v7832_v33  ;;  %v12311_v37 = vrot.slane %v1830_v57, %v14612_v40 }
 0x494   : > { %v9176_v34 = vadd.f32 %v7834_v32, %v14610_v53  ;;  %v12299_v23 = vadd.f32 %v9170_v44, %v7967_v56 }
 0x496   : > { %v12301_v51 = vadd.f32 %v9176_v34, %v7970_v9 }
 0x4d6   : > { %v8672_v52 = vpop.f32.mrb[28].mxu1 }
 0x4d7   : > { %v9088_v56 = vadd.f32 %v12200_v15, %v8672_v52  ;;  %v3765_v58 = vpop.f32.mrb[29].mxu1 }
 0x4d8   : > { %v9091_v9 = vadd.f32 %v12186_v13, %v3765_v58  ;;  %v8673_v29 = vpop.f32.mrb[30].mxu1 }
 0x4d9   : > { %v12316_v5 = vadd.f32 %v9088_v56, %v12311_v37  ;;  %v9094_v12 = vadd.f32 %v12202_v61, %v8673_v29  ;;  %v3768_v47 = vpop.f32.mrb[31].mxu1 }
 0x4da   : > { %v12320_v8 = vadd.f32 %v9091_v9, %v12311_v37  ;;  %v9097_v33 = vadd.f32 %v12188_v3, %v3768_v47 }
 0x4db   : > { %v12324_v50 = vadd.f32 %v9094_v12, %v12311_v37  ;;  %v4003_v3 = vmul.f32 %v12316_v5, %v12316_v5 }
 0x4dc   : > { %v12327_v15 = vadd.f32 %v9097_v33, %v12311_v37  ;;  %v4001_v13 = vmul.f32 %v12320_v8, %v12320_v8 }
 0x4dd   : > { %v4004_v2 = vmul.f32 %v12324_v50, %v12324_v50 }
 0x4de   : > { %v3964_v35 = vadd.f32 %v12327_v15, %v12320_v8  ;;  %v4002_v61 = vmul.f32 %v12327_v15, %v12327_v15  ;;  %v8676_v44 = vpop.f32.mrb[32].mxu1 }
 0x4df   : > { %v9100_v32 = vadd.f32 %v12225_v48, %v8676_v44  ;;  %v3781_v53 = vpop.f32.mrb[33].mxu1 }
 0x4e0   : > { %v3965_v34 = vadd.f32 %v3964_v35, %v12316_v5  ;;  %v4033_v42 = vadd.f32 %v4002_v61, %v4001_v13  ;;  %v9103_v4 = vadd.f32 %v12212_v38, %v3781_v53  ;;  %v8677_v41 = vpop.f32.mrb[34].mxu1 }
 0x4e1   : > { %v12343_v57 = vadd.f32 %v9100_v32, %v12311_v37  ;;  %v9106_v52 = vadd.f32 %v12227_v6, %v8677_v41  ;;  %v3784_v56 = vpop.f32.mrb[35].mxu1 }
 0x4e2   : > { %v4034_v48 = vadd.f32 %v4033_v42, %v4003_v3  ;;  %v12347_v58 = vadd.f32 %v9103_v4, %v12311_v37  ;;  %v3966_v9 = vadd.f32 %v3965_v34, %v12324_v50  ;;  %v9109_v29 = vadd.f32 %v12214_v24, %v3784_v56 }
 0x4e3   : > { %v12352_v38 = vadd.f32 %v9106_v52, %v12311_v37  ;;  %v4007_v53 = vmul.f32 %v12343_v57, %v12343_v57 }
 0x4e4   : > { %v3967_v12 = vadd.f32 %v3966_v9, %v12347_v58  ;;  %v4005_v47 = vmul.f32 %v12347_v58, %v12347_v58  ;;  %v4035_v33 = vadd.f32 %v4034_v48, %v4004_v2  ;;  %v12358_v6 = vadd.f32 %v9109_v29, %v12311_v37 }
 0x4e5   : > { %v4008_v41 = vmul.f32 %v12352_v38, %v12352_v38 }
 0x4e6   : > { %v4036_v13 = vadd.f32 %v4035_v33, %v4005_v47  ;;  %v3968_v35 = vadd.f32 %v3967_v12, %v12358_v6  ;;  %v4006_v61 = vmul.f32 %v12358_v6, %v12358_v6  ;;  %v8680_v44 = vpop.f32.mrb[36].mxu1 }
 0x4e7   : > { %v9112_v24 = vadd.f32 %v12239_v22, %v8680_v44  ;;  %v3797_v32 = vpop.f32.mrb[37].mxu1 }
 0x4e8   : > { %v3969_v3 = vadd.f32 %v3968_v35, %v12343_v57  ;;  %v4037_v34 = vadd.f32 %v4036_v13, %v4006_v61  ;;  %v9115_v42 = vadd.f32 %v12233_v1, %v3797_v32  ;;  %v8681_v4 = vpop.f32.mrb[38].mxu1 }
 0x4e9   : > { %v12371_v2 = vadd.f32 %v9112_v24, %v12311_v37  ;;  %v9118_v52 = vadd.f32 %v12241_v49, %v8681_v4  ;;  %v3800_v56 = vpop.f32.mrb[39].mxu1 }
 0x4ea   : > { %v4038_v22 = vadd.f32 %v4037_v34, %v4007_v53  ;;  %v12375_v48 = vadd.f32 %v9115_v42, %v12311_v37  ;;  %v3970_v9 = vadd.f32 %v3969_v3, %v12352_v38  ;;  %v9121_v29 = vadd.f32 %v12235_v20, %v3800_v56 }
 0x4eb   : > { %v12380_v1 = vadd.f32 %v9118_v52, %v12311_v37  ;;  %v4011_v32 = vmul.f32 %v12371_v2, %v12371_v2 }
 0x4ec   : > { %v3971_v12 = vadd.f32 %v3970_v9, %v12375_v48  ;;  %v4009_v47 = vmul.f32 %v12375_v48, %v12375_v48  ;;  %v4039_v33 = vadd.f32 %v4038_v22, %v4008_v41  ;;  %v12386_v49 = vadd.f32 %v9121_v29, %v12311_v37 }
 0x4ed   : > { %v4012_v4 = vmul.f32 %v12380_v1, %v12380_v1 }
 0x4ee   : > { %v4040_v13 = vadd.f32 %v4039_v33, %v4009_v47  ;;  %v3972_v35 = vadd.f32 %v3971_v12, %v12386_v49  ;;  %v4010_v61 = vmul.f32 %v12386_v49, %v12386_v49  ;;  %v8684_v44 = vpop.f32.mrb[40].mxu1 }
 0x4ef   : > { %v9124_v20 = vadd.f32 %v12251_v54, %v8684_v44  ;;  %v3813_v24 = vpop.f32.mrb[41].mxu1 }
 0x4f0   : > { %v3973_v53 = vadd.f32 %v3972_v35, %v12371_v2  ;;  %v4041_v3 = vadd.f32 %v4040_v13, %v4010_v61  ;;  %v9127_v34 = vadd.f32 %v12245_v18, %v3813_v24  ;;  %v8685_v42 = vpop.f32.mrb[42].mxu1 }
 0x4f1   : > { %v12399_v41 = vadd.f32 %v9124_v20, %v12311_v37  ;;  %v9130_v52 = vadd.f32 %v12253_v10, %v8685_v42  ;;  %v3816_v56 = vpop.f32.mrb[43].mxu1 }
 0x4f2   : > { %v4042_v54 = vadd.f32 %v4041_v3, %v4011_v32  ;;  %v12403_v22 = vadd.f32 %v9127_v34, %v12311_v37  ;;  %v3974_v9 = vadd.f32 %v3973_v53, %v12380_v1  ;;  %v9133_v29 = vadd.f32 %v12247_v28, %v3816_v56 }
 0x4f3   : > { %v12408_v18 = vadd.f32 %v9130_v52, %v12311_v37  ;;  %v4015_v24 = vmul.f32 %v12399_v41, %v12399_v41 }
 0x4f4   : > { %v3975_v12 = vadd.f32 %v3974_v9, %v12403_v22  ;;  %v4013_v47 = vmul.f32 %v12403_v22, %v12403_v22  ;;  %v4043_v33 = vadd.f32 %v4042_v54, %v4012_v4  ;;  %v12414_v10 = vadd.f32 %v9133_v29, %v12311_v37 }
 0x4f5   : > { %v4016_v42 = vmul.f32 %v12408_v18, %v12408_v18 }
 0x4f6   : > { %v4044_v13 = vadd.f32 %v4043_v33, %v4013_v47  ;;  %v3976_v35 = vadd.f32 %v3975_v12, %v12414_v10  ;;  %v4014_v61 = vmul.f32 %v12414_v10, %v12414_v10  ;;  %v8688_v44 = vpop.f32.mrb[44].mxu1 }
 0x4f7   : > { %v9136_v28 = vadd.f32 %v12263_v26, %v8688_v44  ;;  %v3829_v20 = vpop.f32.mrb[45].mxu1 }
 0x4f8   : > { %v3977_v32 = vadd.f32 %v3976_v35, %v12399_v41  ;;  %v4045_v53 = vadd.f32 %v4044_v13, %v4014_v61  ;;  %v9139_v3 = vadd.f32 %v12257_v36, %v3829_v20  ;;  %v8689_v34 = vpop.f32.mrb[46].mxu1 }
 0x4f9   : > { %v12427_v4 = vadd.f32 %v9136_v28, %v12311_v37  ;;  %v9142_v52 = vadd.f32 %v12265_v63, %v8689_v34  ;;  %v3832_v56 = vpop.f32.mrb[47].mxu1 }
 0x4fa   : > { %v4046_v26 = vadd.f32 %v4045_v53, %v4015_v24  ;;  %v12431_v54 = vadd.f32 %v9139_v3, %v12311_v37  ;;  %v3978_v9 = vadd.f32 %v3977_v32, %v12408_v18  ;;  %v9145_v29 = vadd.f32 %v12259_v59, %v3832_v56 }
 0x4fb   : > { %v12436_v36 = vadd.f32 %v9142_v52, %v12311_v37  ;;  %v4019_v20 = vmul.f32 %v12427_v4, %v12427_v4 }
 0x4fc   : > { %v3979_v12 = vadd.f32 %v3978_v9, %v12431_v54  ;;  %v4017_v47 = vmul.f32 %v12431_v54, %v12431_v54  ;;  %v4047_v33 = vadd.f32 %v4046_v26, %v4016_v42  ;;  %v12442_v63 = vadd.f32 %v9145_v29, %v12311_v37 }
 0x4fd   : > { %v4020_v34 = vmul.f32 %v12436_v36, %v12436_v36 }
 0x4fe   : > { %v4048_v13 = vadd.f32 %v4047_v33, %v4017_v47  ;;  %v3980_v35 = vadd.f32 %v3979_v12, %v12442_v63  ;;  %v4018_v61 = vmul.f32 %v12442_v63, %v12442_v63  ;;  %v8692_v44 = vpop.f32.mrb[48].mxu1 }
 0x4ff   : > { %v9148_v59 = vadd.f32 %v12275_v46, %v8692_v44  ;;  %v3845_v28 = vpop.f32.mrb[49].mxu1 }
 0x500   : > { %v3981_v24 = vadd.f32 %v3980_v35, %v12427_v4  ;;  %v4049_v32 = vadd.f32 %v4048_v13, %v4018_v61  ;;  %v9151_v53 = vadd.f32 %v12269_v14, %v3845_v28  ;;  %v8693_v3 = vpop.f32.mrb[50].mxu1 }
 0x501   : > { %v12455_v42 = vadd.f32 %v9148_v59, %v12311_v37  ;;  %v9154_v52 = vadd.f32 %v12277_v55, %v8693_v3  ;;  %v3848_v56 = vpop.f32.mrb[51].mxu1 }
 0x502   : > { %v4050_v46 = vadd.f32 %v4049_v32, %v4019_v20  ;;  %v12459_v26 = vadd.f32 %v9151_v53, %v12311_v37  ;;  %v3982_v9 = vadd.f32 %v3981_v24, %v12436_v36  ;;  %v9157_v29 = vadd.f32 %v12271_v27, %v3848_v56 }
 0x503   : > { %v12464_v14 = vadd.f32 %v9154_v52, %v12311_v37  ;;  %v4023_v28 = vmul.f32 %v12455_v42, %v12455_v42 }
 0x504   : > { %v3983_v12 = vadd.f32 %v3982_v9, %v12459_v26  ;;  %v4021_v47 = vmul.f32 %v12459_v26, %v12459_v26  ;;  %v4051_v33 = vadd.f32 %v4050_v46, %v4020_v34  ;;  %v12470_v55 = vadd.f32 %v9157_v29, %v12311_v37 }
 0x505   : > { %v4024_v29 = vmul.f32 %v12464_v14, %v12464_v14 }
 0x506   : > { %v4052_v13 = vadd.f32 %v4051_v33, %v4021_v47  ;;  %v3984_v35 = vadd.f32 %v3983_v12, %v12470_v55  ;;  %v4022_v61 = vmul.f32 %v12470_v55, %v12470_v55  ;;  %v8696_v44 = vpop.f32.mrb[52].mxu1 }
 0x507   : > { %v9160_v27 = vadd.f32 %v12287_v62, %v8696_v44  ;;  %v3861_v59 = vpop.f32.mrb[53].mxu1 }
 0x508   : > { %v3985_v20 = vadd.f32 %v3984_v35, %v12455_v42  ;;  %v4053_v24 = vadd.f32 %v4052_v13, %v4022_v61  ;;  %v9163_v32 = vadd.f32 %v12281_v31, %v3861_v59  ;;  %v8697_v53 = vpop.f32.mrb[54].mxu1 }
 0x509   : > { %v12481_v3 = vadd.f32 %v9160_v27, %v12311_v37  ;;  %v9166_v34 = vadd.f32 %v12289_v11, %v8697_v53  ;;  %v3864_v52 = vpop.f32.mrb[55].mxu1 }
 0x50a   : > { %v4054_v56 = vadd.f32 %v4053_v24, %v4023_v28  ;;  %v12485_v46 = vadd.f32 %v9163_v32, %v12311_v37  ;;  %v3986_v62 = vadd.f32 %v3985_v20, %v12464_v14  ;;  %v9169_v9 = vadd.f32 %v12283_v60, %v3864_v52 }
 0x50b   : > { %v12492_v31 = vadd.f32 %v9166_v34, %v12311_v37 }
 0x50c   : > { %v3987_v12 = vadd.f32 %v3986_v62, %v12485_v46  ;;  %v12496_v47 = vadd.f32 %v9169_v9, %v12311_v37  ;;  %v4025_v11 = vmul.f32 %v12485_v46, %v12485_v46  ;;  %v4055_v33 = vadd.f32 %v4054_v56, %v4024_v29 }
 0x50d   : > { %v4027_v29 = vmul.f32 %v12481_v3, %v12481_v3 }
 0x50e   : > { %v3988_v13 = vadd.f32 %v3987_v12, %v12496_v47  ;;  %v8700_v35 = vpop.f32.mrb[56].mxu1  ;;  %v4056_v28 = vadd.f32 %v4055_v33, %v4025_v11  ;;  %v4026_v53 = vmul.f32 %v12496_v47, %v12496_v47 }
 0x50f   : > { %v9172_v60 = vadd.f32 %v12299_v23, %v8700_v35  ;;  %v3877_v61 = vpop.f32.mrb[57].mxu1 }
 0x510   : > { %v3989_v44 = vadd.f32 %v3988_v13, %v12481_v3  ;;  %v9175_v27 = vadd.f32 %v12293_v0, %v3877_v61  ;;  %v8701_v59 = vpop.f32.mrb[58].mxu1 }
 0x511   : > { %v12505_v20 = vadd.f32 %v9172_v60, %v12311_v37  ;;  %v9178_v24 = vadd.f32 %v12301_v51, %v8701_v59  ;;  %v3880_v32 = vpop.f32.mrb[59].mxu1  ;;  %v4057_v51 = vadd.f32 %v4056_v28, %v4026_v53 }
 0x512   : > { %v12511_v34 = vadd.f32 %v9175_v27, %v12311_v37  ;;  %v3990_v23 = vadd.f32 %v3989_v44, %v12492_v31  ;;  %v9181_v52 = vadd.f32 %v12295_v17, %v3880_v32  ;;  %v4028_v17 = vmul.f32 %v12492_v31, %v12492_v31 }
 0x513   : > { %v12516_v0 = vadd.f32 %v9178_v24, %v12311_v37  ;;  %v4058_v11 = vadd.f32 %v4057_v51, %v4027_v29  ;;  %v4031_v53 = vmul.f32 %v12505_v20, %v12505_v20  ;;  %v14615_v51 = vmov 0.0|0.0   ;;  %v14616_v29 = vld [vmem:[#allocation16_spill] sm:$0xff] }
 0x514   : > { %v3991_v56 = vadd.f32 %v3990_v23, %v12511_v34  ;;  %v12520_v62 = vadd.f32 %v9181_v52, %v12311_v37  ;;  %v4029_v35 = vmul.f32 %v12511_v34, %v12511_v34  ;;  %v14613_v23 = vld [vmem:[#allocation15_spill] sm:$0xff]  ;;  %v14614_v52 = vmov 0.0  }
 0x515   : > { %v4059_v37 = vadd.f32 %v4058_v11, %v4028_v17  ;;  %v14617_v11 = vld [vmem:[#allocation17_spill] sm:$0xff]  ;;  %v14618_v17 = vld [vmem:[#allocation18_spill] sm:$0xff] }
 0x516   : > { %v3992_v9 = vadd.f32 %v3991_v56, %v12520_v62  ;;  %v4030_v27 = vmul.f32 %v12520_v62, %v12520_v62 }
 0x517   : > { %v4060_v44 = vadd.f32 %v4059_v37, %v4029_v35  ;;  %v14619_v35 = vld [vmem:[#allocation19_spill] sm:$0xff] }
 0x518   : > { %v3993_v12 = vadd.f32 %v3992_v9, %v12505_v20  ;;  %v4032_v9 = vmul.f32 %v12516_v0, %v12516_v0 }
 0x519   : > { %v4061_v24 = vadd.f32 %v4060_v44, %v4030_v27  ;;  %v14621_v44 = vld [vmem:[#allocation21_spill] sm:$0xff] }
 0x51a   : > { %v3994_v33 = vadd.f32 %v3993_v12, %v12516_v0 }
 0x51b   : > { %v4062_v56 = vadd.f32 %v4061_v24, %v4031_v53  ;;  %v14623_v24 = vld [vmem:[#allocation23_spill] sm:$0xff] }
 0x51c   : > { %v3995_v13 = vrot.slane %v3994_v33, 4 }
 0x51d   : > { %v4063_v12 = vadd.f32 %v4062_v56, %v4032_v9 }
 0x51e   : > { %v3996_v60 = vadd.f32 %v3995_v13, %v3994_v33 }
 0x51f   : > { %v4064_v33 = vrot.slane %v4063_v12, 4 }
 0x520   : > { %v3997_v61 = vrot.slane %v3996_v60, 2 }
 0x521   : > { %v4065_v13 = vadd.f32 %v4064_v33, %v4063_v12 }
 0x522   : > { %v3998_v59 = vadd.f32 %v3997_v61, %v3996_v60  ;;  %v14620_v60 = vld [vmem:[#allocation20_spill] sm:$0xff] }
 0x523   : > { %v4066_v37 = vrot.slane %v4065_v13, 2 }
 0x524   : > { %v3999_v28 = vrot.slane %v3998_v59, 1 }
 0x525   : > { %v4067_v61 = vadd.f32 %v4066_v37, %v4065_v13 }
 0x526   : > { %v4000_v32 = vadd.f32 %v3999_v28, %v3998_v59  ;;  %v14622_v59 = vld [vmem:[#allocation22_spill] sm:$0xff] }
 0x527   : > { %v4068_v27 = vrot.slane %v4067_v61, 1 }
 0x528   : > { %8735 = vmatmul.mubr.f32.vlgmr.msra.gmra.mrb[112].mxu0 %v4000_v32  ;;  %v14624_v32 = vld [vmem:[#allocation24_spill] sm:$0xff] }
 0x529   : > { %9036 = vmatpush3.bf16.msra.mxu0 %v14613_v23  ;;  %8769 = vmatprep.mubr.msk.f32.mxu0 %vm14580_vm15, %v14614_v52  ;;  %v4069_v28 = vadd.f32 %v4068_v27, %v4067_v61  ;;  %v9557_v61 = vld [vmem:[#allocation8 + $0x140] sm:$0xff]   ;;  %v9561_v27 = vld [vmem:[#allocation8 + $0xc8] sm:$0xff]  }
 0x52a   : > { %9037 = vmatprep.subr.bf16.mxu0 %v14615_v51 }
 0x52d   : > { %9039 = vmatpush3.bf16.msra.mxu0 %v14616_v29 }
 0x52e   : > { %9040 = vmatprep.subr.bf16.mxu0 %v14615_v51 }
 0x531   : > { %9042 = vmatpush3.bf16.msra.mxu0 %v14617_v11 }
 0x532   : > { %9043 = vmatprep.subr.bf16.mxu0 %v14615_v51 }
 0x535   : > { %9045 = vmatpush3.bf16.msra.mxu0 %v14618_v17 }
 0x536   : > { %9046 = vmatprep.subr.bf16.mxu0 %v14615_v51 }
 0x539   : > { %9048 = vmatpush3.bf16.msra.mxu0 %v14619_v35 }
 0x53a   : > { %9049 = vmatprep.subr.bf16.mxu0 %v14615_v51 }
 0x53d   : > { %9051 = vmatpush3.bf16.msra.mxu0 %v14620_v60  ;;  %v9556_v60 = vld [vmem:[#allocation8 + $0x100] sm:$0xff]  }
 0x53e   : > { %9052 = vmatprep.subr.bf16.mxu0 %v14615_v51  ;;  %8039 = vmatprep.subr.bf16.mxu1 %v9556_v60  ;;  %v9577_v60 = vld [vmem:[#allocation8 + $0x138] sm:$0xff]  }
 0x541   : > { %9054 = vmatpush3.bf16.msra.mxu0 %v14621_v44  ;;  %v9560_v44 = vld [vmem:[#allocation8 + $0x148] sm:$0xff]  }
 0x542   : > { %9055 = vmatprep.subr.bf16.mxu0 %v14615_v51 }
 0x545   : > { %9057 = vmatpush3.bf16.msra.mxu0 %v14622_v59  ;;  %v9562_v59 = vld [vmem:[#allocation8 + $0x110] sm:$0xff]  }
 0x546   : > { %9058 = vmatprep.subr.bf16.mxu0 %v14615_v51 }
 0x548   : > { %8770 = vmatmul.mubr.f32.vlgmr.msra.gmra.mrb[114].mxu0 %v4069_v28  ;;  %v9563_v28 = vld [vmem:[#allocation8 + $0x150] sm:$0xff]  }
 0x549   : > { %9060 = vmatpush3.bf16.msra.mxu0 %v14623_v24  ;;  %8780 = vmatprep.mubr.msk.f32.mxu0 %vm14580_vm15, %v14614_v52 }
 0x54a   : > { %9061 = vmatprep.subr.bf16.mxu0 %v14615_v51 }
 0x54d   : > { %9063 = vmatpush3.bf16.msra.mxu0 %v14624_v32 }
 0x54e   : > { %9064 = vmatprep.subr.bf16.mxu0 %v14615_v51 }
 0x5fb   : > { %v4136_v53 = vpop.f32.mrb[112].mxu0 }
 0x5fc   : > { %v4140_v23 = vmul.f32 0.00390625, %v4136_v53  ;;  %v8736_v56 = vpop.f32.mrb[113].mxu0  ;;  %v9566_v53 = vld [vmem:[#allocation8 + $0x158] sm:$0xff]  }
 0x5fd   : > { %v9568_v56 = vld [vmem:[#allocation8 + $0x120] sm:$0xff]  }
 0x5fe   : > { %8781 = vmatmul.mubr.msk.f32.vlgmr.msra.gmra.mrb[116].mxu0 %vm14625_vm13, %v4140_v23  ;;  %v4212_v29 = vmul.f32 %v4140_v23, %v4140_v23  ;;  %v9567_v23 = vld [vmem:[#allocation8 + $0xd8] sm:$0xff]  }
 0x5ff   : > { %9066 = vmatpush3.bf16.msra.mxu0 %v14623_v24  ;;  %8791 = vmatprep.mubr.msk.f32.mxu0 %vm14580_vm15, %v14614_v52  ;;  %v9558_v52 = vld [vmem:[#allocation8 + $0xc0] sm:$0xff]   ;;  %v9564_v24 = vld [vmem:[#allocation8 + $0xd0] sm:$0xff]  }
 0x600   : > { %9067 = vmatprep.subr.bf16.mxu0 %v14615_v51  ;;  %8040 = vmatpush3.bf16.msra.mxu1 %v9558_v52  ;;  %v9559_v51 = vld [vmem:[#allocation8 + $0x108] sm:$0xff]   ;;  %v9579_v52 = vld [vmem:[#allocation8 + $0xf8] sm:$0xff]  }
 0x601   : > { %8041 = vmatprep.subr.bf16.mxu1 %v9559_v51  ;;  %v9580_v51 = vld [vmem:[#allocation8 + $0x40] sm:$0xff]  }
 0x603   : > { %9069 = vmatpush3.bf16.msra.mxu0 %v14624_v32  ;;  %v9565_v32 = vld [vmem:[#allocation8 + $0x118] sm:$0xff]  }
 0x604   : > { %8794 = vmatprep.subr.bf16.mxu0 %v9557_v61  ;;  %8042 = vmatpush3.bf16.msra.mxu1 %v9561_v27 }
 0x605   : > { %8043 = vmatprep.subr.bf16.mxu1 %v9562_v59 }
 0x608   : > { %8044 = vmatpush3.bf16.msra.mxu1 %v9564_v24  ;;  %v3963_v24 = vld [vmem:[%s14628_s19] sm:$0x1]  ;;  %s10115_s19 = smov [#allocation9]  }
 0x609   : > { %8045 = vmatprep.subr.bf16.mxu1 %v9565_v32  ;;  %s10035_s29 = sshll.u32 %s10115_s19, 4  ;;  %s10036_s29 = int_to_ptr.vmem [resolvable:$false] %s10035_s29 }
 0x60a   : > { %s10037_s20 = scalar_lea.vmem %s10036_s29, 8192  ;;  %p10038_p9 = scmp.lt.s32.totalorder %s13911_s8, %s10036_s29 }
 0x60b   : > { %p10039_p12 = scmp.lt.s32.totalorder %s10037_s20, %s10031_s6 }
 0x60c   : > { %8046 = vmatpush3.bf16.msra.mxu1 %v9567_v23 }
 0x60d   : > { %8047 = vmatprep.subr.bf16.mxu1 %v9568_v56  ;;  %p10040_p2 = por %p10039_p12, %p10038_p9 }
 0x60f   : > { %p10041_p13 = pnand %p10040_p2, %p10034_p7 }
 0x61b   : > { %v4207_v9 = vpop.f32.mrb[114].mxu0 }
 0x61c   : > { %v4211_v12 = vmul.f32 0.00390625, %v4207_v9  ;;  %v8771_v11 = vpop.f32.mrb[115].mxu0  ;;  %v9569_v9 = vld [vmem:[#allocation8 + $0x160] sm:$0xff]  }
 0x61d   : > { %v9572_v11 = vld [vmem:[#allocation8 + $0x168] sm:$0xff]  }
 0x61e   : > { %v4213_v33 = vsub.f32 %v4211_v12, %v4212_v29  ;;  %v9570_v29 = vld [vmem:[#allocation8 + $0xe0] sm:$0xff]   ;;  %v9571_v12 = vld [vmem:[#allocation8 + $0x128] sm:$0xff]  }
 0x61f   : > { %8048 = vmatpush3.bf16.msra.mxu1 %v9570_v29 }
 0x620   : > { %v4214_v17 = vadd.f32 1e-05, %v4213_v33  ;;  %v9573_v33 = vld [vmem:[#allocation8 + $0xe8] sm:$0xff]   ;;  %8049 = vmatprep.subr.bf16.mxu1 %v9571_v12 }
 0x622   : > { %9762 = vrsqrt.f32 %v4214_v17  ;;  %v9574_v17 = vld [vmem:[#allocation8 + $0x130] sm:$0xff]  }
 0x623   : > { %8050 = vmatpush3.bf16.msra.mxu1 %v9573_v33 }
 0x624   : > { %8051 = vmatprep.subr.bf16.mxu1 %v9574_v17 }
 0x62c   : > { %v9763_v13 = vpop.eup %9762 }
 0x62d   : > { %8792 = vmatmul.mubr.msk.f32.vlgmr.msra.gmra.mrb[118].mxu0 %vm14626_vm9, %v9763_v13  ;;  %v9575_v13 = vld [vmem:[#allocation8 + $0x170] sm:$0xff]  }
 0x62e   : > { %8795 = vmatpush3.bf16.msra.mxu0 %v9557_v61  ;;  %v9578_v61 = vld [vmem:[#allocation8 + $0x178] sm:$0xff]  }
 0x62f   : > { %8796 = vmatprep.subr.bf16.mxu0 %v9560_v44 }
 0x632   : > { %8797 = vmatpush3.bf16.msra.mxu0 %v9560_v44  ;;  %v3962_v44 = vld [vmem:[%s14627_s0] sm:$0x1]  ;;  %s14797_s0 = sld [smem:[#allocation81_spill]] }
 0x633   : > { %8798 = vmatprep.subr.bf16.mxu0 %v9563_v28 }
 0x636   : > { %8799 = vmatpush3.bf16.msra.mxu0 %v9563_v28 }
 0x637   : > { %8800 = vmatprep.subr.bf16.mxu0 %v9566_v53 }
 0x638   : > { %s13909_s17 = scalar_lea.hbm %s14797_s0, %s6981_s25 }
 0x63a   : > { %8801 = vmatpush3.bf16.msra.mxu0 %v9566_v53 }
 0x63b   : > { %8802 = vmatprep.subr.bf16.mxu0 %v9569_v9 }
 0x63e   : > { %8803 = vmatpush3.bf16.msra.mxu0 %v9569_v9 }
 0x63f   : > { %8804 = vmatprep.subr.bf16.mxu0 %v9572_v11 }
 0x642   : > { %8805 = vmatpush3.bf16.msra.mxu0 %v9572_v11 }
 0x643   : > { %8806 = vmatprep.subr.bf16.mxu0 %v9575_v13 }
 0x646   : > { %8807 = vmatpush3.bf16.msra.mxu0 %v9575_v13 }
 0x647   : > { %8808 = vmatprep.subr.bf16.mxu0 %v9578_v61 }
 0x64a   : > { %8809 = vmatpush3.bf16.msra.mxu0 %v9578_v61 }
 0x64b   : > { %8175 = vmatprep.subr.bf16.mxu0 %v9580_v51 }
 0x6d1   : > { %v12568_v35 = vpop.f32.mrb[116].mxu0 }
 0x6d2   : > { %v8782_v37 = vpop.f32.mrb[117].mxu0 }
 0x6d3   : > { %v9576_v37 = vld [vmem:[#allocation8 + $0xf0] sm:$0xff]  }
 0x6d4   : > { %8052 = vmatpush3.bf16.msra.mxu1 %v9576_v37 }
 0x6d5   : > { %8053 = vmatprep.subr.bf16.mxu1 %v9577_v60 }
 0x6d8   : > { %8054 = vmatpush3.bf16.msra.mxu1 %v9579_v52 }
 0x700   : > { %v4358_v27 = vpop.f32.mrb[118].mxu0 }
 0x701   : > { %v4362_v59 = vmul.f32 %v4358_v27, %v3962_v44  ;;  %v8793_v28 = vpop.f32.mrb[119].mxu0 }
 0x703   : > { %v4363_v32 = vmul.f32 %v4362_v59, %v12568_v35  ;;  %v4368_v53 = vrot.slane %v4362_v59, %v14612_v40 }
 0x705   : > { %v4364_v23 = vsub.f32 %v3963_v24, %v4363_v32  ;;  %v4369_v56 = vmul.f32 %v4368_v53, %v12320_v8  ;;  %v4370_v9 = vmul.f32 %v4368_v53, %v12327_v15  ;;  %v4371_v29 = vmul.f32 %v4368_v53, %v12316_v5 }
 0x706   : > { %v4372_v12 = vmul.f32 %v4368_v53, %v12324_v50  ;;  %v4373_v11 = vmul.f32 %v4368_v53, %v12347_v58  ;;  %v4374_v33 = vmul.f32 %v4368_v53, %v12358_v6  ;;  %v4375_v17 = vmul.f32 %v4368_v53, %v12343_v57 }
 0x707   : > { %v4405_v13 = vrot.slane %v4364_v23, %v14612_v40  ;;  %v4376_v35 = vmul.f32 %v4368_v53, %v12352_v38  ;;  %v4377_v37 = vmul.f32 %v4368_v53, %v12375_v48  ;;  %v4378_v8 = vmul.f32 %v4368_v53, %v12386_v49 }
 0x708   : > { %v4379_v15 = vmul.f32 %v4368_v53, %v12371_v2  ;;  %v4380_v5 = vmul.f32 %v4368_v53, %v12380_v1  ;;  %v4381_v50 = vmul.f32 %v4368_v53, %v12403_v22  ;;  %v4382_v58 = vmul.f32 %v4368_v53, %v12414_v10 }
 0x709   : > { %v4383_v6 = vmul.f32 %v4368_v53, %v12399_v41  ;;  %v4384_v57 = vmul.f32 %v4368_v53, %v12408_v18  ;;  %v4385_v40 = vmul.f32 %v4368_v53, %v12431_v54  ;;  %v4386_v38 = vmul.f32 %v4368_v53, %v12442_v63 }
 0x70a   : > { %v4387_v48 = vmul.f32 %v4368_v53, %v12427_v4  ;;  %v4388_v49 = vmul.f32 %v4368_v53, %v12436_v36  ;;  %v4389_v2 = vmul.f32 %v4368_v53, %v12459_v26  ;;  %v4390_v1 = vmul.f32 %v4368_v53, %v12470_v55 }
 0x70b   : > { %v4391_v22 = vmul.f32 %v4368_v53, %v12455_v42  ;;  %v4392_v10 = vmul.f32 %v4368_v53, %v12464_v14  ;;  %v4393_v41 = vmul.f32 %v4368_v53, %v12485_v46  ;;  %v4394_v18 = vmul.f32 %v4368_v53, %v12496_v47 }
 0x70c   : > { %v4395_v54 = vmul.f32 %v4368_v53, %v12481_v3  ;;  %v4396_v63 = vmul.f32 %v4368_v53, %v12492_v31  ;;  %v4397_v4 = vmul.f32 %v4368_v53, %v12511_v34  ;;  %v4398_v36 = vmul.f32 %v4368_v53, %v12520_v62 }
 0x70d   : > { %v4399_v26 = vmul.f32 %v4368_v53, %v12505_v20  ;;  %v4400_v55 = vmul.f32 %v4368_v53, %v12516_v0  ;;  %v12611_v60 = vadd.f32 %v4405_v13, %v4369_v56  ;;  %v12613_v42 = vadd.f32 %v4405_v13, %v4370_v9 }
 0x70e   : > { %v12615_v14 = vadd.f32 %v4405_v13, %v4371_v29  ;;  %v12617_v46 = vadd.f32 %v4405_v13, %v4372_v12  ;;  %v12619_v47 = vadd.f32 %v4405_v13, %v4373_v11  ;;  %v12621_v3 = vadd.f32 %v4405_v13, %v4374_v33 }
 0x70f   : > { %v12623_v31 = vadd.f32 %v4405_v13, %v4375_v17  ;;  %v12625_v34 = vadd.f32 %v4405_v13, %v4376_v35  ;;  %v12627_v62 = vadd.f32 %v4405_v13, %v4377_v37  ;;  %v12629_v20 = vadd.f32 %v4405_v13, %v4378_v8 }
 0x710   : > { %v12631_v0 = vadd.f32 %v4405_v13, %v4379_v15  ;;  %v12633_v61 = vadd.f32 %v4405_v13, %v4380_v5  ;;  %v12635_v52 = vadd.f32 %v4405_v13, %v4381_v50  ;;  %v12637_v51 = vadd.f32 %v4405_v13, %v4382_v58 }
 0x711   : > { %v12639_v44 = vadd.f32 %v4405_v13, %v4383_v6  ;;  %v12641_v27 = vadd.f32 %v4405_v13, %v4384_v57  ;;  %v12643_v59 = vadd.f32 %v4405_v13, %v4385_v40  ;;  %v12645_v28 = vadd.f32 %v4405_v13, %v4386_v38 }
 0x712   : > { %v12647_v24 = vadd.f32 %v4405_v13, %v4387_v48  ;;  %v12649_v32 = vadd.f32 %v4405_v13, %v4388_v49  ;;  %v12651_v53 = vadd.f32 %v4405_v13, %v4389_v2  ;;  %v12653_v23 = vadd.f32 %v4405_v13, %v4390_v1 }
 0x713   : > { %v12655_v56 = vadd.f32 %v4405_v13, %v4391_v22  ;;  %v12657_v9 = vadd.f32 %v4405_v13, %v4392_v10  ;;  %v12659_v29 = vadd.f32 %v4405_v13, %v4393_v41  ;;  %v12661_v12 = vadd.f32 %v4405_v13, %v4394_v18 }
 0x714   : > { %v12663_v11 = vadd.f32 %v4405_v13, %v4395_v54  ;;  %v12665_v33 = vadd.f32 %v4405_v13, %v4396_v63  ;;  %v12667_v17 = vadd.f32 %v4405_v13, %v4397_v4  ;;  %v12669_v35 = vadd.f32 %v4405_v13, %v4398_v36 }
 0x715   : > { %14629 = vst [vmem:[#allocation49_spill] sm:$0xff] %v12657_v9  ;;  %14630 = vst [vmem:[#allocation51_spill] sm:$0xff] %v12659_v29  ;;  %v12671_v37 = vadd.f32 %v4405_v13, %v4399_v26  ;;  %v12673_v8 = vadd.f32 %v4405_v13, %v4400_v55  ;;  %v4439_v15 = vsub.f32 0.0, %v12611_v60  ;;  %v4440_v5 = vsub.f32 0.0, %v12613_v42 }
 0x716   : > { %14631 = vst [vmem:[#allocation53_spill] sm:$0xff] %v12661_v12  ;;  %14632 = vst [vmem:[#allocation56_spill] sm:$0xff] %v12663_v11  ;;  %v4441_v50 = vsub.f32 0.0, %v12615_v14  ;;  %v4442_v58 = vsub.f32 0.0, %v12617_v46  ;;  %v4443_v6 = vsub.f32 0.0, %v12619_v47  ;;  %v4444_v57 = vsub.f32 0.0, %v12621_v3 }
 0x717   : > { %14633 = vst [vmem:[#allocation58_spill] sm:$0xff] %v12665_v33  ;;  %14634 = vst [vmem:[#allocation29_spill] sm:$0xff] %v12667_v17  ;;  %v4445_v40 = vsub.f32 0.0, %v12623_v31  ;;  %v4471_v38 = vmul.f32 1.442695, %v4439_v15  ;;  %v4446_v49 = vsub.f32 0.0, %v12625_v34 }
 0x718   : > { %14635 = vst [vmem:[#allocation60_spill] sm:$0xff] %v12669_v35  ;;  %14636 = vst [vmem:[#allocation65_spill] sm:$0xff] %v12671_v37  ;;  %v4473_v48 = vmul.f32 1.442695, %v4440_v5  ;;  %v4475_v13 = vmul.f32 1.442695, %v4441_v50 }
 0x719   : > { %14637 = vst [vmem:[#allocation68_spill] sm:$0xff] %v12673_v8  ;;  %v4477_v2 = vmul.f32 1.442695, %v4442_v58  ;;  %v4447_v1 = vsub.f32 0.0, %v12627_v62  ;;  %9764 = vpow2.f32 %v4471_v38  ;;  %v4479_v22 = vmul.f32 1.442695, %v4443_v6 }
 0x71a   : > { %v4448_v10 = vsub.f32 0.0, %v12629_v20  ;;  %9766 = vpow2.f32 %v4473_v48  ;;  %v4481_v41 = vmul.f32 1.442695, %v4444_v57  ;;  %v4449_v18 = vsub.f32 0.0, %v12631_v0 }
 0x71b   : > { %9768 = vpow2.f32 %v4475_v13  ;;  %v4483_v54 = vmul.f32 1.442695, %v4445_v40  ;;  %v4450_v63 = vsub.f32 0.0, %v12633_v61  ;;  %v4485_v4 = vmul.f32 1.442695, %v4446_v49 }
 0x71c   : > { %9770 = vpow2.f32 %v4477_v2  ;;  %v4451_v36 = vsub.f32 0.0, %v12635_v52  ;;  %v4487_v26 = vmul.f32 1.442695, %v4447_v1  ;;  %v4452_v55 = vsub.f32 0.0, %v12637_v51  ;;  %v9596_v1 = vld [vmem:[#allocation8 + $0x1c0] sm:$0xff]  }
 0x71d   : > { %9772 = vpow2.f32 %v4479_v22  ;;  %v4489_v15 = vmul.f32 1.442695, %v4448_v10  ;;  %v4453_v5 = vsub.f32 0.0, %v12639_v44  ;;  %v4491_v50 = vmul.f32 1.442695, %v4449_v18  ;;  %8311 = vmatprep.subr.bf16.mxu1 %v9596_v1 }
 0x71e   : > { %9774 = vpow2.f32 %v4481_v41  ;;  %v4454_v58 = vsub.f32 0.0, %v12641_v27  ;;  %v4493_v6 = vmul.f32 1.442695, %v4450_v63  ;;  %v4455_v57 = vsub.f32 0.0, %v12643_v59 }
 0x71f   : > { %9776 = vpow2.f32 %v4483_v54  ;;  %v4495_v40 = vmul.f32 1.442695, %v4451_v36  ;;  %v4456_v38 = vsub.f32 0.0, %v12645_v28  ;;  %v4497_v48 = vmul.f32 1.442695, %v4452_v55 }
 0x720   : > { %9778 = vpow2.f32 %v4485_v4  ;;  %v4457_v13 = vsub.f32 0.0, %v12647_v24  ;;  %v4499_v2 = vmul.f32 1.442695, %v4453_v5  ;;  %v4458_v10 = vsub.f32 0.0, %v12649_v32 }
 0x721   : > { %9780 = vpow2.f32 %v4487_v26  ;;  %v4501_v41 = vmul.f32 1.442695, %v4454_v58  ;;  %v4459_v54 = vsub.f32 0.0, %v12651_v53  ;;  %v4503_v63 = vmul.f32 1.442695, %v4455_v57 }
 0x722   : > { %9782 = vpow2.f32 %v4489_v15  ;;  %v4460_v36 = vsub.f32 0.0, %v12653_v23  ;;  %v4505_v26 = vmul.f32 1.442695, %v4456_v38  ;;  %v4461_v15 = vsub.f32 0.0, %v12655_v56 }
 0x723   : > { %v12693_v49 = vpop.eup %9764  ;;  %9784 = vpow2.f32 %v4491_v50  ;;  %v4507_v5 = vmul.f32 1.442695, %v4457_v13  ;;  %v4462_v58 = vsub.f32 0.0, %v12657_v9  ;;  %v4511_v1 = vmul.f32 1.442695, %v4459_v54 }
 0x724   : > { %v12696_v22 = vpop.eup %9766  ;;  %9786 = vpow2.f32 %v4493_v6  ;;  %v4509_v6 = vmul.f32 1.442695, %v4458_v10  ;;  %v4464_v38 = vsub.f32 0.0, %v12661_v12  ;;  %v4515_v13 = vmul.f32 1.442695, %v4461_v15 }
 0x725   : > { %v12699_v18 = vpop.eup %9768  ;;  %9788 = vpow2.f32 %v4495_v40  ;;  %v4463_v40 = vsub.f32 0.0, %v12659_v29  ;;  %v4466_v45 = vsub.f32 0.0, %v12665_v33  ;;  %v4517_v10 = vmul.f32 1.442695, %v4462_v58 }
 0x726   : > { %v12702_v4 = vpop.eup %9770  ;;  %9790 = vpow2.f32 %v4497_v48  ;;  %v4513_v48 = vmul.f32 1.442695, %v4460_v36  ;;  %v4467_v39 = vsub.f32 0.0, %v12667_v17  ;;  %v4468_v43 = vsub.f32 0.0, %v12669_v35 }
 0x727   : > { %v12705_v55 = vpop.eup %9772  ;;  %9792 = vpow2.f32 %v4499_v2  ;;  %v4465_v2 = vsub.f32 0.0, %v12663_v11  ;;  %v4519_v54 = vmul.f32 1.442695, %v4463_v40  ;;  %v4521_v36 = vmul.f32 1.442695, %v4464_v38 }
 0x728   : > { %v12708_v50 = vpop.eup %9774  ;;  %9794 = vpow2.f32 %v4501_v41  ;;  %v4469_v30 = vsub.f32 0.0, %v12671_v37  ;;  %v4470_v33 = vsub.f32 0.0, %v12673_v8  ;;  %v4525_v58 = vmul.f32 1.442695, %v4466_v45 }
 0x729   : > { %v9777_v57 = vpop.eup %9776  ;;  %9796 = vpow2.f32 %v4503_v63  ;;  %v4523_v15 = vmul.f32 1.442695, %v4465_v2  ;;  %v4527_v17 = vmul.f32 1.442695, %v4467_v39  ;;  %v4529_v40 = vmul.f32 1.442695, %v4468_v43 }
 0x72a   : > { %v9779_v21 = vpop.eup %9778  ;;  %9798 = vpow2.f32 %v4505_v26  ;;  %v4533_v35 = vmul.f32 1.442695, %v4470_v33  ;;  %v4535_v2 = vadd.f32 1.0, %v12693_v49  ;;  %v4536_v45 = vadd.f32 1.0, %v12696_v22 }
 0x72b   : > { %v9781_v16 = vpop.eup %9780  ;;  %9800 = vpow2.f32 %v4507_v5  ;;  %v4537_v39 = vadd.f32 1.0, %v12699_v18  ;;  %v4538_v43 = vadd.f32 1.0, %v12702_v4 }
 0x72c   : > { %v9783_v25 = vpop.eup %9782  ;;  %9802 = vpow2.f32 %v4509_v6  ;;  %v4543_v18 = vadd.f32 1.0, %v9781_v16 }
 0x72d   : > { %v9785_v41 = vpop.eup %9784  ;;  %9804 = vpow2.f32 %v4511_v1 }
 0x72e   : > { %v9787_v63 = vpop.eup %9786  ;;  %9806 = vpow2.f32 %v4513_v48  ;;  %v4531_v48 = vmul.f32 1.442695, %v4469_v30  ;;  %v4545_v4 = vadd.f32 1.0, %v9785_v41 }
 0x72f   : > { %v9789_v26 = vpop.eup %9788  ;;  %9808 = vpow2.f32 %v4515_v13  ;;  %v4546_v8 = vadd.f32 1.0, %v9787_v63 }
 0x730   : > { %v9791_v5 = vpop.eup %9790  ;;  %9810 = vpow2.f32 %v4517_v10  ;;  %v4547_v12 = vadd.f32 1.0, %v9789_v26 }
 0x731   : > { %v9793_v6 = vpop.eup %9792  ;;  %9812 = vpow2.f32 %v4519_v54 }
 0x732   : > { %v9795_v1 = vpop.eup %9794  ;;  %9814 = vpow2.f32 %v4521_v36  ;;  %v4539_v36 = vadd.f32 1.0, %v12705_v55  ;;  %v4549_v29 = vadd.f32 1.0, %v9793_v6 }
 0x733   : > { %v9797_v11 = vpop.eup %9796  ;;  %9816 = vpow2.f32 %v4523_v15  ;;  %v4541_v15 = vadd.f32 1.0, %v9777_v57 }
 0x734   : > { %v9799_v38 = vpop.eup %9798  ;;  %9818 = vpow2.f32 %v4525_v58  ;;  %v4542_v58 = vadd.f32 1.0, %v9779_v21  ;;  %v4551_v57 = vadd.f32 1.0, %v9797_v11 }
 0x735   : > { %v9801_v37 = vpop.eup %9800  ;;  %9820 = vpow2.f32 %v4527_v17  ;;  %v4540_v17 = vadd.f32 1.0, %v12708_v50  ;;  %v4550_v50 = vadd.f32 1.0, %v9795_v1 }
 0x736   : > { %v9803_v13 = vpop.eup %9802  ;;  %9822 = vpow2.f32 %v4529_v40  ;;  %v4553_v9 = vadd.f32 1.0, %v9801_v37 }
 0x737   : > { %v9805_v10 = vpop.eup %9804  ;;  %9824 = vpow2.f32 %v4531_v48  ;;  %v4544_v48 = vadd.f32 1.0, %v9783_v25 }
 0x738   : > { %v9807_v54 = vpop.eup %9806  ;;  %9826 = vpow2.f32 %v4533_v35  ;;  %v4555_v16 = vadd.f32 1.0, %v9805_v10 }
 0x739   : > { %v9809_v30 = vpop.eup %9808  ;;  %9828 = vrcp.f32 %v4535_v2  ;;  %v4548_v2 = vadd.f32 1.0, %v9791_v5  ;;  %v12725_v25 = vadd.f32 1.0, %v9807_v54 }
 0x73a   : > { %v9811_v33 = vpop.eup %9810  ;;  %9830 = vrcp.f32 %v4536_v45  ;;  %v12727_v63 = vadd.f32 1.0, %v9809_v30 }
 0x73b   : > { %v9813_v49 = vpop.eup %9812  ;;  %9832 = vrcp.f32 %v4537_v39  ;;  %v4552_v39 = vadd.f32 1.0, %v9799_v38  ;;  %v12729_v26 = vadd.f32 1.0, %v9811_v33 }
 0x73c   : > { %v9815_v22 = vpop.eup %9814  ;;  %9834 = vrcp.f32 %v4538_v43  ;;  %v4554_v43 = vadd.f32 1.0, %v9803_v13  ;;  %v12731_v5 = vadd.f32 1.0, %v9813_v49 }
 0x73d   : > { %v9817_v40 = vpop.eup %9816  ;;  %9836 = vrcp.f32 %v4539_v36  ;;  %v12733_v1 = vadd.f32 1.0, %v9815_v22 }
 0x73e   : > { %v9819_v35 = vpop.eup %9818  ;;  %9838 = vrcp.f32 %v4540_v17  ;;  %v12735_v11 = vadd.f32 1.0, %v9817_v40 }
 0x73f   : > { %v9821_v55 = vpop.eup %9820  ;;  %9840 = vrcp.f32 %v4541_v15  ;;  %v12737_v37 = vadd.f32 1.0, %v9819_v35 }
 0x740   : > { %v9823_v45 = vpop.eup %9822  ;;  %9842 = vrcp.f32 %v4542_v58  ;;  %v12739_v13 = vadd.f32 1.0, %v9821_v55 }
 0x741   : > { %v9825_v21 = vpop.eup %9824  ;;  %9844 = vrcp.f32 %v4543_v18  ;;  %v12741_v10 = vadd.f32 1.0, %v9823_v45 }
 0x742   : > { %v9827_v41 = vpop.eup %9826  ;;  %9846 = vrcp.f32 %v4544_v48  ;;  %v12746_v36 = vadd.f32 1.0, %v9825_v21 }
 0x743   : > { %v9829_v6 = vpop.eup %9828  ;;  %9848 = vrcp.f32 %v4545_v4  ;;  %v12748_v33 = vadd.f32 1.0, %v9827_v41  ;;  %v14638_v4 = vld [vmem:[#allocation26_spill] sm:$0xff] }
 0x744   : > { %v9831_v38 = vpop.eup %9830  ;;  %9850 = vrcp.f32 %v4546_v8  ;;  %v12744_v54 = vmul.f32 %v9829_v6, %v12611_v60  ;;  %vm14639_vm15 = vcmp.lt.s32.totalorder %v14638_v4, 1  ;;  %vm14640_vm9 = vcmp.lt.s32.totalorder %v14638_v4, 7 }
 0x745   : > { %v9833_v30 = vpop.eup %9832  ;;  %9852 = vrcp.f32 %v4547_v12  ;;  %v12751_v17 = vmul.f32 %v9831_v38, %v12613_v42  ;;  %vm14641_vm13 = vmmov %vm14640_vm9 }
 0x746   : > { %v9835_v49 = vpop.eup %9834  ;;  %v12754_v15 = vmul.f32 %v9833_v30, %v12615_v14  ;;  %9854 = vrcp.f32 %v4548_v2  ;;  %v14209_v22 = vrot.slane %v12744_v54, 7  ;;  %v14208_v8 = vrot.slane %v12744_v54, 1 }
 0x747   : > { %v9837_v60 = vpop.eup %9836  ;;  %9856 = vrcp.f32 %v4549_v29  ;;  %v12760_v58 = vpack.c.bf16 %v12751_v17, %v12744_v54  ;;  %v4649_v12 = vrot.slane %v12751_v17, 7  ;;  %v4761_v42 = vrot.slane %v12751_v17, 1 }
 0x748   : > { %v9839_v40 = vpop.eup %9838  ;;  %v12765_v18 = vmul.f32 %v9837_v60, %v12619_v47  ;;  %9858 = vrcp.f32 %v4550_v50  ;;  %v4762_v14 = vrot.slane %v12754_v15, 1  ;;  %v12769_v48 = vmul.f32 %v9835_v49, %v12617_v46 }
 0x749   : > { %v9841_v35 = vpop.eup %9840  ;;  %v12772_v29 = vmul.f32 %v9839_v40, %v12621_v3  ;;  %9860 = vrcp.f32 %v4551_v57  ;;  %v12778_v55 = vsel %vm14639_vm15, %v14209_v22, %v4649_v12  ;;  %5292 = vmatprep.mubr.bf16.mxu1 %v12760_v58  ;;  %v4822_v47 = vsel %vm14640_vm9, %v14208_v8, %v4761_v42  ;;  %v14672_v8 = vld [vmem:[#allocation65_spill] sm:$0xff] }
 0x74a   : > { %v9843_v46 = vpop.eup %9842  ;;  %v12786_v2 = vmul.f32 %v9841_v35, %v12623_v31  ;;  %9862 = vrcp.f32 %v4552_v39  ;;  %v4764_v3 = vrot.slane %v12765_v18, 1  ;;  %v4821_v50 = vsel %vm14641_vm13, %v4761_v42, %v4762_v14  ;;  %vm14644_vm13 = vmmov %vm14640_vm9  ;;  %v9582_v35 = vld [vmem:[#allocation8 + $0x48] sm:$0xff]  }
 0x74b   : > { %v9845_v45 = vpop.eup %9844  ;;  %v12792_v57 = vmul.f32 %v9843_v46, %v12625_v34  ;;  %9864 = vrcp.f32 %v4553_v9  ;;  %v12794_v21 = vpack.c.bf16 %v4821_v50, %v4822_v47  ;;  %v12798_v41 = vpack.c.bf16 %v12769_v48, %v12754_v15  ;;  %v14642_v9 = vld [vmem:[#allocation59_spill] sm:$0xff] }
 0x74c   : > { %v9847_v6 = vpop.eup %9846  ;;  %v12801_v31 = vmul.f32 %v9845_v45, %v12627_v62  ;;  %9866 = vrcp.f32 %v4554_v43  ;;  %v4763_v39 = vrot.slane %v12769_v48, 1  ;;  %v4765_v38 = vrot.slane %v12772_v29, 1 }
 0x74d   : > { %v9849_v30 = vpop.eup %9848  ;;  %v12806_v34 = vmul.f32 %v9847_v6, %v12629_v20  ;;  %9868 = vrcp.f32 %v4555_v16  ;;  %vm14643_vm15 = vnez %v14642_v9  ;;  %v4766_v17 = vrot.slane %v12786_v2, 1  ;;  %v9581_v16 = vld [vmem:[#allocation8] sm:$0xff]  }
 0x74e   : > { %8810 = vmatprep.mubr.msk.bf16.mxu0 %vm14643_vm15, %v12794_v21  ;;  %v4650_v49 = vrot.slane %v12754_v15, 7  ;;  %v9851_v62 = vpop.eup %9850  ;;  %v12814_v43 = vmul.f32 %v9849_v30, %v12631_v0  ;;  %9870 = vrcp.f32 %v12725_v25  ;;  %v4819_v60 = vsel %vm14640_vm9, %v4763_v39, %v4764_v3  ;;  %vm14645_vm15 = vmmov %vm14640_vm9 }
 0x74f   : > { %v4820_v20 = vsel %vm14644_vm13, %v4762_v14, %v4763_v39  ;;  %v9853_v42 = vpop.eup %9852  ;;  %v12822_v40 = vmul.f32 %v9851_v62, %v12633_v61  ;;  %9872 = vrcp.f32 %v12727_v63  ;;  %v4817_v0 = vsel %vm14645_vm15, %v4765_v38, %v4766_v17 }
 0x750   : > { %v12825_v15 = vpack.c.bf16 %v4819_v60, %v4820_v20  ;;  %v9855_v25 = vpop.eup %9854  ;;  %v12830_v47 = vmul.f32 %v9853_v42, %v12635_v52  ;;  %9874 = vrcp.f32 %v12729_v26  ;;  %v4818_v14 = vsel %vm14640_vm9, %v4764_v3, %v4765_v38  ;;  %v9585_v42 = vld [vmem:[#allocation8 + $0x10] sm:$0xff]  }
 0x751   : > { %v4651_v61 = vrot.slane %v12769_v48, 7  ;;  %v9857_v46 = vpop.eup %9856  ;;  %v12837_v63 = vmul.f32 %v9855_v25, %v12637_v51  ;;  %9876 = vrcp.f32 %v12731_v5  ;;  %v12843_v45 = vpack.c.bf16 %v4817_v0, %v4818_v14  ;;  %v9583_v48 = vld [vmem:[#allocation8 + $0x8] sm:$0xff]  }
 0x752   : > { %8811 = vmatmul.mubr.msk.bf16.vlgmr.msra.gmra.mrb[120].mxu0 %vm14588_vm2, %v12825_v15  ;;  %vm14647_vm15 = vcmp.lt.s32.totalorder %v14638_v4, 1  ;;  %v9859_v26 = vpop.eup %9858  ;;  %v12848_v3 = vmul.f32 %v9857_v46, %v12639_v44  ;;  %9878 = vrcp.f32 %v12733_v1  ;;  %v12855_v5 = vpack.c.bf16 %v12772_v29, %v12765_v18 }
 0x753   : > { %v4709_v52 = vsel %vm14647_vm15, %v4649_v12, %v4650_v49  ;;  %8176 = vmatpush3.bf16.msra.mxu0 %v9581_v16  ;;  %vm14648_vm13 = vmmov %vm14647_vm15  ;;  %v9861_v6 = vpop.eup %9860  ;;  %v12858_v39 = vmul.f32 %v9859_v26, %v12641_v27  ;;  %9880 = vrcp.f32 %v12735_v11  ;;  %8814 = vmatprep.mubr.msk.bf16.mxu0 %vm14592_vm5, %v12843_v45  ;;  %v4767_v1 = vrot.slane %v12792_v57, 1  ;;  %v9584_v12 = vld [vmem:[#allocation8 + $0x50] sm:$0xff]  }
 0x754   : > { %v4708_v51 = vsel %vm14648_vm13, %v4650_v49, %v4651_v61  ;;  %8177 = vmatprep.subr.bf16.mxu0 %v9582_v35  ;;  %v9863_v38 = vpop.eup %9862  ;;  %v12868_v30 = vmul.f32 %v9861_v6, %v12643_v59  ;;  %9882 = vrcp.f32 %v12737_v37  ;;  %v4768_v27 = vrot.slane %v12801_v31, 1  ;;  %vm14649_vm15 = vmmov %vm14640_vm9  ;;  %v9587_v6 = vld [vmem:[#allocation8 + $0x18] sm:$0xff]  }
 0x755   : > { %v12864_v44 = vpack.c.bf16 %v4708_v51, %v4709_v52  ;;  %v4769_v11 = vrot.slane %v12806_v34, 1  ;;  %v9865_v49 = vpop.eup %9864  ;;  %v12874_v62 = vmul.f32 %v9863_v38, %v12645_v28  ;;  %9884 = vrcp.f32 %v12739_v13  ;;  %vm14650_vm13 = vmmov %vm14640_vm9 }
 0x756   : > { %v4816_v60 = vsel %vm14640_vm9, %v4766_v17, %v4767_v1  ;;  %v4770_v20 = vrot.slane %v12814_v43, 1  ;;  %v9867_v16 = vpop.eup %9866  ;;  %v12881_v59 = vmul.f32 %v9865_v49, %v12647_v24  ;;  %9886 = vrcp.f32 %v12741_v10  ;;  %v9586_v10 = vld [vmem:[#allocation8 + $0x58] sm:$0xff]  }
 0x757   : > { %v4815_v37 = vsel %vm14649_vm15, %v4767_v1, %v4768_v27  ;;  %8178 = vmatpush3.bf16.msra.mxu0 %v9583_v48  ;;  %v4814_v28 = vsel %vm14650_vm13, %v4768_v27, %v4769_v11  ;;  %v9869_v13 = vpop.eup %9868  ;;  %v12889_v0 = vmul.f32 %v9867_v16, %v12649_v32  ;;  %9888 = vrcp.f32 %v12746_v36 }
 0x758   : > { %v12892_v17 = vpack.c.bf16 %v4815_v37, %v4816_v60  ;;  %v4813_v24 = vsel %vm14640_vm9, %v4769_v11, %v4770_v20  ;;  %8179 = vmatprep.subr.bf16.mxu0 %v9584_v12  ;;  %v9871_v35 = vpop.eup %9870  ;;  %v12897_v25 = vmul.f32 %v9869_v13, %v12651_v53  ;;  %9890 = vrcp.f32 %v12748_v33  ;;  %v14655_v12 = vld [vmem:[#allocation49_spill] sm:$0xff]  ;;  %v14657_v60 = vld [vmem:[#allocation51_spill] sm:$0xff] }
 0x759   : > { %v12900_v14 = vpack.c.bf16 %v4813_v24, %v4814_v28  ;;  %v4652_v32 = vrot.slane %v12765_v18, 7  ;;  %v9873_v46 = vpop.eup %9872  ;;  %v12904_v36 = vmul.f32 %v9871_v35, %v12653_v23  ;;  %v4653_v52 = vrot.slane %v12772_v29, 7  ;;  %v14660_v24 = vld [vmem:[#allocation53_spill] sm:$0xff] }
 0x75a   : > { %14651 = vst [vmem:[#allocation52_spill] sm:$0xff] %v12892_v17  ;;  %8815 = vmatmul.mubr.msk.bf16.gmra.mrb[124].mxu0 %vm14593_vm0, %v12892_v17  ;;  %v12912_v53 = vpack.c.bf16 %v12792_v57, %v12786_v2  ;;  %v4771_v33 = vrot.slane %v12822_v40, 1  ;;  %v9875_v26 = vpop.eup %9874  ;;  %v12916_v51 = vmul.f32 %v9873_v46, %v12655_v56  ;;  %vm14654_vm15 = vcmp.lt.s32.totalorder %v14638_v4, 1 }
 0x75b   : > { %14652 = vst [vmem:[#allocation32_spill] sm:$0xff] %v12900_v14  ;;  %8818 = vmatprep.mubr.msk.bf16.mxu0 %vm14595_vm3, %v12900_v14  ;;  %v4707_v23 = vsel %vm14654_vm15, %v4651_v61, %v4652_v32  ;;  %v4772_v48 = vrot.slane %v12830_v47, 1  ;;  %8180 = vmatpush3.bf16.msra.mxu0 %v9585_v42  ;;  %v4773_v29 = vrot.slane %v12837_v63, 1  ;;  %v9877_v1 = vpop.eup %9876  ;;  %v12926_v38 = vmul.f32 %v9875_v26, %v14655_v12  ;;  %vm14656_vm13 = vmmov %vm14654_vm15  ;;  %v9588_v61 = vld [vmem:[#allocation8 + $0x60] sm:$0xff]   ;;  %v14663_v26 = vld [vmem:[#allocation56_spill] sm:$0xff] }
 0x75c   : > { %v4706_v56 = vsel %vm14656_vm13, %v4652_v32, %v4653_v52  ;;  %v4812_v27 = vsel %vm14640_vm9, %v4770_v20, %v4771_v33  ;;  %v4774_v11 = vrot.slane %v12848_v3, 1  ;;  %8181 = vmatprep.subr.bf16.mxu0 %v9586_v10  ;;  %v9879_v49 = vpop.eup %9878  ;;  %v12934_v16 = vmul.f32 %v9877_v1, %v14657_v60  ;;  %vm14658_vm15 = vmmov %vm14640_vm9  ;;  %v9589_v60 = vld [vmem:[#allocation8 + $0x20] sm:$0xff]  }
 0x75d   : > { %v12936_v37 = vpack.c.bf16 %v4706_v56, %v4707_v23  ;;  %v4811_v28 = vsel %vm14658_vm15, %v4771_v33, %v4772_v48  ;;  %vm14659_vm3 = vmmov %vm14640_vm9  ;;  %v9881_v13 = vpop.eup %9880  ;;  %v12943_v35 = vmul.f32 %v9879_v49, %v14660_v24  ;;  %v4654_v32 = vrot.slane %v12786_v2, 7  ;;  %v14665_v56 = vld [vmem:[#allocation58_spill] sm:$0xff] }
 0x75e   : > { %v4810_v42 = vsel %vm14659_vm3, %v4772_v48, %v4773_v29  ;;  %v12945_v20 = vpack.c.bf16 %v4811_v28, %v4812_v27  ;;  %vm14662_vm13 = vmmov %vm14659_vm3  ;;  %v9883_v46 = vpop.eup %9882  ;;  %v12951_v23 = vmul.f32 %v9881_v13, %v14663_v26  ;;  %v4655_v33 = vrot.slane %v12792_v57, 7  ;;  %v14667_v57 = vld [vmem:[#allocation29_spill] sm:$0xff] }
 0x75f   : > { %v4809_v10 = vsel %vm14662_vm13, %v4773_v29, %v4774_v11  ;;  %v12958_v48 = vpack.c.bf16 %v12806_v34, %v12801_v31  ;;  %8182 = vmatpush3.bf16.msra.mxu0 %v9587_v6  ;;  %v9885_v12 = vpop.eup %9884  ;;  %v12961_v27 = vmul.f32 %v9883_v46, %v14665_v56  ;;  %vm14666_vm3 = vcmp.lt.s32.totalorder %v14638_v4, 1  ;;  %vm14671_vm15 = vmmov %vm14662_vm13 }
 0x760   : > { %14661 = vst [vmem:[#allocation37_spill] sm:$0xff] %v12945_v20  ;;  %v12953_v1 = vpack.c.bf16 %v4809_v10, %v4810_v42  ;;  %v4705_v2 = vsel %vm14666_vm3, %v4653_v52, %v4654_v32  ;;  %v4775_v29 = vrot.slane %v12858_v39, 1  ;;  %v4776_v49 = vrot.slane %v12868_v30, 1  ;;  %8183 = vmatprep.subr.bf16.mxu0 %v9588_v61  ;;  %v9887_v28 = vpop.eup %9886  ;;  %vm14668_vm9 = vmmov %vm14666_vm3  ;;  %v9590_v10 = vld [vmem:[#allocation8 + $0x68] sm:$0xff]  }
 0x761   : > { %v12968_v42 = vmul.f32 %v9885_v12, %v14667_v57  ;;  %v4704_v6 = vsel %vm14668_vm9, %v4654_v32, %v4655_v33  ;;  %v4777_v13 = vrot.slane %v12874_v62, 1  ;;  %v4778_v24 = vrot.slane %v12881_v59, 1  ;;  %v9889_v46 = vpop.eup %9888  ;;  %v14669_v52 = vld [vmem:[#allocation60_spill] sm:$0xff]  ;;  %vm14675_vm3 = vmmov %vm14662_vm13 }
 0x762   : > { %14664 = vst [vmem:[#allocation35_spill] sm:$0xff] %v12953_v1  ;;  %v12975_v26 = vmul.f32 %v9887_v28, %v14669_v52  ;;  %8819 = vmatmul.mubr.msk.bf16.gmra.mrb[128].mxu0 %vm14596_vm12, %v12945_v20  ;;  %v12980_v61 = vpack.c.bf16 %v4704_v6, %v4705_v2  ;;  %v4807_v12 = vsel %vm14671_vm15, %v4775_v29, %v4776_v49  ;;  %v9891_v57 = vpop.eup %9890  ;;  %vm14676_vm9 = vmmov %vm14675_vm3  ;;  %v14677_v52 = vld [vmem:[#allocation68_spill] sm:$0xff]  ;;  %v4780_v18 = vrot.slane %v12897_v25, 1 }
 0x763   : > { %v4808_v32 = vsel %vm14662_vm13, %v4774_v11, %v4775_v29  ;;  %v12987_v22 = vmul.f32 %v9889_v46, %v14672_v8  ;;  %8822 = vmatprep.mubr.msk.bf16.mxu0 %vm14597_vm11, %v12953_v1  ;;  %v4805_v2 = vsel %vm14675_vm3, %v4777_v13, %v4778_v24  ;;  %v4806_v6 = vsel %vm14676_vm9, %v4776_v49, %v4777_v13  ;;  %v9591_v46 = vld [vmem:[#allocation8 + $0x28] sm:$0xff]   ;;  %v9592_v13 = vld [vmem:[#allocation8 + $0x70] sm:$0xff]   ;;  %vm14681_vm9 = vmmov %vm14675_vm3 }
 0x764   : > { %v12992_v28 = vpack.c.bf16 %v4807_v12, %v4808_v32  ;;  %v12999_v56 = vmul.f32 %v9891_v57, %v14677_v52  ;;  %v13001_v11 = vpack.c.bf16 %v4805_v2, %v4806_v6  ;;  %v4656_v8 = vrot.slane %v12801_v31, 7  ;;  %8184 = vmatpush3.bf16.msra.mxu0 %v9589_v60  ;;  %vm14682_vm11 = vmmov %vm14675_vm3 }
 0x765   : > { %v4657_v29 = vrot.slane %v12806_v34, 7  ;;  %v13007_v12 = vpack.c.bf16 %v12822_v40, %v12814_v43  ;;  %v4779_v32 = vrot.slane %v12889_v0, 1  ;;  %v4781_v49 = vrot.slane %v12904_v36, 1  ;;  %8185 = vmatprep.subr.bf16.mxu0 %v9590_v10 }
 0x766   : > { %14674 = vst [vmem:[#allocation41_spill] sm:$0xff] %v12992_v28  ;;  %14678 = vst [vmem:[#allocation42_spill] sm:$0xff] %v13001_v11  ;;  %vm14679_vm15 = vcmp.lt.s32.totalorder %v14638_v4, 1  ;;  %v4782_v60 = vrot.slane %v12916_v51, 1  ;;  %v14683_v57 = vrot.slane %v12744_v54, 7  ;;  %v14684_v1 = vrot.slane %v12999_v56, 7 }
 0x767   : > { %v4702_v31 = vsel %vm14679_vm15, %v4656_v8, %v4657_v29  ;;  %vm14680_vm13 = vmmov %vm14679_vm15  ;;  %v4803_v6 = vsel %vm14675_vm3, %v4779_v32, %v4780_v18  ;;  %v4804_v52 = vsel %vm14681_vm9, %v4778_v24, %v4779_v32  ;;  %v4802_v10 = vsel %vm14682_vm11, %v4780_v18, %v4781_v49 }
 0x768   : > { %v4703_v34 = vsel %vm14680_vm13, %v4655_v33, %v4656_v8  ;;  %vm14685_vm15 = vmmov %vm14680_vm13  ;;  %v13032_v8 = vpack.c.bf16 %v4803_v6, %v4804_v52  ;;  %8186 = vmatpush3.bf16.msra.mxu0 %v9591_v46  ;;  %v4659_v18 = vrot.slane %v12822_v40, 7  ;;  %v13045_v20 = vpack.c.bf16 %v12837_v63, %v12830_v47  ;;  %v9594_v40 = vld [vmem:[#allocation8 + $0x78] sm:$0xff]   ;;  %v9597_v6 = vld [vmem:[#allocation8 + $0x180] sm:$0xff]  }
 0x769   : > { %v13018_v2 = vpack.c.bf16 %v4702_v31, %v4703_v34  ;;  %v4711_v33 = vsel %vm14685_vm15, %v14684_v1, %v14683_v57  ;;  %vm14686_vm13 = vmmov %vm14675_vm3  ;;  %v4658_v34 = vrot.slane %v12814_v43, 7  ;;  %8187 = vmatprep.subr.bf16.mxu0 %v9592_v13  ;;  %v9593_v1 = vld [vmem:[#allocation8 + $0x30] sm:$0xff]   ;;  %v4784_v46 = vrot.slane %v12934_v16, 1  ;;  %v14689_v52 = vld [vmem:[#allocation36_spill] sm:$0xff] }
 0x76a   : > { %v4801_v31 = vsel %vm14686_vm13, %v4781_v49, %v4782_v60  ;;  %v13038_v24 = vpack.c.bf16 %v12778_v55, %v4711_v33  ;;  %8823 = vmatmul.mubr.msk.bf16.gmra.mrb[132].mxu0 %vm14598_vm8, %v12992_v28  ;;  %vm14688_vm11 = vmmov %vm14685_vm15  ;;  %v4783_v55 = vrot.slane %v12926_v38, 1  ;;  %v4785_v49 = vrot.slane %v12943_v35, 1  ;;  %v9599_v57 = vld [vmem:[#allocation8 + $0x1c8] sm:$0xff]  }
 0x76b   : > { %v13040_v32 = vpack.c.bf16 %v4801_v31, %v4802_v10  ;;  %v4701_v43 = vsel %vm14688_vm11, %v4657_v29, %v4658_v34  ;;  %vm14690_vm3 = vnez %v14689_v52  ;;  %8826 = vmatprep.mubr.msk.bf16.mxu0 %vm14599_vm6, %v13001_v11  ;;  %vm14692_vm9 = vmmov %vm14688_vm11  ;;  %v4786_v29 = vrot.slane %v12951_v23, 1  ;;  %v9618_v52 = vld [vmem:[#allocation8 + $0xb0] sm:$0xff]  }
 0x76c   : > { %7260 = vmatmul.mubr.msk.bf16.vlgmr.msra.gmra.mrb[124].mxu1 %vm14690_vm3, %v13038_v24  ;;  %v4700_v10 = vsel %vm14692_vm9, %v4658_v34, %v4659_v18  ;;  %v4660_v33 = vrot.slane %v12830_v47, 7  ;;  %v4661_v31 = vrot.slane %v12837_v63, 7  ;;  %vm14693_vm15 = vmmov %vm14686_vm13  ;;  %v4800_v13 = vsel %vm14686_vm13, %v4782_v60, %v4783_v55  ;;  %8188 = vmatpush3.bf16.msra.mxu0 %v9593_v1 }
 0x76d   : > { %5300 = vmatprep.mubr.bf16.mxu1 %v12798_v41  ;;  %v13067_v28 = vpack.c.bf16 %v4700_v10, %v4701_v43  ;;  %v4799_v14 = vsel %vm14693_vm15, %v4783_v55, %v4784_v46  ;;  %vm14694_vm11 = vmmov %vm14686_vm13  ;;  %vm14696_vm6 = vcmp.lt.s32.totalorder %v14638_v4, 1  ;;  %v9595_v10 = vld [vmem:[#allocation8 + $0x38] sm:$0xff]   ;;  %v13089_v60 = vpack.c.bf16 %v12858_v39, %v12848_v3  ;;  %8189 = vmatprep.subr.bf16.mxu0 %v9594_v40 }
 0x76e   : > { %v4798_v34 = vsel %vm14694_vm11, %v4784_v46, %v4785_v49  ;;  %v13075_v11 = vpack.c.bf16 %v4799_v14, %v4800_v13  ;;  %vm14695_vm9 = vmmov %vm14694_vm11  ;;  %v4698_v63 = vsel %vm14696_vm6, %v4660_v33, %v4661_v31  ;;  %v4787_v14 = vrot.slane %v12961_v27, 1  ;;  %8312 = vmatpush3.bf16.msra.mxu1 %v9597_v6  ;;  %v13104_v6 = vld [vmem:[#allocation8 + $0x80] sm:$0xff]  }
 0x76f   : > { %v4797_v47 = vsel %vm14695_vm9, %v4785_v49, %v4786_v29  ;;  %vm14697_vm8 = vmmov %vm14696_vm6  ;;  %v4788_v55 = vrot.slane %v12968_v42, 1  ;;  %v4789_v46 = vrot.slane %v12975_v26, 1  ;;  %v4662_v1 = vrot.slane %v12848_v3, 7  ;;  %8313 = vmatprep.subr.bf16.mxu1 %v9599_v57 }
 0x770   : > { %v4699_v43 = vsel %vm14697_vm8, %v4659_v18, %v4660_v33  ;;  %v13083_v7 = vpack.c.bf16 %v4797_v47, %v4798_v34  ;;  %v4790_v18 = vrot.slane %v12987_v22, 1  ;;  %vm14699_vm8 = vmmov %vm14695_vm9  ;;  %v4663_v13 = vrot.slane %v12858_v39, 7  ;;  %8190 = vmatpush3.bf16.msra.mxu0 %v9595_v10  ;;  %v14704_v47 = vld [vmem:[#allocation34_spill] sm:$0xff] }
 0x771   : > { %v13085_v17 = vpack.c.bf16 %v4698_v63, %v4699_v43  ;;  %v4796_v49 = vsel %vm14699_vm8, %v4786_v29, %v4787_v14  ;;  %v13101_v33 = vpack.c.bf16 %v12874_v62, %v12868_v30  ;;  %v4791_v40 = vrot.slane %v12999_v56, 1  ;;  %vm14700_vm6 = vmmov %vm14699_vm8  ;;  %v9600_v29 = vld [vmem:[#allocation8 + $0x188] sm:$0xff]   ;;  %8842 = vmatprep.subr.bf16.mxu0 %v13104_v6 }
 0x772   : > { %14698 = vst [vmem:[#allocation46_spill] sm:$0xff] %v13083_v7  ;;  %v4795_v34 = vsel %vm14700_vm6, %v4787_v14, %v4788_v55  ;;  %vm14701_vm15 = vmmov %vm14700_vm6  ;;  %vm14703_vm11 = vcmp.lt.s32.totalorder %v14638_v4, 1  ;;  %8827 = vmatmul.mubr.msk.bf16.gmra.mrb[136].mxu0 %vm11809_vm1, %v13032_v8  ;;  %8314 = vmatpush3.bf16.msra.mxu1 %v9600_v29  ;;  %v9613_v4 = vld [vmem:[#allocation8 + $0x1b0] sm:$0xff]  }
 0x773   : > { %v4793_v3 = vsel %vm14701_vm15, %v4789_v46, %v4790_v18  ;;  %vm14702_vm13 = vmmov %vm14700_vm6  ;;  %v4697_v39 = vsel %vm14703_vm11, %v4661_v31, %v4662_v1  ;;  %v13117_v63 = vpack.c.bf16 %v4795_v34, %v4796_v49  ;;  %v14709_v31 = vld [vmem:[#allocation73_spill] sm:$0xff]  ;;  %8830 = vmatprep.mubr.msk.bf16.mxu0 %vm11838_vm14, %v13040_v32  ;;  %v14710_v49 = vrot.slane %v12744_v54, 1 }
 0x774   : > { %v4794_v57 = vsel %vm14702_vm13, %v4788_v55, %v4789_v46  ;;  %vm14705_vm9 = vmmov %vm14703_vm11  ;;  %v9602_v55 = vld [vmem:[#allocation8 + $0x1d0] sm:$0xff]   ;;  %v14707_v46 = vld [vmem:[#allocation43_spill] sm:$0xff]  ;;  %v4667_v54 = vrot.slane %v12889_v0, 7 }
 0x775   : > { %v13119_v43 = vpack.c.bf16 %v4793_v3, %v4794_v57  ;;  %v4696_v14 = vsel %vm14705_vm9, %v4662_v1, %v4663_v13  ;;  %vm14706_vm8 = vmmov %vm14700_vm6  ;;  %vm14708_vm6 = vnez %v14707_v46  ;;  %v4664_v1 = vrot.slane %v12868_v30, 7  ;;  %8315 = vmatprep.subr.bf16.mxu1 %v9602_v55  ;;  %v14777_v46 = vld [vmem:[#allocation41_spill] sm:$0xff] }
 0x776   : > { %v4792_v19 = vsel %vm14706_vm8, %v4790_v18, %v4791_v40  ;;  %7263 = vmatmul.mubr.msk.bf16.gmra.mrb[128].mxu1 %vm14708_vm6, %v12864_v44  ;;  %v13131_v10 = vpack.c.bf16 %v4696_v14, %v4697_v39  ;;  %vm14711_vm15 = vmmov %vm14706_vm8  ;;  %v4665_v18 = vrot.slane %v12874_v62, 7  ;;  %v13145_v57 = vpack.c.bf16 %v12889_v0, %v12881_v59  ;;  %v9603_v14 = vld [vmem:[#allocation8 + $0x190] sm:$0xff]  }
 0x777   : > { %v4823_v34 = vsel %vm14711_vm15, %v4791_v40, %v14710_v49  ;;  %5308 = vmatprep.mubr.bf16.mxu1 %v12855_v5  ;;  %v4666_v39 = vrot.slane %v12881_v59, 7  ;;  %vm14712_vm13 = vmmov %vm14705_vm9  ;;  %v4668_v62 = vrot.slane %v12897_v25, 7  ;;  %v4672_v55 = vrot.slane %v12934_v16, 7  ;;  %8316 = vmatpush3.bf16.msra.mxu1 %v9603_v14 }
 0x778   : > { %v13140_v3 = vpack.c.bf16 %v4823_v34, %v4792_v19  ;;  %v4694_v40 = vsel %vm14712_vm13, %v4664_v1, %v4665_v18  ;;  %vm14713_vm11 = vmmov %vm14705_vm9  ;;  %v13155_v19 = vpack.c.bf16 %v12904_v36, %v12897_v25  ;;  %v4669_v34 = vrot.slane %v12904_v36, 7 }
 0x779   : > { %v4695_v30 = vsel %vm14713_vm11, %v4663_v13, %v4664_v1  ;;  %v4692_v59 = vsel %vm14705_vm9, %v4666_v39, %v4667_v54  ;;  %vm14714_vm8 = vmmov %vm14705_vm9  ;;  %v9605_v13 = vld [vmem:[#allocation8 + $0x1d8] sm:$0xff]   ;;  %v13171_v25 = vpack.c.bf16 %v12926_v38, %v12916_v51  ;;  %v13179_v36 = vpack.c.bf16 %v12943_v35, %v12934_v16 }
 0x77a   : > { %v13158_v49 = vpack.c.bf16 %v4694_v40, %v4695_v30  ;;  %v4693_v0 = vsel %vm14714_vm8, %v4665_v18, %v4666_v39  ;;  %vm14715_vm15 = vmmov %vm14714_vm8  ;;  %v4670_v40 = vrot.slane %v12916_v51, 7  ;;  %v4671_v18 = vrot.slane %v12926_v38, 7  ;;  %8831 = vmatmul.mubr.msk.bf16.gmra.mrb[140].mxu0 %vm11859_vm10, %v13075_v11  ;;  %8317 = vmatprep.subr.bf16.mxu1 %v9605_v13 }
 0x77b   : > { %v13165_v1 = vpack.c.bf16 %v4692_v59, %v4693_v0  ;;  %v4691_v29 = vsel %vm14715_vm15, %v4667_v54, %v4668_v62  ;;  %vm14716_vm13 = vmmov %vm14714_vm8  ;;  %v4673_v59 = vrot.slane %v12943_v35, 7  ;;  %v13189_v51 = vpack.c.bf16 %v12961_v27, %v12951_v23  ;;  %v9608_v35 = vld [vmem:[#allocation8 + $0x1e0] sm:$0xff]   ;;  %8834 = vmatprep.mubr.msk.bf16.mxu0 %vm11864_vm7, %v13083_v7 }
 0x77c   : > { %v4690_v30 = vsel %vm14716_vm13, %v4668_v62, %v4669_v34  ;;  %vm14717_vm11 = vmmov %vm14714_vm8  ;;  %v9606_v62 = vld [vmem:[#allocation8 + $0x198] sm:$0xff]   ;;  %v4687_v0 = vsel %vm14714_vm8, %v4671_v18, %v4672_v55  ;;  %v4675_v14 = vrot.slane %v12961_v27, 7  ;;  %v4676_v27 = vrot.slane %v12968_v42, 7 }
 0x77d   : > { %v13182_v39 = vpack.c.bf16 %v4690_v30, %v4691_v29  ;;  %v4689_v54 = vsel %vm14717_vm11, %v4669_v34, %v4670_v40  ;;  %vm14719_vm9 = vmmov %vm14714_vm8  ;;  %v4674_v34 = vrot.slane %v12951_v23, 7  ;;  %v14720_v29 = vld [vmem:[#allocation47_spill] sm:$0xff]  ;;  %v13212_v23 = vpack.c.bf16 %v12975_v26, %v12968_v42  ;;  %8318 = vmatpush3.bf16.msra.mxu1 %v9606_v62 }
 0x77e   : > { %v4688_v16 = vsel %vm14719_vm9, %v4670_v40, %v4671_v18  ;;  %vm14721_vm15 = vnez %v14720_v29  ;;  %vm14723_vm13 = vmmov %vm14714_vm8  ;;  %v13229_v42 = vpack.c.bf16 %v12999_v56, %v12987_v22  ;;  %8319 = vmatprep.subr.bf16.mxu1 %v9608_v35  ;;  %v9612_v35 = vld [vmem:[#allocation8 + $0x1f0] sm:$0xff]  }
 0x77f   : > { %7266 = vmatmul.mubr.msk.bf16.gmra.mrb[132].mxu1 %vm14721_vm15, %v12936_v37  ;;  %v13206_v38 = vpack.c.bf16 %v4688_v16, %v4689_v54  ;;  %v4686_v40 = vsel %vm14723_vm13, %v4672_v55, %v4673_v59  ;;  %vm14724_vm11 = vmmov %vm14714_vm8  ;;  %v4677_v16 = vrot.slane %v12975_v26, 7  ;;  %v4683_v55 = vsel %vm14714_vm8, %v4675_v14, %v4676_v27 }
 0x780   : > { %5316 = vmatprep.mubr.bf16.mxu1 %v12912_v53  ;;  %v13216_v13 = vpack.c.bf16 %v4686_v40, %v4687_v0  ;;  %v4684_v18 = vsel %vm14724_vm11, %v4674_v34, %v4675_v14  ;;  %vm14725_vm9 = vmmov %vm14714_vm8  ;;  %v9609_v0 = vld [vmem:[#allocation8 + $0x1a0] sm:$0xff]   ;;  %v4678_v40 = vrot.slane %v12987_v22, 7  ;;  %v14727_v26 = vrot.slane %v12999_v56, 7  ;;  %v14730_v22 = vld [vmem:[#allocation44_spill] sm:$0xff] }
 0x781   : > { %v4685_v54 = vsel %vm14725_vm9, %v4673_v59, %v4674_v34  ;;  %vm14726_vm13 = vmmov %vm14714_vm8  ;;  %v9610_v59 = vld [vmem:[#allocation8 + $0x1e8] sm:$0xff]   ;;  %8320 = vmatpush3.bf16.msra.mxu1 %v9609_v0  ;;  %v14733_v56 = vld [vmem:[#allocation75_spill] sm:$0xff] }
 0x782   : > { %v13223_v30 = vpack.c.bf16 %v4684_v18, %v4685_v54  ;;  %v4682_v7 = vsel %vm14726_vm13, %v4676_v27, %v4677_v16  ;;  %vm14728_vm11 = vmmov %vm14714_vm8  ;;  %v9611_v54 = vld [vmem:[#allocation8 + $0x1a8] sm:$0xff]   ;;  %8835 = vmatmul.mubr.msk.bf16.gmra.mrb[144].mxu0 %vm11882_vm4, %v13117_v63  ;;  %8321 = vmatprep.subr.bf16.mxu1 %v9610_v59  ;;  %vm14734_vm13 = vnez %v14733_v56  ;;  %v9614_v27 = vld [vmem:[#allocation8 + $0x1f8] sm:$0xff]  }
 0x783   : > { %v13234_v34 = vpack.c.bf16 %v4682_v7, %v4683_v55  ;;  %v4680_v62 = vsel %vm14728_vm11, %v4678_v40, %v14727_v26  ;;  %vm14729_vm9 = vmmov %vm14714_vm8  ;;  %v14731_v7 = vld [vmem:[#allocation54_spill] sm:$0xff]  ;;  %8838 = vmatprep.mubr.msk.bf16.mxu0 %vm14734_vm13, %v13119_v43  ;;  %v14735_v55 = vld [vmem:[#allocation48_spill] sm:$0xff] }
 0x784   : > { %v4681_v14 = vsel %vm14729_vm9, %v4677_v16, %v4678_v40  ;;  %vm14732_vm8 = vnez %v14731_v7  ;;  %v9615_v16 = vld [vmem:[#allocation8 + $0x1b8] sm:$0xff]   ;;  %vm14736_vm11 = vnez %v14735_v55  ;;  %v14737_v0 = vld [vmem:[#allocation57_spill] sm:$0xff]  ;;  %v14739_v40 = vmov 0   ;;  %v9601_v59 = vld [vmem:[#allocation8 + $0x88] sm:$0xff]  }
 0x785   : > { %v13242_v18 = vpack.c.bf16 %v4680_v62, %v4681_v14  ;;  %8322 = vmatpush3.bf16.msra.mxu1 %v9611_v54  ;;  %vm14738_vm9 = vnez %v14737_v0  ;;  %v14740_v26 = vld [vmem:[#allocation30_spill] sm:$0xff]  ;;  %v9604_v62 = vld [vmem:[#allocation8 + $0x90] sm:$0xff]   ;;  %v14742_v54 = vld [vmem:[#allocation31_spill] sm:$0xff] }
 0x786   : > { %8323 = vmatprep.subr.bf16.mxu1 %v9612_v35  ;;  %vm14741_vm13 = vnez %v14740_v26  ;;  %v9607_v14 = vld [vmem:[#allocation8 + $0x98] sm:$0xff]  }
 0x787   : > { %7269 = vmatmul.mubr.msk.bf16.gmra.mrb[136].mxu1 %vm14732_vm8, %v12980_v61  ;;  %v9619_v35 = vld [vmem:[#allocation8 + $0xb8] sm:$0xff]  }
 0x788   : > { %5324 = vmatprep.mubr.bf16.mxu1 %v12958_v48  ;;  %v14787_v26 = vld [vmem:[#allocation46_spill] sm:$0xff] }
 0x789   : > { %8324 = vmatpush3.bf16.msra.mxu1 %v9613_v4  ;;  %v14746_v4 = vld [vmem:[#allocation67_spill] sm:$0xff] }
 0x78a   : > { %8839 = vmatmul.mubr.msk.bf16.gmra.mrb[148].mxu0 %vm14736_vm11, %v13140_v3  ;;  %8325 = vmatprep.subr.bf16.mxu1 %v9614_v27  ;;  %vm14743_vm11 = vnez %v14742_v54  ;;  %vm14747_vm4 = vnez %v14746_v4  ;;  %v9620_v27 = vld [vmem:[#allocation8 + $0x200] sm:$0xff]   ;;  %v14788_v54 = vld [vmem:[#allocation74_spill] sm:$0xff] }
 0x78b   : > { %5758 = vmatprep.mubr.bf16.mxu0 %v14739_v40 }
 0x78d   : > { %8326 = vmatpush3.bf16.msra.mxu1 %v9615_v16  ;;  %v14748_v16 = vld [vmem:[#allocation71_spill] sm:$0xff] }
 0x78e   : > { %vm14749_vm7 = vnez %v14748_v16 }
 0x78f   : > { %7272 = vmatmul.mubr.msk.bf16.gmra.mrb[140].mxu1 %vm14738_vm9, %v13018_v2 }
 0x790   : > { %5332 = vmatprep.mubr.bf16.mxu1 %v13007_v12 }
 0x792   : > { %5759 = vmatmul.mubr.bf16.vlgmr.msra.gmra.mrb[152].mxu0 %v14739_v40 }
 0x793   : > { %8843 = vmatpush3.bf16.msra.mxu0 %v13104_v6  ;;  %5766 = vmatprep.mubr.bf16.mxu0 %v12760_v58  ;;  %v9616_v58 = vld [vmem:[#allocation8 + $0xa0] sm:$0xff]   ;;  %v9617_v6 = vld [vmem:[#allocation8 + $0xa8] sm:$0xff]  }
 0x794   : > { %8844 = vmatprep.subr.bf16.mxu0 %v9601_v59 }
 0x797   : > { %7275 = vmatmul.mubr.msk.bf16.gmra.mrb[144].mxu1 %vm14741_vm13, %v13067_v28  ;;  %8845 = vmatpush3.bf16.msra.mxu0 %v9601_v59  ;;  %v14750_v59 = vld [vmem:[#allocation72_spill] sm:$0xff] }
 0x798   : > { %5340 = vmatprep.mubr.bf16.mxu1 %v13045_v20  ;;  %8846 = vmatprep.subr.bf16.mxu0 %v9604_v62  ;;  %vm14751_vm10 = vnez %v14750_v59 }
 0x79a   : > { %7356 = vmatmul.mubr.msk.bf16.gmra.mrb[156].mxu0 %vm14690_vm3, %v13038_v24  ;;  %v14744_v24 = vld [vmem:[#allocation63_spill] sm:$0xff] }
 0x79b   : > { %5774 = vmatprep.mubr.bf16.mxu0 %v12798_v41  ;;  %8847 = vmatpush3.bf16.msra.mxu0 %v9604_v62  ;;  %vm14745_vm3 = vnez %v14744_v24  ;;  %v14752_v62 = vld [vmem:[#allocation39_spill] sm:$0xff] }
 0x79c   : > { %8848 = vmatprep.subr.bf16.mxu0 %v9607_v14  ;;  %vm14753_vm14 = vnez %v14752_v62 }
 0x79f   : > { %7278 = vmatmul.mubr.msk.bf16.gmra.mrb[148].mxu1 %vm14743_vm11, %v13085_v17  ;;  %8849 = vmatpush3.bf16.msra.mxu0 %v9607_v14  ;;  %v14754_v14 = vld [vmem:[#allocation45_spill] sm:$0xff] }
 0x7a0   : > { %5348 = vmatprep.mubr.bf16.mxu1 %v13089_v60  ;;  %8850 = vmatprep.subr.bf16.mxu0 %v9616_v58  ;;  %vm14755_vm1 = vnez %v14754_v14 }
 0x7a2   : > { %7359 = vmatmul.mubr.msk.bf16.gmra.mrb[160].mxu0 %vm14708_vm6, %v12864_v44 }
 0x7a3   : > { %5782 = vmatprep.mubr.bf16.mxu0 %v12855_v5  ;;  %8851 = vmatpush3.bf16.msra.mxu0 %v9616_v58  ;;  %v14756_v58 = vld [vmem:[#allocation50_spill] sm:$0xff] }
 0x7a4   : > { %8852 = vmatprep.subr.bf16.mxu0 %v9617_v6  ;;  %vm14757_vm12 = vnez %v14756_v58 }
 0x7a7   : > { %7281 = vmatmul.mubr.msk.bf16.gmra.mrb[152].mxu1 %vm14745_vm3, %v13131_v10  ;;  %8853 = vmatpush3.bf16.msra.mxu0 %v9617_v6  ;;  %v14758_v6 = vld [vmem:[#allocation55_spill] sm:$0xff] }
 0x7a8   : > { %5356 = vmatprep.mubr.bf16.mxu1 %v13101_v33  ;;  %8854 = vmatprep.subr.bf16.mxu0 %v9618_v52  ;;  %vm14759_vm0 = vnez %v14758_v6 }
 0x7aa   : > { %7362 = vmatmul.mubr.msk.bf16.gmra.mrb[164].mxu0 %vm14721_vm15, %v12936_v37 }
 0x7ab   : > { %5790 = vmatprep.mubr.bf16.mxu0 %v12912_v53  ;;  %8855 = vmatpush3.bf16.msra.mxu0 %v9618_v52  ;;  %v14760_v52 = vld [vmem:[#allocation28_spill] sm:$0xff] }
 0x7ac   : > { %8856 = vmatprep.subr.bf16.mxu0 %v9619_v35 }
 0x7af   : > { %7284 = vmatmul.mubr.msk.bf16.gmra.mrb[156].mxu1 %vm14747_vm4, %v13158_v49  ;;  %8857 = vmatpush3.bf16.msra.mxu0 %v9619_v35 }
 0x7b0   : > { %5364 = vmatprep.mubr.bf16.mxu1 %v13145_v57  ;;  %8890 = vmatprep.subr.bf16.mxu0 %v9620_v27 }
 0x7b2   : > { %7365 = vmatmul.mubr.msk.bf16.gmra.mrb[168].mxu0 %vm14732_vm8, %v12980_v61 }
 0x7b3   : > { %5798 = vmatprep.mubr.bf16.mxu0 %v12958_v48 }
 0x7b7   : > { %7287 = vmatmul.mubr.msk.bf16.gmra.mrb[160].mxu1 %vm14749_vm7, %v13165_v1 }
 0x7b8   : > { %5372 = vmatprep.mubr.bf16.mxu1 %v13155_v19 }
 0x7ba   : > { %7368 = vmatmul.mubr.msk.bf16.gmra.mrb[172].mxu0 %vm14738_vm9, %v13018_v2 }
 0x7bb   : > { %5806 = vmatprep.mubr.bf16.mxu0 %v13007_v12 }
 0x7bf   : > { %7290 = vmatmul.mubr.msk.bf16.gmra.mrb[164].mxu1 %vm14751_vm10, %v13182_v39 }
 0x7c0   : > { %5380 = vmatprep.mubr.bf16.mxu1 %v13171_v25 }
 0x7c2   : > { %7371 = vmatmul.mubr.msk.bf16.gmra.mrb[176].mxu0 %vm14741_vm13, %v13067_v28 }
 0x7c3   : > { %5814 = vmatprep.mubr.bf16.mxu0 %v13045_v20 }
 0x7c7   : > { %7293 = vmatmul.mubr.msk.bf16.gmra.mrb[168].mxu1 %vm14753_vm14, %v13206_v38 }
 0x7c8   : > { %5388 = vmatprep.mubr.bf16.mxu1 %v13179_v36 }
 0x7ca   : > { %7374 = vmatmul.mubr.msk.bf16.gmra.mrb[180].mxu0 %vm14743_vm11, %v13085_v17 }
 0x7cb   : > { %5822 = vmatprep.mubr.bf16.mxu0 %v13089_v60 }
 0x7cf   : > { %7296 = vmatmul.mubr.msk.bf16.gmra.mrb[172].mxu1 %vm14755_vm1, %v13216_v13 }
 0x7d0   : > { %5396 = vmatprep.mubr.bf16.mxu1 %v13189_v51 }
 0x7d2   : > { %7377 = vmatmul.mubr.msk.bf16.gmra.mrb[184].mxu0 %vm14745_vm3, %v13131_v10  ;;  %vm14761_vm3 = vnez %v14760_v52 }
 0x7d3   : > { %5830 = vmatprep.mubr.bf16.mxu0 %v13101_v33 }
 0x7d7   : > { %7299 = vmatmul.mubr.msk.bf16.gmra.mrb[176].mxu1 %vm14757_vm12, %v13223_v30 }
 0x7d8   : > { %5404 = vmatprep.mubr.bf16.mxu1 %v13212_v23 }
 0x7da   : > { %7380 = vmatmul.mubr.msk.bf16.gmra.mrb[188].mxu0 %vm14747_vm4, %v13158_v49 }
 0x7db   : > { %5838 = vmatprep.mubr.bf16.mxu0 %v13145_v57 }
 0x7df   : > { %7302 = vmatmul.mubr.msk.bf16.gmra.mrb[180].mxu1 %vm14759_vm0, %v13234_v34 }
 0x7e0   : > { %5412 = vmatprep.mubr.bf16.mxu1 %v13229_v42 }
 0x7e2   : > { %7383 = vmatmul.mubr.msk.bf16.gmra.mrb[192].mxu0 %vm14749_vm7, %v13165_v1 }
 0x7e3   : > { %5846 = vmatprep.mubr.bf16.mxu0 %v13155_v19 }
 0x7e7   : > { %7305 = vmatmul.mubr.msk.bf16.gmra.mrb[184].mxu1 %vm14761_vm3, %v13242_v18 }
 0x7e8   : > { %6273 = vmatprep.mubr.bf16.mxu1 %v12798_v41  ;;  %v9621_v41 = vld [vmem:[#allocation8 + $0x208] sm:$0xff]  }
 0x7ea   : > { %7386 = vmatmul.mubr.msk.bf16.gmra.mrb[196].mxu0 %vm14751_vm10, %v13182_v39 }
 0x7eb   : > { %5854 = vmatprep.mubr.bf16.mxu0 %v13171_v25 }
 0x7ef   : > { %7446 = vmatmul.mubr.msk.bf16.vlgmr.msra.gmra.mrb[188].mxu1 %vm14708_vm6, %v12864_v44  ;;  %vm14762_vm6 = vnez %v14642_v9  ;;  %v9623_v44 = vld [vmem:[#allocation8 + $0x218] sm:$0xff]   ;;  %v14766_v9 = vld [vmem:[#allocation33_spill] sm:$0xff] }
 0x7f0   : > { %6281 = vmatprep.mubr.bf16.mxu1 %v12855_v5  ;;  %v9622_v5 = vld [vmem:[#allocation8 + $0x210] sm:$0xff]  }
 0x7f2   : > { %7389 = vmatmul.mubr.msk.bf16.gmra.mrb[200].mxu0 %vm14753_vm14, %v13206_v38 }
 0x7f3   : > { %5862 = vmatprep.mubr.bf16.mxu0 %v13179_v36 }
 0x7f7   : > { %7449 = vmatmul.mubr.msk.bf16.gmra.mrb[192].mxu1 %vm14721_vm15, %v12936_v37  ;;  %vm14764_vm15 = vnez %v14744_v24  ;;  %v9625_v37 = vld [vmem:[#allocation8 + $0x228] sm:$0xff]  }
 0x7f8   : > { %6289 = vmatprep.mubr.bf16.mxu1 %v12912_v53 }
 0x7fa   : > { %7392 = vmatmul.mubr.msk.bf16.gmra.mrb[204].mxu0 %vm14755_vm1, %v13216_v13 }
 0x7fb   : > { %5870 = vmatprep.mubr.bf16.mxu0 %v13189_v51 }
 0x7ff   : > { %7452 = vmatmul.mubr.msk.bf16.gmra.mrb[196].mxu1 %vm14732_vm8, %v12980_v61  ;;  %vm14767_vm8 = vnez %v14766_v9  ;;  %v14771_v61 = vld [vmem:[#allocation37_spill] sm:$0xff] }
 0x800   : > { %6297 = vmatprep.mubr.bf16.mxu1 %v12958_v48  ;;  %v14769_v48 = vld [vmem:[#allocation38_spill] sm:$0xff] }
 0x802   : > { %7395 = vmatmul.mubr.msk.bf16.gmra.mrb[208].mxu0 %vm14757_vm12, %v13223_v30 }
 0x803   : > { %5878 = vmatprep.mubr.bf16.mxu0 %v13212_v23 }
 0x807   : > { %7455 = vmatmul.mubr.msk.bf16.gmra.mrb[200].mxu1 %vm14738_vm9, %v13018_v2  ;;  %v9627_v2 = vld [vmem:[#allocation8 + $0x238] sm:$0xff]  }
 0x808   : > { %6305 = vmatprep.mubr.bf16.mxu1 %v13007_v12  ;;  %v9626_v12 = vld [vmem:[#allocation8 + $0x230] sm:$0xff]  }
 0x80a   : > { %7398 = vmatmul.mubr.msk.bf16.gmra.mrb[212].mxu0 %vm14759_vm0, %v13234_v34 }
 0x80b   : > { %8858 = vmatprep.mubr.bf16.mxu0 %v14739_v40 }
 0x80f   : > { %7458 = vmatmul.mubr.msk.bf16.gmra.mrb[204].mxu1 %vm14741_vm13, %v13067_v28  ;;  %vm14770_vm13 = vnez %v14769_v48  ;;  %v14772_v28 = vld [vmem:[#allocation64_spill] sm:$0xff] }
 0x810   : > { %6313 = vmatprep.mubr.bf16.mxu1 %v13045_v20  ;;  %v14768_v20 = vld [vmem:[#allocation32_spill] sm:$0xff] }
 0x812   : > { %8859 = vmatmul.mubr.msk.bf16.vlgmr.msra.gmra.mrb[120].mxu0 %vm14762_vm6, %v12794_v21  ;;  %v14765_v21 = vld [vmem:[#allocation52_spill] sm:$0xff] }
 0x813   : > { %8891 = vmatpush3.bf16.msra.mxu0 %v9620_v27  ;;  %8862 = vmatprep.mubr.msk.bf16.mxu0 %vm14588_vm2, %v12825_v15 }
 0x814   : > { %8892 = vmatprep.subr.bf16.mxu0 %v9621_v41 }
 0x817   : > { %7461 = vmatmul.mubr.msk.bf16.gmra.mrb[208].mxu1 %vm14743_vm11, %v13085_v17  ;;  %8893 = vmatpush3.bf16.msra.mxu0 %v9621_v41  ;;  %v9624_v17 = vld [vmem:[#allocation8 + $0x220] sm:$0xff]   ;;  %vm14773_vm11 = vnez %v14772_v28 }
 0x818   : > { %6321 = vmatprep.mubr.bf16.mxu1 %v13089_v60  ;;  %8894 = vmatprep.subr.bf16.mxu0 %v9622_v5  ;;  %v14774_v60 = vld [vmem:[#allocation35_spill] sm:$0xff] }
 0x81a   : > { %8863 = vmatmul.mubr.msk.bf16.gmra.mrb[124].mxu0 %vm14592_vm5, %v12843_v45 }
 0x81b   : > { %8866 = vmatprep.mubr.msk.bf16.mxu0 %vm14767_vm8, %v14765_v21  ;;  %8895 = vmatpush3.bf16.msra.mxu0 %v9622_v5 }
 0x81c   : > { %8896 = vmatprep.subr.bf16.mxu0 %v9623_v44 }
 0x81f   : > { %7464 = vmatmul.mubr.msk.bf16.gmra.mrb[212].mxu1 %vm14764_vm15, %v13131_v10  ;;  %8897 = vmatpush3.bf16.msra.mxu0 %v9623_v44  ;;  %v14778_v10 = vld [vmem:[#allocation69_spill] sm:$0xff]  ;;  %vm14784_vm15 = vnez %v14709_v31 }
 0x820   : > { %6329 = vmatprep.mubr.bf16.mxu1 %v13101_v33  ;;  %8898 = vmatprep.subr.bf16.mxu0 %v9624_v17  ;;  %v14775_v33 = vld [vmem:[#allocation66_spill] sm:$0xff] }
 0x821   : > { %vm14776_vm9 = vnez %v14775_v33 }
 0x822   : > { %8867 = vmatmul.mubr.msk.bf16.gmra.mrb[128].mxu0 %vm14770_vm13, %v14768_v20 }
 0x823   : > { %8870 = vmatprep.mubr.msk.bf16.mxu0 %vm14773_vm11, %v14771_v61  ;;  %8899 = vmatpush3.bf16.msra.mxu0 %v9624_v17 }
 0x824   : > { %8900 = vmatprep.subr.bf16.mxu0 %v9625_v37 }
 0x827   : > { %7467 = vmatmul.mubr.msk.bf16.gmra.mrb[216].mxu1 %vm14747_vm4, %v13158_v49  ;;  %8901 = vmatpush3.bf16.msra.mxu0 %v9625_v37  ;;  %vm14779_vm4 = vnez %v14778_v10  ;;  %v14781_v49 = vld [vmem:[#allocation70_spill] sm:$0xff] }
 0x828   : > { %6337 = vmatprep.mubr.bf16.mxu1 %v13145_v57  ;;  %8902 = vmatprep.subr.bf16.mxu0 %v9626_v12  ;;  %v14780_v57 = vld [vmem:[#allocation42_spill] sm:$0xff]  ;;  %vm14782_vm6 = vnez %v14781_v49 }
 0x82a   : > { %8871 = vmatmul.mubr.msk.bf16.gmra.mrb[132].mxu0 %vm14776_vm9, %v14774_v60 }
 0x82b   : > { %8874 = vmatprep.mubr.msk.bf16.mxu0 %vm14779_vm4, %v14777_v46  ;;  %8903 = vmatpush3.bf16.msra.mxu0 %v9626_v12 }
 0x82c   : > { %8904 = vmatprep.subr.bf16.mxu0 %v9627_v2 }
 0x82f   : > { %7470 = vmatmul.mubr.msk.bf16.gmra.mrb[220].mxu1 %vm14749_vm7, %v13165_v1  ;;  %8905 = vmatpush3.bf16.msra.mxu0 %v9627_v2  ;;  %vm14783_vm7 = vnez %v14704_v47 }
 0x830   : > { %6345 = vmatprep.mubr.bf16.mxu1 %v13155_v19  ;;  %v14785_v19 = vld [vmem:[#allocation40_spill] sm:$0xff] }
 0x832   : > { %8875 = vmatmul.mubr.msk.bf16.gmra.mrb[136].mxu0 %vm14782_vm6, %v14780_v57  ;;  %vm14786_vm6 = vnez %v14785_v19 }
 0x833   : > { %8878 = vmatprep.mubr.msk.bf16.mxu0 %vm14783_vm7, %v13032_v8 }
 0x837   : > { %7473 = vmatmul.mubr.msk.bf16.gmra.mrb[224].mxu1 %vm14751_vm10, %v13182_v39  ;;  %vm14789_vm10 = vnez %v14788_v54 }
 0x838   : > { %6353 = vmatprep.mubr.bf16.mxu1 %v13171_v25 }
 0x83a   : > { %8879 = vmatmul.mubr.msk.bf16.gmra.mrb[140].mxu0 %vm14784_vm15, %v13040_v32 }
 0x83b   : > { %8882 = vmatprep.mubr.msk.bf16.mxu0 %vm14786_vm6, %v13075_v11 }
 0x83f   : > { %7476 = vmatmul.mubr.msk.bf16.gmra.mrb[228].mxu1 %vm14753_vm14, %v13206_v38  ;;  %v8055_v1 = vpop.f32.mrb[124].mxu1  ;;  %vm14790_vm14 = vnez %v14730_v22 }
 0x840   : > { %6361 = vmatprep.mubr.bf16.mxu1 %v13179_v36  ;;  %v8056_v39 = vpop.f32.mrb[125].mxu1 }
 0x841   : > { %v8057_v29 = vadd.f32 %v8056_v39, %v8055_v1  ;;  %v8058_v7 = vpop.f32.mrb[126].mxu1 }
 0x842   : > { %v8059_v0 = vpop.f32.mrb[127].mxu1  ;;  %8883 = vmatmul.mubr.msk.bf16.gmra.mrb[144].mxu0 %vm14789_vm10, %v14787_v26  ;;  %vm14791_vm10 = vnez %v14733_v56 }
 0x843   : > { %v8060_v25 = vadd.f32 %v8059_v0, %v8058_v7  ;;  %8886 = vmatprep.mubr.msk.bf16.mxu0 %vm14790_vm14, %v13117_v63 }
 0x847   : > { %7479 = vmatmul.mubr.msk.bf16.gmra.mrb[232].mxu1 %vm14755_vm1, %v13216_v13 }
 0x848   : > { %6369 = vmatprep.mubr.bf16.mxu1 %v13189_v51 }
 0x849   : > { %v8061_v36 = vpop.f32.mrb[128].mxu1 }
 0x84a   : > { %v8062_v38 = vpop.f32.mrb[129].mxu1  ;;  %8887 = vmatmul.mubr.msk.bf16.gmra.mrb[148].mxu0 %vm14791_vm10, %v13119_v43 }
 0x84b   : > { %v13459_v24 = vadd.f32 %v8062_v38, %v8061_v36  ;;  %v8064_v35 = vpop.f32.mrb[130].mxu1  ;;  %8906 = vmatprep.mubr.msk.bf16.mxu0 %vm14588_vm2, %v12825_v15 }
 0x84c   : > { %v8065_v4 = vpop.f32.mrb[131].mxu1 }
 0x84d   : > { %v13461_v27 = vadd.f32 %v8065_v4, %v8064_v35 }
 0x84f   : > { %7482 = vmatmul.mubr.msk.bf16.gmra.mrb[236].mxu1 %vm14757_vm12, %v13223_v30  ;;  %vm14793_vm12 = vnez %v14788_v54 }
 0x850   : > { %6377 = vmatprep.mubr.bf16.mxu1 %v13212_v23 }
 0x852   : > { %v8067_v51 = vpop.f32.mrb[132].mxu1  ;;  %8907 = vmatmul.mubr.msk.bf16.vlgmr.msra.gmra.mrb[120].mxu0 %vm14592_vm5, %v12843_v45  ;;  %vm14794_vm5 = vnez %v14735_v55 }
 0x853   : > { %v8068_v13 = vpop.f32.mrb[133].mxu1  ;;  %8910 = vmatprep.mubr.msk.bf16.mxu0 %vm14767_vm8, %v14765_v21 }
 0x854   : > { %v13473_v16 = vadd.f32 %v8068_v13, %v8067_v51  ;;  %v8070_v59 = vpop.f32.mrb[134].mxu1 }
 0x855   : > { %v8071_v62 = vpop.f32.mrb[135].mxu1 }
 0x856   : > { %v13475_v14 = vadd.f32 %v8071_v62, %v8070_v59 }
 0x857   : > { %7485 = vmatmul.mubr.msk.bf16.gmra.mrb[240].mxu1 %vm14759_vm0, %v13234_v34  ;;  %vm14792_vm0 = vnez %v14781_v49 }
 0x858   : > { %6385 = vmatprep.mubr.bf16.mxu1 %v13229_v42 }
 0x85a   : > { %v8073_v15 = vpop.f32.mrb[136].mxu1  ;;  %8911 = vmatmul.mubr.msk.bf16.gmra.mrb[124].mxu0 %vm14770_vm13, %v14768_v20 }
 0x85b   : > { %v8074_v50 = vpop.f32.mrb[137].mxu1  ;;  %8914 = vmatprep.mubr.msk.bf16.mxu0 %vm14773_vm11, %v14771_v61 }
 0x85c   : > { %v13487_v30 = vadd.f32 %v8074_v50, %v8073_v15  ;;  %v8076_v23 = vpop.f32.mrb[138].mxu1 }
 0x85d   : > { %v8077_v58 = vpop.f32.mrb[139].mxu1 }
 0x85e   : > { %v13489_v41 = vadd.f32 %v8077_v58, %v8076_v23 }
 0x85f   : > { %7488 = vmatmul.mubr.msk.bf16.gmra.mrb[244].mxu1 %vm14761_vm3, %v13242_v18 }
 0x860   : > { %6393 = vmatprep.mubr.bf16.mxu1 %v14739_v40 }
 0x862   : > { %v8079_v45 = vpop.f32.mrb[140].mxu1  ;;  %8915 = vmatmul.mubr.msk.bf16.gmra.mrb[128].mxu0 %vm14776_vm9, %v14774_v60 }
 0x863   : > { %v8080_v42 = vpop.f32.mrb[141].mxu1  ;;  %8918 = vmatprep.mubr.msk.bf16.mxu0 %vm14779_vm4, %v14777_v46 }
 0x864   : > { %v13501_v34 = vadd.f32 %v8080_v42, %v8079_v45  ;;  %v8082_v6 = vpop.f32.mrb[142].mxu1 }
 0x865   : > { %v8083_v5 = vpop.f32.mrb[143].mxu1  ;;  %v8191_v18 = vpop.f32.mrb[152].mxu0 }
 0x866   : > { %v13503_v44 = vadd.f32 %v8083_v5, %v8082_v6  ;;  %v8192_v53 = vpop.f32.mrb[153].mxu0 }
 0x867   : > { %6394 = vmatmul.mubr.bf16.gmra.mrb[248].mxu1 %v14739_v40  ;;  %v8193_v9 = vadd.f32 %v8192_v53, %v8191_v18  ;;  %v8194_v17 = vpop.f32.mrb[154].mxu0 }
 0x868   : > { %v8195_v48 = vpop.f32.mrb[155].mxu0 }
 0x869   : > { %v13514_v28 = vadd.f32 %v8193_v9, %v8057_v29  ;;  %v8196_v12 = vadd.f32 %v8195_v48, %v8194_v17 }
 0x86a   : > { %v8085_v52 = vpop.f32.mrb[144].mxu1  ;;  %8919 = vmatmul.mubr.msk.bf16.gmra.mrb[132].mxu0 %vm14792_vm0, %v14780_v57 }
 0x86b   : > { %v8086_v21 = vpop.f32.mrb[145].mxu1  ;;  %v13521_v60 = vadd.f32 %v8196_v12, %v8060_v25  ;;  %8922 = vmatprep.mubr.msk.bf16.mxu0 %vm14783_vm7, %v13032_v8 }
 0x86c   : > { %v13512_v37 = vadd.f32 %v8086_v21, %v8085_v52  ;;  %v8088_v20 = vpop.f32.mrb[146].mxu1 }
 0x86d   : > { %v8089_v61 = vpop.f32.mrb[147].mxu1  ;;  %v8197_v33 = vpop.f32.mrb[156].mxu0 }
 0x86e   : > { %v13516_v2 = vadd.f32 %v8089_v61, %v8088_v20  ;;  %v8198_v10 = vpop.f32.mrb[157].mxu0 }
 0x86f   : > { %v8199_v39 = vadd.f32 %v8198_v10, %v8197_v33  ;;  %v8200_v29 = vpop.f32.mrb[158].mxu0 }
 0x870   : > { %v8201_v36 = vpop.f32.mrb[159].mxu0 }
 0x871   : > { %v13529_v49 = vadd.f32 %v8199_v39, %v13459_v24  ;;  %v8202_v57 = vadd.f32 %v8201_v36, %v8200_v29 }
 0x872   : > { %v8091_v46 = vpop.f32.mrb[148].mxu1  ;;  %8923 = vmatmul.mubr.msk.bf16.gmra.mrb[136].mxu0 %vm14784_vm15, %v13040_v32 }
 0x873   : > { %v8092_v1 = vpop.f32.mrb[149].mxu1  ;;  %v13537_v8 = vadd.f32 %v8202_v57, %v13461_v27  ;;  %8926 = vmatprep.mubr.msk.bf16.mxu0 %vm14786_vm6, %v13075_v11 }
 0x874   : > { %v13526_v7 = vadd.f32 %v8092_v1, %v8091_v46  ;;  %v8094_v0 = vpop.f32.mrb[150].mxu1 }
 0x875   : > { %v8095_v38 = vpop.f32.mrb[151].mxu1  ;;  %v8203_v47 = vpop.f32.mrb[160].mxu0 }
 0x876   : > { %v13531_v25 = vadd.f32 %v8095_v38, %v8094_v0  ;;  %v8204_v4 = vpop.f32.mrb[161].mxu0 }
 0x877   : > { %v8205_v24 = vadd.f32 %v8204_v4, %v8203_v47  ;;  %v8206_v13 = vpop.f32.mrb[162].mxu0 }
 0x878   : > { %v8207_v15 = vpop.f32.mrb[163].mxu0 }
 0x879   : > { %v13545_v32 = vadd.f32 %v8205_v24, %v13473_v16  ;;  %v8208_v31 = vadd.f32 %v8207_v15, %v8206_v13 }
 0x87a   : > { %v8097_v35 = vpop.f32.mrb[152].mxu1  ;;  %8927 = vmatmul.mubr.msk.bf16.gmra.mrb[140].mxu0 %vm14793_vm12, %v14787_v26 }
 0x87b   : > { %v8098_v51 = vpop.f32.mrb[153].mxu1  ;;  %v13553_v11 = vadd.f32 %v8208_v31, %v13475_v14  ;;  %8930 = vmatprep.mubr.msk.bf16.mxu0 %vm14790_vm14, %v13117_v63 }
 0x87c   : > { %v13542_v59 = vadd.f32 %v8098_v51, %v8097_v35  ;;  %v8100_v62 = vpop.f32.mrb[154].mxu1 }
 0x87d   : > { %v8101_v50 = vpop.f32.mrb[155].mxu1  ;;  %v8209_v19 = vpop.f32.mrb[164].mxu0 }
 0x87e   : > { %v13547_v27 = vadd.f32 %v8101_v50, %v8100_v62  ;;  %v8210_v58 = vpop.f32.mrb[165].mxu0 }
 0x87f   : > { %v8211_v16 = vadd.f32 %v8210_v58, %v8209_v19  ;;  %v8212_v42 = vpop.f32.mrb[166].mxu0 }
 0x880   : > { %v8213_v18 = vpop.f32.mrb[167].mxu0 }
 0x881   : > { %v13561_v26 = vadd.f32 %v8211_v16, %v13487_v30  ;;  %v8214_v54 = vadd.f32 %v8213_v18, %v8212_v42 }
 0x882   : > { %v8103_v23 = vpop.f32.mrb[156].mxu1  ;;  %8931 = vmatmul.mubr.msk.bf16.gmra.mrb[144].mxu0 %vm14791_vm10, %v13119_v43 }
 0x883   : > { %v8104_v45 = vpop.f32.mrb[157].mxu1  ;;  %v13569_v63 = vadd.f32 %v8214_v54, %v13489_v41  ;;  %8934 = vmatprep.mubr.msk.bf16.mxu0 %vm14794_vm5, %v13140_v3 }
 0x884   : > { %v13558_v6 = vadd.f32 %v8104_v45, %v8103_v23  ;;  %v8106_v5 = vpop.f32.mrb[158].mxu1 }
 0x885   : > { %v8107_v52 = vpop.f32.mrb[159].mxu1  ;;  %v8215_v22 = vpop.f32.mrb[168].mxu0 }
 0x886   : > { %v13563_v14 = vadd.f32 %v8107_v52, %v8106_v5  ;;  %v8216_v21 = vpop.f32.mrb[169].mxu0 }
 0x887   : > { %v8217_v30 = vadd.f32 %v8216_v21, %v8215_v22  ;;  %v8218_v17 = vpop.f32.mrb[170].mxu0 }
 0x888   : > { %v8219_v61 = vpop.f32.mrb[171].mxu0 }
 0x889   : > { %v13577_v43 = vadd.f32 %v8217_v30, %v13501_v34  ;;  %v8220_v56 = vadd.f32 %v8219_v61, %v8218_v17 }
 0x88a   : > { %v8109_v53 = vpop.f32.mrb[160].mxu1  ;;  %8935 = vmatmul.mubr.bf16.gmra.mrb[148].mxu0 %v14739_v40 }
 0x88b   : > { %v8110_v9 = vpop.f32.mrb[161].mxu1  ;;  %v13583_v3 = vadd.f32 %v8220_v56, %v13503_v44 }
 0x88c   : > { %v13574_v20 = vadd.f32 %v8110_v9, %v8109_v53  ;;  %v8112_v48 = vpop.f32.mrb[162].mxu1 }
 0x88d   : > { %v8113_v12 = vpop.f32.mrb[163].mxu1  ;;  %v8221_v55 = vpop.f32.mrb[172].mxu0 }
 0x88e   : > { %v13579_v41 = vadd.f32 %v8113_v12, %v8112_v48  ;;  %v8222_v46 = vpop.f32.mrb[173].mxu0 }
 0x88f   : > { %v8223_v1 = vadd.f32 %v8222_v46, %v8221_v55  ;;  %v8224_v39 = vpop.f32.mrb[174].mxu0 }
 0x890   : > { %v8225_v36 = vpop.f32.mrb[175].mxu0 }
 0x891   : > { %v13588_v38 = vadd.f32 %v8223_v1, %v13512_v37  ;;  %v8226_v57 = vadd.f32 %v8225_v36, %v8224_v39 }
 0x892   : > { %v8115_v33 = vpop.f32.mrb[164].mxu1 }
 0x893   : > { %v8116_v10 = vpop.f32.mrb[165].mxu1  ;;  %v13593_v40 = vadd.f32 %v8226_v57, %v13516_v2 }
 0x894   : > { %v13585_v29 = vadd.f32 %v8116_v10, %v8115_v33  ;;  %v8118_v0 = vpop.f32.mrb[166].mxu1 }
 0x895   : > { %v8119_v34 = vpop.f32.mrb[167].mxu1  ;;  %v8227_v44 = vpop.f32.mrb[176].mxu0 }
 0x896   : > { %v13590_v47 = vadd.f32 %v8119_v34, %v8118_v0  ;;  %v8228_v4 = vpop.f32.mrb[177].mxu0 }
 0x897   : > { %v8229_v24 = vadd.f32 %v8228_v4, %v8227_v44  ;;  %v8230_v13 = vpop.f32.mrb[178].mxu0 }
 0x898   : > { %v8231_v50 = vpop.f32.mrb[179].mxu0 }
 0x899   : > { %v13598_v37 = vadd.f32 %v8229_v24, %v13526_v7  ;;  %v8232_v19 = vadd.f32 %v8231_v50, %v8230_v13 }
 0x89a   : > { %v8121_v35 = vpop.f32.mrb[168].mxu1 }
 0x89b   : > { %v8122_v51 = vpop.f32.mrb[169].mxu1  ;;  %v13603_v2 = vadd.f32 %v8232_v19, %v13531_v25 }
 0x89c   : > { %v13595_v62 = vadd.f32 %v8122_v51, %v8121_v35  ;;  %v8124_v15 = vpop.f32.mrb[170].mxu1 }
 0x89d   : > { %v8125_v31 = vpop.f32.mrb[171].mxu1  ;;  %v8233_v58 = vpop.f32.mrb[180].mxu0 }
 0x89e   : > { %v13600_v23 = vadd.f32 %v8125_v31, %v8124_v15  ;;  %v8234_v16 = vpop.f32.mrb[181].mxu0 }
 0x89f   : > { %v8235_v5 = vadd.f32 %v8234_v16, %v8233_v58  ;;  %v8236_v18 = vpop.f32.mrb[182].mxu0 }
 0x8a0   : > { %v8237_v22 = vpop.f32.mrb[183].mxu0 }
 0x8a1   : > { %v13608_v7 = vadd.f32 %v8235_v5, %v13542_v59  ;;  %v8238_v21 = vadd.f32 %v8237_v22, %v8236_v18 }
 0x8a2   : > { %v8127_v45 = vpop.f32.mrb[172].mxu1 }
 0x8a3   : > { %v8128_v42 = vpop.f32.mrb[173].mxu1  ;;  %v13613_v25 = vadd.f32 %v8238_v21, %v13547_v27 }
 0x8a4   : > { %v13605_v52 = vadd.f32 %v8128_v42, %v8127_v45  ;;  %v8130_v54 = vpop.f32.mrb[174].mxu1 }
 0x8a5   : > { %v8131_v53 = vpop.f32.mrb[175].mxu1  ;;  %v8239_v30 = vpop.f32.mrb[184].mxu0 }
 0x8a6   : > { %v13610_v9 = vadd.f32 %v8131_v53, %v8130_v54  ;;  %v8240_v48 = vpop.f32.mrb[185].mxu0 }
 0x8a7   : > { %v8241_v12 = vadd.f32 %v8240_v48, %v8239_v30  ;;  %v8242_v56 = vpop.f32.mrb[186].mxu0 }
 0x8a8   : > { %v8243_v46 = vpop.f32.mrb[187].mxu0 }
 0x8a9   : > { %v13618_v59 = vadd.f32 %v8241_v12, %v13558_v6  ;;  %v8244_v1 = vadd.f32 %v8243_v46, %v8242_v56 }
 0x8aa   : > { %v8133_v17 = vpop.f32.mrb[176].mxu1 }
 0x8ab   : > { %v8134_v61 = vpop.f32.mrb[177].mxu1  ;;  %v13623_v27 = vadd.f32 %v8244_v1, %v13563_v14 }
 0x8ac   : > { %v13615_v55 = vadd.f32 %v8134_v61, %v8133_v17  ;;  %v8136_v33 = vpop.f32.mrb[178].mxu1 }
 0x8ad   : > { %v8137_v10 = vpop.f32.mrb[179].mxu1  ;;  %v8245_v0 = vpop.f32.mrb[188].mxu0 }
 0x8ae   : > { %v13620_v39 = vadd.f32 %v8137_v10, %v8136_v33  ;;  %v8246_v34 = vpop.f32.mrb[189].mxu0 }
 0x8af   : > { %v8247_v44 = vadd.f32 %v8246_v34, %v8245_v0  ;;  %v8248_v35 = vpop.f32.mrb[190].mxu0 }
 0x8b0   : > { %v8249_v24 = vpop.f32.mrb[191].mxu0 }
 0x8b1   : > { %v13628_v6 = vadd.f32 %v8247_v44, %v13574_v20  ;;  %v8250_v15 = vadd.f32 %v8249_v24, %v8248_v35 }
 0x8b2   : > { %v8139_v36 = vpop.f32.mrb[180].mxu1 }
 0x8b3   : > { %v8140_v57 = vpop.f32.mrb[181].mxu1  ;;  %v13633_v14 = vadd.f32 %v8250_v15, %v13579_v41 }
 0x8b4   : > { %v13625_v4 = vadd.f32 %v8140_v57, %v8139_v36  ;;  %v8142_v51 = vpop.f32.mrb[182].mxu1 }
 0x8b5   : > { %v8143_v13 = vpop.f32.mrb[183].mxu1  ;;  %v8251_v31 = vpop.f32.mrb[192].mxu0 }
 0x8b6   : > { %v13630_v50 = vadd.f32 %v8143_v13, %v8142_v51  ;;  %v8252_v58 = vpop.f32.mrb[193].mxu0 }
 0x8b7   : > { %v8253_v16 = vadd.f32 %v8252_v58, %v8251_v31  ;;  %v8254_v42 = vpop.f32.mrb[194].mxu0 }
 0x8b8   : > { %v8255_v54 = vpop.f32.mrb[195].mxu0 }
 0x8b9   : > { %v13638_v20 = vadd.f32 %v8253_v16, %v13585_v29  ;;  %v8256_v53 = vadd.f32 %v8255_v54, %v8254_v42 }
 0x8ba   : > { %v8145_v19 = vpop.f32.mrb[184].mxu1 }
 0x8bb   : > { %v8146_v45 = vpop.f32.mrb[185].mxu1  ;;  %v13643_v41 = vadd.f32 %v8256_v53, %v13590_v47 }
 0x8bc   : > { %v13635_v5 = vadd.f32 %v8146_v45, %v8145_v19  ;;  %v8148_v18 = vpop.f32.mrb[186].mxu1 }
 0x8bd   : > { %v8149_v22 = vpop.f32.mrb[187].mxu1  ;;  %v8257_v30 = vpop.f32.mrb[196].mxu0 }
 0x8be   : > { %v13640_v21 = vadd.f32 %v8149_v22, %v8148_v18  ;;  %v8258_v48 = vpop.f32.mrb[197].mxu0 }
 0x8bf   : > { %v8259_v12 = vadd.f32 %v8258_v48, %v8257_v30  ;;  %v8260_v56 = vpop.f32.mrb[198].mxu0 }
 0x8c0   : > { %v8261_v10 = vpop.f32.mrb[199].mxu0 }
 0x8c1   : > { %v13646_v0 = vadd.f32 %v8259_v12, %v13595_v62  ;;  %v8262_v29 = vadd.f32 %v8261_v10, %v8260_v56 }
 0x8c2   : > { %v8327_v17 = vpop.f32.mrb[188].mxu1 }
 0x8c3   : > { %v8328_v61 = vpop.f32.mrb[189].mxu1  ;;  %v13652_v47 = vadd.f32 %v8262_v29, %v13600_v23 }
 0x8c4   : > { %v8329_v33 = vadd.f32 %v8328_v61, %v8327_v17  ;;  %v8330_v46 = vpop.f32.mrb[190].mxu1 }
 0x8c5   : > { %v8331_v1 = vpop.f32.mrb[191].mxu1  ;;  %v8263_v44 = vpop.f32.mrb[200].mxu0 }
 0x8c6   : > { %v8332_v36 = vadd.f32 %v8331_v1, %v8330_v46  ;;  %v13649_v34 = vadd.f32 %v13514_v28, %v8329_v33  ;;  %v8264_v51 = vpop.f32.mrb[201].mxu0 }
 0x8c7   : > { %v8265_v13 = vadd.f32 %v8264_v51, %v8263_v44  ;;  %v8266_v15 = vpop.f32.mrb[202].mxu0 }
 0x8c8   : > { %v13655_v57 = vadd.f32 %v13521_v60, %v8332_v36  ;;  %v8267_v19 = vpop.f32.mrb[203].mxu0 }
 0x8c9   : > { %v13658_v45 = vadd.f32 %v8265_v13, %v13605_v52  ;;  %v8268_v28 = vadd.f32 %v8267_v19, %v8266_v15 }
 0x8ca   : > { %v8333_v35 = vpop.f32.mrb[192].mxu1 }
 0x8cb   : > { %v8334_v24 = vpop.f32.mrb[193].mxu1  ;;  %v13664_v60 = vadd.f32 %v8268_v28, %v13610_v9 }
 0x8cc   : > { %v8335_v31 = vadd.f32 %v8334_v24, %v8333_v35  ;;  %v8336_v62 = vpop.f32.mrb[194].mxu1 }
 0x8cd   : > { %v8337_v58 = vpop.f32.mrb[195].mxu1  ;;  %v8269_v18 = vpop.f32.mrb[204].mxu0 }
 0x8ce   : > { %v8338_v16 = vadd.f32 %v8337_v58, %v8336_v62  ;;  %v13661_v23 = vadd.f32 %v13529_v49, %v8335_v31  ;;  %v8270_v22 = vpop.f32.mrb[205].mxu0 }
 0x8cf   : > { %v8271_v30 = vadd.f32 %v8270_v22, %v8269_v18  ;;  %v8272_v17 = vpop.f32.mrb[206].mxu0 }
 0x8d0   : > { %v13667_v42 = vadd.f32 %v13537_v8, %v8338_v16  ;;  %v8273_v61 = vpop.f32.mrb[207].mxu0 }
 0x8d1   : > { %v13670_v56 = vadd.f32 %v8271_v30, %v13615_v55  ;;  %v8274_v49 = vadd.f32 %v8273_v61, %v8272_v17 }
 0x8d2   : > { %v8339_v54 = vpop.f32.mrb[196].mxu1 }
 0x8d3   : > { %v8340_v53 = vpop.f32.mrb[197].mxu1  ;;  %v13676_v8 = vadd.f32 %v8274_v49, %v13620_v39 }
 0x8d4   : > { %v8341_v48 = vadd.f32 %v8340_v53, %v8339_v54  ;;  %v8342_v52 = vpop.f32.mrb[198].mxu1 }
 0x8d5   : > { %v8343_v12 = vpop.f32.mrb[199].mxu1  ;;  %v8275_v10 = vpop.f32.mrb[208].mxu0 }
 0x8d6   : > { %v8344_v33 = vadd.f32 %v8343_v12, %v8342_v52  ;;  %v13673_v9 = vadd.f32 %v13545_v32, %v8341_v48  ;;  %v8276_v29 = vpop.f32.mrb[209].mxu0 }
 0x8d7   : > { %v8277_v44 = vadd.f32 %v8276_v29, %v8275_v10  ;;  %v8278_v35 = vpop.f32.mrb[210].mxu0 }
 0x8d8   : > { %v13679_v46 = vadd.f32 %v13553_v11, %v8344_v33  ;;  %v8279_v24 = vpop.f32.mrb[211].mxu0 }
 0x8d9   : > { %v13682_v15 = vadd.f32 %v8277_v44, %v13625_v4  ;;  %v8280_v32 = vadd.f32 %v8279_v24, %v8278_v35 }
 0x8da   : > { %v8345_v1 = vpop.f32.mrb[200].mxu1 }
 0x8db   : > { %v8346_v36 = vpop.f32.mrb[201].mxu1  ;;  %v13688_v11 = vadd.f32 %v8280_v32, %v13630_v50 }
 0x8dc   : > { %v8347_v51 = vadd.f32 %v8346_v36, %v8345_v1  ;;  %v8348_v55 = vpop.f32.mrb[202].mxu1 }
 0x8dd   : > { %v8349_v13 = vpop.f32.mrb[203].mxu1  ;;  %v8281_v19 = vpop.f32.mrb[212].mxu0 }
 0x8de   : > { %v8350_v31 = vadd.f32 %v8349_v13, %v8348_v55  ;;  %v13685_v39 = vadd.f32 %v13561_v26, %v8347_v51  ;;  %v8282_v28 = vpop.f32.mrb[213].mxu0 }
 0x8df   : > { %v8283_v18 = vadd.f32 %v8282_v28, %v8281_v19  ;;  %v8284_v54 = vpop.f32.mrb[214].mxu0 }
 0x8e0   : > { %v13691_v62 = vadd.f32 %v13569_v63, %v8350_v31  ;;  %v8285_v53 = vpop.f32.mrb[215].mxu0 }
 0x8e1   : > { %v13694_v17 = vadd.f32 %v8283_v18, %v13635_v5  ;;  %v8286_v26 = vadd.f32 %v8285_v53, %v8284_v54 }
 0x8e2   : > { %v8351_v58 = vpop.f32.mrb[204].mxu1 }
 0x8e3   : > { %v8352_v16 = vpop.f32.mrb[205].mxu1  ;;  %v13700_v63 = vadd.f32 %v8286_v26, %v13640_v21 }
 0x8e4   : > { %v8353_v22 = vadd.f32 %v8352_v16, %v8351_v58  ;;  %v8354_v4 = vpop.f32.mrb[206].mxu1 }
 0x8e5   : > { %v8355_v30 = vpop.f32.mrb[207].mxu1 }
 0x8e6   : > { %v8356_v48 = vadd.f32 %v8355_v30, %v8354_v4  ;;  %v13697_v50 = vadd.f32 %v13577_v43, %v8353_v22 }
 0x8e8   : > { %v13703_v52 = vadd.f32 %v13583_v3, %v8356_v48 }
 0x8ea   : > { %v8357_v61 = vpop.f32.mrb[208].mxu1 }
 0x8eb   : > { %v8358_v12 = vpop.f32.mrb[209].mxu1 }
 0x8ec   : > { %v8359_v49 = vadd.f32 %v8358_v12, %v8357_v61  ;;  %v8360_v33 = vpop.f32.mrb[210].mxu1 }
 0x8ed   : > { %v8361_v10 = vpop.f32.mrb[211].mxu1 }
 0x8ee   : > { %v8362_v1 = vadd.f32 %v8361_v10, %v8360_v33  ;;  %v13706_v5 = vadd.f32 %v13588_v38, %v8359_v49 }
 0x8f0   : > { %v13709_v29 = vadd.f32 %v13593_v40, %v8362_v1 }
 0x8f2   : > { %v8363_v43 = vpop.f32.mrb[212].mxu1 }
 0x8f3   : > { %v8364_v36 = vpop.f32.mrb[213].mxu1 }
 0x8f4   : > { %v8365_v44 = vadd.f32 %v8364_v36, %v8363_v43  ;;  %v8366_v21 = vpop.f32.mrb[214].mxu1 }
 0x8f5   : > { %v8367_v35 = vpop.f32.mrb[215].mxu1 }
 0x8f6   : > { %v8368_v51 = vadd.f32 %v8367_v35, %v8366_v21  ;;  %v13712_v3 = vadd.f32 %v13598_v37, %v8365_v44 }
 0x8f8   : > { %v13715_v55 = vadd.f32 %v13603_v2, %v8368_v51 }
 0x8fa   : > { %v8369_v24 = vpop.f32.mrb[216].mxu1 }
 0x8fb   : > { %v8370_v13 = vpop.f32.mrb[217].mxu1 }
 0x8fc   : > { %v8371_v32 = vadd.f32 %v8370_v13, %v8369_v24  ;;  %v8372_v38 = vpop.f32.mrb[218].mxu1 }
 0x8fd   : > { %v8373_v31 = vpop.f32.mrb[219].mxu1 }
 0x8fe   : > { %v8374_v19 = vadd.f32 %v8373_v31, %v8372_v38  ;;  %v13718_v40 = vadd.f32 %v13608_v7, %v8371_v32 }
 0x900   : > { %v13721_v58 = vadd.f32 %v13613_v25, %v8374_v19 }
 0x902   : > { %v8375_v28 = vpop.f32.mrb[220].mxu1 }
 0x903   : > { %v8376_v16 = vpop.f32.mrb[221].mxu1 }
 0x904   : > { %v8377_v18 = vadd.f32 %v8376_v16, %v8375_v28  ;;  %v8378_v37 = vpop.f32.mrb[222].mxu1 }
 0x905   : > { %v8379_v54 = vpop.f32.mrb[223].mxu1 }
 0x906   : > { %v8380_v22 = vadd.f32 %v8379_v54, %v8378_v37  ;;  %v13724_v2 = vadd.f32 %v13618_v59, %v8377_v18 }
 0x908   : > { %v13727_v4 = vadd.f32 %v13623_v27, %v8380_v22 }
 0x90a   : > { %v8381_v53 = vpop.f32.mrb[224].mxu1 }
 0x90b   : > { %v8382_v30 = vpop.f32.mrb[225].mxu1 }
 0x90c   : > { %v8383_v26 = vadd.f32 %v8382_v30, %v8381_v53  ;;  %v8384_v7 = vpop.f32.mrb[226].mxu1 }
 0x90d   : > { %v8385_v48 = vpop.f32.mrb[227].mxu1 }
 0x90e   : > { %v8386_v61 = vadd.f32 %v8385_v48, %v8384_v7  ;;  %v13730_v25 = vadd.f32 %v13628_v6, %v8383_v26 }
 0x910   : > { %v13733_v12 = vadd.f32 %v13633_v14, %v8386_v61 }
 0x912   : > { %v8387_v49 = vpop.f32.mrb[228].mxu1 }
 0x913   : > { %v8388_v33 = vpop.f32.mrb[229].mxu1 }
 0x914   : > { %v8389_v10 = vadd.f32 %v8388_v33, %v8387_v49  ;;  %v8390_v59 = vpop.f32.mrb[230].mxu1 }
 0x915   : > { %v8391_v1 = vpop.f32.mrb[231].mxu1 }
 0x916   : > { %v8392_v43 = vadd.f32 %v8391_v1, %v8390_v59  ;;  %v13736_v27 = vadd.f32 %v13638_v20, %v8389_v10  ;;  %v9913_v10 = vld [vmem:[%s10371_s26 + $0x10] sm:$0xff] }
 0x918   : > { %v13739_v36 = vadd.f32 %v13643_v41, %v8392_v43  ;;  %v9914_v43 = vld [vmem:[%s10371_s26] sm:$0xff] }
 0x91a   : > { %v8393_v44 = vpop.f32.mrb[232].mxu1 }
 0x91b   : > { %v8394_v21 = vpop.f32.mrb[233].mxu1 }
 0x91c   : > { %v8395_v35 = vadd.f32 %v8394_v21, %v8393_v44  ;;  %v8396_v6 = vpop.f32.mrb[234].mxu1 }
 0x91d   : > { %v8397_v51 = vpop.f32.mrb[235].mxu1 }
 0x91e   : > { %v8398_v24 = vadd.f32 %v8397_v51, %v8396_v6  ;;  %v13742_v14 = vadd.f32 %v13646_v0, %v8395_v35  ;;  %v13756_v0 = vld [vmem:[%s14795_s14] ss:$0 sm:$0xff] }
 0x920   : > { %v13745_v13 = vadd.f32 %v13652_v47, %v8398_v24 }
 0x922   : > { %v8399_v32 = vpop.f32.mrb[236].mxu1 }
 0x923   : > { %v8400_v38 = vpop.f32.mrb[237].mxu1 }
 0x924   : > { %v8401_v31 = vadd.f32 %v8400_v38, %v8399_v32  ;;  %v8402_v20 = vpop.f32.mrb[238].mxu1 }
 0x925   : > { %v8403_v19 = vpop.f32.mrb[239].mxu1  ;;  %v8908_v18 = vpop.f32.mrb[120].mxu0 }
 0x926   : > { %v8404_v28 = vadd.f32 %v8403_v19, %v8402_v20  ;;  %v13748_v41 = vadd.f32 %v13658_v45, %v8401_v31  ;;  %v9184_v37 = vadd.f32 %v13661_v23, %v8908_v18  ;;  %v6436_v54 = vpop.f32.mrb[121].mxu0 }
 0x927   : > { %v9187_v53 = vadd.f32 %v13649_v34, %v6436_v54  ;;  %v8909_v45 = vpop.f32.mrb[122].mxu0 }
 0x928   : > { %v13751_v16 = vadd.f32 %v13664_v60, %v8404_v28  ;;  %v6603_v26 = vadd.f32 %v9184_v37, %v13756_v0  ;;  %v9190_v7 = vadd.f32 %v13667_v42, %v8909_v45  ;;  %v6439_v48 = vpop.f32.mrb[123].mxu0  ;;  %v9917_v45 = vld [vmem:[%s10371_s26 + $0x30] sm:$0xff] }
 0x929   : > { %v6601_v49 = vadd.f32 %v9187_v53, %v13756_v0  ;;  %v9193_v23 = vadd.f32 %v13655_v57, %v6439_v48  ;;  %v9915_v57 = vld [vmem:[%s10371_s26 + $0x18] sm:$0xff] }
 0x92a   : > { %v8405_v47 = vpop.f32.mrb[240].mxu1  ;;  %v6635_v59 = vadd.f32 %v9913_v10, %v6603_v26  ;;  %v6604_v34 = vadd.f32 %v9190_v7, %v13756_v0  ;;  %v9918_v26 = vld [vmem:[%s10371_s26 + $0x20] sm:$0xff]  ;;  %v9919_v48 = vld [vmem:[%s10371_s26 + $0x38] sm:$0xff] }
 0x92b   : > { %v8406_v22 = vpop.f32.mrb[241].mxu1  ;;  %v6633_v44 = vadd.f32 %v9914_v43, %v6601_v49  ;;  %v6602_v21 = vadd.f32 %v9193_v23, %v13756_v0 }
 0x92c   : > { %v8407_v30 = vadd.f32 %v8406_v22, %v8405_v47  ;;  %v8408_v60 = vpop.f32.mrb[242].mxu1  ;;  %6667 = vst [vmem:[%s13773_s21 + $0x10] sm:$0xff] %v6635_v59  ;;  %v6636_v42 = vadd.f32 %v9915_v57, %v6604_v34 }
 0x92d   : > { %v8409_v61 = vpop.f32.mrb[243].mxu1  ;;  %6665 = vst [vmem:[%s13773_s21] sm:$0xff] %v6633_v44  ;;  %v8912_v51 = vpop.f32.mrb[124].mxu0 }
 0x92e   : > { %v8410_v33 = vadd.f32 %v8409_v61, %v8408_v60  ;;  %v13767_v1 = vadd.f32 %v13670_v56, %v8407_v30  ;;  %v9916_v56 = vld [vmem:[%s10371_s26 + $0x8] sm:$0xff]  ;;  %6668 = vst [vmem:[%s13773_s21 + $0x18] sm:$0xff] %v6636_v42  ;;  %v9196_v32 = vadd.f32 %v13685_v39, %v8912_v51  ;;  %v6452_v38 = vpop.f32.mrb[125].mxu0 }
 0x92f   : > { %v6634_v6 = vadd.f32 %v9916_v56, %v6602_v21  ;;  %v9199_v20 = vadd.f32 %v13673_v9, %v6452_v38  ;;  %v8913_v19 = vpop.f32.mrb[126].mxu0 }
 0x930   : > { %v13778_v35 = vadd.f32 %v13676_v8, %v8410_v33  ;;  %v6607_v18 = vadd.f32 %v9196_v32, %v13756_v0  ;;  %v9202_v47 = vadd.f32 %v13691_v62, %v8913_v19  ;;  %v6455_v37 = vpop.f32.mrb[127].mxu0 }
 0x931   : > { %6666 = vst [vmem:[%s13773_s21 + $0x8] sm:$0xff] %v6634_v6  ;;  %v6605_v39 = vadd.f32 %v9199_v20, %v13756_v0  ;;  %v9205_v22 = vadd.f32 %v13679_v46, %v6455_v37  ;;  %v9920_v46 = vld [vmem:[%s10371_s26 + $0x28] sm:$0xff]  ;;  %v9922_v20 = vld [vmem:[%s10371_s26 + $0x40] sm:$0xff] }
 0x932   : > { %v8411_v24 = vpop.f32.mrb[244].mxu1  ;;  %v6639_v9 = vadd.f32 %v9917_v45, %v6607_v18  ;;  %v6608_v30 = vadd.f32 %v9202_v47, %v13756_v0 }
 0x933   : > { %v8412_v31 = vpop.f32.mrb[245].mxu1  ;;  %v6637_v62 = vadd.f32 %v9918_v26, %v6605_v39  ;;  %v6606_v7 = vadd.f32 %v9205_v22, %v13756_v0 }
 0x934   : > { %v8413_v28 = vadd.f32 %v8412_v31, %v8411_v24  ;;  %v8414_v8 = vpop.f32.mrb[246].mxu1  ;;  %6671 = vst [vmem:[%s13773_s21 + $0x30] sm:$0xff] %v6639_v9  ;;  %v6640_v61 = vadd.f32 %v9919_v48, %v6608_v30 }
 0x935   : > { %v8415_v54 = vpop.f32.mrb[247].mxu1  ;;  %6669 = vst [vmem:[%s13773_s21 + $0x20] sm:$0xff] %v6637_v62  ;;  %v6638_v23 = vadd.f32 %v9920_v46, %v6606_v7  ;;  %v8916_v33 = vpop.f32.mrb[128].mxu0  ;;  %v9926_v7 = vld [vmem:[%s10371_s26 + $0x60] sm:$0xff] }
 0x936   : > { %v8416_v53 = vadd.f32 %v8415_v54, %v8414_v8  ;;  %v13793_v60 = vadd.f32 %v13682_v15, %v8413_v28  ;;  %6672 = vst [vmem:[%s13773_s21 + $0x38] sm:$0xff] %v6640_v61  ;;  %v9208_v15 = vadd.f32 %v13706_v5, %v8916_v33  ;;  %v6468_v59 = vpop.f32.mrb[129].mxu0  ;;  %v9923_v28 = vld [vmem:[%s10371_s26 + $0x58] sm:$0xff] }
 0x937   : > { %6670 = vst [vmem:[%s13773_s21 + $0x28] sm:$0xff] %v6638_v23  ;;  %v9211_v43 = vadd.f32 %v13697_v50, %v6468_v59  ;;  %v8917_v44 = vpop.f32.mrb[130].mxu0  ;;  %v9921_v50 = vld [vmem:[%s10371_s26 + $0x50] sm:$0xff]  ;;  %v9927_v61 = vld [vmem:[%s10371_s26 + $0x78] sm:$0xff] }
 0x938   : > { %v13800_v49 = vadd.f32 %v13688_v11, %v8416_v53  ;;  %v6611_v57 = vadd.f32 %v9208_v15, %v13756_v0  ;;  %v9214_v42 = vadd.f32 %v13709_v29, %v8917_v44  ;;  %v6471_v56 = vpop.f32.mrb[131].mxu0 }
 0x939   : > { %v6609_v5 = vadd.f32 %v9211_v43, %v13756_v0  ;;  %v9217_v51 = vadd.f32 %v13703_v52, %v6471_v56  ;;  %v9924_v52 = vld [vmem:[%s10371_s26 + $0x48] sm:$0xff]  ;;  %v9930_v56 = vld [vmem:[%s10371_s26 + $0x80] sm:$0xff] }
 0x93a   : > { %v8417_v10 = vpop.f32.mrb[248].mxu1  ;;  %v6643_v32 = vadd.f32 %v9921_v50, %v6611_v57  ;;  %v6612_v38 = vadd.f32 %v9214_v42, %v13756_v0 }
 0x93b   : > { %v8418_v34 = vpop.f32.mrb[249].mxu1  ;;  %v6641_v29 = vadd.f32 %v9922_v20, %v6609_v5  ;;  %v6610_v19 = vadd.f32 %v9217_v51, %v13756_v0  ;;  %v9931_v5 = vld [vmem:[%s10371_s26 + $0x98] sm:$0xff] }
 0x93c   : > { %v8419_v21 = vadd.f32 %v8418_v34, %v8417_v10  ;;  %v8420_v11 = vpop.f32.mrb[250].mxu1  ;;  %6675 = vst [vmem:[%s13773_s21 + $0x50] sm:$0xff] %v6643_v32  ;;  %v6644_v8 = vadd.f32 %v9923_v28, %v6612_v38 }
 0x93d   : > { %v8421_v6 = vpop.f32.mrb[251].mxu1  ;;  %6673 = vst [vmem:[%s13773_s21 + $0x40] sm:$0xff] %v6641_v29  ;;  %v6642_v47 = vadd.f32 %v9924_v52, %v6610_v19  ;;  %v8920_v37 = vpop.f32.mrb[132].mxu0 }
 0x93e   : > { %v8422_v24 = vadd.f32 %v8421_v6, %v8420_v11  ;;  %v13815_v31 = vadd.f32 %v13694_v17, %v8419_v21  ;;  %6676 = vst [vmem:[%s13773_s21 + $0x58] sm:$0xff] %v6644_v8  ;;  %v9220_v17 = vadd.f32 %v13718_v40, %v8920_v37  ;;  %v6484_v54 = vpop.f32.mrb[133].mxu0  ;;  %v9925_v40 = vld [vmem:[%s10371_s26 + $0x70] sm:$0xff] }
 0x93f   : > { %6674 = vst [vmem:[%s13773_s21 + $0x48] sm:$0xff] %v6642_v47  ;;  %v9223_v39 = vadd.f32 %v13712_v3, %v6484_v54  ;;  %v8921_v22 = vpop.f32.mrb[134].mxu0 }
 0x940   : > { %v13822_v18 = vadd.f32 %v13700_v63, %v8422_v24  ;;  %v6615_v63 = vadd.f32 %v9220_v17, %v13756_v0  ;;  %v9226_v53 = vadd.f32 %v13721_v58, %v8921_v22  ;;  %v6487_v45 = vpop.f32.mrb[135].mxu0  ;;  %v9928_v58 = vld [vmem:[%s10371_s26 + $0x68] sm:$0xff]  ;;  %v9934_v17 = vld [vmem:[%s10371_s26 + $0xa0] sm:$0xff] }
 0x941   : > { %v6613_v9 = vadd.f32 %v9223_v39, %v13756_v0  ;;  %v9229_v30 = vadd.f32 %v13715_v55, %v6487_v45  ;;  %v9935_v39 = vld [vmem:[%s10371_s26 + $0xb8] sm:$0xff] }
 0x942   : > { %v6647_v26 = vadd.f32 %v9925_v40, %v6615_v63  ;;  %v6616_v62 = vadd.f32 %v9226_v53, %v13756_v0 }
 0x943   : > { %v6645_v3 = vadd.f32 %v9926_v7, %v6613_v9  ;;  %v6614_v48 = vadd.f32 %v9229_v30, %v13756_v0 }
 0x944   : > { %6679 = vst [vmem:[%s13773_s21 + $0x70] sm:$0xff] %v6647_v26  ;;  %v6648_v46 = vadd.f32 %v9927_v61, %v6616_v62 }
 0x945   : > { %6677 = vst [vmem:[%s13773_s21 + $0x60] sm:$0xff] %v6645_v3  ;;  %v6646_v23 = vadd.f32 %v9928_v58, %v6614_v48  ;;  %v8924_v33 = vpop.f32.mrb[136].mxu0 }
 0x946   : > { %6680 = vst [vmem:[%s13773_s21 + $0x78] sm:$0xff] %v6648_v46  ;;  %v9232_v55 = vadd.f32 %v13730_v25, %v8924_v33  ;;  %v6500_v10 = vpop.f32.mrb[137].mxu0  ;;  %v9929_v25 = vld [vmem:[%s10371_s26 + $0x90] sm:$0xff]  ;;  %v9938_v46 = vld [vmem:[%s10371_s26 + $0xc0] sm:$0xff] }
 0x947   : > { %6678 = vst [vmem:[%s13773_s21 + $0x68] sm:$0xff] %v6646_v23  ;;  %v9235_v15 = vadd.f32 %v13724_v2, %v6500_v10  ;;  %v8925_v59 = vpop.f32.mrb[138].mxu0  ;;  %v9939_v23 = vld [vmem:[%s10371_s26 + $0xd8] sm:$0xff] }
 0x948   : > { %v6619_v34 = vadd.f32 %v9232_v55, %v13756_v0  ;;  %v9238_v43 = vadd.f32 %v13733_v12, %v8925_v59  ;;  %v6503_v44 = vpop.f32.mrb[139].mxu0  ;;  %v9932_v12 = vld [vmem:[%s10371_s26 + $0x88] sm:$0xff] }
 0x949   : > { %v6617_v21 = vadd.f32 %v9235_v15, %v13756_v0  ;;  %v9241_v11 = vadd.f32 %v13727_v4, %v6503_v44 }
 0x94a   : > { %v6651_v57 = vadd.f32 %v9929_v25, %v6619_v34  ;;  %v6620_v42 = vadd.f32 %v9238_v43, %v13756_v0 }
 0x94b   : > { %v6649_v2 = vadd.f32 %v9930_v56, %v6617_v21  ;;  %v6618_v6 = vadd.f32 %v9241_v11, %v13756_v0 }
 0x94c   : > { %6683 = vst [vmem:[%s13773_s21 + $0x90] sm:$0xff] %v6651_v57  ;;  %v6652_v51 = vadd.f32 %v9931_v5, %v6620_v42  ;;  %v9942_v42 = vld [vmem:[%s10371_s26 + $0xe0] sm:$0xff] }
 0x94d   : > { %6681 = vst [vmem:[%s13773_s21 + $0x80] sm:$0xff] %v6649_v2  ;;  %v6650_v24 = vadd.f32 %v9932_v12, %v6618_v6  ;;  %v8928_v50 = vpop.f32.mrb[140].mxu0  ;;  %v9943_v2 = vld [vmem:[%s10371_s26 + $0xf8] sm:$0xff] }
 0x94e   : > { %6684 = vst [vmem:[%s13773_s21 + $0x98] sm:$0xff] %v6652_v51  ;;  %v9244_v4 = vadd.f32 %v13742_v14, %v8928_v50  ;;  %v6516_v32 = vpop.f32.mrb[141].mxu0  ;;  %v9933_v14 = vld [vmem:[%s10371_s26 + $0xb0] sm:$0xff] }
 0x94f   : > { %6682 = vst [vmem:[%s13773_s21 + $0x88] sm:$0xff] %v6650_v24  ;;  %v9247_v38 = vadd.f32 %v13736_v27, %v6516_v32  ;;  %v8929_v20 = vpop.f32.mrb[142].mxu0 }
 0x950   : > { %v6623_v29 = vadd.f32 %v9244_v4, %v13756_v0  ;;  %v9250_v19 = vadd.f32 %v13745_v13, %v8929_v20  ;;  %v6519_v28 = vpop.f32.mrb[143].mxu0  ;;  %v9936_v13 = vld [vmem:[%s10371_s26 + $0xa8] sm:$0xff] }
 0x951   : > { %v6621_v8 = vadd.f32 %v9247_v38, %v13756_v0  ;;  %v9253_v52 = vadd.f32 %v13739_v36, %v6519_v28 }
 0x952   : > { %v6655_v47 = vadd.f32 %v9933_v14, %v6623_v29  ;;  %v6624_v37 = vadd.f32 %v9250_v19, %v13756_v0 }
 0x953   : > { %v6653_v27 = vadd.f32 %v9934_v17, %v6621_v8  ;;  %v6622_v54 = vadd.f32 %v9253_v52, %v13756_v0 }
 0x954   : > { %6687 = vst [vmem:[%s13773_s21 + $0xb0] sm:$0xff] %v6655_v47  ;;  %v6656_v22 = vadd.f32 %v9935_v39, %v6624_v37 }
 0x955   : > { %6685 = vst [vmem:[%s13773_s21 + $0xa0] sm:$0xff] %v6653_v27  ;;  %v6654_v63 = vadd.f32 %v9936_v13, %v6622_v54  ;;  %v8932_v53 = vpop.f32.mrb[144].mxu0 }
 0x956   : > { %6688 = vst [vmem:[%s13773_s21 + $0xb8] sm:$0xff] %v6656_v22  ;;  %v9256_v36 = vadd.f32 %v13767_v1, %v8932_v53  ;;  %v6532_v45 = vpop.f32.mrb[145].mxu0  ;;  %v9937_v1 = vld [vmem:[%s10371_s26 + $0xd0] sm:$0xff] }
 0x957   : > { %6686 = vst [vmem:[%s13773_s21 + $0xa8] sm:$0xff] %v6654_v63  ;;  %v9259_v9 = vadd.f32 %v13748_v41, %v6532_v45  ;;  %v8933_v30 = vpop.f32.mrb[146].mxu0 }
 0x958   : > { %v6627_v40 = vadd.f32 %v9256_v36, %v13756_v0  ;;  %v9262_v26 = vadd.f32 %v13778_v35, %v8933_v30  ;;  %v6535_v62 = vpop.f32.mrb[147].mxu0  ;;  %v9940_v35 = vld [vmem:[%s10371_s26 + $0xc8] sm:$0xff] }
 0x959   : > { %v6625_v7 = vadd.f32 %v9259_v9, %v13756_v0  ;;  %v9265_v3 = vadd.f32 %v13751_v16, %v6535_v62 }
 0x95a   : > { %v6659_v48 = vadd.f32 %v9937_v1, %v6627_v40  ;;  %v6628_v61 = vadd.f32 %v9262_v26, %v13756_v0 }
 0x95b   : > { %v6657_v41 = vadd.f32 %v9938_v46, %v6625_v7  ;;  %v6626_v58 = vadd.f32 %v9265_v3, %v13756_v0 }
 0x95c   : > { %6691 = vst [vmem:[%s13773_s21 + $0xd0] sm:$0xff] %v6659_v48  ;;  %v6660_v33 = vadd.f32 %v9939_v23, %v6628_v61 }
 0x95d   : > { %6689 = vst [vmem:[%s13773_s21 + $0xc0] sm:$0xff] %v6657_v41  ;;  %v6658_v55 = vadd.f32 %v9940_v35, %v6626_v58  ;;  %v8936_v10 = vpop.f32.mrb[148].mxu0 }
 0x95e   : > { %6692 = vst [vmem:[%s13773_s21 + $0xd8] sm:$0xff] %v6660_v33  ;;  %v9268_v16 = vadd.f32 %v13815_v31, %v8936_v10  ;;  %v6548_v15 = vpop.f32.mrb[149].mxu0  ;;  %v9941_v31 = vld [vmem:[%s10371_s26 + $0xf0] sm:$0xff] }
 0x95f   : > { %6690 = vst [vmem:[%s13773_s21 + $0xc8] sm:$0xff] %v6658_v55  ;;  %v9271_v59 = vadd.f32 %v13793_v60, %v6548_v15  ;;  %v8937_v34 = vpop.f32.mrb[150].mxu0 }
 0x960   : > { %v6631_v43 = vadd.f32 %v9268_v16, %v13756_v0  ;;  %v9274_v44 = vadd.f32 %v13822_v18, %v8937_v34  ;;  %v6551_v21 = vpop.f32.mrb[151].mxu0 }
 0x961   : > { %v6629_v11 = vadd.f32 %v9271_v59, %v13756_v0  ;;  %v9277_v25 = vadd.f32 %v13800_v49, %v6551_v21  ;;  %v9944_v49 = vld [vmem:[%s10371_s26 + $0xe8] sm:$0xff] }
 0x962   : > { %v6663_v60 = vadd.f32 %v9941_v31, %v6631_v43  ;;  %v6632_v57 = vadd.f32 %v9274_v44, %v13756_v0 }
 0x963   : > { %v6661_v56 = vadd.f32 %v9942_v42, %v6629_v11  ;;  %v6630_v18 = vadd.f32 %v9277_v25, %v13756_v0 }
 0x964   : > { %6695 = vst [vmem:[%s13773_s21 + $0xf0] sm:$0xff] %v6663_v60  ;;  %v6664_v6 = vadd.f32 %v9943_v2, %v6632_v57 }
 0x965   : > { %6693 = vst [vmem:[%s13773_s21 + $0xe0] sm:$0xff] %v6661_v56  ;;  %v6662_v5 = vadd.f32 %v9944_v49, %v6630_v18 }
 0x966   : > { %6696 = vst [vmem:[%s13773_s21 + $0xf8] sm:$0xff] %v6664_v6 }
 0x967   : > { %6694 = vst [vmem:[%s13773_s21 + $0xe8] sm:$0xff] %v6662_v5 }
 0x968   : > { %10044 = shalt.err (!%p10041_p13)
}
 0x969   : > { %s10045_s26 = scalar_lea.hbm %s13909_s17, 4096  ;;  %s10049_s21 = scalar_lea.hbm %s14797_s0, 8192 }
 0x96a   : > { %p10046_p6 = scmp.ne.s32.totalorder %s13909_s17, %s10045_s26  ;;  %p10050_p5 = scmp.lt.u32.totalorder %s13909_s17, %s14797_s0 }
 0x96b   : > { %p10051_p8 = scmp.lt.u32.totalorder %s10049_s21, %s10045_s26  ;;  %p10053_p0 = scmp.lt.u32.totalorder %s10045_s26, %s13909_s17 }
 0x96c   : > { %p10047_p10 = pnand %p10046_p6, %p14798_p1 }
 0x96d   : > { %p10052_p11 = por %p10051_p8, %p10050_p5 }
 0x96e   : > { %p10048_p4 = pneg %p10047_p10 }
 0x96f   : > { %p10054_p3 = por %p10053_p0, %p10052_p11 }
 0x971   : > { %p10055_p7 = pnand %p10054_p3, %p10048_p4 }
 0x973   : > { %10058 = shalt.err (!%p10055_p7)
}
 0x974   : > { %s10116_s24 = smov 128   ;;  %s10117_s6 = smov 8  }
 0x975   : > { %9416 = dma.vmem_to_hbm [thread:$0]  (%p14798_p1), %s13911_s8, 4096, %s13909_s17, %s6698_s18, %s10116_s24, %s10116_s24, %s10117_s6  }
 0x976 PF: > { %s14799_s19 = sld [smem:[#allocation13_spill]]  ;;  %s14800_s29 = sld [smem:[#allocation14_spill]] }
 0x977   : > { %p14802_p12 = scmp.ge.s32.totalorder %s10101_s16, 2 }
 0x97c   : > { %s6726_s20 = sand.u32 1, %s14799_s19   ;;  %p14801_p9 = scmp.ne.s32.totalorder %s14800_s29, 0 }
 0x97d   : > { %s6727_s26 = scalar_lea.sflag [#allocation5], %s6726_s20 }
 0x97e   : > { %p9430_p2 = pnand %p14802_p12, %p14801_p9 }
 0x980   : > { %10084 = dma.done.wait (!%p9430_p2), %s6727_s26, 4096  }
 0x981   : > { %10086 = vsyncadd (!%p9430_p2), %s6727_s26, 4294963200  ;;  %p28_p13 = scmp.ge.s32.totalorder %s10303_s11, 4   ;;  %s14803_s29 = smov %s10093_s30 }
 0x982   : > { %s14804_s30 = smov %s10097_s15  ;;  %s14805_s15 = smov %s10319_s28 }
 0x983   : > { %s14806_s16 = smov %s10303_s11  ;;  %30 = sbr.rel (!%p28_p13) target bundleno = 13 (0xd), region = 136 }
 0x98a   :  { %6732 = vsyncpa [#allocation4], 1 }
 0x98b   :  { %6734 = vsyncpa [#allocation4 + $0x1], 1 }
 0x98c   :  { %6735 = vsyncpa [#allocation7], 1 }
 0x98d   :  { %6736 = vsyncpa [#allocation5], 1 }
 0x98e   :  { %6738 = vsyncpa [#allocation5 + $0x1], 1 }

</bundles_post_ra>
